<compile_context>
chip_gen: v7x
topology: tpu7x:2x2x1
jax: 0.10.0
libtpu: 0.0.40
codegen_flags: <defaults>
</compile_context>

<pallas_src>
import functools

import jax
import jax.numpy as jnp
import numpy as np
from jax.experimental import pallas as pl
from jax.experimental.pallas import tpu as pltpu


# ----------------------------------------------------------------------------
# Fused cb_net kernel (one grid step == one batch element)
# ----------------------------------------------------------------------------
def _cb_net_kernel(cb_ref, masks_ref, hw_ref, hb_ref, c1w_ref, c1b_ref,
                   c2w_ref, c2b_ref, tw_ref, tb_ref, gates_ref,
                   o_ref, col_ref, *, H, W, C):
    # cb_ref:    (1, 1, HW)      flattened input image (lane dim = HW)
    # masks_ref: (9, HW)         per-tap boundary masks (0/1 f32)
    # *w_ref:    (Cout, 9*Cin)   packed conv weights (tap-major, ci fastest)
    # *b_ref:    (Cout, 1)       biases
    # gates_ref: (7,)            scalar gates, in SMEM
    # o_ref:     (1, 1, HW)
    # col_ref:   (9*C, HW)       VMEM im2col scratch, reused by every conv
    HW = H * W
    offsets = [(oy, ox) for oy in (-1, 0, 1) for ox in (-1, 0, 1)]

    def conv3x3(x, w2, b, cin, relu):
        # x: (cin, HW) -> (Cout, HW); single MXU matmul with K = 9*cin.
        for t, (oy, ox) in enumerate(offsets):
            off = oy * W + ox
            # shifted[:, p] = x[:, p + off]; circular wrap is killed by mask.
            shifted = x if off == 0 else jnp.roll(x, -off, axis=1)
            col_ref[t * cin:(t + 1) * cin, :] = shifted * masks_ref[t:t + 1, :]
        patches = col_ref[0:9 * cin, :]                      # (9*cin, HW)
        out = jnp.dot(w2, patches, preferred_element_type=jnp.float32) + b
        if relu:
            out = jnp.maximum(out, 0.0)
        return out

    cb = cb_ref[0]                                           # (1, HW)
    head_w, head_b = hw_ref[...], hb_ref[...]
    c1_w, c1_b = c1w_ref[...], c1b_ref[...]                  # shared AB weights
    c2_w, c2_b = c2w_ref[...], c2b_ref[...]
    tail_w, tail_b = tw_ref[...], tb_ref[...]

    x = conv3x3(cb, head_w, head_b, 1, False)                # head: (C, HW)
    for i in range(6):                                       # shared AB block
        h = conv3x3(x, c1_w, c1_b, C, True)
        h = conv3x3(h, c2_w, c2_b, C, False)
        x = x + h * gates_ref[i]
    x = x * gates_ref[6]
    o_ref[0] = conv3x3(x, tail_w, tail_b, C, False) + cb     # tail + residual


# ----------------------------------------------------------------------------
# Wrapper: layout packing + pallas_call
# ----------------------------------------------------------------------------
def _pack_conv_weight(w_oihw):
    # PyTorch OIHW (Cout, Cin, 3, 3) -> (Cout, 9*Cin), tap-major, ci fastest.
    co, ci = w_oihw.shape[0], w_oihw.shape[1]
    return jnp.transpose(w_oihw, (0, 2, 3, 1)).reshape(co, 9 * ci)


def _boundary_masks(H, W):
    ii, jj = np.meshgrid(np.arange(H), np.arange(W), indexing="ij")
    masks = np.zeros((9, H * W), np.float32)
    t = 0
    for oy in (-1, 0, 1):
        for ox in (-1, 0, 1):
            valid = ((ii + oy >= 0) & (ii + oy < H) &
                     (jj + ox >= 0) & (jj + ox < W))
            masks[t] = valid.reshape(-1).astype(np.float32)
            t += 1
    return masks


def cb_net_forward(params, cb_nchw, y_nchw=None):
    """cb_net.forward(cb, y): y is ignored by the reference module."""
    del y_nchw
    B, cin, H, W = cb_nchw.shape
    assert cin == 1
    HW = H * W
    C = params["AB"]["c1"]["w"].shape[0]

    cb_flat = cb_nchw.reshape(B, 1, HW).astype(jnp.float32)
    masks = jnp.asarray(_boundary_masks(H, W))

    head_w = _pack_conv_weight(params["head"]["w"])
    head_b = params["head"]["b"].reshape(-1, 1)
    c1_w = _pack_conv_weight(params["AB"]["c1"]["w"])
    c1_b = params["AB"]["c1"]["b"].reshape(-1, 1)
    c2_w = _pack_conv_weight(params["AB"]["c2"]["w"])
    c2_b = params["AB"]["c2"]["b"].reshape(-1, 1)
    tail_w = _pack_conv_weight(params["tail"]["w"])
    tail_b = params["tail"]["b"].reshape(-1, 1)
    gates = params["gates"].astype(jnp.float32)

    flops = B * 18 * HW * (2 * C + 12 * C * C)
    weight_bytes = 4 * (head_w.size + head_b.size + c1_w.size + c1_b.size +
                        c2_w.size + c2_b.size + tail_w.size + tail_b.size +
                        gates.size + masks.size)
    cost = pl.CostEstimate(flops=flops, transcendentals=0,
                           bytes_accessed=2 * B * HW * 4 + weight_bytes)

    def full_spec(arr):
        nd = arr.ndim
        return pl.BlockSpec(arr.shape, lambda b: (0,) * nd)

    out_flat = pl.pallas_call(
        functools.partial(_cb_net_kernel, H=H, W=W, C=C),
        out_shape=jax.ShapeDtypeStruct((B, 1, HW), jnp.float32),
        grid=(B,),
        in_specs=[
            pl.BlockSpec((1, 1, HW), lambda b: (b, 0, 0)),        # cb
            full_spec(masks),
            full_spec(head_w), full_spec(head_b),
            full_spec(c1_w), full_spec(c1_b),
            full_spec(c2_w), full_spec(c2_b),
            full_spec(tail_w), full_spec(tail_b),
            pl.BlockSpec(memory_space=pltpu.MemorySpace.SMEM),    # gates
        ],
        out_specs=pl.BlockSpec((1, 1, HW), lambda b: (b, 0, 0)),
        scratch_shapes=[pltpu.VMEM((9 * C, HW), jnp.float32)],    # im2col buf
        compiler_params=pltpu.CompilerParams(
            dimension_semantics=("parallel",)),                   # 2 TCs on v7x
        cost_estimate=cost,
    )(cb_flat, masks, head_w, head_b, c1_w, c1_b, c2_w, c2_b,
      tail_w, tail_b, gates)

    return out_flat.reshape(B, 1, H, W)


# ----------------------------------------------------------------------------
# Deterministic parameter init (PyTorch OIHW layout)
# ----------------------------------------------------------------------------
def _init_conv(key, cin, cout):
    kw, kb = jax.random.split(key)
    w = jax.random.normal(kw, (cout, cin, 3, 3), jnp.float32) / np.sqrt(9 * cin)
    b = 0.01 * jax.random.normal(kb, (cout,), jnp.float32)
    return {"w": w, "b": b}


def init_params(key, feature_channels):
    keys = jax.random.split(key, 4)
    return {
        "head": _init_conv(keys[0], 1, feature_channels),
        "AB": {  # TODO(synk): AB body not provided; conv3x3 -> ReLU -> conv3x3
            "c1": _init_conv(keys[1], feature_channels, feature_channels),
            "c2": _init_conv(keys[2], feature_channels, feature_channels),
        },
        "tail": _init_conv(keys[3], feature_channels, 1),
        # TODO(synk): gate body not provided; learnable scalar gates
        "gates": jnp.asarray([1.0 - 0.05 * i for i in range(7)], jnp.float32),
    }


# ----------------------------------------------------------------------------
# Pure-JAX reference (XLA conv) for in-script correctness checking
# ----------------------------------------------------------------------------
def _conv_ref(x, w, b, relu=False):
    out = jax.lax.conv_general_dilated(
        x, w, window_strides=(1, 1), padding=((1, 1), (1, 1)),
        dimension_numbers=("NCHW", "OIHW", "NCHW"),
        precision=jax.lax.Precision.HIGHEST)
    out = out + b.reshape(1, -1, 1, 1)
    return jnp.maximum(out, 0.0) if relu else out


def cb_net_reference(params, cb, y=None):
    del y
    x = _conv_ref(cb, params["head"]["w"], params["head"]["b"])
    for i in range(6):
        h = _conv_ref(x, params["AB"]["c1"]["w"], params["AB"]["c1"]["b"],
                      relu=True)
        h = _conv_ref(h, params["AB"]["c2"]["w"], params["AB"]["c2"]["b"])
        x = x + h * params["gates"][i]
    x = x * params["gates"][6]
    return _conv_ref(x, params["tail"]["w"], params["tail"]["b"]) + cb


# ----------------------------------------------------------------------------
if __name__ == "__main__":
    B, FC = 2, 16                       # feature_channels = 16
    H, W = 16, 16                       # cb (chroma) spatial size
    key = jax.random.PRNGKey(0)
    k_cb, k_y, k_params = jax.random.split(key, 3)

    cb_in = jax.random.normal(k_cb, (B, 1, H, W), jnp.float32)
    y_in = jax.random.normal(k_y, (B, 1, 2 * H, 2 * W), jnp.float32)  # ignored

    params = init_params(k_params, FC)

    fwd = jax.jit(cb_net_forward)
    out = jax.block_until_ready(fwd(params, cb_in, y_in))

    assert out.shape == (B, 1, H, W), out.shape
    assert bool(jnp.all(jnp.isfinite(out)))

    ref = jax.block_until_ready(cb_net_reference(params, cb_in, y_in))
    scale = float(jnp.max(jnp.abs(ref))) + 1e-6
    rel_err = float(jnp.max(jnp.abs(out - ref))) / scale
    assert rel_err < 1e-2, f"mismatch vs XLA reference: rel_err={rel_err}"

    print("KERNEL_OK")
</pallas_src>

<mosaic_0001>
module attributes {stable_mosaic.version = 11 : i64} {
  func.func @_cb_net_kernel(%arg0: i32, %arg1: memref<1x1x256xf32, #tpu.memory_space<vmem>>, %arg2: memref<9x256xf32, #tpu.memory_space<vmem>>, %arg3: memref<16x9xf32, #tpu.memory_space<vmem>>, %arg4: memref<16x1xf32, #tpu.memory_space<vmem>>, %arg5: memref<16x144xf32, #tpu.memory_space<vmem>>, %arg6: memref<16x1xf32, #tpu.memory_space<vmem>>, %arg7: memref<16x144xf32, #tpu.memory_space<vmem>>, %arg8: memref<16x1xf32, #tpu.memory_space<vmem>>, %arg9: memref<1x144xf32, #tpu.memory_space<vmem>>, %arg10: memref<1x1xf32, #tpu.memory_space<vmem>>, %arg11: memref<7xf32, #tpu.memory_space<smem>>, %arg12: memref<1x1x256xf32, #tpu.memory_space<vmem>>, %arg13: memref<144x256xf32, #tpu.memory_space<vmem>>) attributes {dimension_semantics = [#tpu.dimension_semantics<parallel>], iteration_bounds = array<i64: 2>, scalar_prefetch = 0 : i64, scratch_operands = 1 : i64, tpu.core_type = #tpu.core_type<tc>, window_params = [{transform_indices = @transform_0, window_bounds = array<i64: 1, 1, 256>}, {pipeline_mode = #tpu.pipeline_mode<synchronous>, transform_indices = @transform_1, window_bounds = array<i64: 9, 256>}, {pipeline_mode = #tpu.pipeline_mode<synchronous>, transform_indices = @transform_2, window_bounds = array<i64: 16, 9>}, {pipeline_mode = #tpu.pipeline_mode<synchronous>, transform_indices = @transform_3, window_bounds = array<i64: 16, 1>}, {pipeline_mode = #tpu.pipeline_mode<synchronous>, transform_indices = @transform_4, window_bounds = array<i64: 16, 144>}, {pipeline_mode = #tpu.pipeline_mode<synchronous>, transform_indices = @transform_5, window_bounds = array<i64: 16, 1>}, {pipeline_mode = #tpu.pipeline_mode<synchronous>, transform_indices = @transform_6, window_bounds = array<i64: 16, 144>}, {pipeline_mode = #tpu.pipeline_mode<synchronous>, transform_indices = @transform_7, window_bounds = array<i64: 16, 1>}, {pipeline_mode = #tpu.pipeline_mode<synchronous>, transform_indices = @transform_8, window_bounds = array<i64: 1, 144>}, {pipeline_mode = #tpu.pipeline_mode<synchronous>, transform_indices = @transform_9, window_bounds = array<i64: 1, 1>}, {transform_indices = @transform_10, window_bounds = array<i64: 7>}, {transform_indices = @transform_11, window_bounds = array<i64: 1, 1, 256>}]} {
    %c0 = arith.constant 0 : index
    %c0_0 = arith.constant 0 : index
    %c0_1 = arith.constant 0 : index
    %0 = vector.load %arg1[%c0, %c0_0, %c0_1] : memref<1x1x256xf32, #tpu.memory_space<vmem>>, vector<1x1x256xf32>
    %1 = vector.shape_cast %0 : vector<1x1x256xf32> to vector<1x256xf32>
    %c0_2 = arith.constant 0 : index
    %c0_3 = arith.constant 0 : index
    %2 = vector.load %arg3[%c0_2, %c0_3] : memref<16x9xf32, #tpu.memory_space<vmem>>, vector<16x9xf32>
    %c0_4 = arith.constant 0 : index
    %c0_5 = arith.constant 0 : index
    %3 = vector.load %arg4[%c0_4, %c0_5] : memref<16x1xf32, #tpu.memory_space<vmem>>, vector<16x1xf32>
    %c0_6 = arith.constant 0 : index
    %c0_7 = arith.constant 0 : index
    %4 = vector.load %arg5[%c0_6, %c0_7] : memref<16x144xf32, #tpu.memory_space<vmem>>, vector<16x144xf32>
    %c0_8 = arith.constant 0 : index
    %c0_9 = arith.constant 0 : index
    %5 = vector.load %arg6[%c0_8, %c0_9] : memref<16x1xf32, #tpu.memory_space<vmem>>, vector<16x1xf32>
    %c0_10 = arith.constant 0 : index
    %c0_11 = arith.constant 0 : index
    %6 = vector.load %arg7[%c0_10, %c0_11] : memref<16x144xf32, #tpu.memory_space<vmem>>, vector<16x144xf32>
    %c0_12 = arith.constant 0 : index
    %c0_13 = arith.constant 0 : index
    %7 = vector.load %arg8[%c0_12, %c0_13] : memref<16x1xf32, #tpu.memory_space<vmem>>, vector<16x1xf32>
    %c0_14 = arith.constant 0 : index
    %c0_15 = arith.constant 0 : index
    %8 = vector.load %arg9[%c0_14, %c0_15] : memref<1x144xf32, #tpu.memory_space<vmem>>, vector<1x144xf32>
    %c0_16 = arith.constant 0 : index
    %c0_17 = arith.constant 0 : index
    %9 = vector.load %arg10[%c0_16, %c0_17] : memref<1x1xf32, #tpu.memory_space<vmem>>, vector<1x1xf32>
    %10 = vector.extract_strided_slice %1 {offsets = [0, 239], sizes = [1, 17], strides = [1, 1]} : vector<1x256xf32> to vector<1x17xf32>
    %11 = vector.extract_strided_slice %1 {offsets = [0, 0], sizes = [1, 239], strides = [1, 1]} : vector<1x256xf32> to vector<1x239xf32>
    %12 = tpu.concatenate %10, %11 in 1 : vector<1x17xf32>, vector<1x239xf32> -> vector<1x256xf32>
    %c0_18 = arith.constant 0 : index
    %c0_19 = arith.constant 0 : index
    %13 = vector.load %arg2[%c0_18, %c0_19] : memref<9x256xf32, #tpu.memory_space<vmem>>, vector<1x256xf32>
    %14 = arith.mulf %12, %13 : vector<1x256xf32>
    %c0_20 = arith.constant 0 : index
    %c0_21 = arith.constant 0 : index
    %15 = vector.load %arg13[%c0_20, %c0_21] : memref<144x256xf32, #tpu.memory_space<vmem>>, vector<1x256xf32>
    tpu.vector_store %arg13[%c0_20, %c0_21], %14 {strides = array<i32>} : memref<144x256xf32, #tpu.memory_space<vmem>>, vector<1x256xf32>,
    %16 = vector.extract_strided_slice %1 {offsets = [0, 240], sizes = [1, 16], strides = [1, 1]} : vector<1x256xf32> to vector<1x16xf32>
    %17 = vector.extract_strided_slice %1 {offsets = [0, 0], sizes = [1, 240], strides = [1, 1]} : vector<1x256xf32> to vector<1x240xf32>
    %18 = tpu.concatenate %16, %17 in 1 : vector<1x16xf32>, vector<1x240xf32> -> vector<1x256xf32>
    %c1 = arith.constant 1 : index
    %c0_22 = arith.constant 0 : index
    %19 = vector.load %arg2[%c1, %c0_22] : memref<9x256xf32, #tpu.memory_space<vmem>>, vector<1x256xf32>
    %20 = arith.mulf %18, %19 : vector<1x256xf32>
    %c1_23 = arith.constant 1 : index
    %c0_24 = arith.constant 0 : index
    %21 = vector.load %arg13[%c1_23, %c0_24] : memref<144x256xf32, #tpu.memory_space<vmem>>, vector<1x256xf32>
    tpu.vector_store %arg13[%c1_23, %c0_24], %20 {strides = array<i32>} : memref<144x256xf32, #tpu.memory_space<vmem>>, vector<1x256xf32>,
    %22 = vector.extract_strided_slice %1 {offsets = [0, 241], sizes = [1, 15], strides = [1, 1]} : vector<1x256xf32> to vector<1x15xf32>
    %23 = vector.extract_strided_slice %1 {offsets = [0, 0], sizes = [1, 241], strides = [1, 1]} : vector<1x256xf32> to vector<1x241xf32>
    %24 = tpu.concatenate %22, %23 in 1 : vector<1x15xf32>, vector<1x241xf32> -> vector<1x256xf32>
    %c2 = arith.constant 2 : index
    %c0_25 = arith.constant 0 : index
    %25 = vector.load %arg2[%c2, %c0_25] : memref<9x256xf32, #tpu.memory_space<vmem>>, vector<1x256xf32>
    %26 = arith.mulf %24, %25 : vector<1x256xf32>
    %c2_26 = arith.constant 2 : index
    %c0_27 = arith.constant 0 : index
    %27 = vector.load %arg13[%c2_26, %c0_27] : memref<144x256xf32, #tpu.memory_space<vmem>>, vector<1x256xf32>
    tpu.vector_store %arg13[%c2_26, %c0_27], %26 {strides = array<i32>} : memref<144x256xf32, #tpu.memory_space<vmem>>, vector<1x256xf32>,
    %28 = vector.extract_strided_slice %1 {offsets = [0, 255], sizes = [1, 1], strides = [1, 1]} : vector<1x256xf32> to vector<1x1xf32>
    %29 = vector.extract_strided_slice %1 {offsets = [0, 0], sizes = [1, 255], strides = [1, 1]} : vector<1x256xf32> to vector<1x255xf32>
    %30 = tpu.concatenate %28, %29 in 1 : vector<1x1xf32>, vector<1x255xf32> -> vector<1x256xf32>
    %c3 = arith.constant 3 : index
    %c0_28 = arith.constant 0 : index
    %31 = vector.load %arg2[%c3, %c0_28] : memref<9x256xf32, #tpu.memory_space<vmem>>, vector<1x256xf32>
    %32 = arith.mulf %30, %31 : vector<1x256xf32>
    %c3_29 = arith.constant 3 : index
    %c0_30 = arith.constant 0 : index
    %33 = vector.load %arg13[%c3_29, %c0_30] : memref<144x256xf32, #tpu.memory_space<vmem>>, vector<1x256xf32>
    tpu.vector_store %arg13[%c3_29, %c0_30], %32 {strides = array<i32>} : memref<144x256xf32, #tpu.memory_space<vmem>>, vector<1x256xf32>,
    %c4 = arith.constant 4 : index
    %c0_31 = arith.constant 0 : index
    %34 = vector.load %arg2[%c4, %c0_31] : memref<9x256xf32, #tpu.memory_space<vmem>>, vector<1x256xf32>
    %35 = arith.mulf %1, %34 : vector<1x256xf32>
    %c4_32 = arith.constant 4 : index
    %c0_33 = arith.constant 0 : index
    %36 = vector.load %arg13[%c4_32, %c0_33] : memref<144x256xf32, #tpu.memory_space<vmem>>, vector<1x256xf32>
    tpu.vector_store %arg13[%c4_32, %c0_33], %35 {strides = array<i32>} : memref<144x256xf32, #tpu.memory_space<vmem>>, vector<1x256xf32>,
    %37 = vector.extract_strided_slice %1 {offsets = [0, 1], sizes = [1, 255], strides = [1, 1]} : vector<1x256xf32> to vector<1x255xf32>
    %38 = vector.extract_strided_slice %1 {offsets = [0, 0], sizes = [1, 1], strides = [1, 1]} : vector<1x256xf32> to vector<1x1xf32>
    %39 = tpu.concatenate %37, %38 in 1 : vector<1x255xf32>, vector<1x1xf32> -> vector<1x256xf32>
    %c5 = arith.constant 5 : index
    %c0_34 = arith.constant 0 : index
    %40 = vector.load %arg2[%c5, %c0_34] : memref<9x256xf32, #tpu.memory_space<vmem>>, vector<1x256xf32>
    %41 = arith.mulf %39, %40 : vector<1x256xf32>
    %c5_35 = arith.constant 5 : index
    %c0_36 = arith.constant 0 : index
    %42 = vector.load %arg13[%c5_35, %c0_36] : memref<144x256xf32, #tpu.memory_space<vmem>>, vector<1x256xf32>
    tpu.vector_store %arg13[%c5_35, %c0_36], %41 {strides = array<i32>} : memref<144x256xf32, #tpu.memory_space<vmem>>, vector<1x256xf32>,
    %43 = vector.extract_strided_slice %1 {offsets = [0, 15], sizes = [1, 241], strides = [1, 1]} : vector<1x256xf32> to vector<1x241xf32>
    %44 = vector.extract_strided_slice %1 {offsets = [0, 0], sizes = [1, 15], strides = [1, 1]} : vector<1x256xf32> to vector<1x15xf32>
    %45 = tpu.concatenate %43, %44 in 1 : vector<1x241xf32>, vector<1x15xf32> -> vector<1x256xf32>
    %c6 = arith.constant 6 : index
    %c0_37 = arith.constant 0 : index
    %46 = vector.load %arg2[%c6, %c0_37] : memref<9x256xf32, #tpu.memory_space<vmem>>, vector<1x256xf32>
    %47 = arith.mulf %45, %46 : vector<1x256xf32>
    %c6_38 = arith.constant 6 : index
    %c0_39 = arith.constant 0 : index
    %48 = vector.load %arg13[%c6_38, %c0_39] : memref<144x256xf32, #tpu.memory_space<vmem>>, vector<1x256xf32>
    tpu.vector_store %arg13[%c6_38, %c0_39], %47 {strides = array<i32>} : memref<144x256xf32, #tpu.memory_space<vmem>>, vector<1x256xf32>,
    %49 = vector.extract_strided_slice %1 {offsets = [0, 16], sizes = [1, 240], strides = [1, 1]} : vector<1x256xf32> to vector<1x240xf32>
    %50 = vector.extract_strided_slice %1 {offsets = [0, 0], sizes = [1, 16], strides = [1, 1]} : vector<1x256xf32> to vector<1x16xf32>
    %51 = tpu.concatenate %49, %50 in 1 : vector<1x240xf32>, vector<1x16xf32> -> vector<1x256xf32>
    %c7 = arith.constant 7 : index
    %c0_40 = arith.constant 0 : index
    %52 = vector.load %arg2[%c7, %c0_40] : memref<9x256xf32, #tpu.memory_space<vmem>>, vector<1x256xf32>
    %53 = arith.mulf %51, %52 : vector<1x256xf32>
    %c7_41 = arith.constant 7 : index
    %c0_42 = arith.constant 0 : index
    %54 = vector.load %arg13[%c7_41, %c0_42] : memref<144x256xf32, #tpu.memory_space<vmem>>, vector<1x256xf32>
    tpu.vector_store %arg13[%c7_41, %c0_42], %53 {strides = array<i32>} : memref<144x256xf32, #tpu.memory_space<vmem>>, vector<1x256xf32>,
    %55 = vector.extract_strided_slice %1 {offsets = [0, 17], sizes = [1, 239], strides = [1, 1]} : vector<1x256xf32> to vector<1x239xf32>
    %56 = vector.extract_strided_slice %1 {offsets = [0, 0], sizes = [1, 17], strides = [1, 1]} : vector<1x256xf32> to vector<1x17xf32>
    %57 = tpu.concatenate %55, %56 in 1 : vector<1x239xf32>, vector<1x17xf32> -> vector<1x256xf32>
    %c8 = arith.constant 8 : index
    %c0_43 = arith.constant 0 : index
    %58 = vector.load %arg2[%c8, %c0_43] : memref<9x256xf32, #tpu.memory_space<vmem>>, vector<1x256xf32>
    %59 = arith.mulf %57, %58 : vector<1x256xf32>
    %c8_44 = arith.constant 8 : index
    %c0_45 = arith.constant 0 : index
    %60 = vector.load %arg13[%c8_44, %c0_45] : memref<144x256xf32, #tpu.memory_space<vmem>>, vector<1x256xf32>
    tpu.vector_store %arg13[%c8_44, %c0_45], %59 {strides = array<i32>} : memref<144x256xf32, #tpu.memory_space<vmem>>, vector<1x256xf32>,
    %c0_46 = arith.constant 0 : index
    %c0_47 = arith.constant 0 : index
    %61 = vector.load %arg13[%c0_46, %c0_47] : memref<144x256xf32, #tpu.memory_space<vmem>>, vector<9x256xf32>
    %cst = arith.constant dense<0.000000e+00> : vector<16x256xf32>
    %62 = tpu.matmul %2, %61, %cst {dimension_numbers = #tpu.dot_dimension_numbers<[1], [0], [0], [1], [0, 0, 1, 1], [], []>} : vector<16x9xf32>, vector<9x256xf32>, vector<16x256xf32> -> vector<16x256xf32>
    %63 = vector.broadcast %3 : vector<16x1xf32> to vector<16x256xf32>
    %64 = arith.addf %62, %63 : vector<16x256xf32>
    %65 = vector.extract_strided_slice %64 {offsets = [0, 239], sizes = [16, 17], strides = [1, 1]} : vector<16x256xf32> to vector<16x17xf32>
    %66 = vector.extract_strided_slice %64 {offsets = [0, 0], sizes = [16, 239], strides = [1, 1]} : vector<16x256xf32> to vector<16x239xf32>
    %67 = tpu.concatenate %65, %66 in 1 : vector<16x17xf32>, vector<16x239xf32> -> vector<16x256xf32>
    %c0_48 = arith.constant 0 : index
    %c0_49 = arith.constant 0 : index
    %68 = vector.load %arg2[%c0_48, %c0_49] : memref<9x256xf32, #tpu.memory_space<vmem>>, vector<1x256xf32>
    %69 = vector.broadcast %68 : vector<1x256xf32> to vector<16x256xf32>
    %70 = arith.mulf %67, %69 : vector<16x256xf32>
    %c0_50 = arith.constant 0 : index
    %c0_51 = arith.constant 0 : index
    %71 = vector.load %arg13[%c0_50, %c0_51] : memref<144x256xf32, #tpu.memory_space<vmem>>, vector<16x256xf32>
    tpu.vector_store %arg13[%c0_50, %c0_51], %70 {strides = array<i32>} : memref<144x256xf32, #tpu.memory_space<vmem>>, vector<16x256xf32>,
    %72 = vector.extract_strided_slice %64 {offsets = [0, 240], sizes = [16, 16], strides = [1, 1]} : vector<16x256xf32> to vector<16x16xf32>
    %73 = vector.extract_strided_slice %64 {offsets = [0, 0], sizes = [16, 240], strides = [1, 1]} : vector<16x256xf32> to vector<16x240xf32>
    %74 = tpu.concatenate %72, %73 in 1 : vector<16x16xf32>, vector<16x240xf32> -> vector<16x256xf32>
    %c1_52 = arith.constant 1 : index
    %c0_53 = arith.constant 0 : index
    %75 = vector.load %arg2[%c1_52, %c0_53] : memref<9x256xf32, #tpu.memory_space<vmem>>, vector<1x256xf32>
    %76 = vector.broadcast %75 : vector<1x256xf32> to vector<16x256xf32>
    %77 = arith.mulf %74, %76 : vector<16x256xf32>
    %c16 = arith.constant 16 : index
    %c0_54 = arith.constant 0 : index
    %78 = vector.load %arg13[%c16, %c0_54] : memref<144x256xf32, #tpu.memory_space<vmem>>, vector<16x256xf32>
    tpu.vector_store %arg13[%c16, %c0_54], %77 {strides = array<i32>} : memref<144x256xf32, #tpu.memory_space<vmem>>, vector<16x256xf32>,
    %79 = vector.extract_strided_slice %64 {offsets = [0, 241], sizes = [16, 15], strides = [1, 1]} : vector<16x256xf32> to vector<16x15xf32>
    %80 = vector.extract_strided_slice %64 {offsets = [0, 0], sizes = [16, 241], strides = [1, 1]} : vector<16x256xf32> to vector<16x241xf32>
    %81 = tpu.concatenate %79, %80 in 1 : vector<16x15xf32>, vector<16x241xf32> -> vector<16x256xf32>
    %c2_55 = arith.constant 2 : index
    %c0_56 = arith.constant 0 : index
    %82 = vector.load %arg2[%c2_55, %c0_56] : memref<9x256xf32, #tpu.memory_space<vmem>>, vector<1x256xf32>
    %83 = vector.broadcast %82 : vector<1x256xf32> to vector<16x256xf32>
    %84 = arith.mulf %81, %83 : vector<16x256xf32>
    %c32 = arith.constant 32 : index
    %c0_57 = arith.constant 0 : index
    %85 = vector.load %arg13[%c32, %c0_57] : memref<144x256xf32, #tpu.memory_space<vmem>>, vector<16x256xf32>
    tpu.vector_store %arg13[%c32, %c0_57], %84 {strides = array<i32>} : memref<144x256xf32, #tpu.memory_space<vmem>>, vector<16x256xf32>,
    %86 = vector.extract_strided_slice %64 {offsets = [0, 255], sizes = [16, 1], strides = [1, 1]} : vector<16x256xf32> to vector<16x1xf32>
    %87 = vector.extract_strided_slice %64 {offsets = [0, 0], sizes = [16, 255], strides = [1, 1]} : vector<16x256xf32> to vector<16x255xf32>
    %88 = tpu.concatenate %86, %87 in 1 : vector<16x1xf32>, vector<16x255xf32> -> vector<16x256xf32>
    %c3_58 = arith.constant 3 : index
    %c0_59 = arith.constant 0 : index
    %89 = vector.load %arg2[%c3_58, %c0_59] : memref<9x256xf32, #tpu.memory_space<vmem>>, vector<1x256xf32>
    %90 = vector.broadcast %89 : vector<1x256xf32> to vector<16x256xf32>
    %91 = arith.mulf %88, %90 : vector<16x256xf32>
    %c48 = arith.constant 48 : index
    %c0_60 = arith.constant 0 : index
    %92 = vector.load %arg13[%c48, %c0_60] : memref<144x256xf32, #tpu.memory_space<vmem>>, vector<16x256xf32>
    tpu.vector_store %arg13[%c48, %c0_60], %91 {strides = array<i32>} : memref<144x256xf32, #tpu.memory_space<vmem>>, vector<16x256xf32>,
    %c4_61 = arith.constant 4 : index
    %c0_62 = arith.constant 0 : index
    %93 = vector.load %arg2[%c4_61, %c0_62] : memref<9x256xf32, #tpu.memory_space<vmem>>, vector<1x256xf32>
    %94 = vector.broadcast %93 : vector<1x256xf32> to vector<16x256xf32>
    %95 = arith.mulf %64, %94 : vector<16x256xf32>
    %c64 = arith.constant 64 : index
    %c0_63 = arith.constant 0 : index
    %96 = vector.load %arg13[%c64, %c0_63] : memref<144x256xf32, #tpu.memory_space<vmem>>, vector<16x256xf32>
    tpu.vector_store %arg13[%c64, %c0_63], %95 {strides = array<i32>} : memref<144x256xf32, #tpu.memory_space<vmem>>, vector<16x256xf32>,
    %97 = vector.extract_strided_slice %64 {offsets = [0, 1], sizes = [16, 255], strides = [1, 1]} : vector<16x256xf32> to vector<16x255xf32>
    %98 = vector.extract_strided_slice %64 {offsets = [0, 0], sizes = [16, 1], strides = [1, 1]} : vector<16x256xf32> to vector<16x1xf32>
    %99 = tpu.concatenate %97, %98 in 1 : vector<16x255xf32>, vector<16x1xf32> -> vector<16x256xf32>
    %c5_64 = arith.constant 5 : index
    %c0_65 = arith.constant 0 : index
    %100 = vector.load %arg2[%c5_64, %c0_65] : memref<9x256xf32, #tpu.memory_space<vmem>>, vector<1x256xf32>
    %101 = vector.broadcast %100 : vector<1x256xf32> to vector<16x256xf32>
    %102 = arith.mulf %99, %101 : vector<16x256xf32>
    %c80 = arith.constant 80 : index
    %c0_66 = arith.constant 0 : index
    %103 = vector.load %arg13[%c80, %c0_66] : memref<144x256xf32, #tpu.memory_space<vmem>>, vector<16x256xf32>
    tpu.vector_store %arg13[%c80, %c0_66], %102 {strides = array<i32>} : memref<144x256xf32, #tpu.memory_space<vmem>>, vector<16x256xf32>,
    %104 = vector.extract_strided_slice %64 {offsets = [0, 15], sizes = [16, 241], strides = [1, 1]} : vector<16x256xf32> to vector<16x241xf32>
    %105 = vector.extract_strided_slice %64 {offsets = [0, 0], sizes = [16, 15], strides = [1, 1]} : vector<16x256xf32> to vector<16x15xf32>
    %106 = tpu.concatenate %104, %105 in 1 : vector<16x241xf32>, vector<16x15xf32> -> vector<16x256xf32>
    %c6_67 = arith.constant 6 : index
    %c0_68 = arith.constant 0 : index
    %107 = vector.load %arg2[%c6_67, %c0_68] : memref<9x256xf32, #tpu.memory_space<vmem>>, vector<1x256xf32>
    %108 = vector.broadcast %107 : vector<1x256xf32> to vector<16x256xf32>
    %109 = arith.mulf %106, %108 : vector<16x256xf32>
    %c96 = arith.constant 96 : index
    %c0_69 = arith.constant 0 : index
    %110 = vector.load %arg13[%c96, %c0_69] : memref<144x256xf32, #tpu.memory_space<vmem>>, vector<16x256xf32>
    tpu.vector_store %arg13[%c96, %c0_69], %109 {strides = array<i32>} : memref<144x256xf32, #tpu.memory_space<vmem>>, vector<16x256xf32>,
    %111 = vector.extract_strided_slice %64 {offsets = [0, 16], sizes = [16, 240], strides = [1, 1]} : vector<16x256xf32> to vector<16x240xf32>
    %112 = vector.extract_strided_slice %64 {offsets = [0, 0], sizes = [16, 16], strides = [1, 1]} : vector<16x256xf32> to vector<16x16xf32>
    %113 = tpu.concatenate %111, %112 in 1 : vector<16x240xf32>, vector<16x16xf32> -> vector<16x256xf32>
    %c7_70 = arith.constant 7 : index
    %c0_71 = arith.constant 0 : index
    %114 = vector.load %arg2[%c7_70, %c0_71] : memref<9x256xf32, #tpu.memory_space<vmem>>, vector<1x256xf32>
    %115 = vector.broadcast %114 : vector<1x256xf32> to vector<16x256xf32>
    %116 = arith.mulf %113, %115 : vector<16x256xf32>
    %c112 = arith.constant 112 : index
    %c0_72 = arith.constant 0 : index
    %117 = vector.load %arg13[%c112, %c0_72] : memref<144x256xf32, #tpu.memory_space<vmem>>, vector<16x256xf32>
    tpu.vector_store %arg13[%c112, %c0_72], %116 {strides = array<i32>} : memref<144x256xf32, #tpu.memory_space<vmem>>, vector<16x256xf32>,
    %118 = vector.extract_strided_slice %64 {offsets = [0, 17], sizes = [16, 239], strides = [1, 1]} : vector<16x256xf32> to vector<16x239xf32>
    %119 = vector.extract_strided_slice %64 {offsets = [0, 0], sizes = [16, 17], strides = [1, 1]} : vector<16x256xf32> to vector<16x17xf32>
    %120 = tpu.concatenate %118, %119 in 1 : vector<16x239xf32>, vector<16x17xf32> -> vector<16x256xf32>
    %c8_73 = arith.constant 8 : index
    %c0_74 = arith.constant 0 : index
    %121 = vector.load %arg2[%c8_73, %c0_74] : memref<9x256xf32, #tpu.memory_space<vmem>>, vector<1x256xf32>
    %122 = vector.broadcast %121 : vector<1x256xf32> to vector<16x256xf32>
    %123 = arith.mulf %120, %122 : vector<16x256xf32>
    %c128 = arith.constant 128 : index
    %c0_75 = arith.constant 0 : index
    %124 = vector.load %arg13[%c128, %c0_75] : memref<144x256xf32, #tpu.memory_space<vmem>>, vector<16x256xf32>
    tpu.vector_store %arg13[%c128, %c0_75], %123 {strides = array<i32>} : memref<144x256xf32, #tpu.memory_space<vmem>>, vector<16x256xf32>,
    %c0_76 = arith.constant 0 : index
    %c0_77 = arith.constant 0 : index
    %125 = vector.load %arg13[%c0_76, %c0_77] : memref<144x256xf32, #tpu.memory_space<vmem>>, vector<144x256xf32>
    %cst_78 = arith.constant dense<0.000000e+00> : vector<16x256xf32>
    %126 = tpu.matmul %4, %125, %cst_78 {dimension_numbers = #tpu.dot_dimension_numbers<[1], [0], [0], [1], [0, 0, 1, 1], [], []>} : vector<16x144xf32>, vector<144x256xf32>, vector<16x256xf32> -> vector<16x256xf32>
    %127 = vector.broadcast %5 : vector<16x1xf32> to vector<16x256xf32>
    %128 = arith.addf %126, %127 : vector<16x256xf32>
    %cst_79 = arith.constant 0.000000e+00 : f32
    %129 = vector.broadcast %cst_79 : f32 to vector<16x256xf32>
    %130 = arith.maximumf %128, %129 : vector<16x256xf32>
    %131 = vector.extract_strided_slice %130 {offsets = [0, 239], sizes = [16, 17], strides = [1, 1]} : vector<16x256xf32> to vector<16x17xf32>
    %132 = vector.extract_strided_slice %130 {offsets = [0, 0], sizes = [16, 239], strides = [1, 1]} : vector<16x256xf32> to vector<16x239xf32>
    %133 = tpu.concatenate %131, %132 in 1 : vector<16x17xf32>, vector<16x239xf32> -> vector<16x256xf32>
    %c0_80 = arith.constant 0 : index
    %c0_81 = arith.constant 0 : index
    %134 = vector.load %arg2[%c0_80, %c0_81] : memref<9x256xf32, #tpu.memory_space<vmem>>, vector<1x256xf32>
    %135 = vector.broadcast %134 : vector<1x256xf32> to vector<16x256xf32>
    %136 = arith.mulf %133, %135 : vector<16x256xf32>
    %c0_82 = arith.constant 0 : index
    %c0_83 = arith.constant 0 : index
    %137 = vector.load %arg13[%c0_82, %c0_83] : memref<144x256xf32, #tpu.memory_space<vmem>>, vector<16x256xf32>
    tpu.vector_store %arg13[%c0_82, %c0_83], %136 {strides = array<i32>} : memref<144x256xf32, #tpu.memory_space<vmem>>, vector<16x256xf32>,
    %138 = vector.extract_strided_slice %130 {offsets = [0, 240], sizes = [16, 16], strides = [1, 1]} : vector<16x256xf32> to vector<16x16xf32>
    %139 = vector.extract_strided_slice %130 {offsets = [0, 0], sizes = [16, 240], strides = [1, 1]} : vector<16x256xf32> to vector<16x240xf32>
    %140 = tpu.concatenate %138, %139 in 1 : vector<16x16xf32>, vector<16x240xf32> -> vector<16x256xf32>
    %c1_84 = arith.constant 1 : index
    %c0_85 = arith.constant 0 : index
    %141 = vector.load %arg2[%c1_84, %c0_85] : memref<9x256xf32, #tpu.memory_space<vmem>>, vector<1x256xf32>
    %142 = vector.broadcast %141 : vector<1x256xf32> to vector<16x256xf32>
    %143 = arith.mulf %140, %142 : vector<16x256xf32>
    %c16_86 = arith.constant 16 : index
    %c0_87 = arith.constant 0 : index
    %144 = vector.load %arg13[%c16_86, %c0_87] : memref<144x256xf32, #tpu.memory_space<vmem>>, vector<16x256xf32>
    tpu.vector_store %arg13[%c16_86, %c0_87], %143 {strides = array<i32>} : memref<144x256xf32, #tpu.memory_space<vmem>>, vector<16x256xf32>,
    %145 = vector.extract_strided_slice %130 {offsets = [0, 241], sizes = [16, 15], strides = [1, 1]} : vector<16x256xf32> to vector<16x15xf32>
    %146 = vector.extract_strided_slice %130 {offsets = [0, 0], sizes = [16, 241], strides = [1, 1]} : vector<16x256xf32> to vector<16x241xf32>
    %147 = tpu.concatenate %145, %146 in 1 : vector<16x15xf32>, vector<16x241xf32> -> vector<16x256xf32>
    %c2_88 = arith.constant 2 : index
    %c0_89 = arith.constant 0 : index
    %148 = vector.load %arg2[%c2_88, %c0_89] : memref<9x256xf32, #tpu.memory_space<vmem>>, vector<1x256xf32>
    %149 = vector.broadcast %148 : vector<1x256xf32> to vector<16x256xf32>
    %150 = arith.mulf %147, %149 : vector<16x256xf32>
    %c32_90 = arith.constant 32 : index
    %c0_91 = arith.constant 0 : index
    %151 = vector.load %arg13[%c32_90, %c0_91] : memref<144x256xf32, #tpu.memory_space<vmem>>, vector<16x256xf32>
    tpu.vector_store %arg13[%c32_90, %c0_91], %150 {strides = array<i32>} : memref<144x256xf32, #tpu.memory_space<vmem>>, vector<16x256xf32>,
    %152 = vector.extract_strided_slice %130 {offsets = [0, 255], sizes = [16, 1], strides = [1, 1]} : vector<16x256xf32> to vector<16x1xf32>
    %153 = vector.extract_strided_slice %130 {offsets = [0, 0], sizes = [16, 255], strides = [1, 1]} : vector<16x256xf32> to vector<16x255xf32>
    %154 = tpu.concatenate %152, %153 in 1 : vector<16x1xf32>, vector<16x255xf32> -> vector<16x256xf32>
    %c3_92 = arith.constant 3 : index
    %c0_93 = arith.constant 0 : index
    %155 = vector.load %arg2[%c3_92, %c0_93] : memref<9x256xf32, #tpu.memory_space<vmem>>, vector<1x256xf32>
    %156 = vector.broadcast %155 : vector<1x256xf32> to vector<16x256xf32>
    %157 = arith.mulf %154, %156 : vector<16x256xf32>
    %c48_94 = arith.constant 48 : index
    %c0_95 = arith.constant 0 : index
    %158 = vector.load %arg13[%c48_94, %c0_95] : memref<144x256xf32, #tpu.memory_space<vmem>>, vector<16x256xf32>
    tpu.vector_store %arg13[%c48_94, %c0_95], %157 {strides = array<i32>} : memref<144x256xf32, #tpu.memory_space<vmem>>, vector<16x256xf32>,
    %c4_96 = arith.constant 4 : index
    %c0_97 = arith.constant 0 : index
    %159 = vector.load %arg2[%c4_96, %c0_97] : memref<9x256xf32, #tpu.memory_space<vmem>>, vector<1x256xf32>
    %160 = vector.broadcast %159 : vector<1x256xf32> to vector<16x256xf32>
    %161 = arith.mulf %130, %160 : vector<16x256xf32>
    %c64_98 = arith.constant 64 : index
    %c0_99 = arith.constant 0 : index
    %162 = vector.load %arg13[%c64_98, %c0_99] : memref<144x256xf32, #tpu.memory_space<vmem>>, vector<16x256xf32>
    tpu.vector_store %arg13[%c64_98, %c0_99], %161 {strides = array<i32>} : memref<144x256xf32, #tpu.memory_space<vmem>>, vector<16x256xf32>,
    %163 = vector.extract_strided_slice %130 {offsets = [0, 1], sizes = [16, 255], strides = [1, 1]} : vector<16x256xf32> to vector<16x255xf32>
    %164 = vector.extract_strided_slice %130 {offsets = [0, 0], sizes = [16, 1], strides = [1, 1]} : vector<16x256xf32> to vector<16x1xf32>
    %165 = tpu.concatenate %163, %164 in 1 : vector<16x255xf32>, vector<16x1xf32> -> vector<16x256xf32>
    %c5_100 = arith.constant 5 : index
    %c0_101 = arith.constant 0 : index
    %166 = vector.load %arg2[%c5_100, %c0_101] : memref<9x256xf32, #tpu.memory_space<vmem>>, vector<1x256xf32>
    %167 = vector.broadcast %166 : vector<1x256xf32> to vector<16x256xf32>
    %168 = arith.mulf %165, %167 : vector<16x256xf32>
    %c80_102 = arith.constant 80 : index
    %c0_103 = arith.constant 0 : index
    %169 = vector.load %arg13[%c80_102, %c0_103] : memref<144x256xf32, #tpu.memory_space<vmem>>, vector<16x256xf32>
    tpu.vector_store %arg13[%c80_102, %c0_103], %168 {strides = array<i32>} : memref<144x256xf32, #tpu.memory_space<vmem>>, vector<16x256xf32>,
    %170 = vector.extract_strided_slice %130 {offsets = [0, 15], sizes = [16, 241], strides = [1, 1]} : vector<16x256xf32> to vector<16x241xf32>
    %171 = vector.extract_strided_slice %130 {offsets = [0, 0], sizes = [16, 15], strides = [1, 1]} : vector<16x256xf32> to vector<16x15xf32>
    %172 = tpu.concatenate %170, %171 in 1 : vector<16x241xf32>, vector<16x15xf32> -> vector<16x256xf32>
    %c6_104 = arith.constant 6 : index
    %c0_105 = arith.constant 0 : index
    %173 = vector.load %arg2[%c6_104, %c0_105] : memref<9x256xf32, #tpu.memory_space<vmem>>, vector<1x256xf32>
    %174 = vector.broadcast %173 : vector<1x256xf32> to vector<16x256xf32>
    %175 = arith.mulf %172, %174 : vector<16x256xf32>
    %c96_106 = arith.constant 96 : index
    %c0_107 = arith.constant 0 : index
    %176 = vector.load %arg13[%c96_106, %c0_107] : memref<144x256xf32, #tpu.memory_space<vmem>>, vector<16x256xf32>
    tpu.vector_store %arg13[%c96_106, %c0_107], %175 {strides = array<i32>} : memref<144x256xf32, #tpu.memory_space<vmem>>, vector<16x256xf32>,
    %177 = vector.extract_strided_slice %130 {offsets = [0, 16], sizes = [16, 240], strides = [1, 1]} : vector<16x256xf32> to vector<16x240xf32>
    %178 = vector.extract_strided_slice %130 {offsets = [0, 0], sizes = [16, 16], strides = [1, 1]} : vector<16x256xf32> to vector<16x16xf32>
    %179 = tpu.concatenate %177, %178 in 1 : vector<16x240xf32>, vector<16x16xf32> -> vector<16x256xf32>
    %c7_108 = arith.constant 7 : index
    %c0_109 = arith.constant 0 : index
    %180 = vector.load %arg2[%c7_108, %c0_109] : memref<9x256xf32, #tpu.memory_space<vmem>>, vector<1x256xf32>
    %181 = vector.broadcast %180 : vector<1x256xf32> to vector<16x256xf32>
    %182 = arith.mulf %179, %181 : vector<16x256xf32>
    %c112_110 = arith.constant 112 : index
    %c0_111 = arith.constant 0 : index
    %183 = vector.load %arg13[%c112_110, %c0_111] : memref<144x256xf32, #tpu.memory_space<vmem>>, vector<16x256xf32>
    tpu.vector_store %arg13[%c112_110, %c0_111], %182 {strides = array<i32>} : memref<144x256xf32, #tpu.memory_space<vmem>>, vector<16x256xf32>,
    %184 = vector.extract_strided_slice %130 {offsets = [0, 17], sizes = [16, 239], strides = [1, 1]} : vector<16x256xf32> to vector<16x239xf32>
    %185 = vector.extract_strided_slice %130 {offsets = [0, 0], sizes = [16, 17], strides = [1, 1]} : vector<16x256xf32> to vector<16x17xf32>
    %186 = tpu.concatenate %184, %185 in 1 : vector<16x239xf32>, vector<16x17xf32> -> vector<16x256xf32>
    %c8_112 = arith.constant 8 : index
    %c0_113 = arith.constant 0 : index
    %187 = vector.load %arg2[%c8_112, %c0_113] : memref<9x256xf32, #tpu.memory_space<vmem>>, vector<1x256xf32>
    %188 = vector.broadcast %187 : vector<1x256xf32> to vector<16x256xf32>
    %189 = arith.mulf %186, %188 : vector<16x256xf32>
    %c128_114 = arith.constant 128 : index
    %c0_115 = arith.constant 0 : index
    %190 = vector.load %arg13[%c128_114, %c0_115] : memref<144x256xf32, #tpu.memory_space<vmem>>, vector<16x256xf32>
    tpu.vector_store %arg13[%c128_114, %c0_115], %189 {strides = array<i32>} : memref<144x256xf32, #tpu.memory_space<vmem>>, vector<16x256xf32>,
    %c0_116 = arith.constant 0 : index
    %c0_117 = arith.constant 0 : index
    %191 = vector.load %arg13[%c0_116, %c0_117] : memref<144x256xf32, #tpu.memory_space<vmem>>, vector<144x256xf32>
    %cst_118 = arith.constant dense<0.000000e+00> : vector<16x256xf32>
    %192 = tpu.matmul %6, %191, %cst_118 {dimension_numbers = #tpu.dot_dimension_numbers<[1], [0], [0], [1], [0, 0, 1, 1], [], []>} : vector<16x144xf32>, vector<144x256xf32>, vector<16x256xf32> -> vector<16x256xf32>
    %193 = vector.broadcast %7 : vector<16x1xf32> to vector<16x256xf32>
    %194 = arith.addf %192, %193 : vector<16x256xf32>
    %c0_119 = arith.constant 0 : index
    %195 = memref.load %arg11[%c0_119] : memref<7xf32, #tpu.memory_space<smem>>
    %196 = vector.broadcast %195 : f32 to vector<16x256xf32>
    %197 = arith.mulf %194, %196 : vector<16x256xf32>
    %198 = arith.addf %64, %197 : vector<16x256xf32>
    %199 = vector.extract_strided_slice %198 {offsets = [0, 239], sizes = [16, 17], strides = [1, 1]} : vector<16x256xf32> to vector<16x17xf32>
    %200 = vector.extract_strided_slice %198 {offsets = [0, 0], sizes = [16, 239], strides = [1, 1]} : vector<16x256xf32> to vector<16x239xf32>
    %201 = tpu.concatenate %199, %200 in 1 : vector<16x17xf32>, vector<16x239xf32> -> vector<16x256xf32>
    %c0_120 = arith.constant 0 : index
    %c0_121 = arith.constant 0 : index
    %202 = vector.load %arg2[%c0_120, %c0_121] : memref<9x256xf32, #tpu.memory_space<vmem>>, vector<1x256xf32>
    %203 = vector.broadcast %202 : vector<1x256xf32> to vector<16x256xf32>
    %204 = arith.mulf %201, %203 : vector<16x256xf32>
    %c0_122 = arith.constant 0 : index
    %c0_123 = arith.constant 0 : index
    %205 = vector.load %arg13[%c0_122, %c0_123] : memref<144x256xf32, #tpu.memory_space<vmem>>, vector<16x256xf32>
    tpu.vector_store %arg13[%c0_122, %c0_123], %204 {strides = array<i32>} : memref<144x256xf32, #tpu.memory_space<vmem>>, vector<16x256xf32>,
    %206 = vector.extract_strided_slice %198 {offsets = [0, 240], sizes = [16, 16], strides = [1, 1]} : vector<16x256xf32> to vector<16x16xf32>
    %207 = vector.extract_strided_slice %198 {offsets = [0, 0], sizes = [16, 240], strides = [1, 1]} : vector<16x256xf32> to vector<16x240xf32>
    %208 = tpu.concatenate %206, %207 in 1 : vector<16x16xf32>, vector<16x240xf32> -> vector<16x256xf32>
    %c1_124 = arith.constant 1 : index
    %c0_125 = arith.constant 0 : index
    %209 = vector.load %arg2[%c1_124, %c0_125] : memref<9x256xf32, #tpu.memory_space<vmem>>, vector<1x256xf32>
    %210 = vector.broadcast %209 : vector<1x256xf32> to vector<16x256xf32>
    %211 = arith.mulf %208, %210 : vector<16x256xf32>
    %c16_126 = arith.constant 16 : index
    %c0_127 = arith.constant 0 : index
    %212 = vector.load %arg13[%c16_126, %c0_127] : memref<144x256xf32, #tpu.memory_space<vmem>>, vector<16x256xf32>
    tpu.vector_store %arg13[%c16_126, %c0_127], %211 {strides = array<i32>} : memref<144x256xf32, #tpu.memory_space<vmem>>, vector<16x256xf32>,
    %213 = vector.extract_strided_slice %198 {offsets = [0, 241], sizes = [16, 15], strides = [1, 1]} : vector<16x256xf32> to vector<16x15xf32>
    %214 = vector.extract_strided_slice %198 {offsets = [0, 0], sizes = [16, 241], strides = [1, 1]} : vector<16x256xf32> to vector<16x241xf32>
    %215 = tpu.concatenate %213, %214 in 1 : vector<16x15xf32>, vector<16x241xf32> -> vector<16x256xf32>
    %c2_128 = arith.constant 2 : index
    %c0_129 = arith.constant 0 : index
    %216 = vector.load %arg2[%c2_128, %c0_129] : memref<9x256xf32, #tpu.memory_space<vmem>>, vector<1x256xf32>
    %217 = vector.broadcast %216 : vector<1x256xf32> to vector<16x256xf32>
    %218 = arith.mulf %215, %217 : vector<16x256xf32>
    %c32_130 = arith.constant 32 : index
    %c0_131 = arith.constant 0 : index
    %219 = vector.load %arg13[%c32_130, %c0_131] : memref<144x256xf32, #tpu.memory_space<vmem>>, vector<16x256xf32>
    tpu.vector_store %arg13[%c32_130, %c0_131], %218 {strides = array<i32>} : memref<144x256xf32, #tpu.memory_space<vmem>>, vector<16x256xf32>,
    %220 = vector.extract_strided_slice %198 {offsets = [0, 255], sizes = [16, 1], strides = [1, 1]} : vector<16x256xf32> to vector<16x1xf32>
    %221 = vector.extract_strided_slice %198 {offsets = [0, 0], sizes = [16, 255], strides = [1, 1]} : vector<16x256xf32> to vector<16x255xf32>
    %222 = tpu.concatenate %220, %221 in 1 : vector<16x1xf32>, vector<16x255xf32> -> vector<16x256xf32>
    %c3_132 = arith.constant 3 : index
    %c0_133 = arith.constant 0 : index
    %223 = vector.load %arg2[%c3_132, %c0_133] : memref<9x256xf32, #tpu.memory_space<vmem>>, vector<1x256xf32>
    %224 = vector.broadcast %223 : vector<1x256xf32> to vector<16x256xf32>
    %225 = arith.mulf %222, %224 : vector<16x256xf32>
    %c48_134 = arith.constant 48 : index
    %c0_135 = arith.constant 0 : index
    %226 = vector.load %arg13[%c48_134, %c0_135] : memref<144x256xf32, #tpu.memory_space<vmem>>, vector<16x256xf32>
    tpu.vector_store %arg13[%c48_134, %c0_135], %225 {strides = array<i32>} : memref<144x256xf32, #tpu.memory_space<vmem>>, vector<16x256xf32>,
    %c4_136 = arith.constant 4 : index
    %c0_137 = arith.constant 0 : index
    %227 = vector.load %arg2[%c4_136, %c0_137] : memref<9x256xf32, #tpu.memory_space<vmem>>, vector<1x256xf32>
    %228 = vector.broadcast %227 : vector<1x256xf32> to vector<16x256xf32>
    %229 = arith.mulf %198, %228 : vector<16x256xf32>
    %c64_138 = arith.constant 64 : index
    %c0_139 = arith.constant 0 : index
    %230 = vector.load %arg13[%c64_138, %c0_139] : memref<144x256xf32, #tpu.memory_space<vmem>>, vector<16x256xf32>
    tpu.vector_store %arg13[%c64_138, %c0_139], %229 {strides = array<i32>} : memref<144x256xf32, #tpu.memory_space<vmem>>, vector<16x256xf32>,
    %231 = vector.extract_strided_slice %198 {offsets = [0, 1], sizes = [16, 255], strides = [1, 1]} : vector<16x256xf32> to vector<16x255xf32>
    %232 = vector.extract_strided_slice %198 {offsets = [0, 0], sizes = [16, 1], strides = [1, 1]} : vector<16x256xf32> to vector<16x1xf32>
    %233 = tpu.concatenate %231, %232 in 1 : vector<16x255xf32>, vector<16x1xf32> -> vector<16x256xf32>
    %c5_140 = arith.constant 5 : index
    %c0_141 = arith.constant 0 : index
    %234 = vector.load %arg2[%c5_140, %c0_141] : memref<9x256xf32, #tpu.memory_space<vmem>>, vector<1x256xf32>
    %235 = vector.broadcast %234 : vector<1x256xf32> to vector<16x256xf32>
    %236 = arith.mulf %233, %235 : vector<16x256xf32>
    %c80_142 = arith.constant 80 : index
    %c0_143 = arith.constant 0 : index
    %237 = vector.load %arg13[%c80_142, %c0_143] : memref<144x256xf32, #tpu.memory_space<vmem>>, vector<16x256xf32>
    tpu.vector_store %arg13[%c80_142, %c0_143], %236 {strides = array<i32>} : memref<144x256xf32, #tpu.memory_space<vmem>>, vector<16x256xf32>,
    %238 = vector.extract_strided_slice %198 {offsets = [0, 15], sizes = [16, 241], strides = [1, 1]} : vector<16x256xf32> to vector<16x241xf32>
    %239 = vector.extract_strided_slice %198 {offsets = [0, 0], sizes = [16, 15], strides = [1, 1]} : vector<16x256xf32> to vector<16x15xf32>
    %240 = tpu.concatenate %238, %239 in 1 : vector<16x241xf32>, vector<16x15xf32> -> vector<16x256xf32>
    %c6_144 = arith.constant 6 : index
    %c0_145 = arith.constant 0 : index
    %241 = vector.load %arg2[%c6_144, %c0_145] : memref<9x256xf32, #tpu.memory_space<vmem>>, vector<1x256xf32>
    %242 = vector.broadcast %241 : vector<1x256xf32> to vector<16x256xf32>
    %243 = arith.mulf %240, %242 : vector<16x256xf32>
    %c96_146 = arith.constant 96 : index
    %c0_147 = arith.constant 0 : index
    %244 = vector.load %arg13[%c96_146, %c0_147] : memref<144x256xf32, #tpu.memory_space<vmem>>, vector<16x256xf32>
    tpu.vector_store %arg13[%c96_146, %c0_147], %243 {strides = array<i32>} : memref<144x256xf32, #tpu.memory_space<vmem>>, vector<16x256xf32>,
    %245 = vector.extract_strided_slice %198 {offsets = [0, 16], sizes = [16, 240], strides = [1, 1]} : vector<16x256xf32> to vector<16x240xf32>
    %246 = vector.extract_strided_slice %198 {offsets = [0, 0], sizes = [16, 16], strides = [1, 1]} : vector<16x256xf32> to vector<16x16xf32>
    %247 = tpu.concatenate %245, %246 in 1 : vector<16x240xf32>, vector<16x16xf32> -> vector<16x256xf32>
    %c7_148 = arith.constant 7 : index
    %c0_149 = arith.constant 0 : index
    %248 = vector.load %arg2[%c7_148, %c0_149] : memref<9x256xf32, #tpu.memory_space<vmem>>, vector<1x256xf32>
    %249 = vector.broadcast %248 : vector<1x256xf32> to vector<16x256xf32>
    %250 = arith.mulf %247, %249 : vector<16x256xf32>
    %c112_150 = arith.constant 112 : index
    %c0_151 = arith.constant 0 : index
    %251 = vector.load %arg13[%c112_150, %c0_151] : memref<144x256xf32, #tpu.memory_space<vmem>>, vector<16x256xf32>
    tpu.vector_store %arg13[%c112_150, %c0_151], %250 {strides = array<i32>} : memref<144x256xf32, #tpu.memory_space<vmem>>, vector<16x256xf32>,
    %252 = vector.extract_strided_slice %198 {offsets = [0, 17], sizes = [16, 239], strides = [1, 1]} : vector<16x256xf32> to vector<16x239xf32>
    %253 = vector.extract_strided_slice %198 {offsets = [0, 0], sizes = [16, 17], strides = [1, 1]} : vector<16x256xf32> to vector<16x17xf32>
    %254 = tpu.concatenate %252, %253 in 1 : vector<16x239xf32>, vector<16x17xf32> -> vector<16x256xf32>
    %c8_152 = arith.constant 8 : index
    %c0_153 = arith.constant 0 : index
    %255 = vector.load %arg2[%c8_152, %c0_153] : memref<9x256xf32, #tpu.memory_space<vmem>>, vector<1x256xf32>
    %256 = vector.broadcast %255 : vector<1x256xf32> to vector<16x256xf32>
    %257 = arith.mulf %254, %256 : vector<16x256xf32>
    %c128_154 = arith.constant 128 : index
    %c0_155 = arith.constant 0 : index
    %258 = vector.load %arg13[%c128_154, %c0_155] : memref<144x256xf32, #tpu.memory_space<vmem>>, vector<16x256xf32>
    tpu.vector_store %arg13[%c128_154, %c0_155], %257 {strides = array<i32>} : memref<144x256xf32, #tpu.memory_space<vmem>>, vector<16x256xf32>,
    %c0_156 = arith.constant 0 : index
    %c0_157 = arith.constant 0 : index
    %259 = vector.load %arg13[%c0_156, %c0_157] : memref<144x256xf32, #tpu.memory_space<vmem>>, vector<144x256xf32>
    %cst_158 = arith.constant dense<0.000000e+00> : vector<16x256xf32>
    %260 = tpu.matmul %4, %259, %cst_158 {dimension_numbers = #tpu.dot_dimension_numbers<[1], [0], [0], [1], [0, 0, 1, 1], [], []>} : vector<16x144xf32>, vector<144x256xf32>, vector<16x256xf32> -> vector<16x256xf32>
    %261 = vector.broadcast %5 : vector<16x1xf32> to vector<16x256xf32>
    %262 = arith.addf %260, %261 : vector<16x256xf32>
    %cst_159 = arith.constant 0.000000e+00 : f32
    %263 = vector.broadcast %cst_159 : f32 to vector<16x256xf32>
    %264 = arith.maximumf %262, %263 : vector<16x256xf32>
    %265 = vector.extract_strided_slice %264 {offsets = [0, 239], sizes = [16, 17], strides = [1, 1]} : vector<16x256xf32> to vector<16x17xf32>
    %266 = vector.extract_strided_slice %264 {offsets = [0, 0], sizes = [16, 239], strides = [1, 1]} : vector<16x256xf32> to vector<16x239xf32>
    %267 = tpu.concatenate %265, %266 in 1 : vector<16x17xf32>, vector<16x239xf32> -> vector<16x256xf32>
    %c0_160 = arith.constant 0 : index
    %c0_161 = arith.constant 0 : index
    %268 = vector.load %arg2[%c0_160, %c0_161] : memref<9x256xf32, #tpu.memory_space<vmem>>, vector<1x256xf32>
    %269 = vector.broadcast %268 : vector<1x256xf32> to vector<16x256xf32>
    %270 = arith.mulf %267, %269 : vector<16x256xf32>
    %c0_162 = arith.constant 0 : index
    %c0_163 = arith.constant 0 : index
    %271 = vector.load %arg13[%c0_162, %c0_163] : memref<144x256xf32, #tpu.memory_space<vmem>>, vector<16x256xf32>
    tpu.vector_store %arg13[%c0_162, %c0_163], %270 {strides = array<i32>} : memref<144x256xf32, #tpu.memory_space<vmem>>, vector<16x256xf32>,
    %272 = vector.extract_strided_slice %264 {offsets = [0, 240], sizes = [16, 16], strides = [1, 1]} : vector<16x256xf32> to vector<16x16xf32>
    %273 = vector.extract_strided_slice %264 {offsets = [0, 0], sizes = [16, 240], strides = [1, 1]} : vector<16x256xf32> to vector<16x240xf32>
    %274 = tpu.concatenate %272, %273 in 1 : vector<16x16xf32>, vector<16x240xf32> -> vector<16x256xf32>
    %c1_164 = arith.constant 1 : index
    %c0_165 = arith.constant 0 : index
    %275 = vector.load %arg2[%c1_164, %c0_165] : memref<9x256xf32, #tpu.memory_space<vmem>>, vector<1x256xf32>
    %276 = vector.broadcast %275 : vector<1x256xf32> to vector<16x256xf32>
    %277 = arith.mulf %274, %276 : vector<16x256xf32>
    %c16_166 = arith.constant 16 : index
    %c0_167 = arith.constant 0 : index
    %278 = vector.load %arg13[%c16_166, %c0_167] : memref<144x256xf32, #tpu.memory_space<vmem>>, vector<16x256xf32>
    tpu.vector_store %arg13[%c16_166, %c0_167], %277 {strides = array<i32>} : memref<144x256xf32, #tpu.memory_space<vmem>>, vector<16x256xf32>,
    %279 = vector.extract_strided_slice %264 {offsets = [0, 241], sizes = [16, 15], strides = [1, 1]} : vector<16x256xf32> to vector<16x15xf32>
    %280 = vector.extract_strided_slice %264 {offsets = [0, 0], sizes = [16, 241], strides = [1, 1]} : vector<16x256xf32> to vector<16x241xf32>
    %281 = tpu.concatenate %279, %280 in 1 : vector<16x15xf32>, vector<16x241xf32> -> vector<16x256xf32>
    %c2_168 = arith.constant 2 : index
    %c0_169 = arith.constant 0 : index
    %282 = vector.load %arg2[%c2_168, %c0_169] : memref<9x256xf32, #tpu.memory_space<vmem>>, vector<1x256xf32>
    %283 = vector.broadcast %282 : vector<1x256xf32> to vector<16x256xf32>
    %284 = arith.mulf %281, %283 : vector<16x256xf32>
    %c32_170 = arith.constant 32 : index
    %c0_171 = arith.constant 0 : index
    %285 = vector.load %arg13[%c32_170, %c0_171] : memref<144x256xf32, #tpu.memory_space<vmem>>, vector<16x256xf32>
    tpu.vector_store %arg13[%c32_170, %c0_171], %284 {strides = array<i32>} : memref<144x256xf32, #tpu.memory_space<vmem>>, vector<16x256xf32>,
    %286 = vector.extract_strided_slice %264 {offsets = [0, 255], sizes = [16, 1], strides = [1, 1]} : vector<16x256xf32> to vector<16x1xf32>
    %287 = vector.extract_strided_slice %264 {offsets = [0, 0], sizes = [16, 255], strides = [1, 1]} : vector<16x256xf32> to vector<16x255xf32>
    %288 = tpu.concatenate %286, %287 in 1 : vector<16x1xf32>, vector<16x255xf32> -> vector<16x256xf32>
    %c3_172 = arith.constant 3 : index
    %c0_173 = arith.constant 0 : index
    %289 = vector.load %arg2[%c3_172, %c0_173] : memref<9x256xf32, #tpu.memory_space<vmem>>, vector<1x256xf32>
    %290 = vector.broadcast %289 : vector<1x256xf32> to vector<16x256xf32>
    %291 = arith.mulf %288, %290 : vector<16x256xf32>
    %c48_174 = arith.constant 48 : index
    %c0_175 = arith.constant 0 : index
    %292 = vector.load %arg13[%c48_174, %c0_175] : memref<144x256xf32, #tpu.memory_space<vmem>>, vector<16x256xf32>
    tpu.vector_store %arg13[%c48_174, %c0_175], %291 {strides = array<i32>} : memref<144x256xf32, #tpu.memory_space<vmem>>, vector<16x256xf32>,
    %c4_176 = arith.constant 4 : index
    %c0_177 = arith.constant 0 : index
    %293 = vector.load %arg2[%c4_176, %c0_177] : memref<9x256xf32, #tpu.memory_space<vmem>>, vector<1x256xf32>
    %294 = vector.broadcast %293 : vector<1x256xf32> to vector<16x256xf32>
    %295 = arith.mulf %264, %294 : vector<16x256xf32>
    %c64_178 = arith.constant 64 : index
    %c0_179 = arith.constant 0 : index
    %296 = vector.load %arg13[%c64_178, %c0_179] : memref<144x256xf32, #tpu.memory_space<vmem>>, vector<16x256xf32>
    tpu.vector_store %arg13[%c64_178, %c0_179], %295 {strides = array<i32>} : memref<144x256xf32, #tpu.memory_space<vmem>>, vector<16x256xf32>,
    %297 = vector.extract_strided_slice %264 {offsets = [0, 1], sizes = [16, 255], strides = [1, 1]} : vector<16x256xf32> to vector<16x255xf32>
    %298 = vector.extract_strided_slice %264 {offsets = [0, 0], sizes = [16, 1], strides = [1, 1]} : vector<16x256xf32> to vector<16x1xf32>
    %299 = tpu.concatenate %297, %298 in 1 : vector<16x255xf32>, vector<16x1xf32> -> vector<16x256xf32>
    %c5_180 = arith.constant 5 : index
    %c0_181 = arith.constant 0 : index
    %300 = vector.load %arg2[%c5_180, %c0_181] : memref<9x256xf32, #tpu.memory_space<vmem>>, vector<1x256xf32>
    %301 = vector.broadcast %300 : vector<1x256xf32> to vector<16x256xf32>
    %302 = arith.mulf %299, %301 : vector<16x256xf32>
    %c80_182 = arith.constant 80 : index
    %c0_183 = arith.constant 0 : index
    %303 = vector.load %arg13[%c80_182, %c0_183] : memref<144x256xf32, #tpu.memory_space<vmem>>, vector<16x256xf32>
    tpu.vector_store %arg13[%c80_182, %c0_183], %302 {strides = array<i32>} : memref<144x256xf32, #tpu.memory_space<vmem>>, vector<16x256xf32>,
    %304 = vector.extract_strided_slice %264 {offsets = [0, 15], sizes = [16, 241], strides = [1, 1]} : vector<16x256xf32> to vector<16x241xf32>
    %305 = vector.extract_strided_slice %264 {offsets = [0, 0], sizes = [16, 15], strides = [1, 1]} : vector<16x256xf32> to vector<16x15xf32>
    %306 = tpu.concatenate %304, %305 in 1 : vector<16x241xf32>, vector<16x15xf32> -> vector<16x256xf32>
    %c6_184 = arith.constant 6 : index
    %c0_185 = arith.constant 0 : index
    %307 = vector.load %arg2[%c6_184, %c0_185] : memref<9x256xf32, #tpu.memory_space<vmem>>, vector<1x256xf32>
    %308 = vector.broadcast %307 : vector<1x256xf32> to vector<16x256xf32>
    %309 = arith.mulf %306, %308 : vector<16x256xf32>
    %c96_186 = arith.constant 96 : index
    %c0_187 = arith.constant 0 : index
    %310 = vector.load %arg13[%c96_186, %c0_187] : memref<144x256xf32, #tpu.memory_space<vmem>>, vector<16x256xf32>
    tpu.vector_store %arg13[%c96_186, %c0_187], %309 {strides = array<i32>} : memref<144x256xf32, #tpu.memory_space<vmem>>, vector<16x256xf32>,
    %311 = vector.extract_strided_slice %264 {offsets = [0, 16], sizes = [16, 240], strides = [1, 1]} : vector<16x256xf32> to vector<16x240xf32>
    %312 = vector.extract_strided_slice %264 {offsets = [0, 0], sizes = [16, 16], strides = [1, 1]} : vector<16x256xf32> to vector<16x16xf32>
    %313 = tpu.concatenate %311, %312 in 1 : vector<16x240xf32>, vector<16x16xf32> -> vector<16x256xf32>
    %c7_188 = arith.constant 7 : index
    %c0_189 = arith.constant 0 : index
    %314 = vector.load %arg2[%c7_188, %c0_189] : memref<9x256xf32, #tpu.memory_space<vmem>>, vector<1x256xf32>
    %315 = vector.broadcast %314 : vector<1x256xf32> to vector<16x256xf32>
    %316 = arith.mulf %313, %315 : vector<16x256xf32>
    %c112_190 = arith.constant 112 : index
    %c0_191 = arith.constant 0 : index
    %317 = vector.load %arg13[%c112_190, %c0_191] : memref<144x256xf32, #tpu.memory_space<vmem>>, vector<16x256xf32>
    tpu.vector_store %arg13[%c112_190, %c0_191], %316 {strides = array<i32>} : memref<144x256xf32, #tpu.memory_space<vmem>>, vector<16x256xf32>,
    %318 = vector.extract_strided_slice %264 {offsets = [0, 17], sizes = [16, 239], strides = [1, 1]} : vector<16x256xf32> to vector<16x239xf32>
    %319 = vector.extract_strided_slice %264 {offsets = [0, 0], sizes = [16, 17], strides = [1, 1]} : vector<16x256xf32> to vector<16x17xf32>
    %320 = tpu.concatenate %318, %319 in 1 : vector<16x239xf32>, vector<16x17xf32> -> vector<16x256xf32>
    %c8_192 = arith.constant 8 : index
    %c0_193 = arith.constant 0 : index
    %321 = vector.load %arg2[%c8_192, %c0_193] : memref<9x256xf32, #tpu.memory_space<vmem>>, vector<1x256xf32>
    %322 = vector.broadcast %321 : vector<1x256xf32> to vector<16x256xf32>
    %323 = arith.mulf %320, %322 : vector<16x256xf32>
    %c128_194 = arith.constant 128 : index
    %c0_195 = arith.constant 0 : index
    %324 = vector.load %arg13[%c128_194, %c0_195] : memref<144x256xf32, #tpu.memory_space<vmem>>, vector<16x256xf32>
    tpu.vector_store %arg13[%c128_194, %c0_195], %323 {strides = array<i32>} : memref<144x256xf32, #tpu.memory_space<vmem>>, vector<16x256xf32>,
    %c0_196 = arith.constant 0 : index
    %c0_197 = arith.constant 0 : index
    %325 = vector.load %arg13[%c0_196, %c0_197] : memref<144x256xf32, #tpu.memory_space<vmem>>, vector<144x256xf32>
    %cst_198 = arith.constant dense<0.000000e+00> : vector<16x256xf32>
    %326 = tpu.matmul %6, %325, %cst_198 {dimension_numbers = #tpu.dot_dimension_numbers<[1], [0], [0], [1], [0, 0, 1, 1], [], []>} : vector<16x144xf32>, vector<144x256xf32>, vector<16x256xf32> -> vector<16x256xf32>
    %327 = vector.broadcast %7 : vector<16x1xf32> to vector<16x256xf32>
    %328 = arith.addf %326, %327 : vector<16x256xf32>
    %c1_199 = arith.constant 1 : index
    %329 = memref.load %arg11[%c1_199] : memref<7xf32, #tpu.memory_space<smem>>
    %330 = vector.broadcast %329 : f32 to vector<16x256xf32>
    %331 = arith.mulf %328, %330 : vector<16x256xf32>
    %332 = arith.addf %198, %331 : vector<16x256xf32>
    %333 = vector.extract_strided_slice %332 {offsets = [0, 239], sizes = [16, 17], strides = [1, 1]} : vector<16x256xf32> to vector<16x17xf32>
    %334 = vector.extract_strided_slice %332 {offsets = [0, 0], sizes = [16, 239], strides = [1, 1]} : vector<16x256xf32> to vector<16x239xf32>
    %335 = tpu.concatenate %333, %334 in 1 : vector<16x17xf32>, vector<16x239xf32> -> vector<16x256xf32>
    %c0_200 = arith.constant 0 : index
    %c0_201 = arith.constant 0 : index
    %336 = vector.load %arg2[%c0_200, %c0_201] : memref<9x256xf32, #tpu.memory_space<vmem>>, vector<1x256xf32>
    %337 = vector.broadcast %336 : vector<1x256xf32> to vector<16x256xf32>
    %338 = arith.mulf %335, %337 : vector<16x256xf32>
    %c0_202 = arith.constant 0 : index
    %c0_203 = arith.constant 0 : index
    %339 = vector.load %arg13[%c0_202, %c0_203] : memref<144x256xf32, #tpu.memory_space<vmem>>, vector<16x256xf32>
    tpu.vector_store %arg13[%c0_202, %c0_203], %338 {strides = array<i32>} : memref<144x256xf32, #tpu.memory_space<vmem>>, vector<16x256xf32>,
    %340 = vector.extract_strided_slice %332 {offsets = [0, 240], sizes = [16, 16], strides = [1, 1]} : vector<16x256xf32> to vector<16x16xf32>
    %341 = vector.extract_strided_slice %332 {offsets = [0, 0], sizes = [16, 240], strides = [1, 1]} : vector<16x256xf32> to vector<16x240xf32>
    %342 = tpu.concatenate %340, %341 in 1 : vector<16x16xf32>, vector<16x240xf32> -> vector<16x256xf32>
    %c1_204 = arith.constant 1 : index
    %c0_205 = arith.constant 0 : index
    %343 = vector.load %arg2[%c1_204, %c0_205] : memref<9x256xf32, #tpu.memory_space<vmem>>, vector<1x256xf32>
    %344 = vector.broadcast %343 : vector<1x256xf32> to vector<16x256xf32>
    %345 = arith.mulf %342, %344 : vector<16x256xf32>
    %c16_206 = arith.constant 16 : index
    %c0_207 = arith.constant 0 : index
    %346 = vector.load %arg13[%c16_206, %c0_207] : memref<144x256xf32, #tpu.memory_space<vmem>>, vector<16x256xf32>
    tpu.vector_store %arg13[%c16_206, %c0_207], %345 {strides = array<i32>} : memref<144x256xf32, #tpu.memory_space<vmem>>, vector<16x256xf32>,
    %347 = vector.extract_strided_slice %332 {offsets = [0, 241], sizes = [16, 15], strides = [1, 1]} : vector<16x256xf32> to vector<16x15xf32>
    %348 = vector.extract_strided_slice %332 {offsets = [0, 0], sizes = [16, 241], strides = [1, 1]} : vector<16x256xf32> to vector<16x241xf32>
    %349 = tpu.concatenate %347, %348 in 1 : vector<16x15xf32>, vector<16x241xf32> -> vector<16x256xf32>
    %c2_208 = arith.constant 2 : index
    %c0_209 = arith.constant 0 : index
    %350 = vector.load %arg2[%c2_208, %c0_209] : memref<9x256xf32, #tpu.memory_space<vmem>>, vector<1x256xf32>
    %351 = vector.broadcast %350 : vector<1x256xf32> to vector<16x256xf32>
    %352 = arith.mulf %349, %351 : vector<16x256xf32>
    %c32_210 = arith.constant 32 : index
    %c0_211 = arith.constant 0 : index
    %353 = vector.load %arg13[%c32_210, %c0_211] : memref<144x256xf32, #tpu.memory_space<vmem>>, vector<16x256xf32>
    tpu.vector_store %arg13[%c32_210, %c0_211], %352 {strides = array<i32>} : memref<144x256xf32, #tpu.memory_space<vmem>>, vector<16x256xf32>,
    %354 = vector.extract_strided_slice %332 {offsets = [0, 255], sizes = [16, 1], strides = [1, 1]} : vector<16x256xf32> to vector<16x1xf32>
    %355 = vector.extract_strided_slice %332 {offsets = [0, 0], sizes = [16, 255], strides = [1, 1]} : vector<16x256xf32> to vector<16x255xf32>
    %356 = tpu.concatenate %354, %355 in 1 : vector<16x1xf32>, vector<16x255xf32> -> vector<16x256xf32>
    %c3_212 = arith.constant 3 : index
    %c0_213 = arith.constant 0 : index
    %357 = vector.load %arg2[%c3_212, %c0_213] : memref<9x256xf32, #tpu.memory_space<vmem>>, vector<1x256xf32>
    %358 = vector.broadcast %357 : vector<1x256xf32> to vector<16x256xf32>
    %359 = arith.mulf %356, %358 : vector<16x256xf32>
    %c48_214 = arith.constant 48 : index
    %c0_215 = arith.constant 0 : index
    %360 = vector.load %arg13[%c48_214, %c0_215] : memref<144x256xf32, #tpu.memory_space<vmem>>, vector<16x256xf32>
    tpu.vector_store %arg13[%c48_214, %c0_215], %359 {strides = array<i32>} : memref<144x256xf32, #tpu.memory_space<vmem>>, vector<16x256xf32>,
    %c4_216 = arith.constant 4 : index
    %c0_217 = arith.constant 0 : index
    %361 = vector.load %arg2[%c4_216, %c0_217] : memref<9x256xf32, #tpu.memory_space<vmem>>, vector<1x256xf32>
    %362 = vector.broadcast %361 : vector<1x256xf32> to vector<16x256xf32>
    %363 = arith.mulf %332, %362 : vector<16x256xf32>
    %c64_218 = arith.constant 64 : index
    %c0_219 = arith.constant 0 : index
    %364 = vector.load %arg13[%c64_218, %c0_219] : memref<144x256xf32, #tpu.memory_space<vmem>>, vector<16x256xf32>
    tpu.vector_store %arg13[%c64_218, %c0_219], %363 {strides = array<i32>} : memref<144x256xf32, #tpu.memory_space<vmem>>, vector<16x256xf32>,
    %365 = vector.extract_strided_slice %332 {offsets = [0, 1], sizes = [16, 255], strides = [1, 1]} : vector<16x256xf32> to vector<16x255xf32>
    %366 = vector.extract_strided_slice %332 {offsets = [0, 0], sizes = [16, 1], strides = [1, 1]} : vector<16x256xf32> to vector<16x1xf32>
    %367 = tpu.concatenate %365, %366 in 1 : vector<16x255xf32>, vector<16x1xf32> -> vector<16x256xf32>
    %c5_220 = arith.constant 5 : index
    %c0_221 = arith.constant 0 : index
    %368 = vector.load %arg2[%c5_220, %c0_221] : memref<9x256xf32, #tpu.memory_space<vmem>>, vector<1x256xf32>
    %369 = vector.broadcast %368 : vector<1x256xf32> to vector<16x256xf32>
    %370 = arith.mulf %367, %369 : vector<16x256xf32>
    %c80_222 = arith.constant 80 : index
    %c0_223 = arith.constant 0 : index
    %371 = vector.load %arg13[%c80_222, %c0_223] : memref<144x256xf32, #tpu.memory_space<vmem>>, vector<16x256xf32>
    tpu.vector_store %arg13[%c80_222, %c0_223], %370 {strides = array<i32>} : memref<144x256xf32, #tpu.memory_space<vmem>>, vector<16x256xf32>,
    %372 = vector.extract_strided_slice %332 {offsets = [0, 15], sizes = [16, 241], strides = [1, 1]} : vector<16x256xf32> to vector<16x241xf32>
    %373 = vector.extract_strided_slice %332 {offsets = [0, 0], sizes = [16, 15], strides = [1, 1]} : vector<16x256xf32> to vector<16x15xf32>
    %374 = tpu.concatenate %372, %373 in 1 : vector<16x241xf32>, vector<16x15xf32> -> vector<16x256xf32>
    %c6_224 = arith.constant 6 : index
    %c0_225 = arith.constant 0 : index
    %375 = vector.load %arg2[%c6_224, %c0_225] : memref<9x256xf32, #tpu.memory_space<vmem>>, vector<1x256xf32>
    %376 = vector.broadcast %375 : vector<1x256xf32> to vector<16x256xf32>
    %377 = arith.mulf %374, %376 : vector<16x256xf32>
    %c96_226 = arith.constant 96 : index
    %c0_227 = arith.constant 0 : index
    %378 = vector.load %arg13[%c96_226, %c0_227] : memref<144x256xf32, #tpu.memory_space<vmem>>, vector<16x256xf32>
    tpu.vector_store %arg13[%c96_226, %c0_227], %377 {strides = array<i32>} : memref<144x256xf32, #tpu.memory_space<vmem>>, vector<16x256xf32>,
    %379 = vector.extract_strided_slice %332 {offsets = [0, 16], sizes = [16, 240], strides = [1, 1]} : vector<16x256xf32> to vector<16x240xf32>
    %380 = vector.extract_strided_slice %332 {offsets = [0, 0], sizes = [16, 16], strides = [1, 1]} : vector<16x256xf32> to vector<16x16xf32>
    %381 = tpu.concatenate %379, %380 in 1 : vector<16x240xf32>, vector<16x16xf32> -> vector<16x256xf32>
    %c7_228 = arith.constant 7 : index
    %c0_229 = arith.constant 0 : index
    %382 = vector.load %arg2[%c7_228, %c0_229] : memref<9x256xf32, #tpu.memory_space<vmem>>, vector<1x256xf32>
    %383 = vector.broadcast %382 : vector<1x256xf32> to vector<16x256xf32>
    %384 = arith.mulf %381, %383 : vector<16x256xf32>
    %c112_230 = arith.constant 112 : index
    %c0_231 = arith.constant 0 : index
    %385 = vector.load %arg13[%c112_230, %c0_231] : memref<144x256xf32, #tpu.memory_space<vmem>>, vector<16x256xf32>
    tpu.vector_store %arg13[%c112_230, %c0_231], %384 {strides = array<i32>} : memref<144x256xf32, #tpu.memory_space<vmem>>, vector<16x256xf32>,
    %386 = vector.extract_strided_slice %332 {offsets = [0, 17], sizes = [16, 239], strides = [1, 1]} : vector<16x256xf32> to vector<16x239xf32>
    %387 = vector.extract_strided_slice %332 {offsets = [0, 0], sizes = [16, 17], strides = [1, 1]} : vector<16x256xf32> to vector<16x17xf32>
    %388 = tpu.concatenate %386, %387 in 1 : vector<16x239xf32>, vector<16x17xf32> -> vector<16x256xf32>
    %c8_232 = arith.constant 8 : index
    %c0_233 = arith.constant 0 : index
    %389 = vector.load %arg2[%c8_232, %c0_233] : memref<9x256xf32, #tpu.memory_space<vmem>>, vector<1x256xf32>
    %390 = vector.broadcast %389 : vector<1x256xf32> to vector<16x256xf32>
    %391 = arith.mulf %388, %390 : vector<16x256xf32>
    %c128_234 = arith.constant 128 : index
    %c0_235 = arith.constant 0 : index
    %392 = vector.load %arg13[%c128_234, %c0_235] : memref<144x256xf32, #tpu.memory_space<vmem>>, vector<16x256xf32>
    tpu.vector_store %arg13[%c128_234, %c0_235], %391 {strides = array<i32>} : memref<144x256xf32, #tpu.memory_space<vmem>>, vector<16x256xf32>,
    %c0_236 = arith.constant 0 : index
    %c0_237 = arith.constant 0 : index
    %393 = vector.load %arg13[%c0_236, %c0_237] : memref<144x256xf32, #tpu.memory_space<vmem>>, vector<144x256xf32>
    %cst_238 = arith.constant dense<0.000000e+00> : vector<16x256xf32>
    %394 = tpu.matmul %4, %393, %cst_238 {dimension_numbers = #tpu.dot_dimension_numbers<[1], [0], [0], [1], [0, 0, 1, 1], [], []>} : vector<16x144xf32>, vector<144x256xf32>, vector<16x256xf32> -> vector<16x256xf32>
    %395 = vector.broadcast %5 : vector<16x1xf32> to vector<16x256xf32>
    %396 = arith.addf %394, %395 : vector<16x256xf32>
    %cst_239 = arith.constant 0.000000e+00 : f32
    %397 = vector.broadcast %cst_239 : f32 to vector<16x256xf32>
    %398 = arith.maximumf %396, %397 : vector<16x256xf32>
    %399 = vector.extract_strided_slice %398 {offsets = [0, 239], sizes = [16, 17], strides = [1, 1]} : vector<16x256xf32> to vector<16x17xf32>
    %400 = vector.extract_strided_slice %398 {offsets = [0, 0], sizes = [16, 239], strides = [1, 1]} : vector<16x256xf32> to vector<16x239xf32>
    %401 = tpu.concatenate %399, %400 in 1 : vector<16x17xf32>, vector<16x239xf32> -> vector<16x256xf32>
    %c0_240 = arith.constant 0 : index
    %c0_241 = arith.constant 0 : index
    %402 = vector.load %arg2[%c0_240, %c0_241] : memref<9x256xf32, #tpu.memory_space<vmem>>, vector<1x256xf32>
    %403 = vector.broadcast %402 : vector<1x256xf32> to vector<16x256xf32>
    %404 = arith.mulf %401, %403 : vector<16x256xf32>
    %c0_242 = arith.constant 0 : index
    %c0_243 = arith.constant 0 : index
    %405 = vector.load %arg13[%c0_242, %c0_243] : memref<144x256xf32, #tpu.memory_space<vmem>>, vector<16x256xf32>
    tpu.vector_store %arg13[%c0_242, %c0_243], %404 {strides = array<i32>} : memref<144x256xf32, #tpu.memory_space<vmem>>, vector<16x256xf32>,
    %406 = vector.extract_strided_slice %398 {offsets = [0, 240], sizes = [16, 16], strides = [1, 1]} : vector<16x256xf32> to vector<16x16xf32>
    %407 = vector.extract_strided_slice %398 {offsets = [0, 0], sizes = [16, 240], strides = [1, 1]} : vector<16x256xf32> to vector<16x240xf32>
    %408 = tpu.concatenate %406, %407 in 1 : vector<16x16xf32>, vector<16x240xf32> -> vector<16x256xf32>
    %c1_244 = arith.constant 1 : index
    %c0_245 = arith.constant 0 : index
    %409 = vector.load %arg2[%c1_244, %c0_245] : memref<9x256xf32, #tpu.memory_space<vmem>>, vector<1x256xf32>
    %410 = vector.broadcast %409 : vector<1x256xf32> to vector<16x256xf32>
    %411 = arith.mulf %408, %410 : vector<16x256xf32>
    %c16_246 = arith.constant 16 : index
    %c0_247 = arith.constant 0 : index
    %412 = vector.load %arg13[%c16_246, %c0_247] : memref<144x256xf32, #tpu.memory_space<vmem>>, vector<16x256xf32>
    tpu.vector_store %arg13[%c16_246, %c0_247], %411 {strides = array<i32>} : memref<144x256xf32, #tpu.memory_space<vmem>>, vector<16x256xf32>,
    %413 = vector.extract_strided_slice %398 {offsets = [0, 241], sizes = [16, 15], strides = [1, 1]} : vector<16x256xf32> to vector<16x15xf32>
    %414 = vector.extract_strided_slice %398 {offsets = [0, 0], sizes = [16, 241], strides = [1, 1]} : vector<16x256xf32> to vector<16x241xf32>
    %415 = tpu.concatenate %413, %414 in 1 : vector<16x15xf32>, vector<16x241xf32> -> vector<16x256xf32>
    %c2_248 = arith.constant 2 : index
    %c0_249 = arith.constant 0 : index
    %416 = vector.load %arg2[%c2_248, %c0_249] : memref<9x256xf32, #tpu.memory_space<vmem>>, vector<1x256xf32>
    %417 = vector.broadcast %416 : vector<1x256xf32> to vector<16x256xf32>
    %418 = arith.mulf %415, %417 : vector<16x256xf32>
    %c32_250 = arith.constant 32 : index
    %c0_251 = arith.constant 0 : index
    %419 = vector.load %arg13[%c32_250, %c0_251] : memref<144x256xf32, #tpu.memory_space<vmem>>, vector<16x256xf32>
    tpu.vector_store %arg13[%c32_250, %c0_251], %418 {strides = array<i32>} : memref<144x256xf32, #tpu.memory_space<vmem>>, vector<16x256xf32>,
    %420 = vector.extract_strided_slice %398 {offsets = [0, 255], sizes = [16, 1], strides = [1, 1]} : vector<16x256xf32> to vector<16x1xf32>
    %421 = vector.extract_strided_slice %398 {offsets = [0, 0], sizes = [16, 255], strides = [1, 1]} : vector<16x256xf32> to vector<16x255xf32>
    %422 = tpu.concatenate %420, %421 in 1 : vector<16x1xf32>, vector<16x255xf32> -> vector<16x256xf32>
    %c3_252 = arith.constant 3 : index
    %c0_253 = arith.constant 0 : index
    %423 = vector.load %arg2[%c3_252, %c0_253] : memref<9x256xf32, #tpu.memory_space<vmem>>, vector<1x256xf32>
    %424 = vector.broadcast %423 : vector<1x256xf32> to vector<16x256xf32>
    %425 = arith.mulf %422, %424 : vector<16x256xf32>
    %c48_254 = arith.constant 48 : index
    %c0_255 = arith.constant 0 : index
    %426 = vector.load %arg13[%c48_254, %c0_255] : memref<144x256xf32, #tpu.memory_space<vmem>>, vector<16x256xf32>
    tpu.vector_store %arg13[%c48_254, %c0_255], %425 {strides = array<i32>} : memref<144x256xf32, #tpu.memory_space<vmem>>, vector<16x256xf32>,
    %c4_256 = arith.constant 4 : index
    %c0_257 = arith.constant 0 : index
    %427 = vector.load %arg2[%c4_256, %c0_257] : memref<9x256xf32, #tpu.memory_space<vmem>>, vector<1x256xf32>
    %428 = vector.broadcast %427 : vector<1x256xf32> to vector<16x256xf32>
    %429 = arith.mulf %398, %428 : vector<16x256xf32>
    %c64_258 = arith.constant 64 : index
    %c0_259 = arith.constant 0 : index
    %430 = vector.load %arg13[%c64_258, %c0_259] : memref<144x256xf32, #tpu.memory_space<vmem>>, vector<16x256xf32>
    tpu.vector_store %arg13[%c64_258, %c0_259], %429 {strides = array<i32>} : memref<144x256xf32, #tpu.memory_space<vmem>>, vector<16x256xf32>,
    %431 = vector.extract_strided_slice %398 {offsets = [0, 1], sizes = [16, 255], strides = [1, 1]} : vector<16x256xf32> to vector<16x255xf32>
    %432 = vector.extract_strided_slice %398 {offsets = [0, 0], sizes = [16, 1], strides = [1, 1]} : vector<16x256xf32> to vector<16x1xf32>
    %433 = tpu.concatenate %431, %432 in 1 : vector<16x255xf32>, vector<16x1xf32> -> vector<16x256xf32>
    %c5_260 = arith.constant 5 : index
    %c0_261 = arith.constant 0 : index
    %434 = vector.load %arg2[%c5_260, %c0_261] : memref<9x256xf32, #tpu.memory_space<vmem>>, vector<1x256xf32>
    %435 = vector.broadcast %434 : vector<1x256xf32> to vector<16x256xf32>
    %436 = arith.mulf %433, %435 : vector<16x256xf32>
    %c80_262 = arith.constant 80 : index
    %c0_263 = arith.constant 0 : index
    %437 = vector.load %arg13[%c80_262, %c0_263] : memref<144x256xf32, #tpu.memory_space<vmem>>, vector<16x256xf32>
    tpu.vector_store %arg13[%c80_262, %c0_263], %436 {strides = array<i32>} : memref<144x256xf32, #tpu.memory_space<vmem>>, vector<16x256xf32>,
    %438 = vector.extract_strided_slice %398 {offsets = [0, 15], sizes = [16, 241], strides = [1, 1]} : vector<16x256xf32> to vector<16x241xf32>
    %439 = vector.extract_strided_slice %398 {offsets = [0, 0], sizes = [16, 15], strides = [1, 1]} : vector<16x256xf32> to vector<16x15xf32>
    %440 = tpu.concatenate %438, %439 in 1 : vector<16x241xf32>, vector<16x15xf32> -> vector<16x256xf32>
    %c6_264 = arith.constant 6 : index
    %c0_265 = arith.constant 0 : index
    %441 = vector.load %arg2[%c6_264, %c0_265] : memref<9x256xf32, #tpu.memory_space<vmem>>, vector<1x256xf32>
    %442 = vector.broadcast %441 : vector<1x256xf32> to vector<16x256xf32>
    %443 = arith.mulf %440, %442 : vector<16x256xf32>
    %c96_266 = arith.constant 96 : index
    %c0_267 = arith.constant 0 : index
    %444 = vector.load %arg13[%c96_266, %c0_267] : memref<144x256xf32, #tpu.memory_space<vmem>>, vector<16x256xf32>
    tpu.vector_store %arg13[%c96_266, %c0_267], %443 {strides = array<i32>} : memref<144x256xf32, #tpu.memory_space<vmem>>, vector<16x256xf32>,
    %445 = vector.extract_strided_slice %398 {offsets = [0, 16], sizes = [16, 240], strides = [1, 1]} : vector<16x256xf32> to vector<16x240xf32>
    %446 = vector.extract_strided_slice %398 {offsets = [0, 0], sizes = [16, 16], strides = [1, 1]} : vector<16x256xf32> to vector<16x16xf32>
    %447 = tpu.concatenate %445, %446 in 1 : vector<16x240xf32>, vector<16x16xf32> -> vector<16x256xf32>
    %c7_268 = arith.constant 7 : index
    %c0_269 = arith.constant 0 : index
    %448 = vector.load %arg2[%c7_268, %c0_269] : memref<9x256xf32, #tpu.memory_space<vmem>>, vector<1x256xf32>
    %449 = vector.broadcast %448 : vector<1x256xf32> to vector<16x256xf32>
    %450 = arith.mulf %447, %449 : vector<16x256xf32>
    %c112_270 = arith.constant 112 : index
    %c0_271 = arith.constant 0 : index
    %451 = vector.load %arg13[%c112_270, %c0_271] : memref<144x256xf32, #tpu.memory_space<vmem>>, vector<16x256xf32>
    tpu.vector_store %arg13[%c112_270, %c0_271], %450 {strides = array<i32>} : memref<144x256xf32, #tpu.memory_space<vmem>>, vector<16x256xf32>,
    %452 = vector.extract_strided_slice %398 {offsets = [0, 17], sizes = [16, 239], strides = [1, 1]} : vector<16x256xf32> to vector<16x239xf32>
    %453 = vector.extract_strided_slice %398 {offsets = [0, 0], sizes = [16, 17], strides = [1, 1]} : vector<16x256xf32> to vector<16x17xf32>
    %454 = tpu.concatenate %452, %453 in 1 : vector<16x239xf32>, vector<16x17xf32> -> vector<16x256xf32>
    %c8_272 = arith.constant 8 : index
    %c0_273 = arith.constant 0 : index
    %455 = vector.load %arg2[%c8_272, %c0_273] : memref<9x256xf32, #tpu.memory_space<vmem>>, vector<1x256xf32>
    %456 = vector.broadcast %455 : vector<1x256xf32> to vector<16x256xf32>
    %457 = arith.mulf %454, %456 : vector<16x256xf32>
    %c128_274 = arith.constant 128 : index
    %c0_275 = arith.constant 0 : index
    %458 = vector.load %arg13[%c128_274, %c0_275] : memref<144x256xf32, #tpu.memory_space<vmem>>, vector<16x256xf32>
    tpu.vector_store %arg13[%c128_274, %c0_275], %457 {strides = array<i32>} : memref<144x256xf32, #tpu.memory_space<vmem>>, vector<16x256xf32>,
    %c0_276 = arith.constant 0 : index
    %c0_277 = arith.constant 0 : index
    %459 = vector.load %arg13[%c0_276, %c0_277] : memref<144x256xf32, #tpu.memory_space<vmem>>, vector<144x256xf32>
    %cst_278 = arith.constant dense<0.000000e+00> : vector<16x256xf32>
    %460 = tpu.matmul %6, %459, %cst_278 {dimension_numbers = #tpu.dot_dimension_numbers<[1], [0], [0], [1], [0, 0, 1, 1], [], []>} : vector<16x144xf32>, vector<144x256xf32>, vector<16x256xf32> -> vector<16x256xf32>
    %461 = vector.broadcast %7 : vector<16x1xf32> to vector<16x256xf32>
    %462 = arith.addf %460, %461 : vector<16x256xf32>
    %c2_279 = arith.constant 2 : index
    %463 = memref.load %arg11[%c2_279] : memref<7xf32, #tpu.memory_space<smem>>
    %464 = vector.broadcast %463 : f32 to vector<16x256xf32>
    %465 = arith.mulf %462, %464 : vector<16x256xf32>
    %466 = arith.addf %332, %465 : vector<16x256xf32>
    %467 = vector.extract_strided_slice %466 {offsets = [0, 239], sizes = [16, 17], strides = [1, 1]} : vector<16x256xf32> to vector<16x17xf32>
    %468 = vector.extract_strided_slice %466 {offsets = [0, 0], sizes = [16, 239], strides = [1, 1]} : vector<16x256xf32> to vector<16x239xf32>
    %469 = tpu.concatenate %467, %468 in 1 : vector<16x17xf32>, vector<16x239xf32> -> vector<16x256xf32>
    %c0_280 = arith.constant 0 : index
    %c0_281 = arith.constant 0 : index
    %470 = vector.load %arg2[%c0_280, %c0_281] : memref<9x256xf32, #tpu.memory_space<vmem>>, vector<1x256xf32>
    %471 = vector.broadcast %470 : vector<1x256xf32> to vector<16x256xf32>
    %472 = arith.mulf %469, %471 : vector<16x256xf32>
    %c0_282 = arith.constant 0 : index
    %c0_283 = arith.constant 0 : index
    %473 = vector.load %arg13[%c0_282, %c0_283] : memref<144x256xf32, #tpu.memory_space<vmem>>, vector<16x256xf32>
    tpu.vector_store %arg13[%c0_282, %c0_283], %472 {strides = array<i32>} : memref<144x256xf32, #tpu.memory_space<vmem>>, vector<16x256xf32>,
    %474 = vector.extract_strided_slice %466 {offsets = [0, 240], sizes = [16, 16], strides = [1, 1]} : vector<16x256xf32> to vector<16x16xf32>
    %475 = vector.extract_strided_slice %466 {offsets = [0, 0], sizes = [16, 240], strides = [1, 1]} : vector<16x256xf32> to vector<16x240xf32>
    %476 = tpu.concatenate %474, %475 in 1 : vector<16x16xf32>, vector<16x240xf32> -> vector<16x256xf32>
    %c1_284 = arith.constant 1 : index
    %c0_285 = arith.constant 0 : index
    %477 = vector.load %arg2[%c1_284, %c0_285] : memref<9x256xf32, #tpu.memory_space<vmem>>, vector<1x256xf32>
    %478 = vector.broadcast %477 : vector<1x256xf32> to vector<16x256xf32>
    %479 = arith.mulf %476, %478 : vector<16x256xf32>
    %c16_286 = arith.constant 16 : index
    %c0_287 = arith.constant 0 : index
    %480 = vector.load %arg13[%c16_286, %c0_287] : memref<144x256xf32, #tpu.memory_space<vmem>>, vector<16x256xf32>
    tpu.vector_store %arg13[%c16_286, %c0_287], %479 {strides = array<i32>} : memref<144x256xf32, #tpu.memory_space<vmem>>, vector<16x256xf32>,
    %481 = vector.extract_strided_slice %466 {offsets = [0, 241], sizes = [16, 15], strides = [1, 1]} : vector<16x256xf32> to vector<16x15xf32>
    %482 = vector.extract_strided_slice %466 {offsets = [0, 0], sizes = [16, 241], strides = [1, 1]} : vector<16x256xf32> to vector<16x241xf32>
    %483 = tpu.concatenate %481, %482 in 1 : vector<16x15xf32>, vector<16x241xf32> -> vector<16x256xf32>
    %c2_288 = arith.constant 2 : index
    %c0_289 = arith.constant 0 : index
    %484 = vector.load %arg2[%c2_288, %c0_289] : memref<9x256xf32, #tpu.memory_space<vmem>>, vector<1x256xf32>
    %485 = vector.broadcast %484 : vector<1x256xf32> to vector<16x256xf32>
    %486 = arith.mulf %483, %485 : vector<16x256xf32>
    %c32_290 = arith.constant 32 : index
    %c0_291 = arith.constant 0 : index
    %487 = vector.load %arg13[%c32_290, %c0_291] : memref<144x256xf32, #tpu.memory_space<vmem>>, vector<16x256xf32>
    tpu.vector_store %arg13[%c32_290, %c0_291], %486 {strides = array<i32>} : memref<144x256xf32, #tpu.memory_space<vmem>>, vector<16x256xf32>,
    %488 = vector.extract_strided_slice %466 {offsets = [0, 255], sizes = [16, 1], strides = [1, 1]} : vector<16x256xf32> to vector<16x1xf32>
    %489 = vector.extract_strided_slice %466 {offsets = [0, 0], sizes = [16, 255], strides = [1, 1]} : vector<16x256xf32> to vector<16x255xf32>
    %490 = tpu.concatenate %488, %489 in 1 : vector<16x1xf32>, vector<16x255xf32> -> vector<16x256xf32>
    %c3_292 = arith.constant 3 : index
    %c0_293 = arith.constant 0 : index
    %491 = vector.load %arg2[%c3_292, %c0_293] : memref<9x256xf32, #tpu.memory_space<vmem>>, vector<1x256xf32>
    %492 = vector.broadcast %491 : vector<1x256xf32> to vector<16x256xf32>
    %493 = arith.mulf %490, %492 : vector<16x256xf32>
    %c48_294 = arith.constant 48 : index
    %c0_295 = arith.constant 0 : index
    %494 = vector.load %arg13[%c48_294, %c0_295] : memref<144x256xf32, #tpu.memory_space<vmem>>, vector<16x256xf32>
    tpu.vector_store %arg13[%c48_294, %c0_295], %493 {strides = array<i32>} : memref<144x256xf32, #tpu.memory_space<vmem>>, vector<16x256xf32>,
    %c4_296 = arith.constant 4 : index
    %c0_297 = arith.constant 0 : index
    %495 = vector.load %arg2[%c4_296, %c0_297] : memref<9x256xf32, #tpu.memory_space<vmem>>, vector<1x256xf32>
    %496 = vector.broadcast %495 : vector<1x256xf32> to vector<16x256xf32>
    %497 = arith.mulf %466, %496 : vector<16x256xf32>
    %c64_298 = arith.constant 64 : index
    %c0_299 = arith.constant 0 : index
    %498 = vector.load %arg13[%c64_298, %c0_299] : memref<144x256xf32, #tpu.memory_space<vmem>>, vector<16x256xf32>
    tpu.vector_store %arg13[%c64_298, %c0_299], %497 {strides = array<i32>} : memref<144x256xf32, #tpu.memory_space<vmem>>, vector<16x256xf32>,
    %499 = vector.extract_strided_slice %466 {offsets = [0, 1], sizes = [16, 255], strides = [1, 1]} : vector<16x256xf32> to vector<16x255xf32>
    %500 = vector.extract_strided_slice %466 {offsets = [0, 0], sizes = [16, 1], strides = [1, 1]} : vector<16x256xf32> to vector<16x1xf32>
    %501 = tpu.concatenate %499, %500 in 1 : vector<16x255xf32>, vector<16x1xf32> -> vector<16x256xf32>
    %c5_300 = arith.constant 5 : index
    %c0_301 = arith.constant 0 : index
    %502 = vector.load %arg2[%c5_300, %c0_301] : memref<9x256xf32, #tpu.memory_space<vmem>>, vector<1x256xf32>
    %503 = vector.broadcast %502 : vector<1x256xf32> to vector<16x256xf32>
    %504 = arith.mulf %501, %503 : vector<16x256xf32>
    %c80_302 = arith.constant 80 : index
    %c0_303 = arith.constant 0 : index
    %505 = vector.load %arg13[%c80_302, %c0_303] : memref<144x256xf32, #tpu.memory_space<vmem>>, vector<16x256xf32>
    tpu.vector_store %arg13[%c80_302, %c0_303], %504 {strides = array<i32>} : memref<144x256xf32, #tpu.memory_space<vmem>>, vector<16x256xf32>,
    %506 = vector.extract_strided_slice %466 {offsets = [0, 15], sizes = [16, 241], strides = [1, 1]} : vector<16x256xf32> to vector<16x241xf32>
    %507 = vector.extract_strided_slice %466 {offsets = [0, 0], sizes = [16, 15], strides = [1, 1]} : vector<16x256xf32> to vector<16x15xf32>
    %508 = tpu.concatenate %506, %507 in 1 : vector<16x241xf32>, vector<16x15xf32> -> vector<16x256xf32>
    %c6_304 = arith.constant 6 : index
    %c0_305 = arith.constant 0 : index
    %509 = vector.load %arg2[%c6_304, %c0_305] : memref<9x256xf32, #tpu.memory_space<vmem>>, vector<1x256xf32>
    %510 = vector.broadcast %509 : vector<1x256xf32> to vector<16x256xf32>
    %511 = arith.mulf %508, %510 : vector<16x256xf32>
    %c96_306 = arith.constant 96 : index
    %c0_307 = arith.constant 0 : index
    %512 = vector.load %arg13[%c96_306, %c0_307] : memref<144x256xf32, #tpu.memory_space<vmem>>, vector<16x256xf32>
    tpu.vector_store %arg13[%c96_306, %c0_307], %511 {strides = array<i32>} : memref<144x256xf32, #tpu.memory_space<vmem>>, vector<16x256xf32>,
    %513 = vector.extract_strided_slice %466 {offsets = [0, 16], sizes = [16, 240], strides = [1, 1]} : vector<16x256xf32> to vector<16x240xf32>
    %514 = vector.extract_strided_slice %466 {offsets = [0, 0], sizes = [16, 16], strides = [1, 1]} : vector<16x256xf32> to vector<16x16xf32>
    %515 = tpu.concatenate %513, %514 in 1 : vector<16x240xf32>, vector<16x16xf32> -> vector<16x256xf32>
    %c7_308 = arith.constant 7 : index
    %c0_309 = arith.constant 0 : index
    %516 = vector.load %arg2[%c7_308, %c0_309] : memref<9x256xf32, #tpu.memory_space<vmem>>, vector<1x256xf32>
    %517 = vector.broadcast %516 : vector<1x256xf32> to vector<16x256xf32>
    %518 = arith.mulf %515, %517 : vector<16x256xf32>
    %c112_310 = arith.constant 112 : index
    %c0_311 = arith.constant 0 : index
    %519 = vector.load %arg13[%c112_310, %c0_311] : memref<144x256xf32, #tpu.memory_space<vmem>>, vector<16x256xf32>
    tpu.vector_store %arg13[%c112_310, %c0_311], %518 {strides = array<i32>} : memref<144x256xf32, #tpu.memory_space<vmem>>, vector<16x256xf32>,
    %520 = vector.extract_strided_slice %466 {offsets = [0, 17], sizes = [16, 239], strides = [1, 1]} : vector<16x256xf32> to vector<16x239xf32>
    %521 = vector.extract_strided_slice %466 {offsets = [0, 0], sizes = [16, 17], strides = [1, 1]} : vector<16x256xf32> to vector<16x17xf32>
    %522 = tpu.concatenate %520, %521 in 1 : vector<16x239xf32>, vector<16x17xf32> -> vector<16x256xf32>
    %c8_312 = arith.constant 8 : index
    %c0_313 = arith.constant 0 : index
    %523 = vector.load %arg2[%c8_312, %c0_313] : memref<9x256xf32, #tpu.memory_space<vmem>>, vector<1x256xf32>
    %524 = vector.broadcast %523 : vector<1x256xf32> to vector<16x256xf32>
    %525 = arith.mulf %522, %524 : vector<16x256xf32>
    %c128_314 = arith.constant 128 : index
    %c0_315 = arith.constant 0 : index
    %526 = vector.load %arg13[%c128_314, %c0_315] : memref<144x256xf32, #tpu.memory_space<vmem>>, vector<16x256xf32>
    tpu.vector_store %arg13[%c128_314, %c0_315], %525 {strides = array<i32>} : memref<144x256xf32, #tpu.memory_space<vmem>>, vector<16x256xf32>,
    %c0_316 = arith.constant 0 : index
    %c0_317 = arith.constant 0 : index
    %527 = vector.load %arg13[%c0_316, %c0_317] : memref<144x256xf32, #tpu.memory_space<vmem>>, vector<144x256xf32>
    %cst_318 = arith.constant dense<0.000000e+00> : vector<16x256xf32>
    %528 = tpu.matmul %4, %527, %cst_318 {dimension_numbers = #tpu.dot_dimension_numbers<[1], [0], [0], [1], [0, 0, 1, 1], [], []>} : vector<16x144xf32>, vector<144x256xf32>, vector<16x256xf32> -> vector<16x256xf32>
    %529 = vector.broadcast %5 : vector<16x1xf32> to vector<16x256xf32>
    %530 = arith.addf %528, %529 : vector<16x256xf32>
    %cst_319 = arith.constant 0.000000e+00 : f32
    %531 = vector.broadcast %cst_319 : f32 to vector<16x256xf32>
    %532 = arith.maximumf %530, %531 : vector<16x256xf32>
    %533 = vector.extract_strided_slice %532 {offsets = [0, 239], sizes = [16, 17], strides = [1, 1]} : vector<16x256xf32> to vector<16x17xf32>
    %534 = vector.extract_strided_slice %532 {offsets = [0, 0], sizes = [16, 239], strides = [1, 1]} : vector<16x256xf32> to vector<16x239xf32>
    %535 = tpu.concatenate %533, %534 in 1 : vector<16x17xf32>, vector<16x239xf32> -> vector<16x256xf32>
    %c0_320 = arith.constant 0 : index
    %c0_321 = arith.constant 0 : index
    %536 = vector.load %arg2[%c0_320, %c0_321] : memref<9x256xf32, #tpu.memory_space<vmem>>, vector<1x256xf32>
    %537 = vector.broadcast %536 : vector<1x256xf32> to vector<16x256xf32>
    %538 = arith.mulf %535, %537 : vector<16x256xf32>
    %c0_322 = arith.constant 0 : index
    %c0_323 = arith.constant 0 : index
    %539 = vector.load %arg13[%c0_322, %c0_323] : memref<144x256xf32, #tpu.memory_space<vmem>>, vector<16x256xf32>
    tpu.vector_store %arg13[%c0_322, %c0_323], %538 {strides = array<i32>} : memref<144x256xf32, #tpu.memory_space<vmem>>, vector<16x256xf32>,
    %540 = vector.extract_strided_slice %532 {offsets = [0, 240], sizes = [16, 16], strides = [1, 1]} : vector<16x256xf32> to vector<16x16xf32>
    %541 = vector.extract_strided_slice %532 {offsets = [0, 0], sizes = [16, 240], strides = [1, 1]} : vector<16x256xf32> to vector<16x240xf32>
    %542 = tpu.concatenate %540, %541 in 1 : vector<16x16xf32>, vector<16x240xf32> -> vector<16x256xf32>
    %c1_324 = arith.constant 1 : index
    %c0_325 = arith.constant 0 : index
    %543 = vector.load %arg2[%c1_324, %c0_325] : memref<9x256xf32, #tpu.memory_space<vmem>>, vector<1x256xf32>
    %544 = vector.broadcast %543 : vector<1x256xf32> to vector<16x256xf32>
    %545 = arith.mulf %542, %544 : vector<16x256xf32>
    %c16_326 = arith.constant 16 : index
    %c0_327 = arith.constant 0 : index
    %546 = vector.load %arg13[%c16_326, %c0_327] : memref<144x256xf32, #tpu.memory_space<vmem>>, vector<16x256xf32>
    tpu.vector_store %arg13[%c16_326, %c0_327], %545 {strides = array<i32>} : memref<144x256xf32, #tpu.memory_space<vmem>>, vector<16x256xf32>,
    %547 = vector.extract_strided_slice %532 {offsets = [0, 241], sizes = [16, 15], strides = [1, 1]} : vector<16x256xf32> to vector<16x15xf32>
    %548 = vector.extract_strided_slice %532 {offsets = [0, 0], sizes = [16, 241], strides = [1, 1]} : vector<16x256xf32> to vector<16x241xf32>
    %549 = tpu.concatenate %547, %548 in 1 : vector<16x15xf32>, vector<16x241xf32> -> vector<16x256xf32>
    %c2_328 = arith.constant 2 : index
    %c0_329 = arith.constant 0 : index
    %550 = vector.load %arg2[%c2_328, %c0_329] : memref<9x256xf32, #tpu.memory_space<vmem>>, vector<1x256xf32>
    %551 = vector.broadcast %550 : vector<1x256xf32> to vector<16x256xf32>
    %552 = arith.mulf %549, %551 : vector<16x256xf32>
    %c32_330 = arith.constant 32 : index
    %c0_331 = arith.constant 0 : index
    %553 = vector.load %arg13[%c32_330, %c0_331] : memref<144x256xf32, #tpu.memory_space<vmem>>, vector<16x256xf32>
    tpu.vector_store %arg13[%c32_330, %c0_331], %552 {strides = array<i32>} : memref<144x256xf32, #tpu.memory_space<vmem>>, vector<16x256xf32>,
    %554 = vector.extract_strided_slice %532 {offsets = [0, 255], sizes = [16, 1], strides = [1, 1]} : vector<16x256xf32> to vector<16x1xf32>
    %555 = vector.extract_strided_slice %532 {offsets = [0, 0], sizes = [16, 255], strides = [1, 1]} : vector<16x256xf32> to vector<16x255xf32>
    %556 = tpu.concatenate %554, %555 in 1 : vector<16x1xf32>, vector<16x255xf32> -> vector<16x256xf32>
    %c3_332 = arith.constant 3 : index
    %c0_333 = arith.constant 0 : index
    %557 = vector.load %arg2[%c3_332, %c0_333] : memref<9x256xf32, #tpu.memory_space<vmem>>, vector<1x256xf32>
    %558 = vector.broadcast %557 : vector<1x256xf32> to vector<16x256xf32>
    %559 = arith.mulf %556, %558 : vector<16x256xf32>
    %c48_334 = arith.constant 48 : index
    %c0_335 = arith.constant 0 : index
    %560 = vector.load %arg13[%c48_334, %c0_335] : memref<144x256xf32, #tpu.memory_space<vmem>>, vector<16x256xf32>
    tpu.vector_store %arg13[%c48_334, %c0_335], %559 {strides = array<i32>} : memref<144x256xf32, #tpu.memory_space<vmem>>, vector<16x256xf32>,
    %c4_336 = arith.constant 4 : index
    %c0_337 = arith.constant 0 : index
    %561 = vector.load %arg2[%c4_336, %c0_337] : memref<9x256xf32, #tpu.memory_space<vmem>>, vector<1x256xf32>
    %562 = vector.broadcast %561 : vector<1x256xf32> to vector<16x256xf32>
    %563 = arith.mulf %532, %562 : vector<16x256xf32>
    %c64_338 = arith.constant 64 : index
    %c0_339 = arith.constant 0 : index
    %564 = vector.load %arg13[%c64_338, %c0_339] : memref<144x256xf32, #tpu.memory_space<vmem>>, vector<16x256xf32>
    tpu.vector_store %arg13[%c64_338, %c0_339], %563 {strides = array<i32>} : memref<144x256xf32, #tpu.memory_space<vmem>>, vector<16x256xf32>,
    %565 = vector.extract_strided_slice %532 {offsets = [0, 1], sizes = [16, 255], strides = [1, 1]} : vector<16x256xf32> to vector<16x255xf32>
    %566 = vector.extract_strided_slice %532 {offsets = [0, 0], sizes = [16, 1], strides = [1, 1]} : vector<16x256xf32> to vector<16x1xf32>
    %567 = tpu.concatenate %565, %566 in 1 : vector<16x255xf32>, vector<16x1xf32> -> vector<16x256xf32>
    %c5_340 = arith.constant 5 : index
    %c0_341 = arith.constant 0 : index
    %568 = vector.load %arg2[%c5_340, %c0_341] : memref<9x256xf32, #tpu.memory_space<vmem>>, vector<1x256xf32>
    %569 = vector.broadcast %568 : vector<1x256xf32> to vector<16x256xf32>
    %570 = arith.mulf %567, %569 : vector<16x256xf32>
    %c80_342 = arith.constant 80 : index
    %c0_343 = arith.constant 0 : index
    %571 = vector.load %arg13[%c80_342, %c0_343] : memref<144x256xf32, #tpu.memory_space<vmem>>, vector<16x256xf32>
    tpu.vector_store %arg13[%c80_342, %c0_343], %570 {strides = array<i32>} : memref<144x256xf32, #tpu.memory_space<vmem>>, vector<16x256xf32>,
    %572 = vector.extract_strided_slice %532 {offsets = [0, 15], sizes = [16, 241], strides = [1, 1]} : vector<16x256xf32> to vector<16x241xf32>
    %573 = vector.extract_strided_slice %532 {offsets = [0, 0], sizes = [16, 15], strides = [1, 1]} : vector<16x256xf32> to vector<16x15xf32>
    %574 = tpu.concatenate %572, %573 in 1 : vector<16x241xf32>, vector<16x15xf32> -> vector<16x256xf32>
    %c6_344 = arith.constant 6 : index
    %c0_345 = arith.constant 0 : index
    %575 = vector.load %arg2[%c6_344, %c0_345] : memref<9x256xf32, #tpu.memory_space<vmem>>, vector<1x256xf32>
    %576 = vector.broadcast %575 : vector<1x256xf32> to vector<16x256xf32>
    %577 = arith.mulf %574, %576 : vector<16x256xf32>
    %c96_346 = arith.constant 96 : index
    %c0_347 = arith.constant 0 : index
    %578 = vector.load %arg13[%c96_346, %c0_347] : memref<144x256xf32, #tpu.memory_space<vmem>>, vector<16x256xf32>
    tpu.vector_store %arg13[%c96_346, %c0_347], %577 {strides = array<i32>} : memref<144x256xf32, #tpu.memory_space<vmem>>, vector<16x256xf32>,
    %579 = vector.extract_strided_slice %532 {offsets = [0, 16], sizes = [16, 240], strides = [1, 1]} : vector<16x256xf32> to vector<16x240xf32>
    %580 = vector.extract_strided_slice %532 {offsets = [0, 0], sizes = [16, 16], strides = [1, 1]} : vector<16x256xf32> to vector<16x16xf32>
    %581 = tpu.concatenate %579, %580 in 1 : vector<16x240xf32>, vector<16x16xf32> -> vector<16x256xf32>
    %c7_348 = arith.constant 7 : index
    %c0_349 = arith.constant 0 : index
    %582 = vector.load %arg2[%c7_348, %c0_349] : memref<9x256xf32, #tpu.memory_space<vmem>>, vector<1x256xf32>
    %583 = vector.broadcast %582 : vector<1x256xf32> to vector<16x256xf32>
    %584 = arith.mulf %581, %583 : vector<16x256xf32>
    %c112_350 = arith.constant 112 : index
    %c0_351 = arith.constant 0 : index
    %585 = vector.load %arg13[%c112_350, %c0_351] : memref<144x256xf32, #tpu.memory_space<vmem>>, vector<16x256xf32>
    tpu.vector_store %arg13[%c112_350, %c0_351], %584 {strides = array<i32>} : memref<144x256xf32, #tpu.memory_space<vmem>>, vector<16x256xf32>,
    %586 = vector.extract_strided_slice %532 {offsets = [0, 17], sizes = [16, 239], strides = [1, 1]} : vector<16x256xf32> to vector<16x239xf32>
    %587 = vector.extract_strided_slice %532 {offsets = [0, 0], sizes = [16, 17], strides = [1, 1]} : vector<16x256xf32> to vector<16x17xf32>
    %588 = tpu.concatenate %586, %587 in 1 : vector<16x239xf32>, vector<16x17xf32> -> vector<16x256xf32>
    %c8_352 = arith.constant 8 : index
    %c0_353 = arith.constant 0 : index
    %589 = vector.load %arg2[%c8_352, %c0_353] : memref<9x256xf32, #tpu.memory_space<vmem>>, vector<1x256xf32>
    %590 = vector.broadcast %589 : vector<1x256xf32> to vector<16x256xf32>
    %591 = arith.mulf %588, %590 : vector<16x256xf32>
    %c128_354 = arith.constant 128 : index
    %c0_355 = arith.constant 0 : index
    %592 = vector.load %arg13[%c128_354, %c0_355] : memref<144x256xf32, #tpu.memory_space<vmem>>, vector<16x256xf32>
    tpu.vector_store %arg13[%c128_354, %c0_355], %591 {strides = array<i32>} : memref<144x256xf32, #tpu.memory_space<vmem>>, vector<16x256xf32>,
    %c0_356 = arith.constant 0 : index
    %c0_357 = arith.constant 0 : index
    %593 = vector.load %arg13[%c0_356, %c0_357] : memref<144x256xf32, #tpu.memory_space<vmem>>, vector<144x256xf32>
    %cst_358 = arith.constant dense<0.000000e+00> : vector<16x256xf32>
    %594 = tpu.matmul %6, %593, %cst_358 {dimension_numbers = #tpu.dot_dimension_numbers<[1], [0], [0], [1], [0, 0, 1, 1], [], []>} : vector<16x144xf32>, vector<144x256xf32>, vector<16x256xf32> -> vector<16x256xf32>
    %595 = vector.broadcast %7 : vector<16x1xf32> to vector<16x256xf32>
    %596 = arith.addf %594, %595 : vector<16x256xf32>
    %c3_359 = arith.constant 3 : index
    %597 = memref.load %arg11[%c3_359] : memref<7xf32, #tpu.memory_space<smem>>
    %598 = vector.broadcast %597 : f32 to vector<16x256xf32>
    %599 = arith.mulf %596, %598 : vector<16x256xf32>
    %600 = arith.addf %466, %599 : vector<16x256xf32>
    %601 = vector.extract_strided_slice %600 {offsets = [0, 239], sizes = [16, 17], strides = [1, 1]} : vector<16x256xf32> to vector<16x17xf32>
    %602 = vector.extract_strided_slice %600 {offsets = [0, 0], sizes = [16, 239], strides = [1, 1]} : vector<16x256xf32> to vector<16x239xf32>
    %603 = tpu.concatenate %601, %602 in 1 : vector<16x17xf32>, vector<16x239xf32> -> vector<16x256xf32>
    %c0_360 = arith.constant 0 : index
    %c0_361 = arith.constant 0 : index
    %604 = vector.load %arg2[%c0_360, %c0_361] : memref<9x256xf32, #tpu.memory_space<vmem>>, vector<1x256xf32>
    %605 = vector.broadcast %604 : vector<1x256xf32> to vector<16x256xf32>
    %606 = arith.mulf %603, %605 : vector<16x256xf32>
    %c0_362 = arith.constant 0 : index
    %c0_363 = arith.constant 0 : index
    %607 = vector.load %arg13[%c0_362, %c0_363] : memref<144x256xf32, #tpu.memory_space<vmem>>, vector<16x256xf32>
    tpu.vector_store %arg13[%c0_362, %c0_363], %606 {strides = array<i32>} : memref<144x256xf32, #tpu.memory_space<vmem>>, vector<16x256xf32>,
    %608 = vector.extract_strided_slice %600 {offsets = [0, 240], sizes = [16, 16], strides = [1, 1]} : vector<16x256xf32> to vector<16x16xf32>
    %609 = vector.extract_strided_slice %600 {offsets = [0, 0], sizes = [16, 240], strides = [1, 1]} : vector<16x256xf32> to vector<16x240xf32>
    %610 = tpu.concatenate %608, %609 in 1 : vector<16x16xf32>, vector<16x240xf32> -> vector<16x256xf32>
    %c1_364 = arith.constant 1 : index
    %c0_365 = arith.constant 0 : index
    %611 = vector.load %arg2[%c1_364, %c0_365] : memref<9x256xf32, #tpu.memory_space<vmem>>, vector<1x256xf32>
    %612 = vector.broadcast %611 : vector<1x256xf32> to vector<16x256xf32>
    %613 = arith.mulf %610, %612 : vector<16x256xf32>
    %c16_366 = arith.constant 16 : index
    %c0_367 = arith.constant 0 : index
    %614 = vector.load %arg13[%c16_366, %c0_367] : memref<144x256xf32, #tpu.memory_space<vmem>>, vector<16x256xf32>
    tpu.vector_store %arg13[%c16_366, %c0_367], %613 {strides = array<i32>} : memref<144x256xf32, #tpu.memory_space<vmem>>, vector<16x256xf32>,
    %615 = vector.extract_strided_slice %600 {offsets = [0, 241], sizes = [16, 15], strides = [1, 1]} : vector<16x256xf32> to vector<16x15xf32>
    %616 = vector.extract_strided_slice %600 {offsets = [0, 0], sizes = [16, 241], strides = [1, 1]} : vector<16x256xf32> to vector<16x241xf32>
    %617 = tpu.concatenate %615, %616 in 1 : vector<16x15xf32>, vector<16x241xf32> -> vector<16x256xf32>
    %c2_368 = arith.constant 2 : index
    %c0_369 = arith.constant 0 : index
    %618 = vector.load %arg2[%c2_368, %c0_369] : memref<9x256xf32, #tpu.memory_space<vmem>>, vector<1x256xf32>
    %619 = vector.broadcast %618 : vector<1x256xf32> to vector<16x256xf32>
    %620 = arith.mulf %617, %619 : vector<16x256xf32>
    %c32_370 = arith.constant 32 : index
    %c0_371 = arith.constant 0 : index
    %621 = vector.load %arg13[%c32_370, %c0_371] : memref<144x256xf32, #tpu.memory_space<vmem>>, vector<16x256xf32>
    tpu.vector_store %arg13[%c32_370, %c0_371], %620 {strides = array<i32>} : memref<144x256xf32, #tpu.memory_space<vmem>>, vector<16x256xf32>,
    %622 = vector.extract_strided_slice %600 {offsets = [0, 255], sizes = [16, 1], strides = [1, 1]} : vector<16x256xf32> to vector<16x1xf32>
    %623 = vector.extract_strided_slice %600 {offsets = [0, 0], sizes = [16, 255], strides = [1, 1]} : vector<16x256xf32> to vector<16x255xf32>
    %624 = tpu.concatenate %622, %623 in 1 : vector<16x1xf32>, vector<16x255xf32> -> vector<16x256xf32>
    %c3_372 = arith.constant 3 : index
    %c0_373 = arith.constant 0 : index
    %625 = vector.load %arg2[%c3_372, %c0_373] : memref<9x256xf32, #tpu.memory_space<vmem>>, vector<1x256xf32>
    %626 = vector.broadcast %625 : vector<1x256xf32> to vector<16x256xf32>
    %627 = arith.mulf %624, %626 : vector<16x256xf32>
    %c48_374 = arith.constant 48 : index
    %c0_375 = arith.constant 0 : index
    %628 = vector.load %arg13[%c48_374, %c0_375] : memref<144x256xf32, #tpu.memory_space<vmem>>, vector<16x256xf32>
    tpu.vector_store %arg13[%c48_374, %c0_375], %627 {strides = array<i32>} : memref<144x256xf32, #tpu.memory_space<vmem>>, vector<16x256xf32>,
    %c4_376 = arith.constant 4 : index
    %c0_377 = arith.constant 0 : index
    %629 = vector.load %arg2[%c4_376, %c0_377] : memref<9x256xf32, #tpu.memory_space<vmem>>, vector<1x256xf32>
    %630 = vector.broadcast %629 : vector<1x256xf32> to vector<16x256xf32>
    %631 = arith.mulf %600, %630 : vector<16x256xf32>
    %c64_378 = arith.constant 64 : index
    %c0_379 = arith.constant 0 : index
    %632 = vector.load %arg13[%c64_378, %c0_379] : memref<144x256xf32, #tpu.memory_space<vmem>>, vector<16x256xf32>
    tpu.vector_store %arg13[%c64_378, %c0_379], %631 {strides = array<i32>} : memref<144x256xf32, #tpu.memory_space<vmem>>, vector<16x256xf32>,
    %633 = vector.extract_strided_slice %600 {offsets = [0, 1], sizes = [16, 255], strides = [1, 1]} : vector<16x256xf32> to vector<16x255xf32>
    %634 = vector.extract_strided_slice %600 {offsets = [0, 0], sizes = [16, 1], strides = [1, 1]} : vector<16x256xf32> to vector<16x1xf32>
    %635 = tpu.concatenate %633, %634 in 1 : vector<16x255xf32>, vector<16x1xf32> -> vector<16x256xf32>
    %c5_380 = arith.constant 5 : index
    %c0_381 = arith.constant 0 : index
    %636 = vector.load %arg2[%c5_380, %c0_381] : memref<9x256xf32, #tpu.memory_space<vmem>>, vector<1x256xf32>
    %637 = vector.broadcast %636 : vector<1x256xf32> to vector<16x256xf32>
    %638 = arith.mulf %635, %637 : vector<16x256xf32>
    %c80_382 = arith.constant 80 : index
    %c0_383 = arith.constant 0 : index
    %639 = vector.load %arg13[%c80_382, %c0_383] : memref<144x256xf32, #tpu.memory_space<vmem>>, vector<16x256xf32>
    tpu.vector_store %arg13[%c80_382, %c0_383], %638 {strides = array<i32>} : memref<144x256xf32, #tpu.memory_space<vmem>>, vector<16x256xf32>,
    %640 = vector.extract_strided_slice %600 {offsets = [0, 15], sizes = [16, 241], strides = [1, 1]} : vector<16x256xf32> to vector<16x241xf32>
    %641 = vector.extract_strided_slice %600 {offsets = [0, 0], sizes = [16, 15], strides = [1, 1]} : vector<16x256xf32> to vector<16x15xf32>
    %642 = tpu.concatenate %640, %641 in 1 : vector<16x241xf32>, vector<16x15xf32> -> vector<16x256xf32>
    %c6_384 = arith.constant 6 : index
    %c0_385 = arith.constant 0 : index
    %643 = vector.load %arg2[%c6_384, %c0_385] : memref<9x256xf32, #tpu.memory_space<vmem>>, vector<1x256xf32>
    %644 = vector.broadcast %643 : vector<1x256xf32> to vector<16x256xf32>
    %645 = arith.mulf %642, %644 : vector<16x256xf32>
    %c96_386 = arith.constant 96 : index
    %c0_387 = arith.constant 0 : index
    %646 = vector.load %arg13[%c96_386, %c0_387] : memref<144x256xf32, #tpu.memory_space<vmem>>, vector<16x256xf32>
    tpu.vector_store %arg13[%c96_386, %c0_387], %645 {strides = array<i32>} : memref<144x256xf32, #tpu.memory_space<vmem>>, vector<16x256xf32>,
    %647 = vector.extract_strided_slice %600 {offsets = [0, 16], sizes = [16, 240], strides = [1, 1]} : vector<16x256xf32> to vector<16x240xf32>
    %648 = vector.extract_strided_slice %600 {offsets = [0, 0], sizes = [16, 16], strides = [1, 1]} : vector<16x256xf32> to vector<16x16xf32>
    %649 = tpu.concatenate %647, %648 in 1 : vector<16x240xf32>, vector<16x16xf32> -> vector<16x256xf32>
    %c7_388 = arith.constant 7 : index
    %c0_389 = arith.constant 0 : index
    %650 = vector.load %arg2[%c7_388, %c0_389] : memref<9x256xf32, #tpu.memory_space<vmem>>, vector<1x256xf32>
    %651 = vector.broadcast %650 : vector<1x256xf32> to vector<16x256xf32>
    %652 = arith.mulf %649, %651 : vector<16x256xf32>
    %c112_390 = arith.constant 112 : index
    %c0_391 = arith.constant 0 : index
    %653 = vector.load %arg13[%c112_390, %c0_391] : memref<144x256xf32, #tpu.memory_space<vmem>>, vector<16x256xf32>
    tpu.vector_store %arg13[%c112_390, %c0_391], %652 {strides = array<i32>} : memref<144x256xf32, #tpu.memory_space<vmem>>, vector<16x256xf32>,
    %654 = vector.extract_strided_slice %600 {offsets = [0, 17], sizes = [16, 239], strides = [1, 1]} : vector<16x256xf32> to vector<16x239xf32>
    %655 = vector.extract_strided_slice %600 {offsets = [0, 0], sizes = [16, 17], strides = [1, 1]} : vector<16x256xf32> to vector<16x17xf32>
    %656 = tpu.concatenate %654, %655 in 1 : vector<16x239xf32>, vector<16x17xf32> -> vector<16x256xf32>
    %c8_392 = arith.constant 8 : index
    %c0_393 = arith.constant 0 : index
    %657 = vector.load %arg2[%c8_392, %c0_393] : memref<9x256xf32, #tpu.memory_space<vmem>>, vector<1x256xf32>
    %658 = vector.broadcast %657 : vector<1x256xf32> to vector<16x256xf32>
    %659 = arith.mulf %656, %658 : vector<16x256xf32>
    %c128_394 = arith.constant 128 : index
    %c0_395 = arith.constant 0 : index
    %660 = vector.load %arg13[%c128_394, %c0_395] : memref<144x256xf32, #tpu.memory_space<vmem>>, vector<16x256xf32>
    tpu.vector_store %arg13[%c128_394, %c0_395], %659 {strides = array<i32>} : memref<144x256xf32, #tpu.memory_space<vmem>>, vector<16x256xf32>,
    %c0_396 = arith.constant 0 : index
    %c0_397 = arith.constant 0 : index
    %661 = vector.load %arg13[%c0_396, %c0_397] : memref<144x256xf32, #tpu.memory_space<vmem>>, vector<144x256xf32>
    %cst_398 = arith.constant dense<0.000000e+00> : vector<16x256xf32>
    %662 = tpu.matmul %4, %661, %cst_398 {dimension_numbers = #tpu.dot_dimension_numbers<[1], [0], [0], [1], [0, 0, 1, 1], [], []>} : vector<16x144xf32>, vector<144x256xf32>, vector<16x256xf32> -> vector<16x256xf32>
    %663 = vector.broadcast %5 : vector<16x1xf32> to vector<16x256xf32>
    %664 = arith.addf %662, %663 : vector<16x256xf32>
    %cst_399 = arith.constant 0.000000e+00 : f32
    %665 = vector.broadcast %cst_399 : f32 to vector<16x256xf32>
    %666 = arith.maximumf %664, %665 : vector<16x256xf32>
    %667 = vector.extract_strided_slice %666 {offsets = [0, 239], sizes = [16, 17], strides = [1, 1]} : vector<16x256xf32> to vector<16x17xf32>
    %668 = vector.extract_strided_slice %666 {offsets = [0, 0], sizes = [16, 239], strides = [1, 1]} : vector<16x256xf32> to vector<16x239xf32>
    %669 = tpu.concatenate %667, %668 in 1 : vector<16x17xf32>, vector<16x239xf32> -> vector<16x256xf32>
    %c0_400 = arith.constant 0 : index
    %c0_401 = arith.constant 0 : index
    %670 = vector.load %arg2[%c0_400, %c0_401] : memref<9x256xf32, #tpu.memory_space<vmem>>, vector<1x256xf32>
    %671 = vector.broadcast %670 : vector<1x256xf32> to vector<16x256xf32>
    %672 = arith.mulf %669, %671 : vector<16x256xf32>
    %c0_402 = arith.constant 0 : index
    %c0_403 = arith.constant 0 : index
    %673 = vector.load %arg13[%c0_402, %c0_403] : memref<144x256xf32, #tpu.memory_space<vmem>>, vector<16x256xf32>
    tpu.vector_store %arg13[%c0_402, %c0_403], %672 {strides = array<i32>} : memref<144x256xf32, #tpu.memory_space<vmem>>, vector<16x256xf32>,
    %674 = vector.extract_strided_slice %666 {offsets = [0, 240], sizes = [16, 16], strides = [1, 1]} : vector<16x256xf32> to vector<16x16xf32>
    %675 = vector.extract_strided_slice %666 {offsets = [0, 0], sizes = [16, 240], strides = [1, 1]} : vector<16x256xf32> to vector<16x240xf32>
    %676 = tpu.concatenate %674, %675 in 1 : vector<16x16xf32>, vector<16x240xf32> -> vector<16x256xf32>
    %c1_404 = arith.constant 1 : index
    %c0_405 = arith.constant 0 : index
    %677 = vector.load %arg2[%c1_404, %c0_405] : memref<9x256xf32, #tpu.memory_space<vmem>>, vector<1x256xf32>
    %678 = vector.broadcast %677 : vector<1x256xf32> to vector<16x256xf32>
    %679 = arith.mulf %676, %678 : vector<16x256xf32>
    %c16_406 = arith.constant 16 : index
    %c0_407 = arith.constant 0 : index
    %680 = vector.load %arg13[%c16_406, %c0_407] : memref<144x256xf32, #tpu.memory_space<vmem>>, vector<16x256xf32>
    tpu.vector_store %arg13[%c16_406, %c0_407], %679 {strides = array<i32>} : memref<144x256xf32, #tpu.memory_space<vmem>>, vector<16x256xf32>,
    %681 = vector.extract_strided_slice %666 {offsets = [0, 241], sizes = [16, 15], strides = [1, 1]} : vector<16x256xf32> to vector<16x15xf32>
    %682 = vector.extract_strided_slice %666 {offsets = [0, 0], sizes = [16, 241], strides = [1, 1]} : vector<16x256xf32> to vector<16x241xf32>
    %683 = tpu.concatenate %681, %682 in 1 : vector<16x15xf32>, vector<16x241xf32> -> vector<16x256xf32>
    %c2_408 = arith.constant 2 : index
    %c0_409 = arith.constant 0 : index
    %684 = vector.load %arg2[%c2_408, %c0_409] : memref<9x256xf32, #tpu.memory_space<vmem>>, vector<1x256xf32>
    %685 = vector.broadcast %684 : vector<1x256xf32> to vector<16x256xf32>
    %686 = arith.mulf %683, %685 : vector<16x256xf32>
    %c32_410 = arith.constant 32 : index
    %c0_411 = arith.constant 0 : index
    %687 = vector.load %arg13[%c32_410, %c0_411] : memref<144x256xf32, #tpu.memory_space<vmem>>, vector<16x256xf32>
    tpu.vector_store %arg13[%c32_410, %c0_411], %686 {strides = array<i32>} : memref<144x256xf32, #tpu.memory_space<vmem>>, vector<16x256xf32>,
    %688 = vector.extract_strided_slice %666 {offsets = [0, 255], sizes = [16, 1], strides = [1, 1]} : vector<16x256xf32> to vector<16x1xf32>
    %689 = vector.extract_strided_slice %666 {offsets = [0, 0], sizes = [16, 255], strides = [1, 1]} : vector<16x256xf32> to vector<16x255xf32>
    %690 = tpu.concatenate %688, %689 in 1 : vector<16x1xf32>, vector<16x255xf32> -> vector<16x256xf32>
    %c3_412 = arith.constant 3 : index
    %c0_413 = arith.constant 0 : index
    %691 = vector.load %arg2[%c3_412, %c0_413] : memref<9x256xf32, #tpu.memory_space<vmem>>, vector<1x256xf32>
    %692 = vector.broadcast %691 : vector<1x256xf32> to vector<16x256xf32>
    %693 = arith.mulf %690, %692 : vector<16x256xf32>
    %c48_414 = arith.constant 48 : index
    %c0_415 = arith.constant 0 : index
    %694 = vector.load %arg13[%c48_414, %c0_415] : memref<144x256xf32, #tpu.memory_space<vmem>>, vector<16x256xf32>
    tpu.vector_store %arg13[%c48_414, %c0_415], %693 {strides = array<i32>} : memref<144x256xf32, #tpu.memory_space<vmem>>, vector<16x256xf32>,
    %c4_416 = arith.constant 4 : index
    %c0_417 = arith.constant 0 : index
    %695 = vector.load %arg2[%c4_416, %c0_417] : memref<9x256xf32, #tpu.memory_space<vmem>>, vector<1x256xf32>
    %696 = vector.broadcast %695 : vector<1x256xf32> to vector<16x256xf32>
    %697 = arith.mulf %666, %696 : vector<16x256xf32>
    %c64_418 = arith.constant 64 : index
    %c0_419 = arith.constant 0 : index
    %698 = vector.load %arg13[%c64_418, %c0_419] : memref<144x256xf32, #tpu.memory_space<vmem>>, vector<16x256xf32>
    tpu.vector_store %arg13[%c64_418, %c0_419], %697 {strides = array<i32>} : memref<144x256xf32, #tpu.memory_space<vmem>>, vector<16x256xf32>,
    %699 = vector.extract_strided_slice %666 {offsets = [0, 1], sizes = [16, 255], strides = [1, 1]} : vector<16x256xf32> to vector<16x255xf32>
    %700 = vector.extract_strided_slice %666 {offsets = [0, 0], sizes = [16, 1], strides = [1, 1]} : vector<16x256xf32> to vector<16x1xf32>
    %701 = tpu.concatenate %699, %700 in 1 : vector<16x255xf32>, vector<16x1xf32> -> vector<16x256xf32>
    %c5_420 = arith.constant 5 : index
    %c0_421 = arith.constant 0 : index
    %702 = vector.load %arg2[%c5_420, %c0_421] : memref<9x256xf32, #tpu.memory_space<vmem>>, vector<1x256xf32>
    %703 = vector.broadcast %702 : vector<1x256xf32> to vector<16x256xf32>
    %704 = arith.mulf %701, %703 : vector<16x256xf32>
    %c80_422 = arith.constant 80 : index
    %c0_423 = arith.constant 0 : index
    %705 = vector.load %arg13[%c80_422, %c0_423] : memref<144x256xf32, #tpu.memory_space<vmem>>, vector<16x256xf32>
    tpu.vector_store %arg13[%c80_422, %c0_423], %704 {strides = array<i32>} : memref<144x256xf32, #tpu.memory_space<vmem>>, vector<16x256xf32>,
    %706 = vector.extract_strided_slice %666 {offsets = [0, 15], sizes = [16, 241], strides = [1, 1]} : vector<16x256xf32> to vector<16x241xf32>
    %707 = vector.extract_strided_slice %666 {offsets = [0, 0], sizes = [16, 15], strides = [1, 1]} : vector<16x256xf32> to vector<16x15xf32>
    %708 = tpu.concatenate %706, %707 in 1 : vector<16x241xf32>, vector<16x15xf32> -> vector<16x256xf32>
    %c6_424 = arith.constant 6 : index
    %c0_425 = arith.constant 0 : index
    %709 = vector.load %arg2[%c6_424, %c0_425] : memref<9x256xf32, #tpu.memory_space<vmem>>, vector<1x256xf32>
    %710 = vector.broadcast %709 : vector<1x256xf32> to vector<16x256xf32>
    %711 = arith.mulf %708, %710 : vector<16x256xf32>
    %c96_426 = arith.constant 96 : index
    %c0_427 = arith.constant 0 : index
    %712 = vector.load %arg13[%c96_426, %c0_427] : memref<144x256xf32, #tpu.memory_space<vmem>>, vector<16x256xf32>
    tpu.vector_store %arg13[%c96_426, %c0_427], %711 {strides = array<i32>} : memref<144x256xf32, #tpu.memory_space<vmem>>, vector<16x256xf32>,
    %713 = vector.extract_strided_slice %666 {offsets = [0, 16], sizes = [16, 240], strides = [1, 1]} : vector<16x256xf32> to vector<16x240xf32>
    %714 = vector.extract_strided_slice %666 {offsets = [0, 0], sizes = [16, 16], strides = [1, 1]} : vector<16x256xf32> to vector<16x16xf32>
    %715 = tpu.concatenate %713, %714 in 1 : vector<16x240xf32>, vector<16x16xf32> -> vector<16x256xf32>
    %c7_428 = arith.constant 7 : index
    %c0_429 = arith.constant 0 : index
    %716 = vector.load %arg2[%c7_428, %c0_429] : memref<9x256xf32, #tpu.memory_space<vmem>>, vector<1x256xf32>
    %717 = vector.broadcast %716 : vector<1x256xf32> to vector<16x256xf32>
    %718 = arith.mulf %715, %717 : vector<16x256xf32>
    %c112_430 = arith.constant 112 : index
    %c0_431 = arith.constant 0 : index
    %719 = vector.load %arg13[%c112_430, %c0_431] : memref<144x256xf32, #tpu.memory_space<vmem>>, vector<16x256xf32>
    tpu.vector_store %arg13[%c112_430, %c0_431], %718 {strides = array<i32>} : memref<144x256xf32, #tpu.memory_space<vmem>>, vector<16x256xf32>,
    %720 = vector.extract_strided_slice %666 {offsets = [0, 17], sizes = [16, 239], strides = [1, 1]} : vector<16x256xf32> to vector<16x239xf32>
    %721 = vector.extract_strided_slice %666 {offsets = [0, 0], sizes = [16, 17], strides = [1, 1]} : vector<16x256xf32> to vector<16x17xf32>
    %722 = tpu.concatenate %720, %721 in 1 : vector<16x239xf32>, vector<16x17xf32> -> vector<16x256xf32>
    %c8_432 = arith.constant 8 : index
    %c0_433 = arith.constant 0 : index
    %723 = vector.load %arg2[%c8_432, %c0_433] : memref<9x256xf32, #tpu.memory_space<vmem>>, vector<1x256xf32>
    %724 = vector.broadcast %723 : vector<1x256xf32> to vector<16x256xf32>
    %725 = arith.mulf %722, %724 : vector<16x256xf32>
    %c128_434 = arith.constant 128 : index
    %c0_435 = arith.constant 0 : index
    %726 = vector.load %arg13[%c128_434, %c0_435] : memref<144x256xf32, #tpu.memory_space<vmem>>, vector<16x256xf32>
    tpu.vector_store %arg13[%c128_434, %c0_435], %725 {strides = array<i32>} : memref<144x256xf32, #tpu.memory_space<vmem>>, vector<16x256xf32>,
    %c0_436 = arith.constant 0 : index
    %c0_437 = arith.constant 0 : index
    %727 = vector.load %arg13[%c0_436, %c0_437] : memref<144x256xf32, #tpu.memory_space<vmem>>, vector<144x256xf32>
    %cst_438 = arith.constant dense<0.000000e+00> : vector<16x256xf32>
    %728 = tpu.matmul %6, %727, %cst_438 {dimension_numbers = #tpu.dot_dimension_numbers<[1], [0], [0], [1], [0, 0, 1, 1], [], []>} : vector<16x144xf32>, vector<144x256xf32>, vector<16x256xf32> -> vector<16x256xf32>
    %729 = vector.broadcast %7 : vector<16x1xf32> to vector<16x256xf32>
    %730 = arith.addf %728, %729 : vector<16x256xf32>
    %c4_439 = arith.constant 4 : index
    %731 = memref.load %arg11[%c4_439] : memref<7xf32, #tpu.memory_space<smem>>
    %732 = vector.broadcast %731 : f32 to vector<16x256xf32>
    %733 = arith.mulf %730, %732 : vector<16x256xf32>
    %734 = arith.addf %600, %733 : vector<16x256xf32>
    %735 = vector.extract_strided_slice %734 {offsets = [0, 239], sizes = [16, 17], strides = [1, 1]} : vector<16x256xf32> to vector<16x17xf32>
    %736 = vector.extract_strided_slice %734 {offsets = [0, 0], sizes = [16, 239], strides = [1, 1]} : vector<16x256xf32> to vector<16x239xf32>
    %737 = tpu.concatenate %735, %736 in 1 : vector<16x17xf32>, vector<16x239xf32> -> vector<16x256xf32>
    %c0_440 = arith.constant 0 : index
    %c0_441 = arith.constant 0 : index
    %738 = vector.load %arg2[%c0_440, %c0_441] : memref<9x256xf32, #tpu.memory_space<vmem>>, vector<1x256xf32>
    %739 = vector.broadcast %738 : vector<1x256xf32> to vector<16x256xf32>
    %740 = arith.mulf %737, %739 : vector<16x256xf32>
    %c0_442 = arith.constant 0 : index
    %c0_443 = arith.constant 0 : index
    %741 = vector.load %arg13[%c0_442, %c0_443] : memref<144x256xf32, #tpu.memory_space<vmem>>, vector<16x256xf32>
    tpu.vector_store %arg13[%c0_442, %c0_443], %740 {strides = array<i32>} : memref<144x256xf32, #tpu.memory_space<vmem>>, vector<16x256xf32>,
    %742 = vector.extract_strided_slice %734 {offsets = [0, 240], sizes = [16, 16], strides = [1, 1]} : vector<16x256xf32> to vector<16x16xf32>
    %743 = vector.extract_strided_slice %734 {offsets = [0, 0], sizes = [16, 240], strides = [1, 1]} : vector<16x256xf32> to vector<16x240xf32>
    %744 = tpu.concatenate %742, %743 in 1 : vector<16x16xf32>, vector<16x240xf32> -> vector<16x256xf32>
    %c1_444 = arith.constant 1 : index
    %c0_445 = arith.constant 0 : index
    %745 = vector.load %arg2[%c1_444, %c0_445] : memref<9x256xf32, #tpu.memory_space<vmem>>, vector<1x256xf32>
    %746 = vector.broadcast %745 : vector<1x256xf32> to vector<16x256xf32>
    %747 = arith.mulf %744, %746 : vector<16x256xf32>
    %c16_446 = arith.constant 16 : index
    %c0_447 = arith.constant 0 : index
    %748 = vector.load %arg13[%c16_446, %c0_447] : memref<144x256xf32, #tpu.memory_space<vmem>>, vector<16x256xf32>
    tpu.vector_store %arg13[%c16_446, %c0_447], %747 {strides = array<i32>} : memref<144x256xf32, #tpu.memory_space<vmem>>, vector<16x256xf32>,
    %749 = vector.extract_strided_slice %734 {offsets = [0, 241], sizes = [16, 15], strides = [1, 1]} : vector<16x256xf32> to vector<16x15xf32>
    %750 = vector.extract_strided_slice %734 {offsets = [0, 0], sizes = [16, 241], strides = [1, 1]} : vector<16x256xf32> to vector<16x241xf32>
    %751 = tpu.concatenate %749, %750 in 1 : vector<16x15xf32>, vector<16x241xf32> -> vector<16x256xf32>
    %c2_448 = arith.constant 2 : index
    %c0_449 = arith.constant 0 : index
    %752 = vector.load %arg2[%c2_448, %c0_449] : memref<9x256xf32, #tpu.memory_space<vmem>>, vector<1x256xf32>
    %753 = vector.broadcast %752 : vector<1x256xf32> to vector<16x256xf32>
    %754 = arith.mulf %751, %753 : vector<16x256xf32>
    %c32_450 = arith.constant 32 : index
    %c0_451 = arith.constant 0 : index
    %755 = vector.load %arg13[%c32_450, %c0_451] : memref<144x256xf32, #tpu.memory_space<vmem>>, vector<16x256xf32>
    tpu.vector_store %arg13[%c32_450, %c0_451], %754 {strides = array<i32>} : memref<144x256xf32, #tpu.memory_space<vmem>>, vector<16x256xf32>,
    %756 = vector.extract_strided_slice %734 {offsets = [0, 255], sizes = [16, 1], strides = [1, 1]} : vector<16x256xf32> to vector<16x1xf32>
    %757 = vector.extract_strided_slice %734 {offsets = [0, 0], sizes = [16, 255], strides = [1, 1]} : vector<16x256xf32> to vector<16x255xf32>
    %758 = tpu.concatenate %756, %757 in 1 : vector<16x1xf32>, vector<16x255xf32> -> vector<16x256xf32>
    %c3_452 = arith.constant 3 : index
    %c0_453 = arith.constant 0 : index
    %759 = vector.load %arg2[%c3_452, %c0_453] : memref<9x256xf32, #tpu.memory_space<vmem>>, vector<1x256xf32>
    %760 = vector.broadcast %759 : vector<1x256xf32> to vector<16x256xf32>
    %761 = arith.mulf %758, %760 : vector<16x256xf32>
    %c48_454 = arith.constant 48 : index
    %c0_455 = arith.constant 0 : index
    %762 = vector.load %arg13[%c48_454, %c0_455] : memref<144x256xf32, #tpu.memory_space<vmem>>, vector<16x256xf32>
    tpu.vector_store %arg13[%c48_454, %c0_455], %761 {strides = array<i32>} : memref<144x256xf32, #tpu.memory_space<vmem>>, vector<16x256xf32>,
    %c4_456 = arith.constant 4 : index
    %c0_457 = arith.constant 0 : index
    %763 = vector.load %arg2[%c4_456, %c0_457] : memref<9x256xf32, #tpu.memory_space<vmem>>, vector<1x256xf32>
    %764 = vector.broadcast %763 : vector<1x256xf32> to vector<16x256xf32>
    %765 = arith.mulf %734, %764 : vector<16x256xf32>
    %c64_458 = arith.constant 64 : index
    %c0_459 = arith.constant 0 : index
    %766 = vector.load %arg13[%c64_458, %c0_459] : memref<144x256xf32, #tpu.memory_space<vmem>>, vector<16x256xf32>
    tpu.vector_store %arg13[%c64_458, %c0_459], %765 {strides = array<i32>} : memref<144x256xf32, #tpu.memory_space<vmem>>, vector<16x256xf32>,
    %767 = vector.extract_strided_slice %734 {offsets = [0, 1], sizes = [16, 255], strides = [1, 1]} : vector<16x256xf32> to vector<16x255xf32>
    %768 = vector.extract_strided_slice %734 {offsets = [0, 0], sizes = [16, 1], strides = [1, 1]} : vector<16x256xf32> to vector<16x1xf32>
    %769 = tpu.concatenate %767, %768 in 1 : vector<16x255xf32>, vector<16x1xf32> -> vector<16x256xf32>
    %c5_460 = arith.constant 5 : index
    %c0_461 = arith.constant 0 : index
    %770 = vector.load %arg2[%c5_460, %c0_461] : memref<9x256xf32, #tpu.memory_space<vmem>>, vector<1x256xf32>
    %771 = vector.broadcast %770 : vector<1x256xf32> to vector<16x256xf32>
    %772 = arith.mulf %769, %771 : vector<16x256xf32>
    %c80_462 = arith.constant 80 : index
    %c0_463 = arith.constant 0 : index
    %773 = vector.load %arg13[%c80_462, %c0_463] : memref<144x256xf32, #tpu.memory_space<vmem>>, vector<16x256xf32>
    tpu.vector_store %arg13[%c80_462, %c0_463], %772 {strides = array<i32>} : memref<144x256xf32, #tpu.memory_space<vmem>>, vector<16x256xf32>,
    %774 = vector.extract_strided_slice %734 {offsets = [0, 15], sizes = [16, 241], strides = [1, 1]} : vector<16x256xf32> to vector<16x241xf32>
    %775 = vector.extract_strided_slice %734 {offsets = [0, 0], sizes = [16, 15], strides = [1, 1]} : vector<16x256xf32> to vector<16x15xf32>
    %776 = tpu.concatenate %774, %775 in 1 : vector<16x241xf32>, vector<16x15xf32> -> vector<16x256xf32>
    %c6_464 = arith.constant 6 : index
    %c0_465 = arith.constant 0 : index
    %777 = vector.load %arg2[%c6_464, %c0_465] : memref<9x256xf32, #tpu.memory_space<vmem>>, vector<1x256xf32>
    %778 = vector.broadcast %777 : vector<1x256xf32> to vector<16x256xf32>
    %779 = arith.mulf %776, %778 : vector<16x256xf32>
    %c96_466 = arith.constant 96 : index
    %c0_467 = arith.constant 0 : index
    %780 = vector.load %arg13[%c96_466, %c0_467] : memref<144x256xf32, #tpu.memory_space<vmem>>, vector<16x256xf32>
    tpu.vector_store %arg13[%c96_466, %c0_467], %779 {strides = array<i32>} : memref<144x256xf32, #tpu.memory_space<vmem>>, vector<16x256xf32>,
    %781 = vector.extract_strided_slice %734 {offsets = [0, 16], sizes = [16, 240], strides = [1, 1]} : vector<16x256xf32> to vector<16x240xf32>
    %782 = vector.extract_strided_slice %734 {offsets = [0, 0], sizes = [16, 16], strides = [1, 1]} : vector<16x256xf32> to vector<16x16xf32>
    %783 = tpu.concatenate %781, %782 in 1 : vector<16x240xf32>, vector<16x16xf32> -> vector<16x256xf32>
    %c7_468 = arith.constant 7 : index
    %c0_469 = arith.constant 0 : index
    %784 = vector.load %arg2[%c7_468, %c0_469] : memref<9x256xf32, #tpu.memory_space<vmem>>, vector<1x256xf32>
    %785 = vector.broadcast %784 : vector<1x256xf32> to vector<16x256xf32>
    %786 = arith.mulf %783, %785 : vector<16x256xf32>
    %c112_470 = arith.constant 112 : index
    %c0_471 = arith.constant 0 : index
    %787 = vector.load %arg13[%c112_470, %c0_471] : memref<144x256xf32, #tpu.memory_space<vmem>>, vector<16x256xf32>
    tpu.vector_store %arg13[%c112_470, %c0_471], %786 {strides = array<i32>} : memref<144x256xf32, #tpu.memory_space<vmem>>, vector<16x256xf32>,
    %788 = vector.extract_strided_slice %734 {offsets = [0, 17], sizes = [16, 239], strides = [1, 1]} : vector<16x256xf32> to vector<16x239xf32>
    %789 = vector.extract_strided_slice %734 {offsets = [0, 0], sizes = [16, 17], strides = [1, 1]} : vector<16x256xf32> to vector<16x17xf32>
    %790 = tpu.concatenate %788, %789 in 1 : vector<16x239xf32>, vector<16x17xf32> -> vector<16x256xf32>
    %c8_472 = arith.constant 8 : index
    %c0_473 = arith.constant 0 : index
    %791 = vector.load %arg2[%c8_472, %c0_473] : memref<9x256xf32, #tpu.memory_space<vmem>>, vector<1x256xf32>
    %792 = vector.broadcast %791 : vector<1x256xf32> to vector<16x256xf32>
    %793 = arith.mulf %790, %792 : vector<16x256xf32>
    %c128_474 = arith.constant 128 : index
    %c0_475 = arith.constant 0 : index
    %794 = vector.load %arg13[%c128_474, %c0_475] : memref<144x256xf32, #tpu.memory_space<vmem>>, vector<16x256xf32>
    tpu.vector_store %arg13[%c128_474, %c0_475], %793 {strides = array<i32>} : memref<144x256xf32, #tpu.memory_space<vmem>>, vector<16x256xf32>,
    %c0_476 = arith.constant 0 : index
    %c0_477 = arith.constant 0 : index
    %795 = vector.load %arg13[%c0_476, %c0_477] : memref<144x256xf32, #tpu.memory_space<vmem>>, vector<144x256xf32>
    %cst_478 = arith.constant dense<0.000000e+00> : vector<16x256xf32>
    %796 = tpu.matmul %4, %795, %cst_478 {dimension_numbers = #tpu.dot_dimension_numbers<[1], [0], [0], [1], [0, 0, 1, 1], [], []>} : vector<16x144xf32>, vector<144x256xf32>, vector<16x256xf32> -> vector<16x256xf32>
    %797 = vector.broadcast %5 : vector<16x1xf32> to vector<16x256xf32>
    %798 = arith.addf %796, %797 : vector<16x256xf32>
    %cst_479 = arith.constant 0.000000e+00 : f32
    %799 = vector.broadcast %cst_479 : f32 to vector<16x256xf32>
    %800 = arith.maximumf %798, %799 : vector<16x256xf32>
    %801 = vector.extract_strided_slice %800 {offsets = [0, 239], sizes = [16, 17], strides = [1, 1]} : vector<16x256xf32> to vector<16x17xf32>
    %802 = vector.extract_strided_slice %800 {offsets = [0, 0], sizes = [16, 239], strides = [1, 1]} : vector<16x256xf32> to vector<16x239xf32>
    %803 = tpu.concatenate %801, %802 in 1 : vector<16x17xf32>, vector<16x239xf32> -> vector<16x256xf32>
    %c0_480 = arith.constant 0 : index
    %c0_481 = arith.constant 0 : index
    %804 = vector.load %arg2[%c0_480, %c0_481] : memref<9x256xf32, #tpu.memory_space<vmem>>, vector<1x256xf32>
    %805 = vector.broadcast %804 : vector<1x256xf32> to vector<16x256xf32>
    %806 = arith.mulf %803, %805 : vector<16x256xf32>
    %c0_482 = arith.constant 0 : index
    %c0_483 = arith.constant 0 : index
    %807 = vector.load %arg13[%c0_482, %c0_483] : memref<144x256xf32, #tpu.memory_space<vmem>>, vector<16x256xf32>
    tpu.vector_store %arg13[%c0_482, %c0_483], %806 {strides = array<i32>} : memref<144x256xf32, #tpu.memory_space<vmem>>, vector<16x256xf32>,
    %808 = vector.extract_strided_slice %800 {offsets = [0, 240], sizes = [16, 16], strides = [1, 1]} : vector<16x256xf32> to vector<16x16xf32>
    %809 = vector.extract_strided_slice %800 {offsets = [0, 0], sizes = [16, 240], strides = [1, 1]} : vector<16x256xf32> to vector<16x240xf32>
    %810 = tpu.concatenate %808, %809 in 1 : vector<16x16xf32>, vector<16x240xf32> -> vector<16x256xf32>
    %c1_484 = arith.constant 1 : index
    %c0_485 = arith.constant 0 : index
    %811 = vector.load %arg2[%c1_484, %c0_485] : memref<9x256xf32, #tpu.memory_space<vmem>>, vector<1x256xf32>
    %812 = vector.broadcast %811 : vector<1x256xf32> to vector<16x256xf32>
    %813 = arith.mulf %810, %812 : vector<16x256xf32>
    %c16_486 = arith.constant 16 : index
    %c0_487 = arith.constant 0 : index
    %814 = vector.load %arg13[%c16_486, %c0_487] : memref<144x256xf32, #tpu.memory_space<vmem>>, vector<16x256xf32>
    tpu.vector_store %arg13[%c16_486, %c0_487], %813 {strides = array<i32>} : memref<144x256xf32, #tpu.memory_space<vmem>>, vector<16x256xf32>,
    %815 = vector.extract_strided_slice %800 {offsets = [0, 241], sizes = [16, 15], strides = [1, 1]} : vector<16x256xf32> to vector<16x15xf32>
    %816 = vector.extract_strided_slice %800 {offsets = [0, 0], sizes = [16, 241], strides = [1, 1]} : vector<16x256xf32> to vector<16x241xf32>
    %817 = tpu.concatenate %815, %816 in 1 : vector<16x15xf32>, vector<16x241xf32> -> vector<16x256xf32>
    %c2_488 = arith.constant 2 : index
    %c0_489 = arith.constant 0 : index
    %818 = vector.load %arg2[%c2_488, %c0_489] : memref<9x256xf32, #tpu.memory_space<vmem>>, vector<1x256xf32>
    %819 = vector.broadcast %818 : vector<1x256xf32> to vector<16x256xf32>
    %820 = arith.mulf %817, %819 : vector<16x256xf32>
    %c32_490 = arith.constant 32 : index
    %c0_491 = arith.constant 0 : index
    %821 = vector.load %arg13[%c32_490, %c0_491] : memref<144x256xf32, #tpu.memory_space<vmem>>, vector<16x256xf32>
    tpu.vector_store %arg13[%c32_490, %c0_491], %820 {strides = array<i32>} : memref<144x256xf32, #tpu.memory_space<vmem>>, vector<16x256xf32>,
    %822 = vector.extract_strided_slice %800 {offsets = [0, 255], sizes = [16, 1], strides = [1, 1]} : vector<16x256xf32> to vector<16x1xf32>
    %823 = vector.extract_strided_slice %800 {offsets = [0, 0], sizes = [16, 255], strides = [1, 1]} : vector<16x256xf32> to vector<16x255xf32>
    %824 = tpu.concatenate %822, %823 in 1 : vector<16x1xf32>, vector<16x255xf32> -> vector<16x256xf32>
    %c3_492 = arith.constant 3 : index
    %c0_493 = arith.constant 0 : index
    %825 = vector.load %arg2[%c3_492, %c0_493] : memref<9x256xf32, #tpu.memory_space<vmem>>, vector<1x256xf32>
    %826 = vector.broadcast %825 : vector<1x256xf32> to vector<16x256xf32>
    %827 = arith.mulf %824, %826 : vector<16x256xf32>
    %c48_494 = arith.constant 48 : index
    %c0_495 = arith.constant 0 : index
    %828 = vector.load %arg13[%c48_494, %c0_495] : memref<144x256xf32, #tpu.memory_space<vmem>>, vector<16x256xf32>
    tpu.vector_store %arg13[%c48_494, %c0_495], %827 {strides = array<i32>} : memref<144x256xf32, #tpu.memory_space<vmem>>, vector<16x256xf32>,
    %c4_496 = arith.constant 4 : index
    %c0_497 = arith.constant 0 : index
    %829 = vector.load %arg2[%c4_496, %c0_497] : memref<9x256xf32, #tpu.memory_space<vmem>>, vector<1x256xf32>
    %830 = vector.broadcast %829 : vector<1x256xf32> to vector<16x256xf32>
    %831 = arith.mulf %800, %830 : vector<16x256xf32>
    %c64_498 = arith.constant 64 : index
    %c0_499 = arith.constant 0 : index
    %832 = vector.load %arg13[%c64_498, %c0_499] : memref<144x256xf32, #tpu.memory_space<vmem>>, vector<16x256xf32>
    tpu.vector_store %arg13[%c64_498, %c0_499], %831 {strides = array<i32>} : memref<144x256xf32, #tpu.memory_space<vmem>>, vector<16x256xf32>,
    %833 = vector.extract_strided_slice %800 {offsets = [0, 1], sizes = [16, 255], strides = [1, 1]} : vector<16x256xf32> to vector<16x255xf32>
    %834 = vector.extract_strided_slice %800 {offsets = [0, 0], sizes = [16, 1], strides = [1, 1]} : vector<16x256xf32> to vector<16x1xf32>
    %835 = tpu.concatenate %833, %834 in 1 : vector<16x255xf32>, vector<16x1xf32> -> vector<16x256xf32>
    %c5_500 = arith.constant 5 : index
    %c0_501 = arith.constant 0 : index
    %836 = vector.load %arg2[%c5_500, %c0_501] : memref<9x256xf32, #tpu.memory_space<vmem>>, vector<1x256xf32>
    %837 = vector.broadcast %836 : vector<1x256xf32> to vector<16x256xf32>
    %838 = arith.mulf %835, %837 : vector<16x256xf32>
    %c80_502 = arith.constant 80 : index
    %c0_503 = arith.constant 0 : index
    %839 = vector.load %arg13[%c80_502, %c0_503] : memref<144x256xf32, #tpu.memory_space<vmem>>, vector<16x256xf32>
    tpu.vector_store %arg13[%c80_502, %c0_503], %838 {strides = array<i32>} : memref<144x256xf32, #tpu.memory_space<vmem>>, vector<16x256xf32>,
    %840 = vector.extract_strided_slice %800 {offsets = [0, 15], sizes = [16, 241], strides = [1, 1]} : vector<16x256xf32> to vector<16x241xf32>
    %841 = vector.extract_strided_slice %800 {offsets = [0, 0], sizes = [16, 15], strides = [1, 1]} : vector<16x256xf32> to vector<16x15xf32>
    %842 = tpu.concatenate %840, %841 in 1 : vector<16x241xf32>, vector<16x15xf32> -> vector<16x256xf32>
    %c6_504 = arith.constant 6 : index
    %c0_505 = arith.constant 0 : index
    %843 = vector.load %arg2[%c6_504, %c0_505] : memref<9x256xf32, #tpu.memory_space<vmem>>, vector<1x256xf32>
    %844 = vector.broadcast %843 : vector<1x256xf32> to vector<16x256xf32>
    %845 = arith.mulf %842, %844 : vector<16x256xf32>
    %c96_506 = arith.constant 96 : index
    %c0_507 = arith.constant 0 : index
    %846 = vector.load %arg13[%c96_506, %c0_507] : memref<144x256xf32, #tpu.memory_space<vmem>>, vector<16x256xf32>
    tpu.vector_store %arg13[%c96_506, %c0_507], %845 {strides = array<i32>} : memref<144x256xf32, #tpu.memory_space<vmem>>, vector<16x256xf32>,
    %847 = vector.extract_strided_slice %800 {offsets = [0, 16], sizes = [16, 240], strides = [1, 1]} : vector<16x256xf32> to vector<16x240xf32>
    %848 = vector.extract_strided_slice %800 {offsets = [0, 0], sizes = [16, 16], strides = [1, 1]} : vector<16x256xf32> to vector<16x16xf32>
    %849 = tpu.concatenate %847, %848 in 1 : vector<16x240xf32>, vector<16x16xf32> -> vector<16x256xf32>
    %c7_508 = arith.constant 7 : index
    %c0_509 = arith.constant 0 : index
    %850 = vector.load %arg2[%c7_508, %c0_509] : memref<9x256xf32, #tpu.memory_space<vmem>>, vector<1x256xf32>
    %851 = vector.broadcast %850 : vector<1x256xf32> to vector<16x256xf32>
    %852 = arith.mulf %849, %851 : vector<16x256xf32>
    %c112_510 = arith.constant 112 : index
    %c0_511 = arith.constant 0 : index
    %853 = vector.load %arg13[%c112_510, %c0_511] : memref<144x256xf32, #tpu.memory_space<vmem>>, vector<16x256xf32>
    tpu.vector_store %arg13[%c112_510, %c0_511], %852 {strides = array<i32>} : memref<144x256xf32, #tpu.memory_space<vmem>>, vector<16x256xf32>,
    %854 = vector.extract_strided_slice %800 {offsets = [0, 17], sizes = [16, 239], strides = [1, 1]} : vector<16x256xf32> to vector<16x239xf32>
    %855 = vector.extract_strided_slice %800 {offsets = [0, 0], sizes = [16, 17], strides = [1, 1]} : vector<16x256xf32> to vector<16x17xf32>
    %856 = tpu.concatenate %854, %855 in 1 : vector<16x239xf32>, vector<16x17xf32> -> vector<16x256xf32>
    %c8_512 = arith.constant 8 : index
    %c0_513 = arith.constant 0 : index
    %857 = vector.load %arg2[%c8_512, %c0_513] : memref<9x256xf32, #tpu.memory_space<vmem>>, vector<1x256xf32>
    %858 = vector.broadcast %857 : vector<1x256xf32> to vector<16x256xf32>
    %859 = arith.mulf %856, %858 : vector<16x256xf32>
    %c128_514 = arith.constant 128 : index
    %c0_515 = arith.constant 0 : index
    %860 = vector.load %arg13[%c128_514, %c0_515] : memref<144x256xf32, #tpu.memory_space<vmem>>, vector<16x256xf32>
    tpu.vector_store %arg13[%c128_514, %c0_515], %859 {strides = array<i32>} : memref<144x256xf32, #tpu.memory_space<vmem>>, vector<16x256xf32>,
    %c0_516 = arith.constant 0 : index
    %c0_517 = arith.constant 0 : index
    %861 = vector.load %arg13[%c0_516, %c0_517] : memref<144x256xf32, #tpu.memory_space<vmem>>, vector<144x256xf32>
    %cst_518 = arith.constant dense<0.000000e+00> : vector<16x256xf32>
    %862 = tpu.matmul %6, %861, %cst_518 {dimension_numbers = #tpu.dot_dimension_numbers<[1], [0], [0], [1], [0, 0, 1, 1], [], []>} : vector<16x144xf32>, vector<144x256xf32>, vector<16x256xf32> -> vector<16x256xf32>
    %863 = vector.broadcast %7 : vector<16x1xf32> to vector<16x256xf32>
    %864 = arith.addf %862, %863 : vector<16x256xf32>
    %c5_519 = arith.constant 5 : index
    %865 = memref.load %arg11[%c5_519] : memref<7xf32, #tpu.memory_space<smem>>
    %866 = vector.broadcast %865 : f32 to vector<16x256xf32>
    %867 = arith.mulf %864, %866 : vector<16x256xf32>
    %868 = arith.addf %734, %867 : vector<16x256xf32>
    %c6_520 = arith.constant 6 : index
    %869 = memref.load %arg11[%c6_520] : memref<7xf32, #tpu.memory_space<smem>>
    %870 = vector.broadcast %869 : f32 to vector<16x256xf32>
    %871 = arith.mulf %868, %870 : vector<16x256xf32>
    %872 = vector.extract_strided_slice %871 {offsets = [0, 239], sizes = [16, 17], strides = [1, 1]} : vector<16x256xf32> to vector<16x17xf32>
    %873 = vector.extract_strided_slice %871 {offsets = [0, 0], sizes = [16, 239], strides = [1, 1]} : vector<16x256xf32> to vector<16x239xf32>
    %874 = tpu.concatenate %872, %873 in 1 : vector<16x17xf32>, vector<16x239xf32> -> vector<16x256xf32>
    %c0_521 = arith.constant 0 : index
    %c0_522 = arith.constant 0 : index
    %875 = vector.load %arg2[%c0_521, %c0_522] : memref<9x256xf32, #tpu.memory_space<vmem>>, vector<1x256xf32>
    %876 = vector.broadcast %875 : vector<1x256xf32> to vector<16x256xf32>
    %877 = arith.mulf %874, %876 : vector<16x256xf32>
    %c0_523 = arith.constant 0 : index
    %c0_524 = arith.constant 0 : index
    %878 = vector.load %arg13[%c0_523, %c0_524] : memref<144x256xf32, #tpu.memory_space<vmem>>, vector<16x256xf32>
    tpu.vector_store %arg13[%c0_523, %c0_524], %877 {strides = array<i32>} : memref<144x256xf32, #tpu.memory_space<vmem>>, vector<16x256xf32>,
    %879 = vector.extract_strided_slice %871 {offsets = [0, 240], sizes = [16, 16], strides = [1, 1]} : vector<16x256xf32> to vector<16x16xf32>
    %880 = vector.extract_strided_slice %871 {offsets = [0, 0], sizes = [16, 240], strides = [1, 1]} : vector<16x256xf32> to vector<16x240xf32>
    %881 = tpu.concatenate %879, %880 in 1 : vector<16x16xf32>, vector<16x240xf32> -> vector<16x256xf32>
    %c1_525 = arith.constant 1 : index
    %c0_526 = arith.constant 0 : index
    %882 = vector.load %arg2[%c1_525, %c0_526] : memref<9x256xf32, #tpu.memory_space<vmem>>, vector<1x256xf32>
    %883 = vector.broadcast %882 : vector<1x256xf32> to vector<16x256xf32>
    %884 = arith.mulf %881, %883 : vector<16x256xf32>
    %c16_527 = arith.constant 16 : index
    %c0_528 = arith.constant 0 : index
    %885 = vector.load %arg13[%c16_527, %c0_528] : memref<144x256xf32, #tpu.memory_space<vmem>>, vector<16x256xf32>
    tpu.vector_store %arg13[%c16_527, %c0_528], %884 {strides = array<i32>} : memref<144x256xf32, #tpu.memory_space<vmem>>, vector<16x256xf32>,
    %886 = vector.extract_strided_slice %871 {offsets = [0, 241], sizes = [16, 15], strides = [1, 1]} : vector<16x256xf32> to vector<16x15xf32>
    %887 = vector.extract_strided_slice %871 {offsets = [0, 0], sizes = [16, 241], strides = [1, 1]} : vector<16x256xf32> to vector<16x241xf32>
    %888 = tpu.concatenate %886, %887 in 1 : vector<16x15xf32>, vector<16x241xf32> -> vector<16x256xf32>
    %c2_529 = arith.constant 2 : index
    %c0_530 = arith.constant 0 : index
    %889 = vector.load %arg2[%c2_529, %c0_530] : memref<9x256xf32, #tpu.memory_space<vmem>>, vector<1x256xf32>
    %890 = vector.broadcast %889 : vector<1x256xf32> to vector<16x256xf32>
    %891 = arith.mulf %888, %890 : vector<16x256xf32>
    %c32_531 = arith.constant 32 : index
    %c0_532 = arith.constant 0 : index
    %892 = vector.load %arg13[%c32_531, %c0_532] : memref<144x256xf32, #tpu.memory_space<vmem>>, vector<16x256xf32>
    tpu.vector_store %arg13[%c32_531, %c0_532], %891 {strides = array<i32>} : memref<144x256xf32, #tpu.memory_space<vmem>>, vector<16x256xf32>,
    %893 = vector.extract_strided_slice %871 {offsets = [0, 255], sizes = [16, 1], strides = [1, 1]} : vector<16x256xf32> to vector<16x1xf32>
    %894 = vector.extract_strided_slice %871 {offsets = [0, 0], sizes = [16, 255], strides = [1, 1]} : vector<16x256xf32> to vector<16x255xf32>
    %895 = tpu.concatenate %893, %894 in 1 : vector<16x1xf32>, vector<16x255xf32> -> vector<16x256xf32>
    %c3_533 = arith.constant 3 : index
    %c0_534 = arith.constant 0 : index
    %896 = vector.load %arg2[%c3_533, %c0_534] : memref<9x256xf32, #tpu.memory_space<vmem>>, vector<1x256xf32>
    %897 = vector.broadcast %896 : vector<1x256xf32> to vector<16x256xf32>
    %898 = arith.mulf %895, %897 : vector<16x256xf32>
    %c48_535 = arith.constant 48 : index
    %c0_536 = arith.constant 0 : index
    %899 = vector.load %arg13[%c48_535, %c0_536] : memref<144x256xf32, #tpu.memory_space<vmem>>, vector<16x256xf32>
    tpu.vector_store %arg13[%c48_535, %c0_536], %898 {strides = array<i32>} : memref<144x256xf32, #tpu.memory_space<vmem>>, vector<16x256xf32>,
    %c4_537 = arith.constant 4 : index
    %c0_538 = arith.constant 0 : index
    %900 = vector.load %arg2[%c4_537, %c0_538] : memref<9x256xf32, #tpu.memory_space<vmem>>, vector<1x256xf32>
    %901 = vector.broadcast %900 : vector<1x256xf32> to vector<16x256xf32>
    %902 = arith.mulf %871, %901 : vector<16x256xf32>
    %c64_539 = arith.constant 64 : index
    %c0_540 = arith.constant 0 : index
    %903 = vector.load %arg13[%c64_539, %c0_540] : memref<144x256xf32, #tpu.memory_space<vmem>>, vector<16x256xf32>
    tpu.vector_store %arg13[%c64_539, %c0_540], %902 {strides = array<i32>} : memref<144x256xf32, #tpu.memory_space<vmem>>, vector<16x256xf32>,
    %904 = vector.extract_strided_slice %871 {offsets = [0, 1], sizes = [16, 255], strides = [1, 1]} : vector<16x256xf32> to vector<16x255xf32>
    %905 = vector.extract_strided_slice %871 {offsets = [0, 0], sizes = [16, 1], strides = [1, 1]} : vector<16x256xf32> to vector<16x1xf32>
    %906 = tpu.concatenate %904, %905 in 1 : vector<16x255xf32>, vector<16x1xf32> -> vector<16x256xf32>
    %c5_541 = arith.constant 5 : index
    %c0_542 = arith.constant 0 : index
    %907 = vector.load %arg2[%c5_541, %c0_542] : memref<9x256xf32, #tpu.memory_space<vmem>>, vector<1x256xf32>
    %908 = vector.broadcast %907 : vector<1x256xf32> to vector<16x256xf32>
    %909 = arith.mulf %906, %908 : vector<16x256xf32>
    %c80_543 = arith.constant 80 : index
    %c0_544 = arith.constant 0 : index
    %910 = vector.load %arg13[%c80_543, %c0_544] : memref<144x256xf32, #tpu.memory_space<vmem>>, vector<16x256xf32>
    tpu.vector_store %arg13[%c80_543, %c0_544], %909 {strides = array<i32>} : memref<144x256xf32, #tpu.memory_space<vmem>>, vector<16x256xf32>,
    %911 = vector.extract_strided_slice %871 {offsets = [0, 15], sizes = [16, 241], strides = [1, 1]} : vector<16x256xf32> to vector<16x241xf32>
    %912 = vector.extract_strided_slice %871 {offsets = [0, 0], sizes = [16, 15], strides = [1, 1]} : vector<16x256xf32> to vector<16x15xf32>
    %913 = tpu.concatenate %911, %912 in 1 : vector<16x241xf32>, vector<16x15xf32> -> vector<16x256xf32>
    %c6_545 = arith.constant 6 : index
    %c0_546 = arith.constant 0 : index
    %914 = vector.load %arg2[%c6_545, %c0_546] : memref<9x256xf32, #tpu.memory_space<vmem>>, vector<1x256xf32>
    %915 = vector.broadcast %914 : vector<1x256xf32> to vector<16x256xf32>
    %916 = arith.mulf %913, %915 : vector<16x256xf32>
    %c96_547 = arith.constant 96 : index
    %c0_548 = arith.constant 0 : index
    %917 = vector.load %arg13[%c96_547, %c0_548] : memref<144x256xf32, #tpu.memory_space<vmem>>, vector<16x256xf32>
    tpu.vector_store %arg13[%c96_547, %c0_548], %916 {strides = array<i32>} : memref<144x256xf32, #tpu.memory_space<vmem>>, vector<16x256xf32>,
    %918 = vector.extract_strided_slice %871 {offsets = [0, 16], sizes = [16, 240], strides = [1, 1]} : vector<16x256xf32> to vector<16x240xf32>
    %919 = vector.extract_strided_slice %871 {offsets = [0, 0], sizes = [16, 16], strides = [1, 1]} : vector<16x256xf32> to vector<16x16xf32>
    %920 = tpu.concatenate %918, %919 in 1 : vector<16x240xf32>, vector<16x16xf32> -> vector<16x256xf32>
    %c7_549 = arith.constant 7 : index
    %c0_550 = arith.constant 0 : index
    %921 = vector.load %arg2[%c7_549, %c0_550] : memref<9x256xf32, #tpu.memory_space<vmem>>, vector<1x256xf32>
    %922 = vector.broadcast %921 : vector<1x256xf32> to vector<16x256xf32>
    %923 = arith.mulf %920, %922 : vector<16x256xf32>
    %c112_551 = arith.constant 112 : index
    %c0_552 = arith.constant 0 : index
    %924 = vector.load %arg13[%c112_551, %c0_552] : memref<144x256xf32, #tpu.memory_space<vmem>>, vector<16x256xf32>
    tpu.vector_store %arg13[%c112_551, %c0_552], %923 {strides = array<i32>} : memref<144x256xf32, #tpu.memory_space<vmem>>, vector<16x256xf32>,
    %925 = vector.extract_strided_slice %871 {offsets = [0, 17], sizes = [16, 239], strides = [1, 1]} : vector<16x256xf32> to vector<16x239xf32>
    %926 = vector.extract_strided_slice %871 {offsets = [0, 0], sizes = [16, 17], strides = [1, 1]} : vector<16x256xf32> to vector<16x17xf32>
    %927 = tpu.concatenate %925, %926 in 1 : vector<16x239xf32>, vector<16x17xf32> -> vector<16x256xf32>
    %c8_553 = arith.constant 8 : index
    %c0_554 = arith.constant 0 : index
    %928 = vector.load %arg2[%c8_553, %c0_554] : memref<9x256xf32, #tpu.memory_space<vmem>>, vector<1x256xf32>
    %929 = vector.broadcast %928 : vector<1x256xf32> to vector<16x256xf32>
    %930 = arith.mulf %927, %929 : vector<16x256xf32>
    %c128_555 = arith.constant 128 : index
    %c0_556 = arith.constant 0 : index
    %931 = vector.load %arg13[%c128_555, %c0_556] : memref<144x256xf32, #tpu.memory_space<vmem>>, vector<16x256xf32>
    tpu.vector_store %arg13[%c128_555, %c0_556], %930 {strides = array<i32>} : memref<144x256xf32, #tpu.memory_space<vmem>>, vector<16x256xf32>,
    %c0_557 = arith.constant 0 : index
    %c0_558 = arith.constant 0 : index
    %932 = vector.load %arg13[%c0_557, %c0_558] : memref<144x256xf32, #tpu.memory_space<vmem>>, vector<144x256xf32>
    %cst_559 = arith.constant dense<0.000000e+00> : vector<1x256xf32>
    %933 = tpu.matmul %8, %932, %cst_559 {dimension_numbers = #tpu.dot_dimension_numbers<[1], [0], [0], [1], [0, 0, 1, 1], [], []>} : vector<1x144xf32>, vector<144x256xf32>, vector<1x256xf32> -> vector<1x256xf32>
    %934 = vector.broadcast %9 : vector<1x1xf32> to vector<1x256xf32>
    %935 = arith.addf %933, %934 : vector<1x256xf32>
    %936 = arith.addf %935, %1 : vector<1x256xf32>
    %c0_560 = arith.constant 0 : index
    %c0_561 = arith.constant 0 : index
    %c0_562 = arith.constant 0 : index
    %937 = vector.load %arg12[%c0_560, %c0_561, %c0_562] : memref<1x1x256xf32, #tpu.memory_space<vmem>>, vector<1x1x256xf32>
    %938 = vector.shape_cast %937 : vector<1x1x256xf32> to vector<1x256xf32>
    %939 = vector.shape_cast %936 : vector<1x256xf32> to vector<1x1x256xf32>
    tpu.vector_store %arg12[%c0_560, %c0_561, %c0_562], %939 {strides = array<i32>} : memref<1x1x256xf32, #tpu.memory_space<vmem>>, vector<1x1x256xf32>,
    return
  }
  func.func @transform_0(%arg0: i32) -> (i32, i32, i32) {
    %c0_i32 = arith.constant 0 : i32
    %c0_i32_0 = arith.constant 0 : i32
    %c0_i32_1 = arith.constant 0 : i32
    return %arg0, %c0_i32, %c0_i32_0 : i32, i32, i32
  }
  func.func @transform_1(%arg0: i32) -> (i32, i32) {
    %c0_i32 = arith.constant 0 : i32
    %c0_i32_0 = arith.constant 0 : i32
    %c0_i32_1 = arith.constant 0 : i32
    return %c0_i32, %c0_i32_0 : i32, i32
  }
  func.func @transform_2(%arg0: i32) -> (i32, i32) {
    %c0_i32 = arith.constant 0 : i32
    %c0_i32_0 = arith.constant 0 : i32
    %c0_i32_1 = arith.constant 0 : i32
    return %c0_i32, %c0_i32_0 : i32, i32
  }
  func.func @transform_3(%arg0: i32) -> (i32, i32) {
    %c0_i32 = arith.constant 0 : i32
    %c0_i32_0 = arith.constant 0 : i32
    %c0_i32_1 = arith.constant 0 : i32
    return %c0_i32, %c0_i32_0 : i32, i32
  }
  func.func @transform_4(%arg0: i32) -> (i32, i32) {
    %c0_i32 = arith.constant 0 : i32
    %c0_i32_0 = arith.constant 0 : i32
    %c0_i32_1 = arith.constant 0 : i32
    return %c0_i32, %c0_i32_0 : i32, i32
  }
  func.func @transform_5(%arg0: i32) -> (i32, i32) {
    %c0_i32 = arith.constant 0 : i32
    %c0_i32_0 = arith.constant 0 : i32
    %c0_i32_1 = arith.constant 0 : i32
    return %c0_i32, %c0_i32_0 : i32, i32
  }
  func.func @transform_6(%arg0: i32) -> (i32, i32) {
    %c0_i32 = arith.constant 0 : i32
    %c0_i32_0 = arith.constant 0 : i32
    %c0_i32_1 = arith.constant 0 : i32
    return %c0_i32, %c0_i32_0 : i32, i32
  }
  func.func @transform_7(%arg0: i32) -> (i32, i32) {
    %c0_i32 = arith.constant 0 : i32
    %c0_i32_0 = arith.constant 0 : i32
    %c0_i32_1 = arith.constant 0 : i32
    return %c0_i32, %c0_i32_0 : i32, i32
  }
  func.func @transform_8(%arg0: i32) -> (i32, i32) {
    %c0_i32 = arith.constant 0 : i32
    %c0_i32_0 = arith.constant 0 : i32
    %c0_i32_1 = arith.constant 0 : i32
    return %c0_i32, %c0_i32_0 : i32, i32
  }
  func.func @transform_9(%arg0: i32) -> (i32, i32) {
    %c0_i32 = arith.constant 0 : i32
    %c0_i32_0 = arith.constant 0 : i32
    %c0_i32_1 = arith.constant 0 : i32
    return %c0_i32, %c0_i32_0 : i32, i32
  }
  func.func @transform_10(%arg0: i32) -> i32 {
    %c0_i32 = arith.constant 0 : i32
    %c0_i32_0 = arith.constant 0 : i32
    return %c0_i32 : i32
  }
  func.func @transform_11(%arg0: i32) -> (i32, i32, i32) {
    %c0_i32 = arith.constant 0 : i32
    %c0_i32_0 = arith.constant 0 : i32
    %c0_i32_1 = arith.constant 0 : i32
    return %arg0, %c0_i32, %c0_i32_0 : i32, i32, i32
  }
}

</mosaic_0001>

<bundles_post_ra>
// kernel: cb_net_forward.1
= control target key start
LH: loop header
LB: loop body
LE: loop exit
PB: predicated region body
PF: predicated region fallthrough
CT: control target
= control target key end

     0   :  { %s10340_s0 = inlined_call_operand.vmem [shape: f32[2,1,256], index: 0, kind: input, shape index: {}]   ;;  %s10341_s1 = inlined_call_operand.vmem [shape: f32[9,256], index: 1, kind: input, shape index: {}]   ;;  %s10342_s2 = inlined_call_operand.vmem [shape: f32[16,9], index: 2, kind: input, shape index: {}]   ;;  %s10343_s3 = inlined_call_operand.vmem [shape: f32[16,1], index: 3, kind: input, shape index: {}]   ;;  %s10344_s4 = inlined_call_operand.vmem [shape: f32[16,144], index: 4, kind: input, shape index: {}]   ;;  %s10345_s5 = inlined_call_operand.vmem [shape: f32[16,1], index: 5, kind: input, shape index: {}]   ;;  %s10346_s6 = inlined_call_operand.vmem [shape: f32[16,144], index: 6, kind: input, shape index: {}]   ;;  %s10347_s7 = inlined_call_operand.vmem [shape: f32[16,1], index: 7, kind: input, shape index: {}]   ;;  %s10348_s8 = inlined_call_operand.vmem [shape: f32[1,144], index: 8, kind: input, shape index: {}]   ;;  %s10349_s9 = inlined_call_operand.<no memory space> [shape: f32[1,1], index: 9, kind: input, shape index: {}]   ;;  %s10350_s10 = inlined_call_operand.vmem [shape: f32[7], index: 10, kind: input, shape index: {}]   ;;  %s10351_s11 = inlined_call_operand.vmem [shape: f32[2,1,256], index: 11, kind: output, shape index: {}]  }
   0x1   :  { %v16_v0 = vstv %s10349_s9 }
   0x2   :  { %17 = vst [vmem:[#allocation3] sm:$0x1] %v16_v0 }
   0x3   :  { %18 = vsyncpa [#allocation5], 0  ;;  %s7649_s19 = smov 0  }
   0x4 LB: > { %s6865_s20 = sadd.s32 4294967295, %s7571_s19   ;;  %p6867_p0 = scmp.ge.s32.totalorder %s7571_s19, 1  ;;  %s7571_s19 = sphi %s7649_s19, %s24_s19  }
   0x5   : > { %p291_p1 = scmp.lt.s32.totalorder %s7571_s19, 3  ;;  %s331_s23 = sshll.u32 %s10350_s10, 4  ;;  %s332_s23 = int_to_ptr.vmem [resolvable:$true] %s331_s23 }
   0x6   : > { %p7505_p3 = scmp.eq.s32.totalorder %s6865_s20, 0  ;;  %s7546_s24 = scalar_lea.vmem %s332_s23, 16 }
   0x7   : > { %p7660_p2 = pnand %p6867_p0, %p291_p1  ;;  %p7547_p6 = scmp.ne.s32.totalorder %s332_s23, %s7546_s24 }
   0x8   : > { %p7554_p10 = scmp.lt.s32.totalorder %s332_s23, %s332_s23  ;;  %p7555_p11 = scmp.lt.s32.totalorder %s7546_s24, %s7546_s24 }
   0x9   : > { %p7501_p4 = pneg %p7660_p2 }
   0xa   : > { %p7556_p12 = por %p7555_p11, %p7554_p10 }
   0xb   : > { %p7502_p5 = pnand %p7505_p3, %p7501_p4 }
   0xd   : > { %p7548_p7 = pneg %p7502_p5 }
   0xf   : > { %p7549_p8 = pnand %p7548_p7, %p7547_p6 }
  0x11   : > { %p7550_p9 = pneg %p7549_p8 }
  0x13   : > { %p7557_p13 = pnand %p7556_p12, %p7550_p9 }
  0x15   : > { %7560 = shalt.err (!%p7557_p13)
}
  0x16   : > { %s7573_s25 = smov [#allocation4]   ;;  %351 = sbr.rel (%p7660_p2) target bundleno = 5655 (0x1617), region = 64 }
  0x17   : > { %7504 = dma.vmem_to_smem (!%p7502_p5), %s332_s23, 16, %s7573_s25, [#allocation5]  }
  0x1d   : > { %7566 = dma.done.wait (%p7505_p3), [#allocation5], 16  }
  0x1e   : > { %7568 = vsyncadd (%p7505_p3), [#allocation5], 4294967280 }
  0x1f   : > { %357 = sfence }
  0x20   : > { %p390_p0 = scmp.lt.s32.totalorder %s6865_s20, 1  ;;  %v418_v1 = vlaneseq  ;;  %s7574_s30 = smov 16   ;;  %v6877_v8 = vld [vmem:[%s10341_s1 + $0x4] ss:$8 sm:$0x3]  ;;  %v7582_v11 = vmov 0.0  }
  0x21   : > { %s7575_s12 = smov 17   ;;  %s7576_s13 = smov 15   ;;  %894 = vmatprep.mubr.f32.mxu0 %v7582_v11  ;;  %v401_v12 = vld [vmem:[%s10343_s3] sm:$0xff]  ;;  %v402_v13 = vld [vmem:[%s10343_s3 + $0x8] sm:$0xff]  ;;  %v7583_v14 = vmov 0   ;;  %vm479_vm1 = vcmask 130048  }
  0x22   : > { %s10356_s20 = smov (!%p390_p0, %s6865_s20), 1  ;;  %v419_v2 = vshrl.u32 %v418_v1, 7  ;;  %s7577_s14 = smov 1   ;;  %vm7712_vm0 = vcmp.lt.s32.totalorder %v418_v1, 256  ;;  %7528 = vset.pattern.permute.xlu0 %v7583_v14  ;;  %7529 = vset.pattern.permute.xlu1 %v7583_v14  ;;  %v7584_v15 = vmov 1966171168  }
  0x23   : > { %s6872_s26 = sshll.u32 %s10356_s20, 1  ;;  %s7578_s15 = smov 127   ;;  %v454_v16 = vunpack.c.l.s4 %v7584_v15  ;;  %v6874_v17 = vld [vmem:[%s10341_s1 + $0x1] ss:$8 sm:$0x3]  ;;  %vm431_vm2 = vcmask 138240  }
  0x24   : > { %v7674_v3 = vsub.s32 1, %v419_v2  ;;  %s393_s29 = scalar_lea.vmem %s10340_s0, %s6872_s26  ;;  %v7681_v4 = vsub.s32 0, %v419_v2  ;;  %s7579_s18 = smov 113   ;;  %v436_v18 = vld [vmem:[%s10341_s1] ss:$8 sm:$0x3] }
  0x25   : > { %v398_v5 = vld [vmem:[%s393_s29] sm:$0x3]  ;;  %s7580_s21 = smov 112   ;;  %s7581_s22 = smov 111   ;;  %v455_v21 = vunpack.c.0.s8 %v454_v16  ;;  %vm525_vm3 = vcmask 121856   ;;  %vm571_vm4 = vcmask 7168  }
  0x26   : > { %v7684_v6 = vrot.slane %v398_v5, %v7674_v3  ;;  %v7691_v7 = vrot.slane %v398_v5, %v7681_v4  ;;  %v614_v9 = vmul.f32 %v6877_v8, %v398_v5  ;;  %v6875_v22 = vld [vmem:[%s10341_s1 + $0x2] ss:$8 sm:$0x3]  ;;  %v490_v23 = vrot.slane %v6874_v17, %v7681_v4  ;;  %v6876_v40 = vld [vmem:[%s10341_s1 + $0x3] ss:$8 sm:$0x3] }
  0x27   : > { %v494_v24 = vrot.slane %v6874_v17, %v7674_v3  ;;  %v441_v25 = vrot.slane %v436_v18, %v7681_v4  ;;  %v445_v26 = vrot.slane %v436_v18, %v7674_v3  ;;  %v7750_v27 = vsub.s32 %v455_v21, %v419_v2  ;;  %v6878_v53 = vld [vmem:[%s10341_s1 + $0x5] ss:$8 sm:$0x3]  ;;  %v6879_v2 = vld [vmem:[%s10341_s1 + $0x6] ss:$8 sm:$0x3] }
  0x28   : > { %474 = vrot.lane.b32.xlu1 %v7684_v6, %s7574_s30  ;;  %422 = vrot.lane.b32.xlu0 %v7684_v6, %s7575_s12  ;;  %616 = vst.msk [vmem:[#allocation2 + $0x4] ss:$8 sm:$0x3] %vm7712_vm0, %v614_v9  ;;  %v536_v30 = vrot.slane %v6875_v22, %v7681_v4  ;;  %v540_v31 = vrot.slane %v6875_v22, %v7674_v3  ;;  %vm622_vm5 = vcmask 1039360   ;;  %vm668_vm6 = vcmask 924672   ;;  %s1825_s25 = sld [smem:[#allocation4]] }
  0x29   : > { %v582_v47 = vrot.slane %v6876_v40, %v7681_v4  ;;  %v586_v48 = vrot.slane %v6876_v40, %v7674_v3  ;;  %v634_v61 = vrot.slane %v6878_v53, %v7681_v4  ;;  %v638_v1 = vrot.slane %v6878_v53, %v7674_v3  ;;  %s6926_s17 = sld [smem:[#allocation4 + $0x1]]  ;;  %s7010_s27 = sld [smem:[#allocation4 + $0x5]] }
  0x2a   : > { %v680_v15 = vrot.slane %v6879_v2, %v7681_v4  ;;  %vm714_vm7 = vcmask 916480   ;;  %vm760_vm8 = vcmask 908288   ;;  %vm823_vm9 = vcmask 1040384   ;;  %s7011_s28 = sld [smem:[#allocation4 + $0x6]] }
  0x2b   : > { %vm7585_vm10 = vmmov 1   ;;  %vm816_vm12 = vcmask 72704  }
  0x2c   : > { %477 = vrot.lane.b32.xlu1 %v7691_v7, %s7574_s30  ;;  %429 = vrot.lane.b32.xlu0 %v7691_v7, %s7575_s12  ;;  %vm7024_vm11 = vmpackc.low %vm823_vm9, %vm7585_vm10 }
  0x30   : > { %523 = vrot.lane.b32.xlu1 %v7691_v7, %s7576_s13  ;;  %520 = vrot.lane.b32.xlu0 %v7684_v6, %s7576_s13 }
  0x34   : > { %569 = vrot.lane.b32.xlu1 %v7691_v7, %s7577_s14  ;;  %566 = vrot.lane.b32.xlu0 %v7684_v6, %s7577_s14 }
  0x38   : > { %620 = vrot.lane.b32.xlu1 %v7684_v6, %s7578_s15  ;;  %618 = vrot.lane.b32.xlu0 %v7691_v7, %s7578_s15 }
  0x3c   : > { %666 = vrot.lane.b32.xlu1 %v7684_v6, %s7579_s18  ;;  %664 = vrot.lane.b32.xlu0 %v7691_v7, %s7579_s18 }
  0x40   : > { %712 = vrot.lane.b32.xlu1 %v7684_v6, %s7580_s21  ;;  %710 = vrot.lane.b32.xlu0 %v7691_v7, %s7580_s21 }
  0x44   : > { %758 = vrot.lane.b32.xlu1 %v7684_v6, %s7581_s22  ;;  %756 = vrot.lane.b32.xlu0 %v7691_v7, %s7581_s22 }
  0x48   : > { %808 = vperm.xlu0 %7528, %v401_v12   ;;  %813 = vperm.xlu1 %7529, %v402_v13  }
  0x9a   : > { %v475_v19 = vpop.permute.xlu1 %474  ;;  %v423_v20 = vpop.permute.xlu0 %422 }
  0x9e   : > { %v478_v28 = vpop.permute.xlu1 %477  ;;  %v430_v29 = vpop.permute.xlu0 %429 }
  0x9f   : > { %v480_v32 = vsel %vm479_vm1, %v478_v28, %v475_v19  ;;  %v483_v33 = vsel %vm479_vm1, %v475_v19, %v478_v28  ;;  %v432_v34 = vsel %vm431_vm2, %v430_v29, %v423_v20  ;;  %v435_v35 = vsel %vm431_vm2, %v423_v20, %v430_v29  ;;  %v6880_v20 = vld [vmem:[%s10341_s1 + $0x7] ss:$8 sm:$0x3] }
  0xa0   : > { %v497_v36 = vmul.f32 %v490_v23, %v483_v33  ;;  %v498_v37 = vmul.f32 %v494_v24, %v480_v32  ;;  %v448_v38 = vmul.f32 %v441_v25, %v435_v35  ;;  %v449_v39 = vmul.f32 %v445_v26, %v432_v34  ;;  %v6881_v33 = vld [vmem:[%s10341_s1 + $0x10] ss:$8 sm:$0x3] }
  0xa1   : > { %v684_v19 = vrot.slane %v6879_v2, %v7674_v3  ;;  %v726_v28 = vrot.slane %v6880_v20, %v7681_v4  ;;  %v730_v32 = vrot.slane %v6880_v20, %v7674_v3  ;;  %v772_v40 = vrot.slane %v6881_v33, %v7681_v4 }
  0xa2   : > { %v501_v41 = vcombine.low %v497_v36, %v498_v37  ;;  %v452_v42 = vcombine.low %v448_v38, %v449_v39  ;;  %v524_v43 = vpop.permute.xlu1 %523  ;;  %v521_v44 = vpop.permute.xlu0 %520 }
  0xa3   : > { %v526_v45 = vsel %vm525_vm3, %v524_v43, %v521_v44  ;;  %v529_v46 = vsel %vm525_vm3, %v521_v44, %v524_v43  ;;  %v776_v44 = vrot.slane %v6881_v33, %v7674_v3  ;;  %v929_v33 = vld [vmem:[%s10341_s1] ss:$8 sm:$0x3] }
  0xa4   : > { %v508_v49 = vrot.slane %v501_v41, %v7750_v27  ;;  %v459_v50 = vrot.slane %v452_v42, %v7750_v27  ;;  %v543_v51 = vmul.f32 %v536_v30, %v529_v46  ;;  %v544_v52 = vmul.f32 %v540_v31, %v526_v45 }
  0xa6   : > { %v515_v54 = vrot.slane %v508_v49, %v7750_v27  ;;  %v466_v55 = vrot.slane %v459_v50, %v7750_v27  ;;  %v547_v56 = vcombine.low %v543_v51, %v544_v52  ;;  %v570_v57 = vpop.permute.xlu1 %569  ;;  %v567_v58 = vpop.permute.xlu0 %566 }
  0xa7   : > { %v572_v59 = vsel %vm571_vm4, %v570_v57, %v567_v58  ;;  %v575_v60 = vsel %vm571_vm4, %v567_v58, %v570_v57 }
  0xa8   : > { %518 = vst.msk [vmem:[#allocation2 + $0x1] ss:$8 sm:$0x3] %vm7712_vm0, %v515_v54  ;;  %472 = vst.msk [vmem:[#allocation2] ss:$8 sm:$0x3] %vm7712_vm0, %v466_v55  ;;  %v554_v62 = vrot.slane %v547_v56, %v7750_v27  ;;  %v589_v63 = vmul.f32 %v582_v47, %v575_v60  ;;  %v590_v0 = vmul.f32 %v586_v48, %v572_v59 }
  0xaa   : > { %v561_v5 = vrot.slane %v554_v62, %v7750_v27  ;;  %v593_v8 = vcombine.low %v589_v63, %v590_v0  ;;  %v621_v9 = vpop.permute.xlu1 %620  ;;  %v619_v12 = vpop.permute.xlu0 %618  ;;  %v399_v0 = vld [vmem:[%s10342_s2] sm:$0xff] }
  0xab   : > { %v623_v13 = vsel %vm622_vm5, %v619_v12, %v621_v9  ;;  %v627_v14 = vsel %vm622_vm5, %v621_v9, %v619_v12 }
  0xac   : > { %564 = vst.msk [vmem:[#allocation2 + $0x2] ss:$8 sm:$0x3] %vm7712_vm0, %v561_v5  ;;  %v600_v16 = vrot.slane %v593_v8, %v7750_v27  ;;  %v641_v17 = vmul.f32 %v634_v61, %v623_v13  ;;  %v642_v18 = vmul.f32 %v638_v1, %v627_v14  ;;  %v400_v1 = vld [vmem:[%s10342_s2 + $0x8] sm:$0xff] }
  0xae   : > { %v607_v21 = vrot.slane %v600_v16, %v7750_v27  ;;  %v645_v22 = vcombine.low %v641_v17, %v642_v18  ;;  %v667_v23 = vpop.permute.xlu1 %666  ;;  %v665_v24 = vpop.permute.xlu0 %664  ;;  %v7901_v17 = vld [vmem:[%s10344_s4 + $0x8] sm:$0xff]  ;;  %v407_v18 = vld [vmem:[%s10345_s5] sm:$0xff] }
  0xaf   : > { %v669_v25 = vsel %vm668_vm6, %v665_v24, %v667_v23  ;;  %v673_v26 = vsel %vm668_vm6, %v667_v23, %v665_v24  ;;  %6894 = vmatprep.mubr.msk.f32.mxu1 %vm479_vm1, %v7901_v17 }
  0xb0   : > { %610 = vst.msk [vmem:[#allocation2 + $0x3] ss:$8 sm:$0x3] %vm7712_vm0, %v607_v21  ;;  %v652_v29 = vrot.slane %v645_v22, %v7750_v27  ;;  %v687_v30 = vmul.f32 %v680_v15, %v669_v25  ;;  %v688_v31 = vmul.f32 %v684_v19, %v673_v26  ;;  %v408_v19 = vld [vmem:[%s10345_s5 + $0x8] sm:$0xff] }
  0xb2   : > { %v659_v34 = vrot.slane %v652_v29, %v7750_v27  ;;  %v691_v35 = vcombine.low %v687_v30, %v688_v31  ;;  %v713_v36 = vpop.permute.xlu1 %712  ;;  %v711_v37 = vpop.permute.xlu0 %710 }
  0xb3   : > { %v715_v38 = vsel %vm714_vm7, %v711_v37, %v713_v36  ;;  %v719_v39 = vsel %vm714_vm7, %v713_v36, %v711_v37  ;;  %v934_v36 = vrot.slane %v929_v33, %v7681_v4  ;;  %v938_v37 = vrot.slane %v929_v33, %v7674_v3 }
  0xb4   : > { %662 = vst.msk [vmem:[#allocation2 + $0x5] ss:$8 sm:$0x3] %vm7712_vm0, %v659_v34  ;;  %v698_v41 = vrot.slane %v691_v35, %v7750_v27  ;;  %v733_v42 = vmul.f32 %v726_v28, %v715_v38  ;;  %v734_v43 = vmul.f32 %v730_v32, %v719_v39  ;;  %v6886_v38 = vld [vmem:[%s10341_s1 + $0x1] ss:$8 sm:$0x3] }
  0xb6   : > { %v705_v45 = vrot.slane %v698_v41, %v7750_v27  ;;  %v737_v46 = vcombine.low %v733_v42, %v734_v43  ;;  %v759_v47 = vpop.permute.xlu1 %758  ;;  %v757_v48 = vpop.permute.xlu0 %756  ;;  %v972_v43 = vrot.slane %v6886_v38, %v7681_v4 }
  0xb7   : > { %v761_v49 = vsel %vm760_vm8, %v757_v48, %v759_v47  ;;  %v765_v50 = vsel %vm760_vm8, %v759_v47, %v757_v48 }
  0xb8   : > { %708 = vst.msk [vmem:[#allocation2 + $0x6] ss:$8 sm:$0x3] %vm7712_vm0, %v705_v45  ;;  %v744_v51 = vrot.slane %v737_v46, %v7750_v27  ;;  %v779_v52 = vmul.f32 %v772_v40, %v761_v49  ;;  %v780_v53 = vmul.f32 %v776_v44, %v765_v50  ;;  %v976_v44 = vrot.slane %v6886_v38, %v7674_v3  ;;  %v6887_v45 = vld [vmem:[%s10341_s1 + $0x2] ss:$8 sm:$0x3] }
  0xba   : > { %v751_v54 = vrot.slane %v744_v51, %v7750_v27  ;;  %v783_v55 = vcombine.low %v779_v52, %v780_v53  ;;  %v1010_v53 = vrot.slane %v6887_v45, %v7681_v4 }
  0xbc   : > { %754 = vst.msk [vmem:[#allocation2 + $0x7] ss:$8 sm:$0x3] %vm7712_vm0, %v751_v54  ;;  %v790_v56 = vrot.slane %v783_v55, %v7750_v27  ;;  %v1014_v54 = vrot.slane %v6887_v45, %v7674_v3 }
  0xbe   : > { %v797_v57 = vrot.slane %v790_v56, %v7750_v27 }
  0xc0   : > { %800 = vst.msk [vmem:[#allocation2 + $0x10] ss:$8 sm:$0x3] %vm7712_vm0, %v797_v57 }
  0xc3   : > { %v803_v58 = vld [vmem:[#allocation2 + $0x8] sm:$0xff]  ;;  %v802_v60 = vld [vmem:[#allocation2] sm:$0xff] }
  0xc7   : > { %v805_v59 = vld [vmem:[#allocation2 + $0x18] sm:$0x1]  ;;  %v804_v61 = vld [vmem:[#allocation2 + $0x10] sm:$0x1]  ;;  %v809_v2 = vpop.permute.xlu0 %808  ;;  %v814_v14 = vpop.permute.xlu1 %813 }
  0xc8   : > { %v7023_v62 = vpack.c.bf16 %v805_v59, %v803_v58  ;;  %v7026_v63 = vpack.c.bf16 %v804_v61, %v802_v60  ;;  %v6888_v58 = vld [vmem:[%s10341_s1 + $0x3] ss:$8 sm:$0x3] }
  0xca   : > { %7025 = vmatprep.subr.msk.bf16.mxu0 %vm7024_vm11, %v7023_v62 }
  0xcb   : > { %7028 = vmatpush1.bf16.msk.msra.mxu0 %vm7024_vm11, %v7026_v63 }
  0xce   : > { %6884 = vmatmul.mubr.msk.f32.vlgmr.msra.gmra.mrb[0].mxu0 %vm816_vm12, %v399_v0 }
  0xcf   : > { %900 = vmatprep.mubr.f32.mxu0 %v7582_v11 }
  0xd2   : > { %6885 = vmatmul.mubr.msk.f32.gmra.mrb[2].mxu0 %vm816_vm12, %v400_v1 }
 0x1a1   : > { %v896_v5 = vpop.f32.mrb[0].mxu0 }
 0x1a2   : > { %v7834_v8 = vadd.f32 %v896_v5, %v809_v2  ;;  %v898_v9 = vpop.f32.mrb[1].mxu0 }
 0x1a3   : > { %v7836_v12 = vadd.f32 %v898_v9, %v809_v2  ;;  %v1048_v9 = vrot.slane %v6888_v58, %v7681_v4 }
 0x1a4   : > { %917 = vrot.lane.b32.xlu1 %v7834_v8, %s7575_s12 }
 0x1a5   : > { %v902_v13 = vpop.f32.mrb[2].mxu0  ;;  %1085 = vrot.lane.b32.xlu0 %v7836_v12, %s7578_s15 }
 0x1a6   : > { %v904_v11 = vpop.f32.mrb[3].mxu0  ;;  %v7850_v15 = vadd.f32 %v902_v13, %v814_v14  ;;  %v1052_v13 = vrot.slane %v6888_v58, %v7674_v3 }
 0x1a7   : > { %v7868_v16 = vadd.f32 %v904_v11, %v814_v14 }
 0x1a8   : > { %955 = vrot.lane.b32.xlu1 %v7834_v8, %s7574_s30 }
 0x1a9   : > { %1123 = vrot.lane.b32.xlu0 %v7836_v12, %s7579_s18 }
 0x1ac   : > { %993 = vrot.lane.b32.xlu1 %v7834_v8, %s7576_s13 }
 0x1ad   : > { %1161 = vrot.lane.b32.xlu0 %v7836_v12, %s7580_s21 }
 0x1b0   : > { %1031 = vrot.lane.b32.xlu1 %v7834_v8, %s7577_s14 }
 0x1b1   : > { %919 = vrot.lane.b32.xlu0 %v7850_v15, %s7575_s12 }
 0x1b4   : > { %1083 = vrot.lane.b32.xlu1 %v7834_v8, %s7578_s15 }
 0x1b5   : > { %957 = vrot.lane.b32.xlu0 %v7850_v15, %s7574_s30 }
 0x1b8   : > { %1121 = vrot.lane.b32.xlu1 %v7834_v8, %s7579_s18 }
 0x1b9   : > { %995 = vrot.lane.b32.xlu0 %v7850_v15, %s7576_s13 }
 0x1bc   : > { %1159 = vrot.lane.b32.xlu1 %v7834_v8, %s7580_s21 }
 0x1bd   : > { %1033 = vrot.lane.b32.xlu0 %v7850_v15, %s7577_s14 }
 0x1c0   : > { %909 = vrot.lane.b32.xlu1 %v7836_v12, %s7575_s12 }
 0x1c1   : > { %911 = vrot.lane.b32.xlu0 %v7868_v16, %s7575_s12 }
 0x1c4   : > { %949 = vrot.lane.b32.xlu1 %v7836_v12, %s7574_s30 }
 0x1c5   : > { %951 = vrot.lane.b32.xlu0 %v7868_v16, %s7574_s30 }
 0x1c8   : > { %987 = vrot.lane.b32.xlu1 %v7836_v12, %s7576_s13 }
 0x1c9   : > { %989 = vrot.lane.b32.xlu0 %v7868_v16, %s7576_s13 }
 0x1cc   : > { %1025 = vrot.lane.b32.xlu1 %v7836_v12, %s7577_s14 }
 0x1cd   : > { %1027 = vrot.lane.b32.xlu0 %v7868_v16, %s7577_s14 }
 0x1d0   : > { %1197 = vrot.lane.b32.xlu1 %v7834_v8, %s7581_s22 }
 0x1d1   : > { %1199 = vrot.lane.b32.xlu0 %v7836_v12, %s7581_s22 }
 0x1d4   : > { %1087 = vrot.lane.b32.xlu1 %v7850_v15, %s7578_s15 }
 0x1d5   : > { %1089 = vrot.lane.b32.xlu0 %v7868_v16, %s7578_s15 }
 0x1d8   : > { %1125 = vrot.lane.b32.xlu1 %v7850_v15, %s7579_s18 }
 0x1d9   : > { %1127 = vrot.lane.b32.xlu0 %v7868_v16, %s7579_s18 }
 0x1dc   : > { %1163 = vrot.lane.b32.xlu1 %v7850_v15, %s7580_s21 }
 0x1dd   : > { %1165 = vrot.lane.b32.xlu0 %v7868_v16, %s7580_s21 }
 0x1e0   : > { %1201 = vrot.lane.b32.xlu1 %v7850_v15, %s7581_s22 }
 0x1e1   : > { %1203 = vrot.lane.b32.xlu0 %v7868_v16, %s7581_s22 }
 0x1e4   : > { %1273 = vperm.xlu1 %7529, %v407_v18  }
 0x1e5   : > { %1278 = vperm.xlu0 %7528, %v408_v19  }
 0x216   : > { %v918_v20 = vpop.permute.xlu1 %917 }
 0x217   : > { %v7919_v21 = vpop.permute.xlu0 %1085 }
 0x21a   : > { %v956_v22 = vpop.permute.xlu1 %955 }
 0x21b   : > { %v7921_v23 = vpop.permute.xlu0 %1123 }
 0x21e   : > { %v994_v24 = vpop.permute.xlu1 %993 }
 0x21f   : > { %v7923_v25 = vpop.permute.xlu0 %1161 }
 0x222   : > { %v7925_v26 = vpop.permute.xlu1 %1031 }
 0x223   : > { %v920_v28 = vpop.permute.xlu0 %919 }
 0x226   : > { %v7927_v29 = vpop.permute.xlu1 %1083 }
 0x227   : > { %v958_v30 = vpop.permute.xlu0 %957 }
 0x22a   : > { %v7929_v31 = vpop.permute.xlu1 %1121 }
 0x22b   : > { %v996_v32 = vpop.permute.xlu0 %995 }
 0x22e   : > { %v7934_v34 = vpop.permute.xlu1 %1159 }
 0x22f   : > { %v1034_v35 = vpop.permute.xlu0 %1033 }
 0x232   : > { %v910_v39 = vpop.permute.xlu1 %909 }
 0x233   : > { %v921_v40 = vsel %vm431_vm2, %v918_v20, %v910_v39  ;;  %v927_v41 = vsel %vm431_vm2, %v910_v39, %v918_v20  ;;  %v912_v42 = vpop.permute.xlu0 %911 }
 0x234   : > { %v941_v46 = vmul.f32 %v934_v36, %v927_v41  ;;  %v942_v47 = vmul.f32 %v938_v37, %v921_v40  ;;  %v922_v48 = vsel %vm431_vm2, %v920_v28, %v912_v42  ;;  %v928_v49 = vsel %vm431_vm2, %v912_v42, %v920_v28 }
 0x235   : > { %v943_v50 = vmul.f32 %v934_v36, %v928_v49  ;;  %v944_v51 = vmul.f32 %v938_v37, %v922_v48 }
 0x236   : > { %v950_v52 = vpop.permute.xlu1 %949 }
 0x237   : > { %v959_v55 = vsel %vm479_vm1, %v956_v22, %v950_v52  ;;  %v965_v56 = vsel %vm479_vm1, %v950_v52, %v956_v22  ;;  %v952_v57 = vpop.permute.xlu0 %951  ;;  %v7029_v59 = vpack.c.bf16 %v944_v51, %v942_v47  ;;  %v7031_v60 = vpack.c.bf16 %v943_v50, %v941_v46  ;;  %v6889_v22 = vld [vmem:[%s10341_s1 + $0x4] ss:$8 sm:$0x3]  ;;  %v6890_v51 = vld [vmem:[%s10341_s1 + $0x5] ss:$8 sm:$0x3] }
 0x238   : > { %v979_v61 = vmul.f32 %v972_v43, %v965_v56  ;;  %v980_v62 = vmul.f32 %v976_v44, %v959_v55  ;;  %v960_v63 = vsel %vm479_vm1, %v958_v30, %v952_v57  ;;  %v966_v0 = vsel %vm479_vm1, %v952_v57, %v958_v30 }
 0x239   : > { %v981_v1 = vmul.f32 %v972_v43, %v966_v0  ;;  %v982_v2 = vmul.f32 %v976_v44, %v960_v63  ;;  %7030 = vmatprep.subr.bf16.mxu1 %v7029_v59  ;;  %v1106_v58 = vrot.slane %v6890_v51, %v7681_v4  ;;  %v1110_v59 = vrot.slane %v6890_v51, %v7674_v3 }
 0x23a   : > { %v988_v5 = vpop.permute.xlu1 %987  ;;  %7032 = vmatpush1.bf16.msra.mxu1 %v7031_v60 }
 0x23b   : > { %v997_v11 = vsel %vm525_vm3, %v994_v24, %v988_v5  ;;  %v1003_v14 = vsel %vm525_vm3, %v988_v5, %v994_v24  ;;  %v990_v18 = vpop.permute.xlu0 %989  ;;  %v7033_v19 = vpack.c.bf16 %v982_v2, %v980_v62  ;;  %v7035_v20 = vpack.c.bf16 %v981_v1, %v979_v61 }
 0x23c   : > { %v1017_v28 = vmul.f32 %v1010_v53, %v1003_v14  ;;  %v1018_v30 = vmul.f32 %v1014_v54, %v997_v11  ;;  %v998_v33 = vsel %vm525_vm3, %v996_v32, %v990_v18  ;;  %v1004_v36 = vsel %vm525_vm3, %v990_v18, %v996_v32 }
 0x23d   : > { %v1019_v37 = vmul.f32 %v1010_v53, %v1004_v36  ;;  %v1020_v38 = vmul.f32 %v1014_v54, %v998_v33  ;;  %7034 = vmatprep.subr.bf16.mxu1 %v7033_v19  ;;  %v1072_v24 = vrot.slane %v6889_v22, %v7674_v3  ;;  %v1091_v61 = vsel %vm622_vm5, %v7927_v29, %v7919_v21 }
 0x23e   : > { %v1026_v39 = vpop.permute.xlu1 %1025  ;;  %7036 = vmatpush1.bf16.msra.mxu1 %v7035_v20  ;;  %v1099_v62 = vsel %vm622_vm5, %v7919_v21, %v7927_v29  ;;  %v1113_v14 = vmul.f32 %v1106_v58, %v1091_v61  ;;  %v6892_v21 = vld [vmem:[%s10341_s1 + $0x7] ss:$8 sm:$0x3]  ;;  %v1129_v20 = vsel %vm668_vm6, %v7929_v31, %v7921_v23 }
 0x23f   : > { %v1035_v40 = vsel %vm571_vm4, %v7925_v26, %v1026_v39  ;;  %v1041_v41 = vsel %vm571_vm4, %v1026_v39, %v7925_v26  ;;  %v1028_v42 = vpop.permute.xlu0 %1027  ;;  %v7037_v43 = vpack.c.bf16 %v1020_v38, %v1018_v30  ;;  %v7039_v44 = vpack.c.bf16 %v1019_v37, %v1017_v28 }
 0x240   : > { %v1055_v45 = vmul.f32 %v1048_v9, %v1041_v41  ;;  %v1056_v46 = vmul.f32 %v1052_v13, %v1035_v40  ;;  %v1036_v32 = vsel %vm571_vm4, %v1034_v35, %v1028_v42  ;;  %v1042_v47 = vsel %vm571_vm4, %v1028_v42, %v1034_v35  ;;  %v6891_v35 = vld [vmem:[%s10341_s1 + $0x6] ss:$8 sm:$0x3]  ;;  %v6893_v42 = vld [vmem:[%s10341_s1 + $0x10] ss:$8 sm:$0x3] }
 0x241   : > { %v1057_v48 = vmul.f32 %v1048_v9, %v1042_v47  ;;  %v1058_v49 = vmul.f32 %v1052_v13, %v1036_v32  ;;  %7038 = vmatprep.subr.bf16.mxu1 %v7037_v43  ;;  %v1078_v50 = vmul.f32 %v1072_v24, %v7868_v16  ;;  %v1068_v26 = vrot.slane %v6889_v22, %v7681_v4 }
 0x242   : > { %v7979_v52 = vpop.permute.xlu1 %1197  ;;  %7040 = vmatpush1.bf16.msra.mxu1 %v7039_v44  ;;  %v1076_v56 = vmul.f32 %v1072_v24, %v7836_v12  ;;  %v1144_v1 = vrot.slane %v6891_v35, %v7681_v4  ;;  %v1148_v5 = vrot.slane %v6891_v35, %v7674_v3  ;;  %v1114_v18 = vmul.f32 %v1110_v59, %v1099_v62 }
 0x243   : > { %v1200_v53 = vpop.permute.xlu0 %1199  ;;  %v7041_v54 = vpack.c.bf16 %v1058_v49, %v1056_v46  ;;  %v7043_v55 = vpack.c.bf16 %v1057_v48, %v1055_v45  ;;  %v1077_v57 = vmul.f32 %v1068_v26, %v7850_v15  ;;  %v1075_v0 = vmul.f32 %v1068_v26, %v7834_v8 }
 0x244   : > { %v7045_v60 = vpack.c.bf16 %v1078_v50, %v1076_v56  ;;  %v1137_v22 = vsel %vm668_vm6, %v7921_v23, %v7929_v31  ;;  %v1182_v37 = vrot.slane %v6892_v21, %v7681_v4  ;;  %v1186_v38 = vrot.slane %v6892_v21, %v7674_v3  ;;  %v6899_v21 = vld [vmem:[%s10341_s1 + $0x4] ss:$8 sm:$0x3] }
 0x245   : > { %7042 = vmatprep.subr.bf16.mxu1 %v7041_v54  ;;  %v7047_v11 = vpack.c.bf16 %v1077_v57, %v1075_v0  ;;  %v1151_v40 = vmul.f32 %v1144_v1, %v1129_v20  ;;  %v1152_v41 = vmul.f32 %v1148_v5, %v1137_v22  ;;  %v1167_v43 = vsel %vm714_vm7, %v7934_v34, %v7923_v25 }
 0x246   : > { %v1088_v63 = vpop.permute.xlu1 %1087  ;;  %7044 = vmatpush1.bf16.msra.mxu1 %v7043_v55  ;;  %v1175_v44 = vsel %vm714_vm7, %v7923_v25, %v7934_v34  ;;  %v1220_v48 = vrot.slane %v6893_v42, %v7681_v4  ;;  %v1224_v49 = vrot.slane %v6893_v42, %v7674_v3  ;;  %v1189_v26 = vmul.f32 %v1182_v37, %v1167_v43  ;;  %v8109_v43 = vld [vmem:[%s10346_s6 + $0x8] sm:$0xff] }
 0x247   : > { %v1090_v2 = vpop.permute.xlu0 %1089  ;;  %7046 = vmatprep.subr.bf16.mxu1 %v7045_v60  ;;  %v1190_v54 = vmul.f32 %v1186_v38, %v1175_v44  ;;  %v1205_v25 = vsel %vm760_vm8, %v7979_v52, %v1200_v53  ;;  %v1213_v34 = vsel %vm760_vm8, %v1200_v53, %v7979_v52  ;;  %v8035_v52 = vld [vmem:[%s10344_s4] sm:$0xff]  ;;  %v8040_v53 = vld [vmem:[%s10344_s4 + $0x18] sm:$0xff]  ;;  %6904 = vmatprep.mubr.msk.f32.mxu0 %vm479_vm1, %v8109_v43 }
 0x248   : > { %v1092_v9 = vsel %vm622_vm5, %v1088_v63, %v1090_v2  ;;  %v1100_v13 = vsel %vm622_vm5, %v1090_v2, %v1088_v63  ;;  %v1227_v62 = vmul.f32 %v1220_v48, %v1205_v25  ;;  %v1228_v63 = vmul.f32 %v1224_v49, %v1213_v34  ;;  %v413_v44 = vld [vmem:[%s10347_s7] sm:$0xff] }
 0x249   : > { %v1115_v29 = vmul.f32 %v1106_v58, %v1092_v9  ;;  %v1116_v19 = vmul.f32 %v1110_v59, %v1100_v13  ;;  %v8048_v9 = vld [vmem:[%s10344_s4 + $0x10] sm:$0xff]  ;;  %v1390_v34 = vld [vmem:[%s10341_s1] ss:$8 sm:$0x3] }
 0x24a   : > { %v1126_v28 = vpop.permute.xlu1 %1125  ;;  %7048 = vmatpush1.bf16.msra.mxu1 %v7047_v11 }
 0x24b   : > { %v1128_v30 = vpop.permute.xlu0 %1127  ;;  %v7049_v33 = vpack.c.bf16 %v1116_v19, %v1114_v18  ;;  %v7051_v36 = vpack.c.bf16 %v1115_v29, %v1113_v14 }
 0x24c   : > { %v1130_v39 = vsel %vm668_vm6, %v1126_v28, %v1128_v30  ;;  %v1138_v24 = vsel %vm668_vm6, %v1128_v30, %v1126_v28  ;;  %v1529_v30 = vrot.slane %v6899_v21, %v7681_v4 }
 0x24d   : > { %v1153_v23 = vmul.f32 %v1144_v1, %v1130_v39  ;;  %v1154_v31 = vmul.f32 %v1148_v5, %v1138_v24  ;;  %7050 = vmatprep.subr.bf16.mxu1 %v7049_v33 }
 0x24e   : > { %v1164_v45 = vpop.permute.xlu1 %1163  ;;  %7052 = vmatpush1.bf16.msra.mxu1 %v7051_v36 }
 0x24f   : > { %v1166_v46 = vpop.permute.xlu0 %1165  ;;  %v7053_v32 = vpack.c.bf16 %v1154_v31, %v1152_v41  ;;  %v7055_v47 = vpack.c.bf16 %v1153_v23, %v1151_v40 }
 0x250   : > { %v1168_v50 = vsel %vm714_vm7, %v1164_v45, %v1166_v46  ;;  %v1176_v51 = vsel %vm714_vm7, %v1166_v46, %v1164_v45  ;;  %v414_v45 = vld [vmem:[%s10347_s7 + $0x8] sm:$0xff] }
 0x251   : > { %v1191_v55 = vmul.f32 %v1182_v37, %v1168_v50  ;;  %v1192_v56 = vmul.f32 %v1186_v38, %v1176_v51  ;;  %7054 = vmatprep.subr.bf16.mxu1 %v7053_v32  ;;  %v1533_v37 = vrot.slane %v6899_v21, %v7674_v3 }
 0x252   : > { %v1202_v35 = vpop.permute.xlu1 %1201  ;;  %7056 = vmatpush1.bf16.msra.mxu1 %v7055_v47 }
 0x253   : > { %v1204_v57 = vpop.permute.xlu0 %1203  ;;  %v7057_v58 = vpack.c.bf16 %v1192_v56, %v1190_v54  ;;  %v7059_v59 = vpack.c.bf16 %v1191_v55, %v1189_v26 }
 0x254   : > { %v1206_v60 = vsel %vm760_vm8, %v1202_v35, %v1204_v57  ;;  %v1214_v61 = vsel %vm760_vm8, %v1204_v57, %v1202_v35 }
 0x255   : > { %v1229_v0 = vmul.f32 %v1220_v48, %v1206_v60  ;;  %v1230_v1 = vmul.f32 %v1224_v49, %v1214_v61  ;;  %7058 = vmatprep.subr.bf16.mxu1 %v7057_v58  ;;  %v1395_v58 = vrot.slane %v1390_v34, %v7681_v4  ;;  %v6896_v60 = vld [vmem:[%s10341_s1 + $0x1] ss:$8 sm:$0x3] }
 0x256   : > { %7060 = vmatpush1.bf16.msra.mxu1 %v7059_v59  ;;  %v1399_v59 = vrot.slane %v1390_v34, %v7674_v3 }
 0x257   : > { %v7061_v2 = vpack.c.bf16 %v1230_v1, %v1228_v63  ;;  %v7063_v5 = vpack.c.bf16 %v1229_v0, %v1227_v62  ;;  %v1433_v1 = vrot.slane %v6896_v60, %v7681_v4 }
 0x259   : > { %7062 = vmatprep.subr.bf16.mxu1 %v7061_v2  ;;  %v1437_v2 = vrot.slane %v6896_v60, %v7674_v3 }
 0x25a   : > { %7064 = vmatpush1.bf16.msra.mxu1 %v7063_v5  ;;  %v6897_v5 = vld [vmem:[%s10341_s1 + $0x2] ss:$8 sm:$0x3] }
 0x25d   : > { %1352 = vmatmul.mubr.f32.vlgmr.msra.gmra.mrb[0].mxu1 %v8035_v52 }
 0x25e   : > { %6895 = vmatprep.mubr.msk.f32.mxu1 %vm479_vm1, %v8040_v53 }
 0x261   : > { %1358 = vmatmul.mubr.f32.gmra.mrb[2].mxu1 %v8048_v9 }
 0x262   : > { %6914 = vmatprep.mubr.msk.f32.mxu1 %vm479_vm1, %v7901_v17 }
 0x263   : > { %v8053_v13 = vpop.permute.xlu1 %1273 }
 0x264   : > { %v8060_v20 = vpop.permute.xlu0 %1278 }
 0x330   : > { %v1353_v11 = vpop.f32.mrb[0].mxu1 }
 0x331   : > { %v1354_v14 = vadd.f32 %v1353_v11, %v8053_v13  ;;  %v1355_v18 = vpop.f32.mrb[1].mxu1 }
 0x332   : > { %v1356_v29 = vadd.f32 %v1355_v18, %v8053_v13 }
 0x333   : > { %v1364_v19 = vmax.f32 %v1354_v14, 0.0 }
 0x334   : > { %v1365_v22 = vmax.f32 %v1356_v29, 0.0  ;;  %v1359_v28 = vpop.f32.mrb[2].mxu1 }
 0x335   : > { %v1360_v17 = vadd.f32 %v1359_v28, %v8060_v20  ;;  %v1361_v33 = vpop.f32.mrb[3].mxu1  ;;  %1378 = vrot.lane.b32.xlu1 %v1364_v19, %s7575_s12  ;;  %v8068_v24 = vmul.f32 %v1529_v30, %v1364_v19  ;;  %v1471_v28 = vrot.slane %v6897_v5, %v7681_v4 }
 0x336   : > { %v1362_v36 = vadd.f32 %v1361_v33, %v8060_v20  ;;  %1546 = vrot.lane.b32.xlu0 %v1365_v22, %s7578_s15  ;;  %v8074_v41 = vmul.f32 %v1533_v37, %v1365_v22 }
 0x337   : > { %v1366_v38 = vmax.f32 %v1360_v17, 0.0 }
 0x338   : > { %v1367_v39 = vmax.f32 %v1362_v36, 0.0 }
 0x339   : > { %v8070_v40 = vmul.f32 %v1529_v30, %v1366_v38  ;;  %1416 = vrot.lane.b32.xlu1 %v1364_v19, %s7574_s30  ;;  %v1475_v30 = vrot.slane %v6897_v5, %v7674_v3 }
 0x33a   : > { %1584 = vrot.lane.b32.xlu0 %v1365_v22, %s7579_s18  ;;  %v8076_v42 = vmul.f32 %v1533_v37, %v1367_v39  ;;  %v6898_v37 = vld [vmem:[%s10341_s1 + $0x3] ss:$8 sm:$0x3] }
 0x33b   : > { %v7083_v23 = vpack.c.bf16 %v8070_v40, %v8068_v24  ;;  %v1509_v60 = vrot.slane %v6898_v37, %v7681_v4 }
 0x33c   : > { %v7081_v31 = vpack.c.bf16 %v8076_v42, %v8074_v41 }
 0x33d   : > { %1454 = vrot.lane.b32.xlu1 %v1364_v19, %s7576_s13 }
 0x33e   : > { %1622 = vrot.lane.b32.xlu0 %v1365_v22, %s7580_s21 }
 0x341   : > { %1492 = vrot.lane.b32.xlu1 %v1364_v19, %s7577_s14 }
 0x342   : > { %1380 = vrot.lane.b32.xlu0 %v1366_v38, %s7575_s12 }
 0x345   : > { %1544 = vrot.lane.b32.xlu1 %v1364_v19, %s7578_s15 }
 0x346   : > { %1418 = vrot.lane.b32.xlu0 %v1366_v38, %s7574_s30 }
 0x349   : > { %1582 = vrot.lane.b32.xlu1 %v1364_v19, %s7579_s18 }
 0x34a   : > { %1456 = vrot.lane.b32.xlu0 %v1366_v38, %s7576_s13 }
 0x34d   : > { %1620 = vrot.lane.b32.xlu1 %v1364_v19, %s7580_s21 }
 0x34e   : > { %1494 = vrot.lane.b32.xlu0 %v1366_v38, %s7577_s14 }
 0x351   : > { %1370 = vrot.lane.b32.xlu1 %v1365_v22, %s7575_s12 }
 0x352   : > { %1372 = vrot.lane.b32.xlu0 %v1367_v39, %s7575_s12 }
 0x355   : > { %1410 = vrot.lane.b32.xlu1 %v1365_v22, %s7574_s30 }
 0x356   : > { %1412 = vrot.lane.b32.xlu0 %v1367_v39, %s7574_s30 }
 0x359   : > { %1448 = vrot.lane.b32.xlu1 %v1365_v22, %s7576_s13 }
 0x35a   : > { %1450 = vrot.lane.b32.xlu0 %v1367_v39, %s7576_s13 }
 0x35d   : > { %1486 = vrot.lane.b32.xlu1 %v1365_v22, %s7577_s14 }
 0x35e   : > { %1488 = vrot.lane.b32.xlu0 %v1367_v39, %s7577_s14 }
 0x361   : > { %1658 = vrot.lane.b32.xlu1 %v1364_v19, %s7581_s22 }
 0x362   : > { %1660 = vrot.lane.b32.xlu0 %v1365_v22, %s7581_s22 }
 0x365   : > { %1548 = vrot.lane.b32.xlu1 %v1366_v38, %s7578_s15 }
 0x366   : > { %1550 = vrot.lane.b32.xlu0 %v1367_v39, %s7578_s15 }
 0x369   : > { %1586 = vrot.lane.b32.xlu1 %v1366_v38, %s7579_s18 }
 0x36a   : > { %1588 = vrot.lane.b32.xlu0 %v1367_v39, %s7579_s18 }
 0x36d   : > { %1624 = vrot.lane.b32.xlu1 %v1366_v38, %s7580_s21 }
 0x36e   : > { %1626 = vrot.lane.b32.xlu0 %v1367_v39, %s7580_s21 }
 0x371   : > { %1662 = vrot.lane.b32.xlu1 %v1366_v38, %s7581_s22 }
 0x372   : > { %1664 = vrot.lane.b32.xlu0 %v1367_v39, %s7581_s22 }
 0x375   : > { %1734 = vperm.xlu1 %7529, %v413_v44  }
 0x376   : > { %1739 = vperm.xlu0 %7528, %v414_v45  }
 0x3a7   : > { %v1379_v46 = vpop.permute.xlu1 %1378 }
 0x3a8   : > { %v8123_v32 = vpop.permute.xlu0 %1546 }
 0x3ab   : > { %v1417_v47 = vpop.permute.xlu1 %1416 }
 0x3ac   : > { %v8125_v48 = vpop.permute.xlu0 %1584 }
 0x3af   : > { %v1455_v49 = vpop.permute.xlu1 %1454 }
 0x3b0   : > { %v8127_v50 = vpop.permute.xlu0 %1622 }
 0x3b3   : > { %v1493_v51 = vpop.permute.xlu1 %1492 }
 0x3b4   : > { %v1381_v26 = vpop.permute.xlu0 %1380 }
 0x3b7   : > { %v8129_v54 = vpop.permute.xlu1 %1544 }
 0x3b8   : > { %v1419_v55 = vpop.permute.xlu0 %1418 }
 0x3bb   : > { %v8131_v56 = vpop.permute.xlu1 %1582 }
 0x3bc   : > { %v1457_v25 = vpop.permute.xlu0 %1456  ;;  %v1590_v41 = vsel %vm668_vm6, %v8131_v56, %v8125_v48  ;;  %v1598_v42 = vsel %vm668_vm6, %v8125_v48, %v8131_v56  ;;  %v6903_v48 = vld [vmem:[%s10341_s1 + $0x10] ss:$8 sm:$0x3] }
 0x3bf   : > { %v8136_v35 = vpop.permute.xlu1 %1620 }
 0x3c0   : > { %v1495_v57 = vpop.permute.xlu0 %1494  ;;  %v1628_v40 = vsel %vm714_vm7, %v8136_v35, %v8127_v50 }
 0x3c3   : > { %v1371_v61 = vpop.permute.xlu1 %1370 }
 0x3c4   : > { %v1382_v62 = vsel %vm431_vm2, %v1379_v46, %v1371_v61  ;;  %v1388_v63 = vsel %vm431_vm2, %v1371_v61, %v1379_v46  ;;  %v1373_v0 = vpop.permute.xlu0 %1372 }
 0x3c5   : > { %v1402_v11 = vmul.f32 %v1395_v58, %v1388_v63  ;;  %v1403_v14 = vmul.f32 %v1399_v59, %v1382_v62  ;;  %v1383_v18 = vsel %vm431_vm2, %v1381_v26, %v1373_v0  ;;  %v1389_v21 = vsel %vm431_vm2, %v1373_v0, %v1381_v26 }
 0x3c6   : > { %v1404_v29 = vmul.f32 %v1395_v58, %v1389_v21  ;;  %v1405_v19 = vmul.f32 %v1399_v59, %v1383_v18 }
 0x3c7   : > { %v1411_v22 = vpop.permute.xlu1 %1410 }
 0x3c8   : > { %v1420_v17 = vsel %vm479_vm1, %v1417_v47, %v1411_v22  ;;  %v1426_v33 = vsel %vm479_vm1, %v1411_v22, %v1417_v47  ;;  %v1413_v36 = vpop.permute.xlu0 %1412  ;;  %v7065_v38 = vpack.c.bf16 %v1405_v19, %v1403_v14  ;;  %v7067_v39 = vpack.c.bf16 %v1404_v29, %v1402_v11 }
 0x3c9   : > { %v1440_v44 = vmul.f32 %v1433_v1, %v1426_v33  ;;  %v1441_v45 = vmul.f32 %v1437_v2, %v1420_v17  ;;  %v1421_v46 = vsel %vm479_vm1, %v1419_v55, %v1413_v36  ;;  %v1427_v26 = vsel %vm479_vm1, %v1413_v36, %v1419_v55 }
 0x3ca   : > { %v1442_v34 = vmul.f32 %v1433_v1, %v1427_v26  ;;  %v1443_v58 = vmul.f32 %v1437_v2, %v1421_v46  ;;  %7066 = vmatprep.subr.bf16.mxu0 %v7065_v38  ;;  %v1513_v47 = vrot.slane %v6898_v37, %v7674_v3 }
 0x3cb   : > { %v1449_v59 = vpop.permute.xlu1 %1448  ;;  %7068 = vmatpush1.bf16.msra.mxu0 %v7067_v39 }
 0x3cc   : > { %v1458_v61 = vsel %vm525_vm3, %v1455_v49, %v1449_v59  ;;  %v1464_v62 = vsel %vm525_vm3, %v1449_v59, %v1455_v49  ;;  %v1451_v63 = vpop.permute.xlu0 %1450  ;;  %v7069_v0 = vpack.c.bf16 %v1443_v58, %v1441_v45  ;;  %v7071_v5 = vpack.c.bf16 %v1442_v34, %v1440_v44 }
 0x3cd   : > { %v1478_v11 = vmul.f32 %v1471_v28, %v1464_v62  ;;  %v1479_v14 = vmul.f32 %v1475_v30, %v1458_v61  ;;  %v1459_v55 = vsel %vm525_vm3, %v1457_v25, %v1451_v63  ;;  %v1465_v1 = vsel %vm525_vm3, %v1451_v63, %v1457_v25 }
 0x3ce   : > { %v1480_v2 = vmul.f32 %v1471_v28, %v1465_v1  ;;  %v1481_v18 = vmul.f32 %v1475_v30, %v1459_v55  ;;  %7070 = vmatprep.subr.bf16.mxu0 %v7069_v0  ;;  %v6900_v28 = vld [vmem:[%s10341_s1 + $0x5] ss:$8 sm:$0x3]  ;;  %v1552_v34 = vsel %vm622_vm5, %v8129_v54, %v8123_v32  ;;  %v1560_v58 = vsel %vm622_vm5, %v8123_v32, %v8129_v54  ;;  %v6902_v32 = vld [vmem:[%s10341_s1 + $0x7] ss:$8 sm:$0x3] }
 0x3cf   : > { %v1487_v21 = vpop.permute.xlu1 %1486  ;;  %7072 = vmatpush1.bf16.msra.mxu0 %v7071_v5  ;;  %v1567_v46 = vrot.slane %v6900_v28, %v7681_v4  ;;  %v1571_v26 = vrot.slane %v6900_v28, %v7674_v3 }
 0x3d0   : > { %v1496_v29 = vsel %vm571_vm4, %v1493_v51, %v1487_v21  ;;  %v1502_v19 = vsel %vm571_vm4, %v1487_v21, %v1493_v51  ;;  %v1489_v22 = vpop.permute.xlu0 %1488  ;;  %v7073_v49 = vpack.c.bf16 %v1481_v18, %v1479_v14  ;;  %v7075_v17 = vpack.c.bf16 %v1480_v2, %v1478_v11 }
 0x3d1   : > { %v1516_v33 = vmul.f32 %v1509_v60, %v1502_v19  ;;  %v1517_v36 = vmul.f32 %v1513_v47, %v1496_v29  ;;  %v1497_v37 = vsel %vm571_vm4, %v1495_v57, %v1489_v22  ;;  %v1503_v38 = vsel %vm571_vm4, %v1489_v22, %v1495_v57  ;;  %v6901_v57 = vld [vmem:[%s10341_s1 + $0x6] ss:$8 sm:$0x3] }
 0x3d2   : > { %v1518_v39 = vmul.f32 %v1509_v60, %v1503_v38  ;;  %v1519_v25 = vmul.f32 %v1513_v47, %v1497_v37  ;;  %7074 = vmatprep.subr.bf16.mxu0 %v7073_v49  ;;  %v1605_v47 = vrot.slane %v6901_v57, %v7681_v4  ;;  %v1609_v61 = vrot.slane %v6901_v57, %v7674_v3 }
 0x3d3   : > { %v1659_v30 = vpop.permute.xlu1 %1658  ;;  %7076 = vmatpush1.bf16.msra.mxu0 %v7075_v17  ;;  %v1574_v0 = vmul.f32 %v1567_v46, %v1552_v34  ;;  %v1575_v5 = vmul.f32 %v1571_v26, %v1560_v58  ;;  %v1643_v2 = vrot.slane %v6902_v32, %v7681_v4  ;;  %v1647_v18 = vrot.slane %v6902_v32, %v7674_v3  ;;  %v8241_v32 = vld [vmem:[%s10346_s6 + $0x10] sm:$0xff] }
 0x3d4   : > { %v1661_v44 = vpop.permute.xlu0 %1660  ;;  %v7077_v51 = vpack.c.bf16 %v1519_v25, %v1517_v36  ;;  %v7079_v45 = vpack.c.bf16 %v1518_v39, %v1516_v33  ;;  %v1612_v19 = vmul.f32 %v1605_v47, %v1590_v41  ;;  %v1613_v22 = vmul.f32 %v1609_v61, %v1598_v42 }
 0x3d5   : > { %v1681_v37 = vrot.slane %v6903_v48, %v7681_v4  ;;  %v1685_v38 = vrot.slane %v6903_v48, %v7674_v3  ;;  %v1650_v28 = vmul.f32 %v1643_v2, %v1628_v40  ;;  %v1826_v41 = vstv %s1825_s25  ;;  %s6947_s25 = sld [smem:[#allocation4 + $0x2]] }
 0x3d6   : > { %7078 = vmatprep.subr.bf16.mxu0 %v7077_v51 }
 0x3d7   : > { %v1549_v59 = vpop.permute.xlu1 %1548  ;;  %7080 = vmatpush1.bf16.msra.mxu0 %v7079_v45 }
 0x3d8   : > { %v1551_v60 = vpop.permute.xlu0 %1550  ;;  %7082 = vmatprep.subr.bf16.mxu0 %v7081_v31 }
 0x3d9   : > { %v1553_v62 = vsel %vm622_vm5, %v1549_v59, %v1551_v60  ;;  %v1561_v63 = vsel %vm622_vm5, %v1551_v60, %v1549_v59 }
 0x3da   : > { %v1576_v54 = vmul.f32 %v1567_v46, %v1553_v62  ;;  %v1577_v11 = vmul.f32 %v1571_v26, %v1561_v63 }
 0x3db   : > { %v1587_v31 = vpop.permute.xlu1 %1586  ;;  %7084 = vmatpush1.bf16.msra.mxu0 %v7083_v23  ;;  %v1636_v23 = vsel %vm714_vm7, %v8127_v50, %v8136_v35  ;;  %v1666_v50 = vsel %vm760_vm8, %v1659_v30, %v1661_v44  ;;  %v1674_v35 = vsel %vm760_vm8, %v1661_v44, %v1659_v30  ;;  %v8228_v30 = vld [vmem:[%s10346_s6] sm:$0xff]  ;;  %v8233_v44 = vld [vmem:[%s10346_s6 + $0x18] sm:$0xff] }
 0x3dc   : > { %v1589_v14 = vpop.permute.xlu0 %1588  ;;  %v7085_v55 = vpack.c.bf16 %v1577_v11, %v1575_v5  ;;  %v7087_v1 = vpack.c.bf16 %v1576_v54, %v1574_v0  ;;  %v1651_v51 = vmul.f32 %v1647_v18, %v1636_v23 }
 0x3dd   : > { %v1591_v21 = vsel %vm668_vm6, %v1587_v31, %v1589_v14  ;;  %v1599_v29 = vsel %vm668_vm6, %v1589_v14, %v1587_v31 }
 0x3de   : > { %v1614_v56 = vmul.f32 %v1605_v47, %v1591_v21  ;;  %v1615_v24 = vmul.f32 %v1609_v61, %v1599_v29  ;;  %7086 = vmatprep.subr.bf16.mxu0 %v7085_v55  ;;  %v1688_v47 = vmul.f32 %v1681_v37, %v1666_v50  ;;  %v1689_v61 = vmul.f32 %v1685_v38, %v1674_v35  ;;  %v6906_v50 = vld [vmem:[%s10341_s1 + $0x1] ss:$8 sm:$0x3] }
 0x3df   : > { %v1625_v49 = vpop.permute.xlu1 %1624  ;;  %7088 = vmatpush1.bf16.msra.mxu0 %v7087_v1 }
 0x3e0   : > { %v1627_v17 = vpop.permute.xlu0 %1626  ;;  %v7089_v33 = vpack.c.bf16 %v1615_v24, %v1613_v22  ;;  %v7091_v36 = vpack.c.bf16 %v1614_v56, %v1612_v19 }
 0x3e1   : > { %v1629_v39 = vsel %vm714_vm7, %v1625_v49, %v1627_v17  ;;  %v1637_v25 = vsel %vm714_vm7, %v1627_v17, %v1625_v49 }
 0x3e2   : > { %v1652_v45 = vmul.f32 %v1643_v2, %v1629_v39  ;;  %v1653_v46 = vmul.f32 %v1647_v18, %v1637_v25  ;;  %7090 = vmatprep.subr.bf16.mxu0 %v7089_v33  ;;  %v1857_v25 = vld [vmem:[%s10341_s1] ss:$8 sm:$0x3] }
 0x3e3   : > { %v1663_v26 = vpop.permute.xlu1 %1662  ;;  %7092 = vmatpush1.bf16.msra.mxu0 %v7091_v36 }
 0x3e4   : > { %v1665_v57 = vpop.permute.xlu0 %1664  ;;  %v7093_v34 = vpack.c.bf16 %v1653_v46, %v1651_v51  ;;  %v7095_v58 = vpack.c.bf16 %v1652_v45, %v1650_v28  ;;  %v1862_v45 = vrot.slane %v1857_v25, %v7681_v4  ;;  %v1866_v46 = vrot.slane %v1857_v25, %v7674_v3 }
 0x3e5   : > { %v1667_v59 = vsel %vm760_vm8, %v1663_v26, %v1665_v57  ;;  %v1675_v60 = vsel %vm760_vm8, %v1665_v57, %v1663_v26 }
 0x3e6   : > { %v1690_v62 = vmul.f32 %v1681_v37, %v1667_v59  ;;  %v1691_v63 = vmul.f32 %v1685_v38, %v1675_v60  ;;  %7094 = vmatprep.subr.bf16.mxu0 %v7093_v34  ;;  %v1904_v59 = vrot.slane %v6906_v50, %v7674_v3  ;;  %v6907_v60 = vld [vmem:[%s10341_s1 + $0x2] ss:$8 sm:$0x3] }
 0x3e7   : > { %7096 = vmatpush1.bf16.msra.mxu0 %v7095_v58  ;;  %v1900_v58 = vrot.slane %v6906_v50, %v7681_v4 }
 0x3e8   : > { %v7097_v0 = vpack.c.bf16 %v1691_v63, %v1689_v61  ;;  %v7099_v5 = vpack.c.bf16 %v1690_v62, %v1688_v47 }
 0x3ea   : > { %7098 = vmatprep.subr.bf16.mxu0 %v7097_v0 }
 0x3eb   : > { %7100 = vmatpush1.bf16.msra.mxu0 %v7099_v5 }
 0x3ee   : > { %1813 = vmatmul.mubr.f32.vlgmr.msra.gmra.mrb[4].mxu0 %v8228_v30 }
 0x3ef   : > { %6905 = vmatprep.mubr.msk.f32.mxu0 %vm479_vm1, %v8233_v44 }
 0x3f2   : > { %1819 = vmatmul.mubr.f32.gmra.mrb[6].mxu0 %v8241_v32 }
 0x3f3   : > { %6924 = vmatprep.mubr.msk.f32.mxu0 %vm479_vm1, %v8109_v43 }
 0x3f4   : > { %v8246_v54 = vpop.permute.xlu1 %1734 }
 0x3f5   : > { %v8260_v43 = vpop.permute.xlu0 %1739 }
 0x4c1   : > { %v1814_v11 = vpop.f32.mrb[4].mxu0 }
 0x4c2   : > { %v1815_v42 = vadd.f32 %v1814_v11, %v8246_v54  ;;  %v1816_v31 = vpop.f32.mrb[5].mxu0 }
 0x4c3   : > { %v1817_v14 = vadd.f32 %v1816_v31, %v8246_v54 }
 0x4c4   : > { %v1827_v55 = vmul.f32 %v1826_v41, %v1815_v42  ;;  %v1942_v42 = vrot.slane %v6907_v60, %v7674_v3 }
 0x4c5   : > { %v1828_v1 = vmul.f32 %v1826_v41, %v1817_v14  ;;  %v1820_v2 = vpop.f32.mrb[6].mxu0 }
 0x4c6   : > { %v8251_v18 = vadd.f32 %v1827_v55, %v7834_v8  ;;  %v1822_v21 = vpop.f32.mrb[7].mxu0  ;;  %v1821_v19 = vadd.f32 %v1820_v2, %v8260_v43 }
 0x4c7   : > { %v8254_v29 = vadd.f32 %v1828_v1, %v7836_v12  ;;  %v1823_v22 = vadd.f32 %v1822_v21, %v8260_v43  ;;  %v6908_v1 = vld [vmem:[%s10341_s1 + $0x3] ss:$8 sm:$0x3] }
 0x4c8   : > { %1845 = vrot.lane.b32.xlu1 %v8251_v18, %s7575_s12  ;;  %v1829_v8 = vmul.f32 %v1826_v41, %v1821_v19 }
 0x4c9   : > { %2013 = vrot.lane.b32.xlu0 %v8254_v29, %s7578_s15 }
 0x4ca   : > { %v8272_v12 = vadd.f32 %v1829_v8, %v7850_v15  ;;  %v1830_v15 = vmul.f32 %v1826_v41, %v1823_v22  ;;  %v1938_v41 = vrot.slane %v6907_v60, %v7681_v4 }
 0x4cc   : > { %1883 = vrot.lane.b32.xlu1 %v8251_v18, %s7574_s30  ;;  %v8292_v48 = vadd.f32 %v1830_v15, %v7868_v16 }
 0x4cd   : > { %2051 = vrot.lane.b32.xlu0 %v8254_v29, %s7579_s18 }
 0x4d0   : > { %1921 = vrot.lane.b32.xlu1 %v8251_v18, %s7576_s13 }
 0x4d1   : > { %2089 = vrot.lane.b32.xlu0 %v8254_v29, %s7580_s21 }
 0x4d4   : > { %1959 = vrot.lane.b32.xlu1 %v8251_v18, %s7577_s14 }
 0x4d5   : > { %1847 = vrot.lane.b32.xlu0 %v8272_v12, %s7575_s12 }
 0x4d8   : > { %2011 = vrot.lane.b32.xlu1 %v8251_v18, %s7578_s15 }
 0x4d9   : > { %1885 = vrot.lane.b32.xlu0 %v8272_v12, %s7574_s30 }
 0x4dc   : > { %2049 = vrot.lane.b32.xlu1 %v8251_v18, %s7579_s18 }
 0x4dd   : > { %1923 = vrot.lane.b32.xlu0 %v8272_v12, %s7576_s13 }
 0x4e0   : > { %2087 = vrot.lane.b32.xlu1 %v8251_v18, %s7580_s21 }
 0x4e1   : > { %1961 = vrot.lane.b32.xlu0 %v8272_v12, %s7577_s14 }
 0x4e4   : > { %1837 = vrot.lane.b32.xlu1 %v8254_v29, %s7575_s12 }
 0x4e5   : > { %1839 = vrot.lane.b32.xlu0 %v8292_v48, %s7575_s12 }
 0x4e8   : > { %1877 = vrot.lane.b32.xlu1 %v8254_v29, %s7574_s30 }
 0x4e9   : > { %1879 = vrot.lane.b32.xlu0 %v8292_v48, %s7574_s30 }
 0x4ec   : > { %1915 = vrot.lane.b32.xlu1 %v8254_v29, %s7576_s13 }
 0x4ed   : > { %1917 = vrot.lane.b32.xlu0 %v8292_v48, %s7576_s13 }
 0x4f0   : > { %1953 = vrot.lane.b32.xlu1 %v8254_v29, %s7577_s14 }
 0x4f1   : > { %1955 = vrot.lane.b32.xlu0 %v8292_v48, %s7577_s14 }
 0x4f4   : > { %2125 = vrot.lane.b32.xlu1 %v8251_v18, %s7581_s22 }
 0x4f5   : > { %2127 = vrot.lane.b32.xlu0 %v8254_v29, %s7581_s22 }
 0x4f8   : > { %2015 = vrot.lane.b32.xlu1 %v8272_v12, %s7578_s15 }
 0x4f9   : > { %2017 = vrot.lane.b32.xlu0 %v8292_v48, %s7578_s15 }
 0x4fc   : > { %2053 = vrot.lane.b32.xlu1 %v8272_v12, %s7579_s18 }
 0x4fd   : > { %2055 = vrot.lane.b32.xlu0 %v8292_v48, %s7579_s18 }
 0x500   : > { %2091 = vrot.lane.b32.xlu1 %v8272_v12, %s7580_s21 }
 0x501   : > { %2093 = vrot.lane.b32.xlu0 %v8292_v48, %s7580_s21 }
 0x504   : > { %2129 = vrot.lane.b32.xlu1 %v8272_v12, %s7581_s22 }
 0x505   : > { %2131 = vrot.lane.b32.xlu0 %v8292_v48, %s7581_s22 }
 0x53a   : > { %v1846_v16 = vpop.permute.xlu1 %1845 }
 0x53b   : > { %v8330_v56 = vpop.permute.xlu0 %2013 }
 0x53e   : > { %v1884_v24 = vpop.permute.xlu1 %1883 }
 0x53f   : > { %v8332_v40 = vpop.permute.xlu0 %2051 }
 0x542   : > { %v1922_v23 = vpop.permute.xlu1 %1921 }
 0x543   : > { %v8334_v49 = vpop.permute.xlu0 %2089 }
 0x546   : > { %v8336_v17 = vpop.permute.xlu1 %1959 }
 0x547   : > { %v1848_v33 = vpop.permute.xlu0 %1847 }
 0x54a   : > { %v8338_v36 = vpop.permute.xlu1 %2011 }
 0x54b   : > { %v1886_v37 = vpop.permute.xlu0 %1885 }
 0x54e   : > { %v8340_v38 = vpop.permute.xlu1 %2049 }
 0x54f   : > { %v1924_v39 = vpop.permute.xlu0 %1923 }
 0x552   : > { %v8345_v28 = vpop.permute.xlu1 %2087 }
 0x553   : > { %v1962_v51 = vpop.permute.xlu0 %1961 }
 0x556   : > { %v1838_v35 = vpop.permute.xlu1 %1837 }
 0x557   : > { %v1849_v26 = vsel %vm431_vm2, %v1846_v16, %v1838_v35  ;;  %v1855_v57 = vsel %vm431_vm2, %v1838_v35, %v1846_v16  ;;  %v1840_v34 = vpop.permute.xlu0 %1839 }
 0x558   : > { %v1869_v47 = vmul.f32 %v1862_v45, %v1855_v57  ;;  %v1870_v61 = vmul.f32 %v1866_v46, %v1849_v26  ;;  %v1850_v62 = vsel %vm431_vm2, %v1848_v33, %v1840_v34  ;;  %v1856_v63 = vsel %vm431_vm2, %v1840_v34, %v1848_v33 }
 0x559   : > { %v1871_v0 = vmul.f32 %v1862_v45, %v1856_v63  ;;  %v1872_v5 = vmul.f32 %v1866_v46, %v1850_v62  ;;  %v1976_v45 = vrot.slane %v6908_v1, %v7681_v4 }
 0x55a   : > { %v1878_v11 = vpop.permute.xlu1 %1877 }
 0x55b   : > { %v1887_v31 = vsel %vm479_vm1, %v1884_v24, %v1878_v11  ;;  %v1893_v14 = vsel %vm479_vm1, %v1878_v11, %v1884_v24  ;;  %v1880_v55 = vpop.permute.xlu0 %1879  ;;  %v7101_v2 = vpack.c.bf16 %v1872_v5, %v1870_v61  ;;  %v7103_v21 = vpack.c.bf16 %v1871_v0, %v1869_v47 }
 0x55c   : > { %v1907_v19 = vmul.f32 %v1900_v58, %v1893_v14  ;;  %v1908_v8 = vmul.f32 %v1904_v59, %v1887_v31  ;;  %v1888_v22 = vsel %vm479_vm1, %v1886_v37, %v1880_v55  ;;  %v1894_v15 = vsel %vm479_vm1, %v1880_v55, %v1886_v37  ;;  %v6909_v37 = vld [vmem:[%s10341_s1 + $0x4] ss:$8 sm:$0x3] }
 0x55d   : > { %v1909_v16 = vmul.f32 %v1900_v58, %v1894_v15  ;;  %v1910_v33 = vmul.f32 %v1904_v59, %v1888_v22  ;;  %7102 = vmatprep.subr.bf16.mxu1 %v7101_v2  ;;  %v1980_v24 = vrot.slane %v6908_v1, %v7674_v3 }
 0x55e   : > { %v1916_v25 = vpop.permute.xlu1 %1915  ;;  %7104 = vmatpush1.bf16.msra.mxu1 %v7103_v21  ;;  %v6910_v21 = vld [vmem:[%s10341_s1 + $0x5] ss:$8 sm:$0x3] }
 0x55f   : > { %v1925_v46 = vsel %vm525_vm3, %v1922_v23, %v1916_v25  ;;  %v1931_v50 = vsel %vm525_vm3, %v1916_v25, %v1922_v23  ;;  %v1918_v35 = vpop.permute.xlu0 %1917  ;;  %v7105_v26 = vpack.c.bf16 %v1910_v33, %v1908_v8  ;;  %v7107_v57 = vpack.c.bf16 %v1909_v16, %v1907_v19 }
 0x560   : > { %v1945_v34 = vmul.f32 %v1938_v41, %v1931_v50  ;;  %v1946_v58 = vmul.f32 %v1942_v42, %v1925_v46  ;;  %v1926_v59 = vsel %vm525_vm3, %v1924_v39, %v1918_v35  ;;  %v1932_v60 = vsel %vm525_vm3, %v1918_v35, %v1924_v39 }
 0x561   : > { %v1947_v47 = vmul.f32 %v1938_v41, %v1932_v60  ;;  %v1948_v61 = vmul.f32 %v1942_v42, %v1926_v59  ;;  %7106 = vmatprep.subr.bf16.mxu1 %v7105_v26  ;;  %v2000_v23 = vrot.slane %v6909_v37, %v7674_v3  ;;  %v2034_v25 = vrot.slane %v6910_v21, %v7681_v4 }
 0x562   : > { %v1954_v62 = vpop.permute.xlu1 %1953  ;;  %7108 = vmatpush1.bf16.msra.mxu1 %v7107_v57  ;;  %v2019_v46 = vsel %vm622_vm5, %v8338_v36, %v8330_v56  ;;  %v2027_v50 = vsel %vm622_vm5, %v8330_v56, %v8338_v36  ;;  %v6912_v56 = vld [vmem:[%s10341_s1 + $0x7] ss:$8 sm:$0x3] }
 0x563   : > { %v1963_v63 = vsel %vm571_vm4, %v8336_v17, %v1954_v62  ;;  %v1969_v0 = vsel %vm571_vm4, %v1954_v62, %v8336_v17  ;;  %v1956_v5 = vpop.permute.xlu0 %1955  ;;  %v7109_v11 = vpack.c.bf16 %v1948_v61, %v1946_v58  ;;  %v7111_v31 = vpack.c.bf16 %v1947_v47, %v1945_v34 }
 0x564   : > { %v1983_v14 = vmul.f32 %v1976_v45, %v1969_v0  ;;  %v1984_v55 = vmul.f32 %v1980_v24, %v1963_v63  ;;  %v1964_v39 = vsel %vm571_vm4, %v1962_v51, %v1956_v5  ;;  %v1970_v41 = vsel %vm571_vm4, %v1956_v5, %v1962_v51  ;;  %v6911_v51 = vld [vmem:[%s10341_s1 + $0x6] ss:$8 sm:$0x3] }
 0x565   : > { %v1985_v42 = vmul.f32 %v1976_v45, %v1970_v41  ;;  %v1986_v1 = vmul.f32 %v1980_v24, %v1964_v39  ;;  %7110 = vmatprep.subr.bf16.mxu1 %v7109_v11  ;;  %v2006_v2 = vmul.f32 %v2000_v23, %v8292_v48  ;;  %v1996_v17 = vrot.slane %v6909_v37, %v7681_v4 }
 0x566   : > { %v8390_v19 = vpop.permute.xlu1 %2125  ;;  %7112 = vmatpush1.bf16.msra.mxu1 %v7111_v31  ;;  %v2004_v16 = vmul.f32 %v2000_v23, %v8254_v29  ;;  %v2038_v45 = vrot.slane %v6910_v21, %v7674_v3  ;;  %v2072_v57 = vrot.slane %v6911_v51, %v7681_v4  ;;  %v2076_v34 = vrot.slane %v6911_v51, %v7674_v3 }
 0x567   : > { %v2128_v8 = vpop.permute.xlu0 %2127  ;;  %v7113_v22 = vpack.c.bf16 %v1986_v1, %v1984_v55  ;;  %v7115_v15 = vpack.c.bf16 %v1985_v42, %v1983_v14  ;;  %v2005_v33 = vmul.f32 %v1996_v17, %v8272_v12  ;;  %v2003_v26 = vmul.f32 %v1996_v17, %v8251_v18 }
 0x568   : > { %v7117_v24 = vpack.c.bf16 %v2006_v2, %v2004_v16  ;;  %v2041_v47 = vmul.f32 %v2034_v25, %v2019_v46  ;;  %v2042_v61 = vmul.f32 %v2038_v45, %v2027_v50  ;;  %v2057_v23 = vsel %vm668_vm6, %v8340_v38, %v8332_v40  ;;  %v6913_v2 = vld [vmem:[%s10341_s1 + $0x10] ss:$8 sm:$0x3] }
 0x569   : > { %7114 = vmatprep.subr.bf16.mxu1 %v7113_v22  ;;  %v7119_v60 = vpack.c.bf16 %v2005_v33, %v2003_v26  ;;  %v2065_v63 = vsel %vm668_vm6, %v8332_v40, %v8340_v38  ;;  %v2110_v14 = vrot.slane %v6912_v56, %v7681_v4  ;;  %v2114_v55 = vrot.slane %v6912_v56, %v7674_v3 }
 0x56a   : > { %v2016_v35 = vpop.permute.xlu1 %2015  ;;  %7116 = vmatpush1.bf16.msra.mxu1 %v7115_v15  ;;  %v2079_v42 = vmul.f32 %v2072_v57, %v2057_v23  ;;  %v2080_v1 = vmul.f32 %v2076_v34, %v2065_v63  ;;  %v2095_v21 = vsel %vm714_vm7, %v8345_v28, %v8334_v49  ;;  %v2103_v17 = vsel %vm714_vm7, %v8334_v49, %v8345_v28 }
 0x56b   : > { %v2018_v37 = vpop.permute.xlu0 %2017  ;;  %7118 = vmatprep.subr.bf16.mxu1 %v7117_v24  ;;  %v2148_v33 = vrot.slane %v6913_v2, %v7681_v4  ;;  %v2117_v46 = vmul.f32 %v2110_v14, %v2095_v21  ;;  %v2118_v50 = vmul.f32 %v2114_v55, %v2103_v17  ;;  %v2133_v49 = vsel %vm760_vm8, %v8390_v19, %v2128_v8 }
 0x56c   : > { %v2020_v58 = vsel %vm622_vm5, %v2016_v35, %v2018_v37  ;;  %v2028_v59 = vsel %vm622_vm5, %v2018_v37, %v2016_v35  ;;  %v2141_v28 = vsel %vm760_vm8, %v2128_v8, %v8390_v19  ;;  %v8450_v19 = vld [vmem:[%s10344_s4 + $0x8] sm:$0xff] }
 0x56d   : > { %v2043_v36 = vmul.f32 %v2034_v25, %v2020_v58  ;;  %v2044_v62 = vmul.f32 %v2038_v45, %v2028_v59  ;;  %v2152_v25 = vrot.slane %v6913_v2, %v7674_v3 }
 0x56e   : > { %v2054_v0 = vpop.permute.xlu1 %2053  ;;  %7120 = vmatpush1.bf16.msra.mxu1 %v7119_v60 }
 0x56f   : > { %v2056_v5 = vpop.permute.xlu0 %2055  ;;  %v7121_v11 = vpack.c.bf16 %v2044_v62, %v2042_v61  ;;  %v7123_v31 = vpack.c.bf16 %v2043_v36, %v2041_v47  ;;  %v2155_v47 = vmul.f32 %v2148_v33, %v2133_v49  ;;  %v2156_v61 = vmul.f32 %v2152_v25, %v2141_v28  ;;  %v2302_v28 = vld [vmem:[%s10341_s1] ss:$8 sm:$0x3] }
 0x570   : > { %v2058_v39 = vsel %vm668_vm6, %v2054_v0, %v2056_v5  ;;  %v2066_v41 = vsel %vm668_vm6, %v2056_v5, %v2054_v0 }
 0x571   : > { %v2081_v40 = vmul.f32 %v2072_v57, %v2058_v39  ;;  %v2082_v38 = vmul.f32 %v2076_v34, %v2066_v41  ;;  %7122 = vmatprep.subr.bf16.mxu1 %v7121_v11 }
 0x572   : > { %v2092_v22 = vpop.permute.xlu1 %2091  ;;  %7124 = vmatpush1.bf16.msra.mxu1 %v7123_v31 }
 0x573   : > { %v2094_v15 = vpop.permute.xlu0 %2093  ;;  %v7125_v16 = vpack.c.bf16 %v2082_v38, %v2080_v1  ;;  %v7127_v51 = vpack.c.bf16 %v2081_v40, %v2079_v42 }
 0x574   : > { %v2096_v45 = vsel %vm714_vm7, %v2092_v22, %v2094_v15  ;;  %v2104_v24 = vsel %vm714_vm7, %v2094_v15, %v2092_v22 }
 0x575   : > { %v2119_v35 = vmul.f32 %v2110_v14, %v2096_v45  ;;  %v2120_v26 = vmul.f32 %v2114_v55, %v2104_v24  ;;  %7126 = vmatprep.subr.bf16.mxu1 %v7125_v16 }
 0x576   : > { %v2130_v57 = vpop.permute.xlu1 %2129  ;;  %7128 = vmatpush1.bf16.msra.mxu1 %v7127_v51 }
 0x577   : > { %v2132_v37 = vpop.permute.xlu0 %2131  ;;  %v7129_v34 = vpack.c.bf16 %v2120_v26, %v2118_v50  ;;  %v7131_v58 = vpack.c.bf16 %v2119_v35, %v2117_v46 }
 0x578   : > { %v2134_v59 = vsel %vm760_vm8, %v2130_v57, %v2132_v37  ;;  %v2142_v60 = vsel %vm760_vm8, %v2132_v37, %v2130_v57 }
 0x579   : > { %v2157_v56 = vmul.f32 %v2148_v33, %v2134_v59  ;;  %v2158_v36 = vmul.f32 %v2152_v25, %v2142_v60  ;;  %7130 = vmatprep.subr.bf16.mxu1 %v7129_v34  ;;  %v2307_v34 = vrot.slane %v2302_v28, %v7681_v4  ;;  %v6916_v59 = vld [vmem:[%s10341_s1 + $0x1] ss:$8 sm:$0x3] }
 0x57a   : > { %7132 = vmatpush1.bf16.msra.mxu1 %v7131_v58  ;;  %v2311_v58 = vrot.slane %v2302_v28, %v7674_v3 }
 0x57b   : > { %v7133_v62 = vpack.c.bf16 %v2158_v36, %v2156_v61  ;;  %v7135_v23 = vpack.c.bf16 %v2157_v56, %v2155_v47  ;;  %v2345_v36 = vrot.slane %v6916_v59, %v7681_v4 }
 0x57d   : > { %7134 = vmatprep.subr.bf16.mxu1 %v7133_v62  ;;  %v2349_v62 = vrot.slane %v6916_v59, %v7674_v3 }
 0x57e   : > { %7136 = vmatpush1.bf16.msra.mxu1 %v7135_v23  ;;  %v6917_v23 = vld [vmem:[%s10341_s1 + $0x2] ss:$8 sm:$0x3] }
 0x581   : > { %2264 = vmatmul.mubr.f32.vlgmr.msra.gmra.mrb[4].mxu1 %v8035_v52  ;;  %v6919_v52 = vld [vmem:[%s10341_s1 + $0x4] ss:$8 sm:$0x3] }
 0x582   : > { %6915 = vmatprep.mubr.msk.f32.mxu1 %vm479_vm1, %v8040_v53  ;;  %v2441_v31 = vrot.slane %v6919_v52, %v7681_v4  ;;  %v2445_v41 = vrot.slane %v6919_v52, %v7674_v3 }
 0x585   : > { %2270 = vmatmul.mubr.f32.gmra.mrb[6].mxu1 %v8048_v9 }
 0x586   : > { %6935 = vmatprep.mubr.msk.f32.mxu1 %vm479_vm1, %v8450_v19 }
 0x654   : > { %v2265_v8 = vpop.f32.mrb[4].mxu1 }
 0x655   : > { %v2266_v63 = vadd.f32 %v2265_v8, %v8053_v13  ;;  %v2267_v0 = vpop.f32.mrb[5].mxu1 }
 0x656   : > { %v2268_v53 = vadd.f32 %v2267_v0, %v8053_v13 }
 0x657   : > { %v2276_v5 = vmax.f32 %v2266_v63, 0.0 }
 0x658   : > { %v2277_v9 = vmax.f32 %v2268_v53, 0.0  ;;  %v2271_v11 = vpop.f32.mrb[6].mxu1 }
 0x659   : > { %v2272_v14 = vadd.f32 %v2271_v11, %v8060_v20  ;;  %v2273_v55 = vpop.f32.mrb[7].mxu1  ;;  %2290 = vrot.lane.b32.xlu1 %v2276_v5, %s7575_s12  ;;  %v8465_v2 = vmul.f32 %v2441_v31, %v2276_v5  ;;  %v2383_v11 = vrot.slane %v6917_v23, %v7681_v4 }
 0x65a   : > { %v2274_v39 = vadd.f32 %v2273_v55, %v8060_v20  ;;  %2458 = vrot.lane.b32.xlu0 %v2277_v9, %s7578_s15  ;;  %v8471_v38 = vmul.f32 %v2445_v41, %v2277_v9 }
 0x65b   : > { %v2278_v42 = vmax.f32 %v2272_v14, 0.0 }
 0x65c   : > { %v2279_v1 = vmax.f32 %v2274_v39, 0.0 }
 0x65d   : > { %v8467_v40 = vmul.f32 %v2441_v31, %v2278_v42  ;;  %2328 = vrot.lane.b32.xlu1 %v2276_v5, %s7574_s30  ;;  %v2387_v31 = vrot.slane %v6917_v23, %v7674_v3 }
 0x65e   : > { %2496 = vrot.lane.b32.xlu0 %v2277_v9, %s7579_s18  ;;  %v8473_v21 = vmul.f32 %v2445_v41, %v2279_v1  ;;  %v6918_v41 = vld [vmem:[%s10341_s1 + $0x3] ss:$8 sm:$0x3] }
 0x65f   : > { %v7155_v17 = vpack.c.bf16 %v8467_v40, %v8465_v2 }
 0x660   : > { %v7153_v22 = vpack.c.bf16 %v8473_v21, %v8471_v38 }
 0x661   : > { %2366 = vrot.lane.b32.xlu1 %v2276_v5, %s7576_s13 }
 0x662   : > { %2534 = vrot.lane.b32.xlu0 %v2277_v9, %s7580_s21 }
 0x665   : > { %2404 = vrot.lane.b32.xlu1 %v2276_v5, %s7577_s14 }
 0x666   : > { %2292 = vrot.lane.b32.xlu0 %v2278_v42, %s7575_s12 }
 0x669   : > { %2456 = vrot.lane.b32.xlu1 %v2276_v5, %s7578_s15 }
 0x66a   : > { %2330 = vrot.lane.b32.xlu0 %v2278_v42, %s7574_s30 }
 0x66d   : > { %2494 = vrot.lane.b32.xlu1 %v2276_v5, %s7579_s18 }
 0x66e   : > { %2368 = vrot.lane.b32.xlu0 %v2278_v42, %s7576_s13 }
 0x671   : > { %2532 = vrot.lane.b32.xlu1 %v2276_v5, %s7580_s21 }
 0x672   : > { %2406 = vrot.lane.b32.xlu0 %v2278_v42, %s7577_s14 }
 0x675   : > { %2282 = vrot.lane.b32.xlu1 %v2277_v9, %s7575_s12 }
 0x676   : > { %2284 = vrot.lane.b32.xlu0 %v2279_v1, %s7575_s12 }
 0x679   : > { %2322 = vrot.lane.b32.xlu1 %v2277_v9, %s7574_s30 }
 0x67a   : > { %2324 = vrot.lane.b32.xlu0 %v2279_v1, %s7574_s30 }
 0x67d   : > { %2360 = vrot.lane.b32.xlu1 %v2277_v9, %s7576_s13 }
 0x67e   : > { %2362 = vrot.lane.b32.xlu0 %v2279_v1, %s7576_s13 }
 0x681   : > { %2398 = vrot.lane.b32.xlu1 %v2277_v9, %s7577_s14 }
 0x682   : > { %2400 = vrot.lane.b32.xlu0 %v2279_v1, %s7577_s14 }
 0x685   : > { %2570 = vrot.lane.b32.xlu1 %v2276_v5, %s7581_s22 }
 0x686   : > { %2572 = vrot.lane.b32.xlu0 %v2277_v9, %s7581_s22 }
 0x689   : > { %2460 = vrot.lane.b32.xlu1 %v2278_v42, %s7578_s15 }
 0x68a   : > { %2462 = vrot.lane.b32.xlu0 %v2279_v1, %s7578_s15 }
 0x68d   : > { %2498 = vrot.lane.b32.xlu1 %v2278_v42, %s7579_s18 }
 0x68e   : > { %2500 = vrot.lane.b32.xlu0 %v2279_v1, %s7579_s18 }
 0x691   : > { %2536 = vrot.lane.b32.xlu1 %v2278_v42, %s7580_s21 }
 0x692   : > { %2538 = vrot.lane.b32.xlu0 %v2279_v1, %s7580_s21 }
 0x695   : > { %2574 = vrot.lane.b32.xlu1 %v2278_v42, %s7581_s22 }
 0x696   : > { %2576 = vrot.lane.b32.xlu0 %v2279_v1, %s7581_s22 }
 0x6cb   : > { %v2291_v15 = vpop.permute.xlu1 %2290 }
 0x6cc   : > { %v8507_v16 = vpop.permute.xlu0 %2458 }
 0x6cf   : > { %v2329_v51 = vpop.permute.xlu1 %2328 }
 0x6d0   : > { %v8509_v33 = vpop.permute.xlu0 %2496 }
 0x6d3   : > { %v2367_v25 = vpop.permute.xlu1 %2366 }
 0x6d4   : > { %v8511_v45 = vpop.permute.xlu0 %2534 }
 0x6d7   : > { %v2405_v24 = vpop.permute.xlu1 %2404 }
 0x6d8   : > { %v2293_v46 = vpop.permute.xlu0 %2292 }
 0x6db   : > { %v8513_v50 = vpop.permute.xlu1 %2456 }
 0x6dc   : > { %v2331_v35 = vpop.permute.xlu0 %2330 }
 0x6df   : > { %v8515_v26 = vpop.permute.xlu1 %2494 }
 0x6e0   : > { %v2369_v49 = vpop.permute.xlu0 %2368  ;;  %v2502_v38 = vsel %vm668_vm6, %v8515_v26, %v8509_v33  ;;  %v2510_v21 = vsel %vm668_vm6, %v8509_v33, %v8515_v26  ;;  %v6923_v33 = vld [vmem:[%s10341_s1 + $0x10] ss:$8 sm:$0x3] }
 0x6e3   : > { %v8520_v57 = vpop.permute.xlu1 %2532 }
 0x6e4   : > { %v2407_v37 = vpop.permute.xlu0 %2406  ;;  %v2540_v40 = vsel %vm714_vm7, %v8520_v57, %v8511_v45 }
 0x6e7   : > { %v2283_v60 = vpop.permute.xlu1 %2282 }
 0x6e8   : > { %v2294_v47 = vsel %vm431_vm2, %v2291_v15, %v2283_v60  ;;  %v2300_v61 = vsel %vm431_vm2, %v2283_v60, %v2291_v15  ;;  %v2285_v56 = vpop.permute.xlu0 %2284 }
 0x6e9   : > { %v2314_v8 = vmul.f32 %v2307_v34, %v2300_v61  ;;  %v2315_v63 = vmul.f32 %v2311_v58, %v2294_v47  ;;  %v2295_v0 = vsel %vm431_vm2, %v2293_v46, %v2285_v56  ;;  %v2301_v52 = vsel %vm431_vm2, %v2285_v56, %v2293_v46 }
 0x6ea   : > { %v2316_v53 = vmul.f32 %v2307_v34, %v2301_v52  ;;  %v2317_v5 = vmul.f32 %v2311_v58, %v2295_v0  ;;  %v2421_v47 = vrot.slane %v6918_v41, %v7681_v4 }
 0x6eb   : > { %v2323_v9 = vpop.permute.xlu1 %2322 }
 0x6ec   : > { %v2332_v14 = vsel %vm479_vm1, %v2329_v51, %v2323_v9  ;;  %v2338_v55 = vsel %vm479_vm1, %v2323_v9, %v2329_v51  ;;  %v2325_v39 = vpop.permute.xlu0 %2324  ;;  %v7137_v42 = vpack.c.bf16 %v2317_v5, %v2315_v63  ;;  %v7139_v1 = vpack.c.bf16 %v2316_v53, %v2314_v8 }
 0x6ed   : > { %v2352_v15 = vmul.f32 %v2345_v36, %v2338_v55  ;;  %v2353_v46 = vmul.f32 %v2349_v62, %v2332_v14  ;;  %v2333_v28 = vsel %vm479_vm1, %v2331_v35, %v2325_v39  ;;  %v2339_v34 = vsel %vm479_vm1, %v2325_v39, %v2331_v35 }
 0x6ee   : > { %v2354_v58 = vmul.f32 %v2345_v36, %v2339_v34  ;;  %v2355_v59 = vmul.f32 %v2349_v62, %v2333_v28  ;;  %7138 = vmatprep.subr.bf16.mxu0 %v7137_v42  ;;  %v2425_v51 = vrot.slane %v6918_v41, %v7674_v3 }
 0x6ef   : > { %v2361_v60 = vpop.permute.xlu1 %2360  ;;  %7140 = vmatpush1.bf16.msra.mxu0 %v7139_v1 }
 0x6f0   : > { %v2370_v61 = vsel %vm525_vm3, %v2367_v25, %v2361_v60  ;;  %v2376_v56 = vsel %vm525_vm3, %v2361_v60, %v2367_v25  ;;  %v2363_v23 = vpop.permute.xlu0 %2362  ;;  %v7141_v8 = vpack.c.bf16 %v2355_v59, %v2353_v46  ;;  %v7143_v63 = vpack.c.bf16 %v2354_v58, %v2352_v15 }
 0x6f1   : > { %v2390_v0 = vmul.f32 %v2383_v11, %v2376_v56  ;;  %v2391_v52 = vmul.f32 %v2387_v31, %v2370_v61  ;;  %v2371_v35 = vsel %vm525_vm3, %v2369_v49, %v2363_v23  ;;  %v2377_v36 = vsel %vm525_vm3, %v2363_v23, %v2369_v49 }
 0x6f2   : > { %v2392_v62 = vmul.f32 %v2383_v11, %v2377_v36  ;;  %v2393_v53 = vmul.f32 %v2387_v31, %v2371_v35  ;;  %7142 = vmatprep.subr.bf16.mxu0 %v7141_v8  ;;  %v6920_v11 = vld [vmem:[%s10341_s1 + $0x5] ss:$8 sm:$0x3]  ;;  %v2464_v60 = vsel %vm622_vm5, %v8513_v50, %v8507_v16 }
 0x6f3   : > { %v2399_v5 = vpop.permute.xlu1 %2398  ;;  %7144 = vmatpush1.bf16.msra.mxu0 %v7143_v63  ;;  %v2479_v58 = vrot.slane %v6920_v11, %v7681_v4  ;;  %v2483_v59 = vrot.slane %v6920_v11, %v7674_v3 }
 0x6f4   : > { %v2408_v9 = vsel %vm571_vm4, %v2405_v24, %v2399_v5  ;;  %v2414_v14 = vsel %vm571_vm4, %v2399_v5, %v2405_v24  ;;  %v2401_v55 = vpop.permute.xlu0 %2400  ;;  %v7145_v25 = vpack.c.bf16 %v2393_v53, %v2391_v52  ;;  %v7147_v39 = vpack.c.bf16 %v2392_v62, %v2390_v0 }
 0x6f5   : > { %v2428_v41 = vmul.f32 %v2421_v47, %v2414_v14  ;;  %v2429_v42 = vmul.f32 %v2425_v51, %v2408_v9  ;;  %v2409_v1 = vsel %vm571_vm4, %v2407_v37, %v2401_v55  ;;  %v2415_v15 = vsel %vm571_vm4, %v2401_v55, %v2407_v37  ;;  %v6921_v37 = vld [vmem:[%s10341_s1 + $0x6] ss:$8 sm:$0x3] }
 0x6f6   : > { %v2430_v46 = vmul.f32 %v2421_v47, %v2415_v15  ;;  %v2431_v49 = vmul.f32 %v2425_v51, %v2409_v1  ;;  %7146 = vmatprep.subr.bf16.mxu0 %v7145_v25  ;;  %v2472_v47 = vsel %vm622_vm5, %v8507_v16, %v8513_v50  ;;  %v2517_v56 = vrot.slane %v6921_v37, %v7681_v4  ;;  %v6922_v16 = vld [vmem:[%s10341_s1 + $0x7] ss:$8 sm:$0x3] }
 0x6f7   : > { %v2571_v31 = vpop.permute.xlu1 %2570  ;;  %7148 = vmatpush1.bf16.msra.mxu0 %v7147_v39  ;;  %v2521_v23 = vrot.slane %v6921_v37, %v7674_v3  ;;  %v2486_v0 = vmul.f32 %v2479_v58, %v2464_v60  ;;  %v2487_v52 = vmul.f32 %v2483_v59, %v2472_v47  ;;  %v2555_v5 = vrot.slane %v6922_v16, %v7681_v4 }
 0x6f8   : > { %v2573_v28 = vpop.permute.xlu0 %2572  ;;  %v7149_v24 = vpack.c.bf16 %v2431_v49, %v2429_v42  ;;  %v7151_v34 = vpack.c.bf16 %v2430_v46, %v2428_v41  ;;  %v2559_v9 = vrot.slane %v6922_v16, %v7674_v3  ;;  %v2524_v25 = vmul.f32 %v2517_v56, %v2502_v38 }
 0x6f9   : > { %v2525_v39 = vmul.f32 %v2521_v23, %v2510_v21  ;;  %v2593_v46 = vrot.slane %v6923_v33, %v7681_v4  ;;  %v2597_v49 = vrot.slane %v6923_v33, %v7674_v3 }
 0x6fa   : > { %7150 = vmatprep.subr.bf16.mxu0 %v7149_v24 }
 0x6fb   : > { %v2461_v51 = vpop.permute.xlu1 %2460  ;;  %7152 = vmatpush1.bf16.msra.mxu0 %v7151_v34  ;;  %v2562_v34 = vmul.f32 %v2555_v5, %v2540_v40 }
 0x6fc   : > { %v2463_v61 = vpop.permute.xlu0 %2462  ;;  %7154 = vmatprep.subr.bf16.mxu0 %v7153_v22 }
 0x6fd   : > { %v2465_v8 = vsel %vm622_vm5, %v2461_v51, %v2463_v61  ;;  %v2473_v63 = vsel %vm622_vm5, %v2463_v61, %v2461_v51 }
 0x6fe   : > { %v2488_v50 = vmul.f32 %v2479_v58, %v2465_v8  ;;  %v2489_v35 = vmul.f32 %v2483_v59, %v2473_v63 }
 0x6ff   : > { %v2499_v22 = vpop.permute.xlu1 %2498  ;;  %7156 = vmatpush1.bf16.msra.mxu0 %v7155_v17  ;;  %v2548_v17 = vsel %vm714_vm7, %v8511_v45, %v8520_v57  ;;  %v2578_v45 = vsel %vm760_vm8, %v2571_v31, %v2573_v28  ;;  %v2586_v57 = vsel %vm760_vm8, %v2573_v28, %v2571_v31  ;;  %v8616_v31 = vld [vmem:[%s10346_s6 + $0x8] sm:$0xff] }
 0x700   : > { %v2501_v36 = vpop.permute.xlu0 %2500  ;;  %v7157_v62 = vpack.c.bf16 %v2489_v35, %v2487_v52  ;;  %v7159_v53 = vpack.c.bf16 %v2488_v50, %v2486_v0  ;;  %v2563_v58 = vmul.f32 %v2559_v9, %v2548_v17  ;;  %v2600_v8 = vmul.f32 %v2593_v46, %v2578_v45 }
 0x701   : > { %v2503_v14 = vsel %vm668_vm6, %v2499_v22, %v2501_v36  ;;  %v2511_v55 = vsel %vm668_vm6, %v2501_v36, %v2499_v22  ;;  %v2601_v63 = vmul.f32 %v2597_v49, %v2586_v57  ;;  %v2722_v35 = vstv %s6926_s17  ;;  %s6968_s17 = sld [smem:[#allocation4 + $0x3]] }
 0x702   : > { %v2526_v26 = vmul.f32 %v2517_v56, %v2503_v14  ;;  %v2527_v2 = vmul.f32 %v2521_v23, %v2511_v55  ;;  %7158 = vmatprep.subr.bf16.mxu0 %v7157_v62 }
 0x703   : > { %v2537_v41 = vpop.permute.xlu1 %2536  ;;  %7160 = vmatpush1.bf16.msra.mxu0 %v7159_v53 }
 0x704   : > { %v2539_v42 = vpop.permute.xlu0 %2538  ;;  %v7161_v1 = vpack.c.bf16 %v2527_v2, %v2525_v39  ;;  %v7163_v15 = vpack.c.bf16 %v2526_v26, %v2524_v25 }
 0x705   : > { %v2541_v11 = vsel %vm714_vm7, %v2537_v41, %v2539_v42  ;;  %v2549_v24 = vsel %vm714_vm7, %v2539_v42, %v2537_v41 }
 0x706   : > { %v2564_v59 = vmul.f32 %v2555_v5, %v2541_v11  ;;  %v2565_v37 = vmul.f32 %v2559_v9, %v2549_v24  ;;  %7162 = vmatprep.subr.bf16.mxu0 %v7161_v1 }
 0x707   : > { %v2575_v60 = vpop.permute.xlu1 %2574  ;;  %7164 = vmatpush1.bf16.msra.mxu0 %v7163_v15  ;;  %v2753_v15 = vld [vmem:[%s10341_s1] ss:$8 sm:$0x3] }
 0x708   : > { %v2577_v47 = vpop.permute.xlu0 %2576  ;;  %v7165_v51 = vpack.c.bf16 %v2565_v37, %v2563_v58  ;;  %v7167_v61 = vpack.c.bf16 %v2564_v59, %v2562_v34  ;;  %v2758_v11 = vrot.slane %v2753_v15, %v7681_v4  ;;  %v2762_v24 = vrot.slane %v2753_v15, %v7674_v3  ;;  %v6927_v34 = vld [vmem:[%s10341_s1 + $0x1] ss:$8 sm:$0x3] }
 0x709   : > { %v2579_v56 = vsel %vm760_vm8, %v2575_v60, %v2577_v47  ;;  %v2587_v23 = vsel %vm760_vm8, %v2577_v47, %v2575_v60  ;;  %v2796_v57 = vrot.slane %v6927_v34, %v7681_v4  ;;  %v2800_v60 = vrot.slane %v6927_v34, %v7674_v3  ;;  %v6928_v47 = vld [vmem:[%s10341_s1 + $0x2] ss:$8 sm:$0x3] }
 0x70a   : > { %v2602_v0 = vmul.f32 %v2593_v46, %v2579_v56  ;;  %v2603_v52 = vmul.f32 %v2597_v49, %v2587_v23  ;;  %7166 = vmatprep.subr.bf16.mxu0 %v7165_v51 }
 0x70b   : > { %7168 = vmatpush1.bf16.msra.mxu0 %v7167_v61 }
 0x70c   : > { %v7169_v16 = vpack.c.bf16 %v2603_v52, %v2601_v63  ;;  %v7171_v50 = vpack.c.bf16 %v2602_v0, %v2600_v8  ;;  %v2834_v52 = vrot.slane %v6928_v47, %v7681_v4 }
 0x70e   : > { %7170 = vmatprep.subr.bf16.mxu0 %v7169_v16  ;;  %v2838_v16 = vrot.slane %v6928_v47, %v7674_v3 }
 0x70f   : > { %7172 = vmatpush1.bf16.msra.mxu0 %v7171_v50 }
 0x712   : > { %2709 = vmatmul.mubr.f32.vlgmr.msra.gmra.mrb[8].mxu0 %v8228_v30 }
 0x713   : > { %6925 = vmatprep.mubr.msk.f32.mxu0 %vm479_vm1, %v8233_v44 }
 0x716   : > { %2715 = vmatmul.mubr.f32.gmra.mrb[10].mxu0 %v8241_v32 }
 0x717   : > { %6945 = vmatprep.mubr.msk.f32.mxu0 %vm479_vm1, %v8616_v31 }
 0x7e5   : > { %v2710_v28 = vpop.f32.mrb[8].mxu0 }
 0x7e6   : > { %v2711_v38 = vadd.f32 %v2710_v28, %v8246_v54  ;;  %v2712_v21 = vpop.f32.mrb[9].mxu0 }
 0x7e7   : > { %v2713_v30 = vadd.f32 %v2712_v21, %v8246_v54 }
 0x7e8   : > { %v2723_v22 = vmul.f32 %v2722_v35, %v2711_v38  ;;  %v6929_v38 = vld [vmem:[%s10341_s1 + $0x3] ss:$8 sm:$0x3] }
 0x7e9   : > { %v2724_v44 = vmul.f32 %v2722_v35, %v2713_v30  ;;  %v2716_v36 = vpop.f32.mrb[10].mxu0 }
 0x7ea   : > { %v8623_v32 = vadd.f32 %v2723_v22, %v8251_v18  ;;  %v2718_v62 = vpop.f32.mrb[11].mxu0  ;;  %v2717_v5 = vadd.f32 %v2716_v36, %v8260_v43 }
 0x7eb   : > { %v8626_v53 = vadd.f32 %v2724_v44, %v8254_v29  ;;  %v2719_v9 = vadd.f32 %v2718_v62, %v8260_v43 }
 0x7ec   : > { %2741 = vrot.lane.b32.xlu1 %v8623_v32, %s7575_s12  ;;  %v2725_v18 = vmul.f32 %v2722_v35, %v2717_v5 }
 0x7ed   : > { %2909 = vrot.lane.b32.xlu0 %v8626_v53, %s7578_s15 }
 0x7ee   : > { %v8642_v29 = vadd.f32 %v2725_v18, %v8272_v12  ;;  %v2726_v12 = vmul.f32 %v2722_v35, %v2719_v9 }
 0x7f0   : > { %2779 = vrot.lane.b32.xlu1 %v8623_v32, %s7574_s30  ;;  %v8662_v14 = vadd.f32 %v2726_v12, %v8292_v48  ;;  %v2872_v12 = vrot.slane %v6929_v38, %v7681_v4 }
 0x7f1   : > { %2947 = vrot.lane.b32.xlu0 %v8626_v53, %s7579_s18 }
 0x7f4   : > { %2817 = vrot.lane.b32.xlu1 %v8623_v32, %s7576_s13 }
 0x7f5   : > { %2985 = vrot.lane.b32.xlu0 %v8626_v53, %s7580_s21 }
 0x7f8   : > { %2855 = vrot.lane.b32.xlu1 %v8623_v32, %s7577_s14 }
 0x7f9   : > { %2743 = vrot.lane.b32.xlu0 %v8642_v29, %s7575_s12 }
 0x7fc   : > { %2907 = vrot.lane.b32.xlu1 %v8623_v32, %s7578_s15 }
 0x7fd   : > { %2781 = vrot.lane.b32.xlu0 %v8642_v29, %s7574_s30 }
 0x800   : > { %2945 = vrot.lane.b32.xlu1 %v8623_v32, %s7579_s18 }
 0x801   : > { %2819 = vrot.lane.b32.xlu0 %v8642_v29, %s7576_s13 }
 0x804   : > { %2983 = vrot.lane.b32.xlu1 %v8623_v32, %s7580_s21 }
 0x805   : > { %2857 = vrot.lane.b32.xlu0 %v8642_v29, %s7577_s14 }
 0x808   : > { %2733 = vrot.lane.b32.xlu1 %v8626_v53, %s7575_s12 }
 0x809   : > { %2735 = vrot.lane.b32.xlu0 %v8662_v14, %s7575_s12 }
 0x80c   : > { %2773 = vrot.lane.b32.xlu1 %v8626_v53, %s7574_s30 }
 0x80d   : > { %2775 = vrot.lane.b32.xlu0 %v8662_v14, %s7574_s30 }
 0x810   : > { %2811 = vrot.lane.b32.xlu1 %v8626_v53, %s7576_s13 }
 0x811   : > { %2813 = vrot.lane.b32.xlu0 %v8662_v14, %s7576_s13 }
 0x814   : > { %2849 = vrot.lane.b32.xlu1 %v8626_v53, %s7577_s14 }
 0x815   : > { %2851 = vrot.lane.b32.xlu0 %v8662_v14, %s7577_s14 }
 0x818   : > { %3021 = vrot.lane.b32.xlu1 %v8623_v32, %s7581_s22 }
 0x819   : > { %3023 = vrot.lane.b32.xlu0 %v8626_v53, %s7581_s22 }
 0x81c   : > { %2911 = vrot.lane.b32.xlu1 %v8642_v29, %s7578_s15 }
 0x81d   : > { %2913 = vrot.lane.b32.xlu0 %v8662_v14, %s7578_s15 }
 0x820   : > { %2949 = vrot.lane.b32.xlu1 %v8642_v29, %s7579_s18 }
 0x821   : > { %2951 = vrot.lane.b32.xlu0 %v8662_v14, %s7579_s18 }
 0x824   : > { %2987 = vrot.lane.b32.xlu1 %v8642_v29, %s7580_s21 }
 0x825   : > { %2989 = vrot.lane.b32.xlu0 %v8662_v14, %s7580_s21 }
 0x828   : > { %3025 = vrot.lane.b32.xlu1 %v8642_v29, %s7581_s22 }
 0x829   : > { %3027 = vrot.lane.b32.xlu0 %v8662_v14, %s7581_s22 }
 0x85e   : > { %v2742_v48 = vpop.permute.xlu1 %2741 }
 0x85f   : > { %v8700_v55 = vpop.permute.xlu0 %2909 }
 0x862   : > { %v2780_v25 = vpop.permute.xlu1 %2779 }
 0x863   : > { %v8702_v39 = vpop.permute.xlu0 %2947 }
 0x866   : > { %v2818_v33 = vpop.permute.xlu1 %2817 }
 0x867   : > { %v8704_v26 = vpop.permute.xlu0 %2985 }
 0x86a   : > { %v8706_v2 = vpop.permute.xlu1 %2855 }
 0x86b   : > { %v2744_v40 = vpop.permute.xlu0 %2743 }
 0x86e   : > { %v8708_v17 = vpop.permute.xlu1 %2907 }
 0x86f   : > { %v2782_v41 = vpop.permute.xlu0 %2781 }
 0x872   : > { %v8710_v42 = vpop.permute.xlu1 %2945 }
 0x873   : > { %v2820_v1 = vpop.permute.xlu0 %2819 }
 0x876   : > { %v8715_v46 = vpop.permute.xlu1 %2983 }
 0x877   : > { %v2858_v49 = vpop.permute.xlu0 %2857 }
 0x87a   : > { %v2734_v58 = vpop.permute.xlu1 %2733 }
 0x87b   : > { %v2745_v59 = vsel %vm431_vm2, %v2742_v48, %v2734_v58  ;;  %v2751_v37 = vsel %vm431_vm2, %v2734_v58, %v2742_v48  ;;  %v2736_v45 = vpop.permute.xlu0 %2735  ;;  %v2876_v48 = vrot.slane %v6929_v38, %v7674_v3 }
 0x87c   : > { %v2765_v51 = vmul.f32 %v2758_v11, %v2751_v37  ;;  %v2766_v61 = vmul.f32 %v2762_v24, %v2745_v59  ;;  %v2746_v56 = vsel %vm431_vm2, %v2744_v40, %v2736_v45  ;;  %v2752_v23 = vsel %vm431_vm2, %v2736_v45, %v2744_v40 }
 0x87d   : > { %v2767_v8 = vmul.f32 %v2758_v11, %v2752_v23  ;;  %v2768_v63 = vmul.f32 %v2762_v24, %v2746_v56 }
 0x87e   : > { %v2774_v0 = vpop.permute.xlu1 %2773 }
 0x87f   : > { %v2783_v50 = vsel %vm479_vm1, %v2780_v25, %v2774_v0  ;;  %v2789_v28 = vsel %vm479_vm1, %v2774_v0, %v2780_v25  ;;  %v2776_v35 = vpop.permute.xlu0 %2775  ;;  %v7173_v21 = vpack.c.bf16 %v2768_v63, %v2766_v61  ;;  %v7175_v30 = vpack.c.bf16 %v2767_v8, %v2765_v51 }
 0x880   : > { %v2803_v22 = vmul.f32 %v2796_v57, %v2789_v28  ;;  %v2804_v44 = vmul.f32 %v2800_v60, %v2783_v50  ;;  %v2784_v36 = vsel %vm479_vm1, %v2782_v41, %v2776_v35  ;;  %v2790_v62 = vsel %vm479_vm1, %v2776_v35, %v2782_v41  ;;  %v6930_v41 = vld [vmem:[%s10341_s1 + $0x4] ss:$8 sm:$0x3]  ;;  %v6931_v28 = vld [vmem:[%s10341_s1 + $0x5] ss:$8 sm:$0x3] }
 0x881   : > { %v2805_v5 = vmul.f32 %v2796_v57, %v2790_v62  ;;  %v2806_v18 = vmul.f32 %v2800_v60, %v2784_v36  ;;  %7174 = vmatprep.subr.bf16.mxu1 %v7173_v21  ;;  %v2930_v36 = vrot.slane %v6931_v28, %v7681_v4  ;;  %v2934_v62 = vrot.slane %v6931_v28, %v7674_v3 }
 0x882   : > { %v2812_v9 = vpop.permute.xlu1 %2811  ;;  %7176 = vmatpush1.bf16.msra.mxu1 %v7175_v30 }
 0x883   : > { %v2821_v25 = vsel %vm525_vm3, %v2818_v33, %v2812_v9  ;;  %v2827_v40 = vsel %vm525_vm3, %v2812_v9, %v2818_v33  ;;  %v2814_v15 = vpop.permute.xlu0 %2813  ;;  %v7177_v11 = vpack.c.bf16 %v2806_v18, %v2804_v44  ;;  %v7179_v24 = vpack.c.bf16 %v2805_v5, %v2803_v22 }
 0x884   : > { %v2841_v34 = vmul.f32 %v2834_v52, %v2827_v40  ;;  %v2842_v58 = vmul.f32 %v2838_v16, %v2821_v25  ;;  %v2822_v59 = vsel %vm525_vm3, %v2820_v1, %v2814_v15  ;;  %v2828_v37 = vsel %vm525_vm3, %v2814_v15, %v2820_v1 }
 0x885   : > { %v2843_v45 = vmul.f32 %v2834_v52, %v2828_v37  ;;  %v2844_v57 = vmul.f32 %v2838_v16, %v2822_v59  ;;  %7178 = vmatprep.subr.bf16.mxu1 %v7177_v11  ;;  %v2896_v33 = vrot.slane %v6930_v41, %v7674_v3  ;;  %v2915_v18 = vsel %vm622_vm5, %v8708_v17, %v8700_v55 }
 0x886   : > { %v2850_v60 = vpop.permute.xlu1 %2849  ;;  %7180 = vmatpush1.bf16.msra.mxu1 %v7179_v24  ;;  %v2923_v9 = vsel %vm622_vm5, %v8700_v55, %v8708_v17  ;;  %v6933_v55 = vld [vmem:[%s10341_s1 + $0x7] ss:$8 sm:$0x3]  ;;  %v2953_v37 = vsel %vm668_vm6, %v8710_v42, %v8702_v39 }
 0x887   : > { %v2859_v47 = vsel %vm571_vm4, %v8706_v2, %v2850_v60  ;;  %v2865_v51 = vsel %vm571_vm4, %v2850_v60, %v8706_v2  ;;  %v2852_v61 = vpop.permute.xlu0 %2851  ;;  %v7181_v56 = vpack.c.bf16 %v2844_v57, %v2842_v58  ;;  %v7183_v23 = vpack.c.bf16 %v2843_v45, %v2841_v34 }
 0x888   : > { %v2879_v8 = vmul.f32 %v2872_v12, %v2865_v51  ;;  %v2880_v63 = vmul.f32 %v2876_v48, %v2859_v47  ;;  %v2860_v1 = vsel %vm571_vm4, %v2858_v49, %v2852_v61  ;;  %v2866_v0 = vsel %vm571_vm4, %v2852_v61, %v2858_v49  ;;  %v6932_v49 = vld [vmem:[%s10341_s1 + $0x6] ss:$8 sm:$0x3] }
 0x889   : > { %v2881_v52 = vmul.f32 %v2872_v12, %v2866_v0  ;;  %v2882_v16 = vmul.f32 %v2876_v48, %v2860_v1  ;;  %7182 = vmatprep.subr.bf16.mxu1 %v7181_v56  ;;  %v2902_v50 = vmul.f32 %v2896_v33, %v8662_v14  ;;  %v2892_v2 = vrot.slane %v6930_v41, %v7681_v4  ;;  %v6934_v1 = vld [vmem:[%s10341_s1 + $0x10] ss:$8 sm:$0x3] }
 0x88a   : > { %v8760_v35 = vpop.permute.xlu1 %3021  ;;  %7184 = vmatpush1.bf16.msra.mxu1 %v7183_v23  ;;  %v2900_v22 = vmul.f32 %v2896_v33, %v8626_v53  ;;  %v2968_v25 = vrot.slane %v6932_v49, %v7681_v4  ;;  %v2972_v15 = vrot.slane %v6932_v49, %v7674_v3  ;;  %v2937_v34 = vmul.f32 %v2930_v36, %v2915_v18 }
 0x88b   : > { %v3024_v38 = vpop.permute.xlu0 %3023  ;;  %v7185_v21 = vpack.c.bf16 %v2882_v16, %v2880_v63  ;;  %v7187_v30 = vpack.c.bf16 %v2881_v52, %v2879_v8  ;;  %v2901_v44 = vmul.f32 %v2892_v2, %v8642_v29  ;;  %v2899_v48 = vmul.f32 %v2892_v2, %v8623_v32 }
 0x88c   : > { %v7189_v5 = vpack.c.bf16 %v2902_v50, %v2900_v22  ;;  %v2938_v58 = vmul.f32 %v2934_v62, %v2923_v9  ;;  %v2961_v45 = vsel %vm668_vm6, %v8702_v39, %v8710_v42  ;;  %v3006_v51 = vrot.slane %v6933_v55, %v7681_v4 }
 0x88d   : > { %7186 = vmatprep.subr.bf16.mxu1 %v7185_v21  ;;  %v7191_v41 = vpack.c.bf16 %v2901_v44, %v2899_v48  ;;  %v3010_v61 = vrot.slane %v6933_v55, %v7674_v3  ;;  %v2975_v8 = vmul.f32 %v2968_v25, %v2953_v37  ;;  %v2976_v63 = vmul.f32 %v2972_v15, %v2961_v45  ;;  %v8829_v55 = vld [vmem:[%s10344_s4 + $0x10] sm:$0xff]  ;;  %v6940_v45 = vld [vmem:[%s10341_s1 + $0x4] ss:$8 sm:$0x3] }
 0x88e   : > { %v2912_v12 = vpop.permute.xlu1 %2911  ;;  %7188 = vmatpush1.bf16.msra.mxu1 %v7187_v30  ;;  %v2991_v0 = vsel %vm714_vm7, %v8715_v46, %v8704_v26  ;;  %v2999_v52 = vsel %vm714_vm7, %v8704_v26, %v8715_v46  ;;  %v3044_v21 = vrot.slane %v6934_v1, %v7681_v4  ;;  %v3048_v30 = vrot.slane %v6934_v1, %v7674_v3 }
 0x88f   : > { %v2914_v40 = vpop.permute.xlu0 %2913  ;;  %7190 = vmatprep.subr.bf16.mxu1 %v7189_v5  ;;  %v3013_v44 = vmul.f32 %v3006_v51, %v2991_v0  ;;  %v3029_v26 = vsel %vm760_vm8, %v8760_v35, %v3024_v38  ;;  %v3037_v46 = vsel %vm760_vm8, %v3024_v38, %v8760_v35  ;;  %v8816_v35 = vld [vmem:[%s10344_s4] sm:$0xff]  ;;  %v8822_v38 = vld [vmem:[%s10344_s4 + $0x18] sm:$0xff] }
 0x890   : > { %v2916_v11 = vsel %vm622_vm5, %v2912_v12, %v2914_v40  ;;  %v2924_v24 = vsel %vm622_vm5, %v2914_v40, %v2912_v12 }
 0x891   : > { %v2939_v17 = vmul.f32 %v2930_v36, %v2916_v11  ;;  %v2940_v59 = vmul.f32 %v2934_v62, %v2924_v24  ;;  %v3014_v36 = vmul.f32 %v3010_v61, %v2999_v52  ;;  %v3052_v11 = vmul.f32 %v3048_v30, %v3037_v46  ;;  %v3198_v46 = vld [vmem:[%s10341_s1] ss:$8 sm:$0x3] }
 0x892   : > { %v2950_v57 = vpop.permute.xlu1 %2949  ;;  %7192 = vmatpush1.bf16.msra.mxu1 %v7191_v41 }
 0x893   : > { %v2952_v60 = vpop.permute.xlu0 %2951  ;;  %v7193_v33 = vpack.c.bf16 %v2940_v59, %v2938_v58  ;;  %v7195_v47 = vpack.c.bf16 %v2939_v17, %v2937_v34 }
 0x894   : > { %v2954_v56 = vsel %vm668_vm6, %v2950_v57, %v2952_v60  ;;  %v2962_v23 = vsel %vm668_vm6, %v2952_v60, %v2950_v57 }
 0x895   : > { %v2977_v39 = vmul.f32 %v2968_v25, %v2954_v56  ;;  %v2978_v42 = vmul.f32 %v2972_v15, %v2962_v23  ;;  %7194 = vmatprep.subr.bf16.mxu1 %v7193_v33  ;;  %v3051_v15 = vmul.f32 %v3044_v21, %v3029_v26  ;;  %v3341_v23 = vrot.slane %v6940_v45, %v7674_v3 }
 0x896   : > { %v2988_v16 = vpop.permute.xlu1 %2987  ;;  %7196 = vmatpush1.bf16.msra.mxu1 %v7195_v47 }
 0x897   : > { %v2990_v50 = vpop.permute.xlu0 %2989  ;;  %v7197_v28 = vpack.c.bf16 %v2978_v42, %v2976_v63  ;;  %v7199_v2 = vpack.c.bf16 %v2977_v39, %v2975_v8 }
 0x898   : > { %v2992_v22 = vsel %vm714_vm7, %v2988_v16, %v2990_v50  ;;  %v3000_v49 = vsel %vm714_vm7, %v2990_v50, %v2988_v16 }
 0x899   : > { %v3015_v62 = vmul.f32 %v3006_v51, %v2992_v22  ;;  %v3016_v5 = vmul.f32 %v3010_v61, %v3000_v49  ;;  %7198 = vmatprep.subr.bf16.mxu1 %v7197_v28  ;;  %v3337_v51 = vrot.slane %v6940_v45, %v7681_v4 }
 0x89a   : > { %v3026_v18 = vpop.permute.xlu1 %3025  ;;  %7200 = vmatpush1.bf16.msra.mxu1 %v7199_v2 }
 0x89b   : > { %v3028_v9 = vpop.permute.xlu0 %3027  ;;  %v7201_v12 = vpack.c.bf16 %v3016_v5, %v3014_v36  ;;  %v7203_v48 = vpack.c.bf16 %v3015_v62, %v3013_v44 }
 0x89c   : > { %v3030_v25 = vsel %vm760_vm8, %v3026_v18, %v3028_v9  ;;  %v3038_v40 = vsel %vm760_vm8, %v3028_v9, %v3026_v18 }
 0x89d   : > { %v3053_v24 = vmul.f32 %v3044_v21, %v3030_v25  ;;  %v3054_v41 = vmul.f32 %v3048_v30, %v3038_v40  ;;  %7202 = vmatprep.subr.bf16.mxu1 %v7201_v12  ;;  %v3203_v12 = vrot.slane %v3198_v46, %v7681_v4  ;;  %v6937_v25 = vld [vmem:[%s10341_s1 + $0x1] ss:$8 sm:$0x3] }
 0x89e   : > { %7204 = vmatpush1.bf16.msra.mxu1 %v7203_v48  ;;  %v3207_v48 = vrot.slane %v3198_v46, %v7674_v3 }
 0x89f   : > { %v7205_v34 = vpack.c.bf16 %v3054_v41, %v3052_v11  ;;  %v7207_v58 = vpack.c.bf16 %v3053_v24, %v3051_v15  ;;  %v3241_v41 = vrot.slane %v6937_v25, %v7681_v4 }
 0x8a1   : > { %7206 = vmatprep.subr.bf16.mxu1 %v7205_v34  ;;  %v3245_v34 = vrot.slane %v6937_v25, %v7674_v3 }
 0x8a2   : > { %7208 = vmatpush1.bf16.msra.mxu1 %v7207_v58  ;;  %v6938_v58 = vld [vmem:[%s10341_s1 + $0x2] ss:$8 sm:$0x3] }
 0x8a5   : > { %3160 = vmatmul.mubr.f32.vlgmr.msra.gmra.mrb[8].mxu1 %v8816_v35 }
 0x8a6   : > { %6936 = vmatprep.mubr.msk.f32.mxu1 %vm479_vm1, %v8822_v38 }
 0x8a9   : > { %3166 = vmatmul.mubr.f32.gmra.mrb[10].mxu1 %v8829_v55 }
 0x8aa   : > { %6956 = vmatprep.mubr.msk.f32.mxu1 %vm479_vm1, %v8450_v19 }
 0x978   : > { %v3161_v17 = vpop.f32.mrb[8].mxu1 }
 0x979   : > { %v3162_v59 = vadd.f32 %v3161_v17, %v8053_v13  ;;  %v3163_v37 = vpop.f32.mrb[9].mxu1 }
 0x97a   : > { %v3164_v57 = vadd.f32 %v3163_v37, %v8053_v13 }
 0x97b   : > { %v3172_v60 = vmax.f32 %v3162_v59, 0.0 }
 0x97c   : > { %v3173_v33 = vmax.f32 %v3164_v57, 0.0  ;;  %v3167_v47 = vpop.f32.mrb[10].mxu1 }
 0x97d   : > { %v3168_v61 = vadd.f32 %v3167_v47, %v8060_v20  ;;  %v3169_v56 = vpop.f32.mrb[11].mxu1  ;;  %3186 = vrot.lane.b32.xlu1 %v3172_v60, %s7575_s12  ;;  %v8845_v1 = vmul.f32 %v3337_v51, %v3172_v60  ;;  %v3279_v47 = vrot.slane %v6938_v58, %v7681_v4 }
 0x97e   : > { %v3170_v19 = vadd.f32 %v3169_v56, %v8060_v20  ;;  %3354 = vrot.lane.b32.xlu0 %v3173_v33, %s7578_s15  ;;  %v8851_v42 = vmul.f32 %v3341_v23, %v3173_v33 }
 0x97f   : > { %v3174_v8 = vmax.f32 %v3168_v61, 0.0 }
 0x980   : > { %v3175_v63 = vmax.f32 %v3170_v19, 0.0 }
 0x981   : > { %v8847_v39 = vmul.f32 %v3337_v51, %v3174_v8  ;;  %3224 = vrot.lane.b32.xlu1 %v3172_v60, %s7574_s30  ;;  %v3283_v51 = vrot.slane %v6938_v58, %v7674_v3 }
 0x982   : > { %3392 = vrot.lane.b32.xlu0 %v3173_v33, %s7579_s18  ;;  %v8853_v0 = vmul.f32 %v3341_v23, %v3175_v63  ;;  %v6939_v23 = vld [vmem:[%s10341_s1 + $0x3] ss:$8 sm:$0x3] }
 0x983   : > { %v7227_v52 = vpack.c.bf16 %v8847_v39, %v8845_v1 }
 0x984   : > { %v7225_v16 = vpack.c.bf16 %v8853_v0, %v8851_v42 }
 0x985   : > { %3262 = vrot.lane.b32.xlu1 %v3172_v60, %s7576_s13 }
 0x986   : > { %3430 = vrot.lane.b32.xlu0 %v3173_v33, %s7580_s21 }
 0x989   : > { %3300 = vrot.lane.b32.xlu1 %v3172_v60, %s7577_s14 }
 0x98a   : > { %3188 = vrot.lane.b32.xlu0 %v3174_v8, %s7575_s12 }
 0x98d   : > { %3352 = vrot.lane.b32.xlu1 %v3172_v60, %s7578_s15 }
 0x98e   : > { %3226 = vrot.lane.b32.xlu0 %v3174_v8, %s7574_s30 }
 0x991   : > { %3390 = vrot.lane.b32.xlu1 %v3172_v60, %s7579_s18 }
 0x992   : > { %3264 = vrot.lane.b32.xlu0 %v3174_v8, %s7576_s13 }
 0x995   : > { %3428 = vrot.lane.b32.xlu1 %v3172_v60, %s7580_s21 }
 0x996   : > { %3302 = vrot.lane.b32.xlu0 %v3174_v8, %s7577_s14 }
 0x999   : > { %3178 = vrot.lane.b32.xlu1 %v3173_v33, %s7575_s12 }
 0x99a   : > { %3180 = vrot.lane.b32.xlu0 %v3175_v63, %s7575_s12 }
 0x99d   : > { %3218 = vrot.lane.b32.xlu1 %v3173_v33, %s7574_s30 }
 0x99e   : > { %3220 = vrot.lane.b32.xlu0 %v3175_v63, %s7574_s30 }
 0x9a1   : > { %3256 = vrot.lane.b32.xlu1 %v3173_v33, %s7576_s13 }
 0x9a2   : > { %3258 = vrot.lane.b32.xlu0 %v3175_v63, %s7576_s13 }
 0x9a5   : > { %3294 = vrot.lane.b32.xlu1 %v3173_v33, %s7577_s14 }
 0x9a6   : > { %3296 = vrot.lane.b32.xlu0 %v3175_v63, %s7577_s14 }
 0x9a9   : > { %3466 = vrot.lane.b32.xlu1 %v3172_v60, %s7581_s22 }
 0x9aa   : > { %3468 = vrot.lane.b32.xlu0 %v3173_v33, %s7581_s22 }
 0x9ad   : > { %3356 = vrot.lane.b32.xlu1 %v3174_v8, %s7578_s15 }
 0x9ae   : > { %3358 = vrot.lane.b32.xlu0 %v3175_v63, %s7578_s15 }
 0x9b1   : > { %3394 = vrot.lane.b32.xlu1 %v3174_v8, %s7579_s18 }
 0x9b2   : > { %3396 = vrot.lane.b32.xlu0 %v3175_v63, %s7579_s18 }
 0x9b5   : > { %3432 = vrot.lane.b32.xlu1 %v3174_v8, %s7580_s21 }
 0x9b6   : > { %3434 = vrot.lane.b32.xlu0 %v3175_v63, %s7580_s21 }
 0x9b9   : > { %3470 = vrot.lane.b32.xlu1 %v3174_v8, %s7581_s22 }
 0x9ba   : > { %3472 = vrot.lane.b32.xlu0 %v3175_v63, %s7581_s22 }
 0x9ef   : > { %v3187_v50 = vpop.permute.xlu1 %3186 }
 0x9f0   : > { %v8887_v28 = vpop.permute.xlu0 %3354 }
 0x9f3   : > { %v3225_v2 = vpop.permute.xlu1 %3224 }
 0x9f4   : > { %v8889_v21 = vpop.permute.xlu0 %3392 }
 0x9f7   : > { %v3263_v30 = vpop.permute.xlu1 %3262 }
 0x9f8   : > { %v8891_v22 = vpop.permute.xlu0 %3430 }
 0x9fb   : > { %v3301_v49 = vpop.permute.xlu1 %3300 }
 0x9fc   : > { %v3189_v44 = vpop.permute.xlu0 %3188 }
 0x9ff   : > { %v8893_v36 = vpop.permute.xlu1 %3352 }
 0xa00   : > { %v3227_v62 = vpop.permute.xlu0 %3226 }
 0xa03   : > { %v8895_v5 = vpop.permute.xlu1 %3390 }
 0xa04   : > { %v3265_v26 = vpop.permute.xlu0 %3264  ;;  %v3398_v42 = vsel %vm668_vm6, %v8895_v5, %v8889_v21  ;;  %v3406_v0 = vsel %vm668_vm6, %v8889_v21, %v8895_v5  ;;  %v6944_v21 = vld [vmem:[%s10341_s1 + $0x10] ss:$8 sm:$0x3] }
 0xa07   : > { %v8900_v18 = vpop.permute.xlu1 %3428 }
 0xa08   : > { %v3303_v9 = vpop.permute.xlu0 %3302  ;;  %v3436_v39 = vsel %vm714_vm7, %v8900_v18, %v8891_v22 }
 0xa0b   : > { %v3179_v40 = vpop.permute.xlu1 %3178 }
 0xa0c   : > { %v3190_v15 = vsel %vm431_vm2, %v3187_v50, %v3179_v40  ;;  %v3196_v11 = vsel %vm431_vm2, %v3179_v40, %v3187_v50  ;;  %v3181_v24 = vpop.permute.xlu0 %3180 }
 0xa0d   : > { %v3210_v17 = vmul.f32 %v3203_v12, %v3196_v11  ;;  %v3211_v59 = vmul.f32 %v3207_v48, %v3190_v15  ;;  %v3191_v37 = vsel %vm431_vm2, %v3189_v44, %v3181_v24  ;;  %v3197_v45 = vsel %vm431_vm2, %v3181_v24, %v3189_v44 }
 0xa0e   : > { %v3212_v57 = vmul.f32 %v3203_v12, %v3197_v45  ;;  %v3213_v60 = vmul.f32 %v3207_v48, %v3191_v37  ;;  %v3317_v15 = vrot.slane %v6939_v23, %v7681_v4 }
 0xa0f   : > { %v3219_v33 = vpop.permute.xlu1 %3218 }
 0xa10   : > { %v3228_v61 = vsel %vm479_vm1, %v3225_v2, %v3219_v33  ;;  %v3234_v56 = vsel %vm479_vm1, %v3219_v33, %v3225_v2  ;;  %v3221_v19 = vpop.permute.xlu0 %3220  ;;  %v7209_v8 = vpack.c.bf16 %v3213_v60, %v3211_v59  ;;  %v7211_v63 = vpack.c.bf16 %v3212_v57, %v3210_v17 }
 0xa11   : > { %v3248_v50 = vmul.f32 %v3241_v41, %v3234_v56  ;;  %v3249_v44 = vmul.f32 %v3245_v34, %v3228_v61  ;;  %v3229_v46 = vsel %vm479_vm1, %v3227_v62, %v3221_v19  ;;  %v3235_v12 = vsel %vm479_vm1, %v3221_v19, %v3227_v62 }
 0xa12   : > { %v3250_v48 = vmul.f32 %v3241_v41, %v3235_v12  ;;  %v3251_v25 = vmul.f32 %v3245_v34, %v3229_v46  ;;  %7210 = vmatprep.subr.bf16.mxu0 %v7209_v8  ;;  %v3321_v2 = vrot.slane %v6939_v23, %v7674_v3 }
 0xa13   : > { %v3257_v40 = vpop.permute.xlu1 %3256  ;;  %7212 = vmatpush1.bf16.msra.mxu0 %v7211_v63 }
 0xa14   : > { %v3266_v11 = vsel %vm525_vm3, %v3263_v30, %v3257_v40  ;;  %v3272_v24 = vsel %vm525_vm3, %v3257_v40, %v3263_v30  ;;  %v3259_v58 = vpop.permute.xlu0 %3258  ;;  %v7213_v17 = vpack.c.bf16 %v3251_v25, %v3249_v44  ;;  %v7215_v59 = vpack.c.bf16 %v3250_v48, %v3248_v50 }
 0xa15   : > { %v3286_v37 = vmul.f32 %v3279_v47, %v3272_v24  ;;  %v3287_v45 = vmul.f32 %v3283_v51, %v3266_v11  ;;  %v3267_v62 = vsel %vm525_vm3, %v3265_v26, %v3259_v58  ;;  %v3273_v41 = vsel %vm525_vm3, %v3259_v58, %v3265_v26 }
 0xa16   : > { %v3288_v34 = vmul.f32 %v3279_v47, %v3273_v41  ;;  %v3289_v57 = vmul.f32 %v3283_v51, %v3267_v62  ;;  %7214 = vmatprep.subr.bf16.mxu0 %v7213_v17  ;;  %v6941_v47 = vld [vmem:[%s10341_s1 + $0x5] ss:$8 sm:$0x3]  ;;  %v3360_v40 = vsel %vm622_vm5, %v8893_v36, %v8887_v28 }
 0xa17   : > { %v3295_v60 = vpop.permute.xlu1 %3294  ;;  %7216 = vmatpush1.bf16.msra.mxu0 %v7215_v59  ;;  %v3375_v48 = vrot.slane %v6941_v47, %v7681_v4  ;;  %v3379_v25 = vrot.slane %v6941_v47, %v7674_v3 }
 0xa18   : > { %v3304_v33 = vsel %vm571_vm4, %v3301_v49, %v3295_v60  ;;  %v3310_v61 = vsel %vm571_vm4, %v3295_v60, %v3301_v49  ;;  %v3297_v56 = vpop.permute.xlu0 %3296  ;;  %v7217_v30 = vpack.c.bf16 %v3289_v57, %v3287_v45  ;;  %v7219_v19 = vpack.c.bf16 %v3288_v34, %v3286_v37 }
 0xa19   : > { %v3324_v23 = vmul.f32 %v3317_v15, %v3310_v61  ;;  %v3325_v8 = vmul.f32 %v3321_v2, %v3304_v33  ;;  %v3305_v63 = vsel %vm571_vm4, %v3303_v9, %v3297_v56  ;;  %v3311_v50 = vsel %vm571_vm4, %v3297_v56, %v3303_v9  ;;  %v6942_v9 = vld [vmem:[%s10341_s1 + $0x6] ss:$8 sm:$0x3] }
 0xa1a   : > { %v3326_v44 = vmul.f32 %v3317_v15, %v3311_v50  ;;  %v3327_v26 = vmul.f32 %v3321_v2, %v3305_v63  ;;  %7218 = vmatprep.subr.bf16.mxu0 %v7217_v30  ;;  %v3368_v15 = vsel %vm622_vm5, %v8887_v28, %v8893_v36  ;;  %v3413_v24 = vrot.slane %v6942_v9, %v7681_v4  ;;  %v6943_v28 = vld [vmem:[%s10341_s1 + $0x7] ss:$8 sm:$0x3] }
 0xa1b   : > { %v3467_v51 = vpop.permute.xlu1 %3466  ;;  %7220 = vmatpush1.bf16.msra.mxu0 %v7219_v19  ;;  %v3417_v58 = vrot.slane %v6942_v9, %v7674_v3  ;;  %v3382_v37 = vmul.f32 %v3375_v48, %v3360_v40  ;;  %v3383_v45 = vmul.f32 %v3379_v25, %v3368_v15  ;;  %v3451_v60 = vrot.slane %v6943_v28, %v7681_v4 }
 0xa1c   : > { %v3469_v46 = vpop.permute.xlu0 %3468  ;;  %v7221_v49 = vpack.c.bf16 %v3327_v26, %v3325_v8  ;;  %v7223_v12 = vpack.c.bf16 %v3326_v44, %v3324_v23  ;;  %v3455_v33 = vrot.slane %v6943_v28, %v7674_v3  ;;  %v3420_v30 = vmul.f32 %v3413_v24, %v3398_v42 }
 0xa1d   : > { %v3421_v19 = vmul.f32 %v3417_v58, %v3406_v0  ;;  %v3489_v44 = vrot.slane %v6944_v21, %v7681_v4  ;;  %v3493_v26 = vrot.slane %v6944_v21, %v7674_v3  ;;  %v3618_v0 = vstv %s6947_s25  ;;  %s6989_s25 = sld [smem:[#allocation4 + $0x4]] }
 0xa1e   : > { %7222 = vmatprep.subr.bf16.mxu0 %v7221_v49 }
 0xa1f   : > { %v3357_v2 = vpop.permute.xlu1 %3356  ;;  %7224 = vmatpush1.bf16.msra.mxu0 %v7223_v12  ;;  %v3458_v12 = vmul.f32 %v3451_v60, %v3436_v39 }
 0xa20   : > { %v3359_v11 = vpop.permute.xlu0 %3358  ;;  %7226 = vmatprep.subr.bf16.mxu0 %v7225_v16 }
 0xa21   : > { %v3361_v17 = vsel %vm622_vm5, %v3357_v2, %v3359_v11  ;;  %v3369_v59 = vsel %vm622_vm5, %v3359_v11, %v3357_v2 }
 0xa22   : > { %v3384_v36 = vmul.f32 %v3375_v48, %v3361_v17  ;;  %v3385_v62 = vmul.f32 %v3379_v25, %v3369_v59 }
 0xa23   : > { %v3395_v16 = vpop.permute.xlu1 %3394  ;;  %7228 = vmatpush1.bf16.msra.mxu0 %v7227_v52  ;;  %v3444_v52 = vsel %vm714_vm7, %v8891_v22, %v8900_v18  ;;  %v3474_v22 = vsel %vm760_vm8, %v3467_v51, %v3469_v46  ;;  %v3482_v18 = vsel %vm760_vm8, %v3469_v46, %v3467_v51  ;;  %v8992_v51 = vld [vmem:[%s10346_s6] sm:$0xff]  ;;  %v8998_v46 = vld [vmem:[%s10346_s6 + $0x18] sm:$0xff] }
 0xa24   : > { %v3397_v41 = vpop.permute.xlu0 %3396  ;;  %v7229_v34 = vpack.c.bf16 %v3385_v62, %v3383_v45  ;;  %v7231_v57 = vpack.c.bf16 %v3384_v36, %v3382_v37  ;;  %v3459_v48 = vmul.f32 %v3455_v33, %v3444_v52  ;;  %v3496_v17 = vmul.f32 %v3489_v44, %v3474_v22  ;;  %v9005_v62 = vld [vmem:[%s10346_s6 + $0x10] sm:$0xff]  ;;  %v6948_v22 = vld [vmem:[%s10341_s1 + $0x1] ss:$8 sm:$0x3] }
 0xa25   : > { %v3399_v61 = vsel %vm668_vm6, %v3395_v16, %v3397_v41  ;;  %v3407_v56 = vsel %vm668_vm6, %v3397_v41, %v3395_v16  ;;  %v3497_v59 = vmul.f32 %v3493_v26, %v3482_v18 }
 0xa26   : > { %v3422_v5 = vmul.f32 %v3413_v24, %v3399_v61  ;;  %v3423_v1 = vmul.f32 %v3417_v58, %v3407_v56  ;;  %7230 = vmatprep.subr.bf16.mxu0 %v7229_v34 }
 0xa27   : > { %v3433_v23 = vpop.permute.xlu1 %3432  ;;  %7232 = vmatpush1.bf16.msra.mxu0 %v7231_v57 }
 0xa28   : > { %v3435_v8 = vpop.permute.xlu0 %3434  ;;  %v7233_v63 = vpack.c.bf16 %v3423_v1, %v3421_v19  ;;  %v7235_v50 = vpack.c.bf16 %v3422_v5, %v3420_v30 }
 0xa29   : > { %v3437_v47 = vsel %vm714_vm7, %v3433_v23, %v3435_v8  ;;  %v3445_v49 = vsel %vm714_vm7, %v3435_v8, %v3433_v23 }
 0xa2a   : > { %v3460_v25 = vmul.f32 %v3451_v60, %v3437_v47  ;;  %v3461_v9 = vmul.f32 %v3455_v33, %v3445_v49  ;;  %7234 = vmatprep.subr.bf16.mxu0 %v7233_v63  ;;  %v3649_v49 = vld [vmem:[%s10341_s1] ss:$8 sm:$0x3] }
 0xa2b   : > { %v3471_v40 = vpop.permute.xlu1 %3470  ;;  %7236 = vmatpush1.bf16.msra.mxu0 %v7235_v50 }
 0xa2c   : > { %v3473_v15 = vpop.permute.xlu0 %3472  ;;  %v7237_v2 = vpack.c.bf16 %v3461_v9, %v3459_v48  ;;  %v7239_v11 = vpack.c.bf16 %v3460_v25, %v3458_v12  ;;  %v3654_v25 = vrot.slane %v3649_v49, %v7681_v4  ;;  %v3658_v9 = vrot.slane %v3649_v49, %v7674_v3 }
 0xa2d   : > { %v3475_v24 = vsel %vm760_vm8, %v3471_v40, %v3473_v15  ;;  %v3483_v58 = vsel %vm760_vm8, %v3473_v15, %v3471_v40 }
 0xa2e   : > { %v3498_v37 = vmul.f32 %v3489_v44, %v3475_v24  ;;  %v3499_v45 = vmul.f32 %v3493_v26, %v3483_v58  ;;  %7238 = vmatprep.subr.bf16.mxu0 %v7237_v2  ;;  %v3696_v24 = vrot.slane %v6948_v22, %v7674_v3  ;;  %v6949_v58 = vld [vmem:[%s10341_s1 + $0x2] ss:$8 sm:$0x3] }
 0xa2f   : > { %7240 = vmatpush1.bf16.msra.mxu0 %v7239_v11  ;;  %v3692_v11 = vrot.slane %v6948_v22, %v7681_v4 }
 0xa30   : > { %v7241_v28 = vpack.c.bf16 %v3499_v45, %v3497_v59  ;;  %v7243_v36 = vpack.c.bf16 %v3498_v37, %v3496_v17 }
 0xa32   : > { %7242 = vmatprep.subr.bf16.mxu0 %v7241_v28 }
 0xa33   : > { %7244 = vmatpush1.bf16.msra.mxu0 %v7243_v36 }
 0xa36   : > { %3605 = vmatmul.mubr.f32.vlgmr.msra.gmra.mrb[12].mxu0 %v8992_v51 }
 0xa37   : > { %6946 = vmatprep.mubr.msk.f32.mxu0 %vm479_vm1, %v8998_v46 }
 0xa3a   : > { %3611 = vmatmul.mubr.f32.gmra.mrb[14].mxu0 %v9005_v62 }
 0xa3b   : > { %6966 = vmatprep.mubr.msk.f32.mxu0 %vm479_vm1, %v8616_v31 }
 0xb09   : > { %v3606_v42 = vpop.f32.mrb[12].mxu0 }
 0xb0a   : > { %v3607_v16 = vadd.f32 %v3606_v42, %v8246_v54  ;;  %v3608_v41 = vpop.f32.mrb[13].mxu0 }
 0xb0b   : > { %v3609_v34 = vadd.f32 %v3608_v41, %v8246_v54 }
 0xb0c   : > { %v3619_v57 = vmul.f32 %v3618_v0, %v3607_v16  ;;  %v3734_v16 = vrot.slane %v6949_v58, %v7674_v3 }
 0xb0d   : > { %v3620_v60 = vmul.f32 %v3618_v0, %v3609_v34  ;;  %v3612_v33 = vpop.f32.mrb[14].mxu0 }
 0xb0e   : > { %v9013_v61 = vadd.f32 %v3619_v57, %v8623_v32  ;;  %v3614_v56 = vpop.f32.mrb[15].mxu0  ;;  %v3613_v31 = vadd.f32 %v3612_v33, %v8260_v43 }
 0xb0f   : > { %v9016_v30 = vadd.f32 %v3620_v60, %v8626_v53  ;;  %v3615_v19 = vadd.f32 %v3614_v56, %v8260_v43  ;;  %v6950_v60 = vld [vmem:[%s10341_s1 + $0x3] ss:$8 sm:$0x3] }
 0xb10   : > { %3637 = vrot.lane.b32.xlu1 %v9013_v61, %s7575_s12  ;;  %v3621_v32 = vmul.f32 %v3618_v0, %v3613_v31 }
 0xb11   : > { %3805 = vrot.lane.b32.xlu0 %v9016_v30, %s7578_s15 }
 0xb12   : > { %v9032_v53 = vadd.f32 %v3621_v32, %v8642_v29  ;;  %v3622_v29 = vmul.f32 %v3618_v0, %v3615_v19  ;;  %v3730_v0 = vrot.slane %v6949_v58, %v7681_v4 }
 0xb14   : > { %3675 = vrot.lane.b32.xlu1 %v9013_v61, %s7574_s30  ;;  %v9052_v21 = vadd.f32 %v3622_v29, %v8662_v14 }
 0xb15   : > { %3843 = vrot.lane.b32.xlu0 %v9016_v30, %s7579_s18 }
 0xb18   : > { %3713 = vrot.lane.b32.xlu1 %v9013_v61, %s7576_s13 }
 0xb19   : > { %3881 = vrot.lane.b32.xlu0 %v9016_v30, %s7580_s21 }
 0xb1c   : > { %3751 = vrot.lane.b32.xlu1 %v9013_v61, %s7577_s14 }
 0xb1d   : > { %3639 = vrot.lane.b32.xlu0 %v9032_v53, %s7575_s12 }
 0xb20   : > { %3803 = vrot.lane.b32.xlu1 %v9013_v61, %s7578_s15 }
 0xb21   : > { %3677 = vrot.lane.b32.xlu0 %v9032_v53, %s7574_s30 }
 0xb24   : > { %3841 = vrot.lane.b32.xlu1 %v9013_v61, %s7579_s18 }
 0xb25   : > { %3715 = vrot.lane.b32.xlu0 %v9032_v53, %s7576_s13 }
 0xb28   : > { %3879 = vrot.lane.b32.xlu1 %v9013_v61, %s7580_s21 }
 0xb29   : > { %3753 = vrot.lane.b32.xlu0 %v9032_v53, %s7577_s14 }
 0xb2c   : > { %3629 = vrot.lane.b32.xlu1 %v9016_v30, %s7575_s12 }
 0xb2d   : > { %3631 = vrot.lane.b32.xlu0 %v9052_v21, %s7575_s12 }
 0xb30   : > { %3669 = vrot.lane.b32.xlu1 %v9016_v30, %s7574_s30 }
 0xb31   : > { %3671 = vrot.lane.b32.xlu0 %v9052_v21, %s7574_s30 }
 0xb34   : > { %3707 = vrot.lane.b32.xlu1 %v9016_v30, %s7576_s13 }
 0xb35   : > { %3709 = vrot.lane.b32.xlu0 %v9052_v21, %s7576_s13 }
 0xb38   : > { %3745 = vrot.lane.b32.xlu1 %v9016_v30, %s7577_s14 }
 0xb39   : > { %3747 = vrot.lane.b32.xlu0 %v9052_v21, %s7577_s14 }
 0xb3c   : > { %3917 = vrot.lane.b32.xlu1 %v9013_v61, %s7581_s22 }
 0xb3d   : > { %3919 = vrot.lane.b32.xlu0 %v9016_v30, %s7581_s22 }
 0xb40   : > { %3807 = vrot.lane.b32.xlu1 %v9032_v53, %s7578_s15 }
 0xb41   : > { %3809 = vrot.lane.b32.xlu0 %v9052_v21, %s7578_s15 }
 0xb44   : > { %3845 = vrot.lane.b32.xlu1 %v9032_v53, %s7579_s18 }
 0xb45   : > { %3847 = vrot.lane.b32.xlu0 %v9052_v21, %s7579_s18 }
 0xb48   : > { %3883 = vrot.lane.b32.xlu1 %v9032_v53, %s7580_s21 }
 0xb49   : > { %3885 = vrot.lane.b32.xlu0 %v9052_v21, %s7580_s21 }
 0xb4c   : > { %3921 = vrot.lane.b32.xlu1 %v9032_v53, %s7581_s22 }
 0xb4d   : > { %3923 = vrot.lane.b32.xlu0 %v9052_v21, %s7581_s22 }
 0xb82   : > { %v3638_v14 = vpop.permute.xlu1 %3637 }
 0xb83   : > { %v9090_v5 = vpop.permute.xlu0 %3805 }
 0xb86   : > { %v3676_v1 = vpop.permute.xlu1 %3675 }
 0xb87   : > { %v9092_v39 = vpop.permute.xlu0 %3843 }
 0xb8a   : > { %v3714_v52 = vpop.permute.xlu1 %3713 }
 0xb8b   : > { %v9094_v23 = vpop.permute.xlu0 %3881 }
 0xb8e   : > { %v9096_v8 = vpop.permute.xlu1 %3751 }
 0xb8f   : > { %v3640_v63 = vpop.permute.xlu0 %3639 }
 0xb92   : > { %v9098_v50 = vpop.permute.xlu1 %3803 }
 0xb93   : > { %v3678_v44 = vpop.permute.xlu0 %3677 }
 0xb96   : > { %v9100_v26 = vpop.permute.xlu1 %3841 }
 0xb97   : > { %v3716_v47 = vpop.permute.xlu0 %3715 }
 0xb9a   : > { %v9105_v12 = vpop.permute.xlu1 %3879 }
 0xb9b   : > { %v3754_v48 = vpop.permute.xlu0 %3753 }
 0xb9e   : > { %v3630_v18 = vpop.permute.xlu1 %3629 }
 0xb9f   : > { %v3641_v40 = vsel %vm431_vm2, %v3638_v14, %v3630_v18  ;;  %v3647_v15 = vsel %vm431_vm2, %v3630_v18, %v3638_v14  ;;  %v3632_v2 = vpop.permute.xlu0 %3631 }
 0xba0   : > { %v3661_v17 = vmul.f32 %v3654_v25, %v3647_v15  ;;  %v3662_v59 = vmul.f32 %v3658_v9, %v3641_v40  ;;  %v3642_v37 = vsel %vm431_vm2, %v3640_v63, %v3632_v2  ;;  %v3648_v45 = vsel %vm431_vm2, %v3632_v2, %v3640_v63 }
 0xba1   : > { %v3663_v28 = vmul.f32 %v3654_v25, %v3648_v45  ;;  %v3664_v36 = vmul.f32 %v3658_v9, %v3642_v37  ;;  %v3768_v25 = vrot.slane %v6950_v60, %v7681_v4 }
 0xba2   : > { %v3670_v42 = vpop.permute.xlu1 %3669 }
 0xba3   : > { %v3679_v41 = vsel %vm479_vm1, %v3676_v1, %v3670_v42  ;;  %v3685_v34 = vsel %vm479_vm1, %v3670_v42, %v3676_v1  ;;  %v3672_v57 = vpop.permute.xlu0 %3671  ;;  %v7245_v33 = vpack.c.bf16 %v3664_v36, %v3662_v59  ;;  %v7247_v56 = vpack.c.bf16 %v3663_v28, %v3661_v17 }
 0xba4   : > { %v3699_v31 = vmul.f32 %v3692_v11, %v3685_v34  ;;  %v3700_v32 = vmul.f32 %v3696_v24, %v3679_v41  ;;  %v3680_v19 = vsel %vm479_vm1, %v3678_v44, %v3672_v57  ;;  %v3686_v29 = vsel %vm479_vm1, %v3672_v57, %v3678_v44  ;;  %v6951_v44 = vld [vmem:[%s10341_s1 + $0x4] ss:$8 sm:$0x3] }
 0xba5   : > { %v3701_v14 = vmul.f32 %v3692_v11, %v3686_v29  ;;  %v3702_v63 = vmul.f32 %v3696_v24, %v3680_v19  ;;  %7246 = vmatprep.subr.bf16.mxu1 %v7245_v33  ;;  %v3772_v1 = vrot.slane %v6950_v60, %v7674_v3 }
 0xba6   : > { %v3708_v49 = vpop.permute.xlu1 %3707  ;;  %7248 = vmatpush1.bf16.msra.mxu1 %v7247_v56  ;;  %v6952_v56 = vld [vmem:[%s10341_s1 + $0x5] ss:$8 sm:$0x3] }
 0xba7   : > { %v3717_v9 = vsel %vm525_vm3, %v3714_v52, %v3708_v49  ;;  %v3723_v22 = vsel %vm525_vm3, %v3708_v49, %v3714_v52  ;;  %v3710_v18 = vpop.permute.xlu0 %3709  ;;  %v7249_v40 = vpack.c.bf16 %v3702_v63, %v3700_v32  ;;  %v7251_v15 = vpack.c.bf16 %v3701_v14, %v3699_v31 }
 0xba8   : > { %v3737_v2 = vmul.f32 %v3730_v0, %v3723_v22  ;;  %v3738_v11 = vmul.f32 %v3734_v16, %v3717_v9  ;;  %v3718_v24 = vsel %vm525_vm3, %v3716_v47, %v3710_v18  ;;  %v3724_v58 = vsel %vm525_vm3, %v3710_v18, %v3716_v47 }
 0xba9   : > { %v3739_v17 = vmul.f32 %v3730_v0, %v3724_v58  ;;  %v3740_v59 = vmul.f32 %v3734_v16, %v3718_v24  ;;  %7250 = vmatprep.subr.bf16.mxu1 %v7249_v40  ;;  %v3792_v52 = vrot.slane %v6951_v44, %v7674_v3  ;;  %v3826_v49 = vrot.slane %v6952_v56, %v7681_v4 }
 0xbaa   : > { %v3746_v37 = vpop.permute.xlu1 %3745  ;;  %7252 = vmatpush1.bf16.msra.mxu1 %v7251_v15  ;;  %v3811_v9 = vsel %vm622_vm5, %v9098_v50, %v9090_v5  ;;  %v3819_v22 = vsel %vm622_vm5, %v9090_v5, %v9098_v50  ;;  %v6954_v5 = vld [vmem:[%s10341_s1 + $0x7] ss:$8 sm:$0x3] }
 0xbab   : > { %v3755_v45 = vsel %vm571_vm4, %v9096_v8, %v3746_v37  ;;  %v3761_v28 = vsel %vm571_vm4, %v3746_v37, %v9096_v8  ;;  %v3748_v36 = vpop.permute.xlu0 %3747  ;;  %v7253_v42 = vpack.c.bf16 %v3740_v59, %v3738_v11  ;;  %v7255_v41 = vpack.c.bf16 %v3739_v17, %v3737_v2 }
 0xbac   : > { %v3775_v34 = vmul.f32 %v3768_v25, %v3761_v28  ;;  %v3776_v57 = vmul.f32 %v3772_v1, %v3755_v45  ;;  %v3756_v47 = vsel %vm571_vm4, %v3754_v48, %v3748_v36  ;;  %v3762_v0 = vsel %vm571_vm4, %v3748_v36, %v3754_v48  ;;  %v6953_v48 = vld [vmem:[%s10341_s1 + $0x6] ss:$8 sm:$0x3] }
 0xbad   : > { %v3777_v16 = vmul.f32 %v3768_v25, %v3762_v0  ;;  %v3778_v60 = vmul.f32 %v3772_v1, %v3756_v47  ;;  %7254 = vmatprep.subr.bf16.mxu1 %v7253_v42  ;;  %v3798_v33 = vmul.f32 %v3792_v52, %v9052_v21  ;;  %v3788_v8 = vrot.slane %v6951_v44, %v7681_v4 }
 0xbae   : > { %v9150_v31 = vpop.permute.xlu1 %3917  ;;  %7256 = vmatpush1.bf16.msra.mxu1 %v7255_v41  ;;  %v3796_v14 = vmul.f32 %v3792_v52, %v9016_v30  ;;  %v3830_v25 = vrot.slane %v6952_v56, %v7674_v3  ;;  %v3864_v15 = vrot.slane %v6953_v48, %v7681_v4  ;;  %v3868_v2 = vrot.slane %v6953_v48, %v7674_v3 }
 0xbaf   : > { %v3920_v32 = vpop.permute.xlu0 %3919  ;;  %v7257_v19 = vpack.c.bf16 %v3778_v60, %v3776_v57  ;;  %v7259_v29 = vpack.c.bf16 %v3777_v16, %v3775_v34  ;;  %v3797_v63 = vmul.f32 %v3788_v8, %v9032_v53  ;;  %v3795_v40 = vmul.f32 %v3788_v8, %v9013_v61 }
 0xbb0   : > { %v7261_v1 = vpack.c.bf16 %v3798_v33, %v3796_v14  ;;  %v3833_v17 = vmul.f32 %v3826_v49, %v3811_v9  ;;  %v3834_v59 = vmul.f32 %v3830_v25, %v3819_v22  ;;  %v3849_v52 = vsel %vm668_vm6, %v9100_v26, %v9092_v39  ;;  %v6955_v33 = vld [vmem:[%s10341_s1 + $0x10] ss:$8 sm:$0x3] }
 0xbb1   : > { %7258 = vmatprep.subr.bf16.mxu1 %v7257_v19  ;;  %v7263_v58 = vpack.c.bf16 %v3797_v63, %v3795_v40  ;;  %v3857_v45 = vsel %vm668_vm6, %v9092_v39, %v9100_v26  ;;  %v3902_v34 = vrot.slane %v6954_v5, %v7681_v4  ;;  %v3906_v57 = vrot.slane %v6954_v5, %v7674_v3 }
 0xbb2   : > { %v3808_v18 = vpop.permute.xlu1 %3807  ;;  %7260 = vmatpush1.bf16.msra.mxu1 %v7259_v29  ;;  %v3871_v16 = vmul.f32 %v3864_v15, %v3849_v52  ;;  %v3872_v60 = vmul.f32 %v3868_v2, %v3857_v45  ;;  %v3887_v56 = vsel %vm714_vm7, %v9105_v12, %v9094_v23  ;;  %v3895_v8 = vsel %vm714_vm7, %v9094_v23, %v9105_v12 }
 0xbb3   : > { %v3810_v44 = vpop.permute.xlu0 %3809  ;;  %7262 = vmatprep.subr.bf16.mxu1 %v7261_v1  ;;  %v3940_v63 = vrot.slane %v6955_v33, %v7681_v4  ;;  %v3909_v9 = vmul.f32 %v3902_v34, %v3887_v56  ;;  %v3910_v22 = vmul.f32 %v3906_v57, %v3895_v8  ;;  %v3925_v23 = vsel %vm760_vm8, %v9150_v31, %v3920_v32 }
 0xbb4   : > { %v3812_v11 = vsel %vm622_vm5, %v3808_v18, %v3810_v44  ;;  %v3820_v24 = vsel %vm622_vm5, %v3810_v44, %v3808_v18  ;;  %v3933_v12 = vsel %vm760_vm8, %v3920_v32, %v9150_v31  ;;  %v9210_v31 = vld [vmem:[%s10344_s4 + $0x8] sm:$0xff] }
 0xbb5   : > { %v3835_v50 = vmul.f32 %v3826_v49, %v3812_v11  ;;  %v3836_v37 = vmul.f32 %v3830_v25, %v3820_v24  ;;  %v3944_v49 = vrot.slane %v6955_v33, %v7674_v3 }
 0xbb6   : > { %v3846_v28 = vpop.permute.xlu1 %3845  ;;  %7264 = vmatpush1.bf16.msra.mxu1 %v7263_v58 }
 0xbb7   : > { %v3848_v36 = vpop.permute.xlu0 %3847  ;;  %v7265_v42 = vpack.c.bf16 %v3836_v37, %v3834_v59  ;;  %v7267_v41 = vpack.c.bf16 %v3835_v50, %v3833_v17  ;;  %v3947_v17 = vmul.f32 %v3940_v63, %v3925_v23  ;;  %v3948_v59 = vmul.f32 %v3944_v49, %v3933_v12  ;;  %v4094_v12 = vld [vmem:[%s10341_s1] ss:$8 sm:$0x3] }
 0xbb8   : > { %v3850_v47 = vsel %vm668_vm6, %v3846_v28, %v3848_v36  ;;  %v3858_v0 = vsel %vm668_vm6, %v3848_v36, %v3846_v28 }
 0xbb9   : > { %v3873_v39 = vmul.f32 %v3864_v15, %v3850_v47  ;;  %v3874_v26 = vmul.f32 %v3868_v2, %v3858_v0  ;;  %7266 = vmatprep.subr.bf16.mxu1 %v7265_v42 }
 0xbba   : > { %v3884_v19 = vpop.permute.xlu1 %3883  ;;  %7268 = vmatpush1.bf16.msra.mxu1 %v7267_v41 }
 0xbbb   : > { %v3886_v29 = vpop.permute.xlu0 %3885  ;;  %v7269_v14 = vpack.c.bf16 %v3874_v26, %v3872_v60  ;;  %v7271_v48 = vpack.c.bf16 %v3873_v39, %v3871_v16 }
 0xbbc   : > { %v3888_v25 = vsel %vm714_vm7, %v3884_v19, %v3886_v29  ;;  %v3896_v1 = vsel %vm714_vm7, %v3886_v29, %v3884_v19 }
 0xbbd   : > { %v3911_v18 = vmul.f32 %v3902_v34, %v3888_v25  ;;  %v3912_v40 = vmul.f32 %v3906_v57, %v3896_v1  ;;  %7270 = vmatprep.subr.bf16.mxu1 %v7269_v14 }
 0xbbe   : > { %v3922_v15 = vpop.permute.xlu1 %3921  ;;  %7272 = vmatpush1.bf16.msra.mxu1 %v7271_v48 }
 0xbbf   : > { %v3924_v44 = vpop.permute.xlu0 %3923  ;;  %v7273_v2 = vpack.c.bf16 %v3912_v40, %v3910_v22  ;;  %v7275_v11 = vpack.c.bf16 %v3911_v18, %v3909_v9 }
 0xbc0   : > { %v3926_v24 = vsel %vm760_vm8, %v3922_v15, %v3924_v44  ;;  %v3934_v58 = vsel %vm760_vm8, %v3924_v44, %v3922_v15 }
 0xbc1   : > { %v3949_v5 = vmul.f32 %v3940_v63, %v3926_v24  ;;  %v3950_v50 = vmul.f32 %v3944_v49, %v3934_v58  ;;  %7274 = vmatprep.subr.bf16.mxu1 %v7273_v2  ;;  %v4099_v2 = vrot.slane %v4094_v12, %v7681_v4  ;;  %v6958_v24 = vld [vmem:[%s10341_s1 + $0x1] ss:$8 sm:$0x3] }
 0xbc2   : > { %7276 = vmatpush1.bf16.msra.mxu1 %v7275_v11  ;;  %v4103_v11 = vrot.slane %v4094_v12, %v7674_v3 }
 0xbc3   : > { %v7277_v37 = vpack.c.bf16 %v3950_v50, %v3948_v59  ;;  %v7279_v52 = vpack.c.bf16 %v3949_v5, %v3947_v17  ;;  %v4137_v50 = vrot.slane %v6958_v24, %v7681_v4 }
 0xbc5   : > { %7278 = vmatprep.subr.bf16.mxu1 %v7277_v37  ;;  %v4141_v37 = vrot.slane %v6958_v24, %v7674_v3 }
 0xbc6   : > { %7280 = vmatpush1.bf16.msra.mxu1 %v7279_v52  ;;  %v6959_v52 = vld [vmem:[%s10341_s1 + $0x2] ss:$8 sm:$0x3] }
 0xbc9   : > { %4056 = vmatmul.mubr.f32.vlgmr.msra.gmra.mrb[12].mxu1 %v8816_v35  ;;  %v6961_v35 = vld [vmem:[%s10341_s1 + $0x4] ss:$8 sm:$0x3] }
 0xbca   : > { %6957 = vmatprep.mubr.msk.f32.mxu1 %vm479_vm1, %v8822_v38  ;;  %v4233_v41 = vrot.slane %v6961_v35, %v7681_v4  ;;  %v4237_v0 = vrot.slane %v6961_v35, %v7674_v3 }
 0xbcd   : > { %4062 = vmatmul.mubr.f32.gmra.mrb[14].mxu1 %v8829_v55 }
 0xbce   : > { %6977 = vmatprep.mubr.msk.f32.mxu1 %vm479_vm1, %v9210_v31 }
 0xc9c   : > { %v4057_v32 = vpop.f32.mrb[12].mxu1 }
 0xc9d   : > { %v4058_v45 = vadd.f32 %v4057_v32, %v8053_v13  ;;  %v4059_v28 = vpop.f32.mrb[13].mxu1 }
 0xc9e   : > { %v4060_v38 = vadd.f32 %v4059_v28, %v8053_v13 }
 0xc9f   : > { %v4068_v36 = vmax.f32 %v4058_v45, 0.0 }
 0xca0   : > { %v4069_v55 = vmax.f32 %v4060_v38, 0.0  ;;  %v4063_v42 = vpop.f32.mrb[14].mxu1 }
 0xca1   : > { %v4064_v34 = vadd.f32 %v4063_v42, %v8060_v20  ;;  %v4065_v57 = vpop.f32.mrb[15].mxu1  ;;  %4082 = vrot.lane.b32.xlu1 %v4068_v36, %s7575_s12  ;;  %v9225_v33 = vmul.f32 %v4233_v41, %v4068_v36  ;;  %v4175_v42 = vrot.slane %v6959_v52, %v7681_v4 }
 0xca2   : > { %v4066_v47 = vadd.f32 %v4065_v57, %v8060_v20  ;;  %4250 = vrot.lane.b32.xlu0 %v4069_v55, %s7578_s15  ;;  %v9231_v26 = vmul.f32 %v4237_v0, %v4069_v55 }
 0xca3   : > { %v4070_v16 = vmax.f32 %v4064_v34, 0.0 }
 0xca4   : > { %v4071_v60 = vmax.f32 %v4066_v47, 0.0 }
 0xca5   : > { %v9227_v39 = vmul.f32 %v4233_v41, %v4070_v16  ;;  %4120 = vrot.lane.b32.xlu1 %v4068_v36, %s7574_s30  ;;  %v4179_v41 = vrot.slane %v6959_v52, %v7674_v3 }
 0xca6   : > { %4288 = vrot.lane.b32.xlu0 %v4069_v55, %s7579_s18  ;;  %v9233_v56 = vmul.f32 %v4237_v0, %v4071_v60  ;;  %v6960_v0 = vld [vmem:[%s10341_s1 + $0x3] ss:$8 sm:$0x3] }
 0xca7   : > { %v7299_v8 = vpack.c.bf16 %v9227_v39, %v9225_v33 }
 0xca8   : > { %v7297_v19 = vpack.c.bf16 %v9233_v56, %v9231_v26 }
 0xca9   : > { %4158 = vrot.lane.b32.xlu1 %v4068_v36, %s7576_s13 }
 0xcaa   : > { %4326 = vrot.lane.b32.xlu0 %v4069_v55, %s7580_s21 }
 0xcad   : > { %4196 = vrot.lane.b32.xlu1 %v4068_v36, %s7577_s14 }
 0xcae   : > { %4084 = vrot.lane.b32.xlu0 %v4070_v16, %s7575_s12 }
 0xcb1   : > { %4248 = vrot.lane.b32.xlu1 %v4068_v36, %s7578_s15 }
 0xcb2   : > { %4122 = vrot.lane.b32.xlu0 %v4070_v16, %s7574_s30 }
 0xcb5   : > { %4286 = vrot.lane.b32.xlu1 %v4068_v36, %s7579_s18 }
 0xcb6   : > { %4160 = vrot.lane.b32.xlu0 %v4070_v16, %s7576_s13 }
 0xcb9   : > { %4324 = vrot.lane.b32.xlu1 %v4068_v36, %s7580_s21 }
 0xcba   : > { %4198 = vrot.lane.b32.xlu0 %v4070_v16, %s7577_s14 }
 0xcbd   : > { %4074 = vrot.lane.b32.xlu1 %v4069_v55, %s7575_s12 }
 0xcbe   : > { %4076 = vrot.lane.b32.xlu0 %v4071_v60, %s7575_s12 }
 0xcc1   : > { %4114 = vrot.lane.b32.xlu1 %v4069_v55, %s7574_s30 }
 0xcc2   : > { %4116 = vrot.lane.b32.xlu0 %v4071_v60, %s7574_s30 }
 0xcc5   : > { %4152 = vrot.lane.b32.xlu1 %v4069_v55, %s7576_s13 }
 0xcc6   : > { %4154 = vrot.lane.b32.xlu0 %v4071_v60, %s7576_s13 }
 0xcc9   : > { %4190 = vrot.lane.b32.xlu1 %v4069_v55, %s7577_s14 }
 0xcca   : > { %4192 = vrot.lane.b32.xlu0 %v4071_v60, %s7577_s14 }
 0xccd   : > { %4362 = vrot.lane.b32.xlu1 %v4068_v36, %s7581_s22 }
 0xcce   : > { %4364 = vrot.lane.b32.xlu0 %v4069_v55, %s7581_s22 }
 0xcd1   : > { %4252 = vrot.lane.b32.xlu1 %v4070_v16, %s7578_s15 }
 0xcd2   : > { %4254 = vrot.lane.b32.xlu0 %v4071_v60, %s7578_s15 }
 0xcd5   : > { %4290 = vrot.lane.b32.xlu1 %v4070_v16, %s7579_s18 }
 0xcd6   : > { %4292 = vrot.lane.b32.xlu0 %v4071_v60, %s7579_s18 }
 0xcd9   : > { %4328 = vrot.lane.b32.xlu1 %v4070_v16, %s7580_s21 }
 0xcda   : > { %4330 = vrot.lane.b32.xlu0 %v4071_v60, %s7580_s21 }
 0xcdd   : > { %4366 = vrot.lane.b32.xlu1 %v4070_v16, %s7581_s22 }
 0xcde   : > { %4368 = vrot.lane.b32.xlu0 %v4071_v60, %s7581_s22 }
 0xd13   : > { %v4083_v29 = vpop.permute.xlu1 %4082 }
 0xd14   : > { %v9267_v14 = vpop.permute.xlu0 %4250 }
 0xd17   : > { %v4121_v48 = vpop.permute.xlu1 %4120 }
 0xd18   : > { %v9269_v63 = vpop.permute.xlu0 %4288 }
 0xd1b   : > { %v4159_v49 = vpop.permute.xlu1 %4158 }
 0xd1c   : > { %v9271_v25 = vpop.permute.xlu0 %4326 }
 0xd1f   : > { %v4197_v1 = vpop.permute.xlu1 %4196 }
 0xd20   : > { %v4085_v9 = vpop.permute.xlu0 %4084 }
 0xd23   : > { %v9273_v22 = vpop.permute.xlu1 %4248 }
 0xd24   : > { %v4123_v18 = vpop.permute.xlu0 %4122 }
 0xd27   : > { %v9275_v40 = vpop.permute.xlu1 %4286 }
 0xd28   : > { %v4161_v23 = vpop.permute.xlu0 %4160  ;;  %v4294_v26 = vsel %vm668_vm6, %v9275_v40, %v9269_v63  ;;  %v4302_v56 = vsel %vm668_vm6, %v9269_v63, %v9275_v40  ;;  %v6965_v63 = vld [vmem:[%s10341_s1 + $0x10] ss:$8 sm:$0x3] }
 0xd2b   : > { %v9280_v15 = vpop.permute.xlu1 %4324 }
 0xd2c   : > { %v4199_v44 = vpop.permute.xlu0 %4198  ;;  %v4332_v39 = vsel %vm714_vm7, %v9280_v15, %v9271_v25 }
 0xd2f   : > { %v4075_v58 = vpop.permute.xlu1 %4074 }
 0xd30   : > { %v4086_v17 = vsel %vm431_vm2, %v4083_v29, %v4075_v58  ;;  %v4092_v59 = vsel %vm431_vm2, %v4075_v58, %v4083_v29  ;;  %v4077_v5 = vpop.permute.xlu0 %4076 }
 0xd31   : > { %v4106_v32 = vmul.f32 %v4099_v2, %v4092_v59  ;;  %v4107_v45 = vmul.f32 %v4103_v11, %v4086_v17  ;;  %v4087_v28 = vsel %vm431_vm2, %v4085_v9, %v4077_v5  ;;  %v4093_v35 = vsel %vm431_vm2, %v4077_v5, %v4085_v9 }
 0xd32   : > { %v4108_v38 = vmul.f32 %v4099_v2, %v4093_v35  ;;  %v4109_v36 = vmul.f32 %v4103_v11, %v4087_v28  ;;  %v4213_v17 = vrot.slane %v6960_v0, %v7681_v4 }
 0xd33   : > { %v4115_v55 = vpop.permute.xlu1 %4114 }
 0xd34   : > { %v4124_v34 = vsel %vm479_vm1, %v4121_v48, %v4115_v55  ;;  %v4130_v57 = vsel %vm479_vm1, %v4115_v55, %v4121_v48  ;;  %v4117_v47 = vpop.permute.xlu0 %4116  ;;  %v7281_v16 = vpack.c.bf16 %v4109_v36, %v4107_v45  ;;  %v7283_v60 = vpack.c.bf16 %v4108_v38, %v4106_v32 }
 0xd35   : > { %v4144_v29 = vmul.f32 %v4137_v50, %v4130_v57  ;;  %v4145_v9 = vmul.f32 %v4141_v37, %v4124_v34  ;;  %v4125_v12 = vsel %vm479_vm1, %v4123_v18, %v4117_v47  ;;  %v4131_v2 = vsel %vm479_vm1, %v4117_v47, %v4123_v18 }
 0xd36   : > { %v4146_v11 = vmul.f32 %v4137_v50, %v4131_v2  ;;  %v4147_v24 = vmul.f32 %v4141_v37, %v4125_v12  ;;  %7282 = vmatprep.subr.bf16.mxu0 %v7281_v16  ;;  %v4217_v48 = vrot.slane %v6960_v0, %v7674_v3 }
 0xd37   : > { %v4153_v58 = vpop.permute.xlu1 %4152  ;;  %7284 = vmatpush1.bf16.msra.mxu0 %v7283_v60 }
 0xd38   : > { %v4162_v59 = vsel %vm525_vm3, %v4159_v49, %v4153_v58  ;;  %v4168_v5 = vsel %vm525_vm3, %v4153_v58, %v4159_v49  ;;  %v4155_v52 = vpop.permute.xlu0 %4154  ;;  %v7285_v32 = vpack.c.bf16 %v4147_v24, %v4145_v9  ;;  %v7287_v45 = vpack.c.bf16 %v4146_v11, %v4144_v29 }
 0xd39   : > { %v4182_v28 = vmul.f32 %v4175_v42, %v4168_v5  ;;  %v4183_v35 = vmul.f32 %v4179_v41, %v4162_v59  ;;  %v4163_v18 = vsel %vm525_vm3, %v4161_v23, %v4155_v52  ;;  %v4169_v50 = vsel %vm525_vm3, %v4155_v52, %v4161_v23 }
 0xd3a   : > { %v4184_v37 = vmul.f32 %v4175_v42, %v4169_v50  ;;  %v4185_v38 = vmul.f32 %v4179_v41, %v4163_v18  ;;  %7286 = vmatprep.subr.bf16.mxu0 %v7285_v32  ;;  %v6962_v42 = vld [vmem:[%s10341_s1 + $0x5] ss:$8 sm:$0x3]  ;;  %v4256_v58 = vsel %vm622_vm5, %v9273_v22, %v9267_v14 }
 0xd3b   : > { %v4191_v36 = vpop.permute.xlu1 %4190  ;;  %7288 = vmatpush1.bf16.msra.mxu0 %v7287_v45  ;;  %v4271_v11 = vrot.slane %v6962_v42, %v7681_v4  ;;  %v4275_v24 = vrot.slane %v6962_v42, %v7674_v3 }
 0xd3c   : > { %v4200_v55 = vsel %vm571_vm4, %v4197_v1, %v4191_v36  ;;  %v4206_v34 = vsel %vm571_vm4, %v4191_v36, %v4197_v1  ;;  %v4193_v57 = vpop.permute.xlu0 %4192  ;;  %v7289_v49 = vpack.c.bf16 %v4185_v38, %v4183_v35  ;;  %v7291_v47 = vpack.c.bf16 %v4184_v37, %v4182_v28 }
 0xd3d   : > { %v4220_v0 = vmul.f32 %v4213_v17, %v4206_v34  ;;  %v4221_v16 = vmul.f32 %v4217_v48, %v4200_v55  ;;  %v4201_v60 = vsel %vm571_vm4, %v4199_v44, %v4193_v57  ;;  %v4207_v29 = vsel %vm571_vm4, %v4193_v57, %v4199_v44  ;;  %v6963_v44 = vld [vmem:[%s10341_s1 + $0x6] ss:$8 sm:$0x3] }
 0xd3e   : > { %v4222_v9 = vmul.f32 %v4213_v17, %v4207_v29  ;;  %v4223_v23 = vmul.f32 %v4217_v48, %v4201_v60  ;;  %7290 = vmatprep.subr.bf16.mxu0 %v7289_v49  ;;  %v4264_v17 = vsel %vm622_vm5, %v9267_v14, %v9273_v22  ;;  %v4309_v5 = vrot.slane %v6963_v44, %v7681_v4  ;;  %v6964_v14 = vld [vmem:[%s10341_s1 + $0x7] ss:$8 sm:$0x3] }
 0xd3f   : > { %v4363_v41 = vpop.permute.xlu1 %4362  ;;  %7292 = vmatpush1.bf16.msra.mxu0 %v7291_v47  ;;  %v4313_v52 = vrot.slane %v6963_v44, %v7674_v3  ;;  %v4278_v28 = vmul.f32 %v4271_v11, %v4256_v58  ;;  %v4279_v35 = vmul.f32 %v4275_v24, %v4264_v17  ;;  %v4347_v36 = vrot.slane %v6964_v14, %v7681_v4 }
 0xd40   : > { %v4365_v12 = vpop.permute.xlu0 %4364  ;;  %v7293_v1 = vpack.c.bf16 %v4223_v23, %v4221_v16  ;;  %v7295_v2 = vpack.c.bf16 %v4222_v9, %v4220_v0  ;;  %v4351_v55 = vrot.slane %v6964_v14, %v7674_v3  ;;  %v4316_v49 = vmul.f32 %v4309_v5, %v4294_v26 }
 0xd41   : > { %v4317_v47 = vmul.f32 %v4313_v52, %v4302_v56  ;;  %v4385_v9 = vrot.slane %v6965_v63, %v7681_v4  ;;  %v4389_v23 = vrot.slane %v6965_v63, %v7674_v3 }
 0xd42   : > { %7294 = vmatprep.subr.bf16.mxu0 %v7293_v1 }
 0xd43   : > { %v4253_v48 = vpop.permute.xlu1 %4252  ;;  %7296 = vmatpush1.bf16.msra.mxu0 %v7295_v2  ;;  %v4354_v2 = vmul.f32 %v4347_v36, %v4332_v39 }
 0xd44   : > { %v4255_v59 = vpop.permute.xlu0 %4254  ;;  %7298 = vmatprep.subr.bf16.mxu0 %v7297_v19 }
 0xd45   : > { %v4257_v32 = vsel %vm622_vm5, %v4253_v48, %v4255_v59  ;;  %v4265_v45 = vsel %vm622_vm5, %v4255_v59, %v4253_v48 }
 0xd46   : > { %v4280_v22 = vmul.f32 %v4271_v11, %v4257_v32  ;;  %v4281_v18 = vmul.f32 %v4275_v24, %v4265_v45 }
 0xd47   : > { %v4291_v19 = vpop.permute.xlu1 %4290  ;;  %7300 = vmatpush1.bf16.msra.mxu0 %v7299_v8  ;;  %v4340_v8 = vsel %vm714_vm7, %v9271_v25, %v9280_v15  ;;  %v4370_v25 = vsel %vm760_vm8, %v4363_v41, %v4365_v12  ;;  %v4378_v15 = vsel %vm760_vm8, %v4365_v12, %v4363_v41  ;;  %v9376_v41 = vld [vmem:[%s10346_s6 + $0x8] sm:$0xff] }
 0xd48   : > { %v4293_v50 = vpop.permute.xlu0 %4292  ;;  %v7301_v37 = vpack.c.bf16 %v4281_v18, %v4279_v35  ;;  %v7303_v38 = vpack.c.bf16 %v4280_v22, %v4278_v28  ;;  %v4355_v11 = vmul.f32 %v4351_v55, %v4340_v8  ;;  %v4392_v32 = vmul.f32 %v4385_v9, %v4370_v25 }
 0xd49   : > { %v4295_v34 = vsel %vm668_vm6, %v4291_v19, %v4293_v50  ;;  %v4303_v57 = vsel %vm668_vm6, %v4293_v50, %v4291_v19  ;;  %v4393_v45 = vmul.f32 %v4389_v23, %v4378_v15  ;;  %v4514_v18 = vstv %s6968_s17 }
 0xd4a   : > { %v4318_v40 = vmul.f32 %v4309_v5, %v4295_v34  ;;  %v4319_v33 = vmul.f32 %v4313_v52, %v4303_v57  ;;  %7302 = vmatprep.subr.bf16.mxu0 %v7301_v37 }
 0xd4b   : > { %v4329_v0 = vpop.permute.xlu1 %4328  ;;  %7304 = vmatpush1.bf16.msra.mxu0 %v7303_v38 }
 0xd4c   : > { %v4331_v16 = vpop.permute.xlu0 %4330  ;;  %v7305_v60 = vpack.c.bf16 %v4319_v33, %v4317_v47  ;;  %v7307_v29 = vpack.c.bf16 %v4318_v40, %v4316_v49 }
 0xd4d   : > { %v4333_v42 = vsel %vm714_vm7, %v4329_v0, %v4331_v16  ;;  %v4341_v1 = vsel %vm714_vm7, %v4331_v16, %v4329_v0 }
 0xd4e   : > { %v4356_v24 = vmul.f32 %v4347_v36, %v4333_v42  ;;  %v4357_v44 = vmul.f32 %v4351_v55, %v4341_v1  ;;  %7306 = vmatprep.subr.bf16.mxu0 %v7305_v60 }
 0xd4f   : > { %v4367_v58 = vpop.permute.xlu1 %4366  ;;  %7308 = vmatpush1.bf16.msra.mxu0 %v7307_v29  ;;  %v4545_v29 = vld [vmem:[%s10341_s1] ss:$8 sm:$0x3] }
 0xd50   : > { %v4369_v17 = vpop.permute.xlu0 %4368  ;;  %v7309_v48 = vpack.c.bf16 %v4357_v44, %v4355_v11  ;;  %v7311_v59 = vpack.c.bf16 %v4356_v24, %v4354_v2  ;;  %v4550_v42 = vrot.slane %v4545_v29, %v7681_v4  ;;  %v4554_v1 = vrot.slane %v4545_v29, %v7674_v3  ;;  %v6969_v2 = vld [vmem:[%s10341_s1 + $0x1] ss:$8 sm:$0x3] }
 0xd51   : > { %v4371_v5 = vsel %vm760_vm8, %v4367_v58, %v4369_v17  ;;  %v4379_v52 = vsel %vm760_vm8, %v4369_v17, %v4367_v58  ;;  %v4588_v15 = vrot.slane %v6969_v2, %v7681_v4  ;;  %v4592_v58 = vrot.slane %v6969_v2, %v7674_v3  ;;  %v6970_v17 = vld [vmem:[%s10341_s1 + $0x2] ss:$8 sm:$0x3] }
 0xd52   : > { %v4394_v28 = vmul.f32 %v4385_v9, %v4371_v5  ;;  %v4395_v35 = vmul.f32 %v4389_v23, %v4379_v52  ;;  %7310 = vmatprep.subr.bf16.mxu0 %v7309_v48 }
 0xd53   : > { %7312 = vmatpush1.bf16.msra.mxu0 %v7311_v59 }
 0xd54   : > { %v7313_v14 = vpack.c.bf16 %v4395_v35, %v4393_v45  ;;  %v7315_v22 = vpack.c.bf16 %v4394_v28, %v4392_v32  ;;  %v4626_v35 = vrot.slane %v6970_v17, %v7681_v4 }
 0xd56   : > { %7314 = vmatprep.subr.bf16.mxu0 %v7313_v14  ;;  %v4630_v14 = vrot.slane %v6970_v17, %v7674_v3 }
 0xd57   : > { %7316 = vmatpush1.bf16.msra.mxu0 %v7315_v22 }
 0xd5a   : > { %4501 = vmatmul.mubr.f32.vlgmr.msra.gmra.mrb[16].mxu0 %v8992_v51 }
 0xd5b   : > { %6967 = vmatprep.mubr.msk.f32.mxu0 %vm479_vm1, %v8998_v46 }
 0xd5e   : > { %4507 = vmatmul.mubr.f32.gmra.mrb[18].mxu0 %v9005_v62 }
 0xd5f   : > { %6987 = vmatprep.mubr.msk.f32.mxu0 %vm479_vm1, %v9376_v41 }
 0xe2d   : > { %v4502_v12 = vpop.f32.mrb[16].mxu0 }
 0xe2e   : > { %v4503_v26 = vadd.f32 %v4502_v12, %v8246_v54  ;;  %v4504_v56 = vpop.f32.mrb[17].mxu0 }
 0xe2f   : > { %v4505_v51 = vadd.f32 %v4504_v56, %v8246_v54 }
 0xe30   : > { %v4515_v19 = vmul.f32 %v4514_v18, %v4503_v26  ;;  %v6971_v26 = vld [vmem:[%s10341_s1 + $0x3] ss:$8 sm:$0x3] }
 0xe31   : > { %v4516_v46 = vmul.f32 %v4514_v18, %v4505_v51  ;;  %v4508_v50 = vpop.f32.mrb[18].mxu0 }
 0xe32   : > { %v9383_v62 = vadd.f32 %v4515_v19, %v9013_v61  ;;  %v4510_v37 = vpop.f32.mrb[19].mxu0  ;;  %v4509_v36 = vadd.f32 %v4508_v50, %v8260_v43 }
 0xe33   : > { %v9386_v38 = vadd.f32 %v4516_v46, %v9016_v30  ;;  %v4511_v55 = vadd.f32 %v4510_v37, %v8260_v43 }
 0xe34   : > { %4533 = vrot.lane.b32.xlu1 %v9383_v62, %s7575_s12  ;;  %v4517_v61 = vmul.f32 %v4514_v18, %v4509_v36 }
 0xe35   : > { %4701 = vrot.lane.b32.xlu0 %v9386_v38, %s7578_s15 }
 0xe36   : > { %v9402_v30 = vadd.f32 %v4517_v61, %v9032_v53  ;;  %v4518_v53 = vmul.f32 %v4514_v18, %v4511_v55 }
 0xe38   : > { %4571 = vrot.lane.b32.xlu1 %v9383_v62, %s7574_s30  ;;  %v9422_v34 = vadd.f32 %v4518_v53, %v9052_v21  ;;  %v4664_v53 = vrot.slane %v6971_v26, %v7681_v4 }
 0xe39   : > { %4739 = vrot.lane.b32.xlu0 %v9386_v38, %s7579_s18 }
 0xe3c   : > { %4609 = vrot.lane.b32.xlu1 %v9383_v62, %s7576_s13 }
 0xe3d   : > { %4777 = vrot.lane.b32.xlu0 %v9386_v38, %s7580_s21 }
 0xe40   : > { %4647 = vrot.lane.b32.xlu1 %v9383_v62, %s7577_s14 }
 0xe41   : > { %4535 = vrot.lane.b32.xlu0 %v9402_v30, %s7575_s12 }
 0xe44   : > { %4699 = vrot.lane.b32.xlu1 %v9383_v62, %s7578_s15 }
 0xe45   : > { %4573 = vrot.lane.b32.xlu0 %v9402_v30, %s7574_s30 }
 0xe48   : > { %4737 = vrot.lane.b32.xlu1 %v9383_v62, %s7579_s18 }
 0xe49   : > { %4611 = vrot.lane.b32.xlu0 %v9402_v30, %s7576_s13 }
 0xe4c   : > { %4775 = vrot.lane.b32.xlu1 %v9383_v62, %s7580_s21 }
 0xe4d   : > { %4649 = vrot.lane.b32.xlu0 %v9402_v30, %s7577_s14 }
 0xe50   : > { %4525 = vrot.lane.b32.xlu1 %v9386_v38, %s7575_s12 }
 0xe51   : > { %4527 = vrot.lane.b32.xlu0 %v9422_v34, %s7575_s12 }
 0xe54   : > { %4565 = vrot.lane.b32.xlu1 %v9386_v38, %s7574_s30 }
 0xe55   : > { %4567 = vrot.lane.b32.xlu0 %v9422_v34, %s7574_s30 }
 0xe58   : > { %4603 = vrot.lane.b32.xlu1 %v9386_v38, %s7576_s13 }
 0xe59   : > { %4605 = vrot.lane.b32.xlu0 %v9422_v34, %s7576_s13 }
 0xe5c   : > { %4641 = vrot.lane.b32.xlu1 %v9386_v38, %s7577_s14 }
 0xe5d   : > { %4643 = vrot.lane.b32.xlu0 %v9422_v34, %s7577_s14 }
 0xe60   : > { %4813 = vrot.lane.b32.xlu1 %v9383_v62, %s7581_s22 }
 0xe61   : > { %4815 = vrot.lane.b32.xlu0 %v9386_v38, %s7581_s22 }
 0xe64   : > { %4703 = vrot.lane.b32.xlu1 %v9402_v30, %s7578_s15 }
 0xe65   : > { %4705 = vrot.lane.b32.xlu0 %v9422_v34, %s7578_s15 }
 0xe68   : > { %4741 = vrot.lane.b32.xlu1 %v9402_v30, %s7579_s18 }
 0xe69   : > { %4743 = vrot.lane.b32.xlu0 %v9422_v34, %s7579_s18 }
 0xe6c   : > { %4779 = vrot.lane.b32.xlu1 %v9402_v30, %s7580_s21 }
 0xe6d   : > { %4781 = vrot.lane.b32.xlu0 %v9422_v34, %s7580_s21 }
 0xe70   : > { %4817 = vrot.lane.b32.xlu1 %v9402_v30, %s7581_s22 }
 0xe71   : > { %4819 = vrot.lane.b32.xlu0 %v9422_v34, %s7581_s22 }
 0xea6   : > { %v4534_v21 = vpop.permute.xlu1 %4533 }
 0xea7   : > { %v9460_v57 = vpop.permute.xlu0 %4701 }
 0xeaa   : > { %v4572_v49 = vpop.permute.xlu1 %4571 }
 0xeab   : > { %v9462_v47 = vpop.permute.xlu0 %4739 }
 0xeae   : > { %v4610_v63 = vpop.permute.xlu1 %4609 }
 0xeaf   : > { %v9464_v40 = vpop.permute.xlu0 %4777 }
 0xeb2   : > { %v9466_v33 = vpop.permute.xlu1 %4647 }
 0xeb3   : > { %v4536_v39 = vpop.permute.xlu0 %4535 }
 0xeb6   : > { %v9468_v8 = vpop.permute.xlu1 %4699 }
 0xeb7   : > { %v4574_v0 = vpop.permute.xlu0 %4573 }
 0xeba   : > { %v9470_v16 = vpop.permute.xlu1 %4737 }
 0xebb   : > { %v4612_v60 = vpop.permute.xlu0 %4611 }
 0xebe   : > { %v9475_v9 = vpop.permute.xlu1 %4775 }
 0xebf   : > { %v4650_v23 = vpop.permute.xlu0 %4649 }
 0xec2   : > { %v4526_v11 = vpop.permute.xlu1 %4525 }
 0xec3   : > { %v4537_v24 = vsel %vm431_vm2, %v4534_v21, %v4526_v11  ;;  %v4543_v44 = vsel %vm431_vm2, %v4526_v11, %v4534_v21  ;;  %v4528_v25 = vpop.permute.xlu0 %4527  ;;  %v4668_v21 = vrot.slane %v6971_v26, %v7674_v3 }
 0xec4   : > { %v4557_v48 = vmul.f32 %v4550_v42, %v4543_v44  ;;  %v4558_v59 = vmul.f32 %v4554_v1, %v4537_v24  ;;  %v4538_v5 = vsel %vm431_vm2, %v4536_v39, %v4528_v25  ;;  %v4544_v52 = vsel %vm431_vm2, %v4528_v25, %v4536_v39 }
 0xec5   : > { %v4559_v32 = vmul.f32 %v4550_v42, %v4544_v52  ;;  %v4560_v45 = vmul.f32 %v4554_v1, %v4538_v5 }
 0xec6   : > { %v4566_v28 = vpop.permute.xlu1 %4565 }
 0xec7   : > { %v4575_v22 = vsel %vm479_vm1, %v4572_v49, %v4566_v28  ;;  %v4581_v12 = vsel %vm479_vm1, %v4566_v28, %v4572_v49  ;;  %v4568_v18 = vpop.permute.xlu0 %4567  ;;  %v7317_v56 = vpack.c.bf16 %v4560_v45, %v4558_v59  ;;  %v7319_v51 = vpack.c.bf16 %v4559_v32, %v4557_v48 }
 0xec8   : > { %v4595_v19 = vmul.f32 %v4588_v15, %v4581_v12  ;;  %v4596_v46 = vmul.f32 %v4592_v58, %v4575_v22  ;;  %v4576_v50 = vsel %vm479_vm1, %v4574_v0, %v4568_v18  ;;  %v4582_v37 = vsel %vm479_vm1, %v4568_v18, %v4574_v0  ;;  %v6972_v0 = vld [vmem:[%s10341_s1 + $0x4] ss:$8 sm:$0x3]  ;;  %v6973_v12 = vld [vmem:[%s10341_s1 + $0x5] ss:$8 sm:$0x3] }
 0xec9   : > { %v4597_v36 = vmul.f32 %v4588_v15, %v4582_v37  ;;  %v4598_v61 = vmul.f32 %v4592_v58, %v4576_v50  ;;  %7318 = vmatprep.subr.bf16.mxu1 %v7317_v56  ;;  %v4722_v50 = vrot.slane %v6973_v12, %v7681_v4  ;;  %v4726_v37 = vrot.slane %v6973_v12, %v7674_v3 }
 0xeca   : > { %v4604_v55 = vpop.permute.xlu1 %4603  ;;  %7320 = vmatpush1.bf16.msra.mxu1 %v7319_v51 }
 0xecb   : > { %v4613_v49 = vsel %vm525_vm3, %v4610_v63, %v4604_v55  ;;  %v4619_v39 = vsel %vm525_vm3, %v4604_v55, %v4610_v63  ;;  %v4606_v29 = vpop.permute.xlu0 %4605  ;;  %v7321_v42 = vpack.c.bf16 %v4598_v61, %v4596_v46  ;;  %v7323_v1 = vpack.c.bf16 %v4597_v36, %v4595_v19 }
 0xecc   : > { %v4633_v2 = vmul.f32 %v4626_v35, %v4619_v39  ;;  %v4634_v11 = vmul.f32 %v4630_v14, %v4613_v49  ;;  %v4614_v24 = vsel %vm525_vm3, %v4612_v60, %v4606_v29  ;;  %v4620_v44 = vsel %vm525_vm3, %v4606_v29, %v4612_v60 }
 0xecd   : > { %v4635_v25 = vmul.f32 %v4626_v35, %v4620_v44  ;;  %v4636_v15 = vmul.f32 %v4630_v14, %v4614_v24  ;;  %7322 = vmatprep.subr.bf16.mxu1 %v7321_v42  ;;  %v4688_v63 = vrot.slane %v6972_v0, %v7674_v3  ;;  %v4707_v61 = vsel %vm622_vm5, %v9468_v8, %v9460_v57 }
 0xece   : > { %v4642_v58 = vpop.permute.xlu1 %4641  ;;  %7324 = vmatpush1.bf16.msra.mxu1 %v7323_v1  ;;  %v4715_v55 = vsel %vm622_vm5, %v9460_v57, %v9468_v8  ;;  %v6975_v57 = vld [vmem:[%s10341_s1 + $0x7] ss:$8 sm:$0x3]  ;;  %v4745_v44 = vsel %vm668_vm6, %v9470_v16, %v9462_v47 }
 0xecf   : > { %v4651_v17 = vsel %vm571_vm4, %v9466_v33, %v4642_v58  ;;  %v4657_v48 = vsel %vm571_vm4, %v4642_v58, %v9466_v33  ;;  %v4644_v59 = vpop.permute.xlu0 %4643  ;;  %v7325_v5 = vpack.c.bf16 %v4636_v15, %v4634_v11  ;;  %v7327_v52 = vpack.c.bf16 %v4635_v25, %v4633_v2 }
 0xed0   : > { %v4671_v32 = vmul.f32 %v4664_v53, %v4657_v48  ;;  %v4672_v45 = vmul.f32 %v4668_v21, %v4651_v17  ;;  %v4652_v60 = vsel %vm571_vm4, %v4650_v23, %v4644_v59  ;;  %v4658_v28 = vsel %vm571_vm4, %v4644_v59, %v4650_v23  ;;  %v6974_v23 = vld [vmem:[%s10341_s1 + $0x6] ss:$8 sm:$0x3] }
 0xed1   : > { %v4673_v35 = vmul.f32 %v4664_v53, %v4658_v28  ;;  %v4674_v14 = vmul.f32 %v4668_v21, %v4652_v60  ;;  %7326 = vmatprep.subr.bf16.mxu1 %v7325_v5  ;;  %v4694_v22 = vmul.f32 %v4688_v63, %v9422_v34  ;;  %v4684_v33 = vrot.slane %v6972_v0, %v7681_v4  ;;  %v6976_v60 = vld [vmem:[%s10341_s1 + $0x10] ss:$8 sm:$0x3] }
 0xed2   : > { %v9520_v18 = vpop.permute.xlu1 %4813  ;;  %7328 = vmatpush1.bf16.msra.mxu1 %v7327_v52  ;;  %v4692_v19 = vmul.f32 %v4688_v63, %v9386_v38  ;;  %v4760_v49 = vrot.slane %v6974_v23, %v7681_v4  ;;  %v4764_v29 = vrot.slane %v6974_v23, %v7674_v3  ;;  %v4729_v2 = vmul.f32 %v4722_v50, %v4707_v61 }
 0xed3   : > { %v4816_v26 = vpop.permute.xlu0 %4815  ;;  %v7329_v56 = vpack.c.bf16 %v4674_v14, %v4672_v45  ;;  %v7331_v51 = vpack.c.bf16 %v4673_v35, %v4671_v32  ;;  %v4693_v46 = vmul.f32 %v4684_v33, %v9402_v30  ;;  %v4691_v21 = vmul.f32 %v4684_v33, %v9383_v62 }
 0xed4   : > { %v7333_v36 = vpack.c.bf16 %v4694_v22, %v4692_v19  ;;  %v4730_v11 = vmul.f32 %v4726_v37, %v4715_v55  ;;  %v4753_v25 = vsel %vm668_vm6, %v9462_v47, %v9470_v16  ;;  %v4798_v48 = vrot.slane %v6975_v57, %v7681_v4 }
 0xed5   : > { %7330 = vmatprep.subr.bf16.mxu1 %v7329_v56  ;;  %v7335_v0 = vpack.c.bf16 %v4693_v46, %v4691_v21  ;;  %v4802_v59 = vrot.slane %v6975_v57, %v7674_v3  ;;  %v4767_v32 = vmul.f32 %v4760_v49, %v4745_v44  ;;  %v4768_v45 = vmul.f32 %v4764_v29, %v4753_v25  ;;  %v9589_v57 = vld [vmem:[%s10344_s4 + $0x10] sm:$0xff]  ;;  %v6982_v25 = vld [vmem:[%s10341_s1 + $0x4] ss:$8 sm:$0x3] }
 0xed6   : > { %v4704_v53 = vpop.permute.xlu1 %4703  ;;  %7332 = vmatpush1.bf16.msra.mxu1 %v7331_v51  ;;  %v4783_v28 = vsel %vm714_vm7, %v9475_v9, %v9464_v40  ;;  %v4791_v35 = vsel %vm714_vm7, %v9464_v40, %v9475_v9  ;;  %v4836_v56 = vrot.slane %v6976_v60, %v7681_v4  ;;  %v4840_v51 = vrot.slane %v6976_v60, %v7674_v3 }
 0xed7   : > { %v4706_v39 = vpop.permute.xlu0 %4705  ;;  %7334 = vmatprep.subr.bf16.mxu1 %v7333_v36  ;;  %v4805_v46 = vmul.f32 %v4798_v48, %v4783_v28  ;;  %v4821_v40 = vsel %vm760_vm8, %v9520_v18, %v4816_v26  ;;  %v4829_v9 = vsel %vm760_vm8, %v4816_v26, %v9520_v18  ;;  %v9576_v18 = vld [vmem:[%s10344_s4] sm:$0xff]  ;;  %v9582_v26 = vld [vmem:[%s10344_s4 + $0x18] sm:$0xff] }
 0xed8   : > { %v4708_v42 = vsel %vm622_vm5, %v4704_v53, %v4706_v39  ;;  %v4716_v1 = vsel %vm622_vm5, %v4706_v39, %v4704_v53 }
 0xed9   : > { %v4731_v8 = vmul.f32 %v4722_v50, %v4708_v42  ;;  %v4732_v24 = vmul.f32 %v4726_v37, %v4716_v1  ;;  %v4806_v50 = vmul.f32 %v4802_v59, %v4791_v35  ;;  %v4844_v42 = vmul.f32 %v4840_v51, %v4829_v9  ;;  %v4990_v9 = vld [vmem:[%s10341_s1] ss:$8 sm:$0x3] }
 0xeda   : > { %v4742_v15 = vpop.permute.xlu1 %4741  ;;  %7336 = vmatpush1.bf16.msra.mxu1 %v7335_v0 }
 0xedb   : > { %v4744_v58 = vpop.permute.xlu0 %4743  ;;  %v7337_v63 = vpack.c.bf16 %v4732_v24, %v4730_v11  ;;  %v7339_v17 = vpack.c.bf16 %v4731_v8, %v4729_v2 }
 0xedc   : > { %v4746_v5 = vsel %vm668_vm6, %v4742_v15, %v4744_v58  ;;  %v4754_v52 = vsel %vm668_vm6, %v4744_v58, %v4742_v15 }
 0xedd   : > { %v4769_v47 = vmul.f32 %v4760_v49, %v4746_v5  ;;  %v4770_v16 = vmul.f32 %v4764_v29, %v4754_v52  ;;  %7338 = vmatprep.subr.bf16.mxu1 %v7337_v63  ;;  %v4843_v29 = vmul.f32 %v4836_v56, %v4821_v40  ;;  %v5133_v52 = vrot.slane %v6982_v25, %v7674_v3 }
 0xede   : > { %v4780_v14 = vpop.permute.xlu1 %4779  ;;  %7340 = vmatpush1.bf16.msra.mxu1 %v7339_v17 }
 0xedf   : > { %v4782_v22 = vpop.permute.xlu0 %4781  ;;  %v7341_v12 = vpack.c.bf16 %v4770_v16, %v4768_v45  ;;  %v7343_v33 = vpack.c.bf16 %v4769_v47, %v4767_v32 }
 0xee0   : > { %v4784_v19 = vsel %vm714_vm7, %v4780_v14, %v4782_v22  ;;  %v4792_v23 = vsel %vm714_vm7, %v4782_v22, %v4780_v14 }
 0xee1   : > { %v4807_v37 = vmul.f32 %v4798_v48, %v4784_v19  ;;  %v4808_v36 = vmul.f32 %v4802_v59, %v4792_v23  ;;  %7342 = vmatprep.subr.bf16.mxu1 %v7341_v12  ;;  %v5129_v48 = vrot.slane %v6982_v25, %v7681_v4 }
 0xee2   : > { %v4818_v61 = vpop.permute.xlu1 %4817  ;;  %7344 = vmatpush1.bf16.msra.mxu1 %v7343_v33 }
 0xee3   : > { %v4820_v55 = vpop.permute.xlu0 %4819  ;;  %v7345_v53 = vpack.c.bf16 %v4808_v36, %v4806_v50  ;;  %v7347_v21 = vpack.c.bf16 %v4807_v37, %v4805_v46 }
 0xee4   : > { %v4822_v49 = vsel %vm760_vm8, %v4818_v61, %v4820_v55  ;;  %v4830_v39 = vsel %vm760_vm8, %v4820_v55, %v4818_v61 }
 0xee5   : > { %v4845_v1 = vmul.f32 %v4836_v56, %v4822_v49  ;;  %v4846_v0 = vmul.f32 %v4840_v51, %v4830_v39  ;;  %7346 = vmatprep.subr.bf16.mxu1 %v7345_v53  ;;  %v4995_v53 = vrot.slane %v4990_v9, %v7681_v4  ;;  %v6979_v49 = vld [vmem:[%s10341_s1 + $0x1] ss:$8 sm:$0x3] }
 0xee6   : > { %7348 = vmatpush1.bf16.msra.mxu1 %v7347_v21  ;;  %v4999_v21 = vrot.slane %v4990_v9, %v7674_v3 }
 0xee7   : > { %v7349_v2 = vpack.c.bf16 %v4846_v0, %v4844_v42  ;;  %v7351_v11 = vpack.c.bf16 %v4845_v1, %v4843_v29  ;;  %v5033_v0 = vrot.slane %v6979_v49, %v7681_v4 }
 0xee9   : > { %7350 = vmatprep.subr.bf16.mxu1 %v7349_v2  ;;  %v5037_v2 = vrot.slane %v6979_v49, %v7674_v3 }
 0xeea   : > { %7352 = vmatpush1.bf16.msra.mxu1 %v7351_v11  ;;  %v6980_v11 = vld [vmem:[%s10341_s1 + $0x2] ss:$8 sm:$0x3] }
 0xeed   : > { %4952 = vmatmul.mubr.f32.vlgmr.msra.gmra.mrb[16].mxu1 %v9576_v18 }
 0xeee   : > { %6978 = vmatprep.mubr.msk.f32.mxu1 %vm479_vm1, %v9582_v26 }
 0xef1   : > { %4958 = vmatmul.mubr.f32.gmra.mrb[18].mxu1 %v9589_v57 }
 0xef2   : > { %6998 = vmatprep.mubr.msk.f32.mxu1 %vm479_vm1, %v9210_v31 }
 0xfc0   : > { %v4953_v8 = vpop.f32.mrb[16].mxu1 }
 0xfc1   : > { %v4954_v24 = vadd.f32 %v4953_v8, %v8053_v13  ;;  %v4955_v44 = vpop.f32.mrb[17].mxu1 }
 0xfc2   : > { %v4956_v15 = vadd.f32 %v4955_v44, %v8053_v13 }
 0xfc3   : > { %v4964_v58 = vmax.f32 %v4954_v24, 0.0 }
 0xfc4   : > { %v4965_v63 = vmax.f32 %v4956_v15, 0.0  ;;  %v4959_v17 = vpop.f32.mrb[18].mxu1 }
 0xfc5   : > { %v4960_v59 = vadd.f32 %v4959_v17, %v8060_v20  ;;  %v4961_v5 = vpop.f32.mrb[19].mxu1  ;;  %4978 = vrot.lane.b32.xlu1 %v4964_v58, %s7575_s12  ;;  %v9605_v60 = vmul.f32 %v5129_v48, %v4964_v58  ;;  %v5071_v17 = vrot.slane %v6980_v11, %v7681_v4 }
 0xfc6   : > { %v4962_v31 = vadd.f32 %v4961_v5, %v8060_v20  ;;  %5146 = vrot.lane.b32.xlu0 %v4965_v63, %s7578_s15  ;;  %v9611_v16 = vmul.f32 %v5133_v52, %v4965_v63 }
 0xfc7   : > { %v4966_v32 = vmax.f32 %v4960_v59, 0.0 }
 0xfc8   : > { %v4967_v45 = vmax.f32 %v4962_v31, 0.0 }
 0xfc9   : > { %v9607_v47 = vmul.f32 %v5129_v48, %v4966_v32  ;;  %5016 = vrot.lane.b32.xlu1 %v4964_v58, %s7574_s30  ;;  %v5075_v48 = vrot.slane %v6980_v11, %v7674_v3 }
 0xfca   : > { %5184 = vrot.lane.b32.xlu0 %v4965_v63, %s7579_s18  ;;  %v9613_v28 = vmul.f32 %v5133_v52, %v4967_v45  ;;  %v6981_v52 = vld [vmem:[%s10341_s1 + $0x3] ss:$8 sm:$0x3] }
 0xfcb   : > { %v7371_v35 = vpack.c.bf16 %v9607_v47, %v9605_v60 }
 0xfcc   : > { %v7369_v14 = vpack.c.bf16 %v9613_v28, %v9611_v16 }
 0xfcd   : > { %5054 = vrot.lane.b32.xlu1 %v4964_v58, %s7576_s13 }
 0xfce   : > { %5222 = vrot.lane.b32.xlu0 %v4965_v63, %s7580_s21 }
 0xfd1   : > { %5092 = vrot.lane.b32.xlu1 %v4964_v58, %s7577_s14 }
 0xfd2   : > { %4980 = vrot.lane.b32.xlu0 %v4966_v32, %s7575_s12 }
 0xfd5   : > { %5144 = vrot.lane.b32.xlu1 %v4964_v58, %s7578_s15 }
 0xfd6   : > { %5018 = vrot.lane.b32.xlu0 %v4966_v32, %s7574_s30 }
 0xfd9   : > { %5182 = vrot.lane.b32.xlu1 %v4964_v58, %s7579_s18 }
 0xfda   : > { %5056 = vrot.lane.b32.xlu0 %v4966_v32, %s7576_s13 }
 0xfdd   : > { %5220 = vrot.lane.b32.xlu1 %v4964_v58, %s7580_s21 }
 0xfde   : > { %5094 = vrot.lane.b32.xlu0 %v4966_v32, %s7577_s14 }
 0xfe1   : > { %4970 = vrot.lane.b32.xlu1 %v4965_v63, %s7575_s12 }
 0xfe2   : > { %4972 = vrot.lane.b32.xlu0 %v4967_v45, %s7575_s12 }
 0xfe5   : > { %5010 = vrot.lane.b32.xlu1 %v4965_v63, %s7574_s30 }
 0xfe6   : > { %5012 = vrot.lane.b32.xlu0 %v4967_v45, %s7574_s30 }
 0xfe9   : > { %5048 = vrot.lane.b32.xlu1 %v4965_v63, %s7576_s13 }
 0xfea   : > { %5050 = vrot.lane.b32.xlu0 %v4967_v45, %s7576_s13 }
 0xfed   : > { %5086 = vrot.lane.b32.xlu1 %v4965_v63, %s7577_s14 }
 0xfee   : > { %5088 = vrot.lane.b32.xlu0 %v4967_v45, %s7577_s14 }
 0xff1   : > { %5258 = vrot.lane.b32.xlu1 %v4964_v58, %s7581_s22 }
 0xff2   : > { %5260 = vrot.lane.b32.xlu0 %v4965_v63, %s7581_s22 }
 0xff5   : > { %5148 = vrot.lane.b32.xlu1 %v4966_v32, %s7578_s15 }
 0xff6   : > { %5150 = vrot.lane.b32.xlu0 %v4967_v45, %s7578_s15 }
 0xff9   : > { %5186 = vrot.lane.b32.xlu1 %v4966_v32, %s7579_s18 }
 0xffa   : > { %5188 = vrot.lane.b32.xlu0 %v4967_v45, %s7579_s18 }
 0xffd   : > { %5224 = vrot.lane.b32.xlu1 %v4966_v32, %s7580_s21 }
 0xffe   : > { %5226 = vrot.lane.b32.xlu0 %v4967_v45, %s7580_s21 }
0x1001   : > { %5262 = vrot.lane.b32.xlu1 %v4966_v32, %s7581_s22 }
0x1002   : > { %5264 = vrot.lane.b32.xlu0 %v4967_v45, %s7581_s22 }
0x1037   : > { %v4979_v22 = vpop.permute.xlu1 %4978 }
0x1038   : > { %v9647_v12 = vpop.permute.xlu0 %5146 }
0x103b   : > { %v5017_v33 = vpop.permute.xlu1 %5016 }
0x103c   : > { %v9649_v56 = vpop.permute.xlu0 %5184 }
0x103f   : > { %v5055_v51 = vpop.permute.xlu1 %5054 }
0x1040   : > { %v9651_v19 = vpop.permute.xlu0 %5222 }
0x1043   : > { %v5093_v23 = vpop.permute.xlu1 %5092 }
0x1044   : > { %v4981_v46 = vpop.permute.xlu0 %4980 }
0x1047   : > { %v9653_v50 = vpop.permute.xlu1 %5144 }
0x1048   : > { %v5019_v37 = vpop.permute.xlu0 %5018 }
0x104b   : > { %v9655_v36 = vpop.permute.xlu1 %5182 }
0x104c   : > { %v5057_v40 = vpop.permute.xlu0 %5056  ;;  %v5190_v16 = vsel %vm668_vm6, %v9655_v36, %v9649_v56  ;;  %v5198_v28 = vsel %vm668_vm6, %v9649_v56, %v9655_v36  ;;  %v6986_v56 = vld [vmem:[%s10341_s1 + $0x10] ss:$8 sm:$0x3] }
0x104f   : > { %v9660_v61 = vpop.permute.xlu1 %5220 }
0x1050   : > { %v5095_v55 = vpop.permute.xlu0 %5094  ;;  %v5228_v47 = vsel %vm714_vm7, %v9660_v61, %v9651_v19 }
0x1053   : > { %v4971_v39 = vpop.permute.xlu1 %4970 }
0x1054   : > { %v4982_v29 = vsel %vm431_vm2, %v4979_v22, %v4971_v39  ;;  %v4988_v42 = vsel %vm431_vm2, %v4971_v39, %v4979_v22  ;;  %v4973_v1 = vpop.permute.xlu0 %4972 }
0x1055   : > { %v5002_v8 = vmul.f32 %v4995_v53, %v4988_v42  ;;  %v5003_v24 = vmul.f32 %v4999_v21, %v4982_v29  ;;  %v4983_v44 = vsel %vm431_vm2, %v4981_v46, %v4973_v1  ;;  %v4989_v25 = vsel %vm431_vm2, %v4973_v1, %v4981_v46 }
0x1056   : > { %v5004_v15 = vmul.f32 %v4995_v53, %v4989_v25  ;;  %v5005_v58 = vmul.f32 %v4999_v21, %v4983_v44  ;;  %v5109_v29 = vrot.slane %v6981_v52, %v7681_v4 }
0x1057   : > { %v5011_v63 = vpop.permute.xlu1 %5010 }
0x1058   : > { %v5020_v59 = vsel %vm479_vm1, %v5017_v33, %v5011_v63  ;;  %v5026_v5 = vsel %vm479_vm1, %v5011_v63, %v5017_v33  ;;  %v5013_v31 = vpop.permute.xlu0 %5012  ;;  %v7353_v32 = vpack.c.bf16 %v5005_v58, %v5003_v24  ;;  %v7355_v45 = vpack.c.bf16 %v5004_v15, %v5002_v8 }
0x1059   : > { %v5040_v22 = vmul.f32 %v5033_v0, %v5026_v5  ;;  %v5041_v46 = vmul.f32 %v5037_v2, %v5020_v59  ;;  %v5021_v9 = vsel %vm479_vm1, %v5019_v37, %v5013_v31  ;;  %v5027_v53 = vsel %vm479_vm1, %v5013_v31, %v5019_v37 }
0x105a   : > { %v5042_v21 = vmul.f32 %v5033_v0, %v5027_v53  ;;  %v5043_v49 = vmul.f32 %v5037_v2, %v5021_v9  ;;  %7354 = vmatprep.subr.bf16.mxu0 %v7353_v32  ;;  %v5113_v33 = vrot.slane %v6981_v52, %v7674_v3 }
0x105b   : > { %v5049_v39 = vpop.permute.xlu1 %5048  ;;  %7356 = vmatpush1.bf16.msra.mxu0 %v7355_v45 }
0x105c   : > { %v5058_v42 = vsel %vm525_vm3, %v5055_v51, %v5049_v39  ;;  %v5064_v1 = vsel %vm525_vm3, %v5049_v39, %v5055_v51  ;;  %v5051_v11 = vpop.permute.xlu0 %5050  ;;  %v7357_v8 = vpack.c.bf16 %v5043_v49, %v5041_v46  ;;  %v7359_v24 = vpack.c.bf16 %v5042_v21, %v5040_v22 }
0x105d   : > { %v5078_v44 = vmul.f32 %v5071_v17, %v5064_v1  ;;  %v5079_v25 = vmul.f32 %v5075_v48, %v5058_v42  ;;  %v5059_v37 = vsel %vm525_vm3, %v5057_v40, %v5051_v11  ;;  %v5065_v0 = vsel %vm525_vm3, %v5051_v11, %v5057_v40 }
0x105e   : > { %v5080_v2 = vmul.f32 %v5071_v17, %v5065_v0  ;;  %v5081_v15 = vmul.f32 %v5075_v48, %v5059_v37  ;;  %7358 = vmatprep.subr.bf16.mxu0 %v7357_v8  ;;  %v6983_v17 = vld [vmem:[%s10341_s1 + $0x5] ss:$8 sm:$0x3]  ;;  %v5152_v39 = vsel %vm622_vm5, %v9653_v50, %v9647_v12 }
0x105f   : > { %v5087_v58 = vpop.permute.xlu1 %5086  ;;  %7360 = vmatpush1.bf16.msra.mxu0 %v7359_v24  ;;  %v5167_v21 = vrot.slane %v6983_v17, %v7681_v4  ;;  %v5171_v49 = vrot.slane %v6983_v17, %v7674_v3 }
0x1060   : > { %v5096_v63 = vsel %vm571_vm4, %v5093_v23, %v5087_v58  ;;  %v5102_v59 = vsel %vm571_vm4, %v5087_v58, %v5093_v23  ;;  %v5089_v5 = vpop.permute.xlu0 %5088  ;;  %v7361_v51 = vpack.c.bf16 %v5081_v15, %v5079_v25  ;;  %v7363_v31 = vpack.c.bf16 %v5080_v2, %v5078_v44 }
0x1061   : > { %v5116_v52 = vmul.f32 %v5109_v29, %v5102_v59  ;;  %v5117_v32 = vmul.f32 %v5113_v33, %v5096_v63  ;;  %v5097_v45 = vsel %vm571_vm4, %v5095_v55, %v5089_v5  ;;  %v5103_v22 = vsel %vm571_vm4, %v5089_v5, %v5095_v55  ;;  %v6984_v55 = vld [vmem:[%s10341_s1 + $0x6] ss:$8 sm:$0x3] }
0x1062   : > { %v5118_v46 = vmul.f32 %v5109_v29, %v5103_v22  ;;  %v5119_v40 = vmul.f32 %v5113_v33, %v5097_v45  ;;  %7362 = vmatprep.subr.bf16.mxu0 %v7361_v51  ;;  %v5160_v29 = vsel %vm622_vm5, %v9647_v12, %v9653_v50  ;;  %v5205_v1 = vrot.slane %v6984_v55, %v7681_v4  ;;  %v6985_v12 = vld [vmem:[%s10341_s1 + $0x7] ss:$8 sm:$0x3] }
0x1063   : > { %v5259_v48 = vpop.permute.xlu1 %5258  ;;  %7364 = vmatpush1.bf16.msra.mxu0 %v7363_v31  ;;  %v5209_v11 = vrot.slane %v6984_v55, %v7674_v3  ;;  %v5174_v44 = vmul.f32 %v5167_v21, %v5152_v39  ;;  %v5175_v25 = vmul.f32 %v5171_v49, %v5160_v29  ;;  %v5243_v58 = vrot.slane %v6985_v12, %v7681_v4 }
0x1064   : > { %v5261_v9 = vpop.permute.xlu0 %5260  ;;  %v7365_v23 = vpack.c.bf16 %v5119_v40, %v5117_v32  ;;  %v7367_v53 = vpack.c.bf16 %v5118_v46, %v5116_v52  ;;  %v5247_v63 = vrot.slane %v6985_v12, %v7674_v3  ;;  %v5212_v51 = vmul.f32 %v5205_v1, %v5190_v16 }
0x1065   : > { %v5213_v31 = vmul.f32 %v5209_v11, %v5198_v28  ;;  %v5281_v46 = vrot.slane %v6986_v56, %v7681_v4  ;;  %v5285_v40 = vrot.slane %v6986_v56, %v7674_v3  ;;  %v5410_v28 = vstv %s6989_s25 }
0x1066   : > { %7366 = vmatprep.subr.bf16.mxu0 %v7365_v23 }
0x1067   : > { %v5149_v33 = vpop.permute.xlu1 %5148  ;;  %7368 = vmatpush1.bf16.msra.mxu0 %v7367_v53  ;;  %v5250_v53 = vmul.f32 %v5243_v58, %v5228_v47 }
0x1068   : > { %v5151_v42 = vpop.permute.xlu0 %5150  ;;  %7370 = vmatprep.subr.bf16.mxu0 %v7369_v14 }
0x1069   : > { %v5153_v8 = vsel %vm622_vm5, %v5149_v33, %v5151_v42  ;;  %v5161_v24 = vsel %vm622_vm5, %v5151_v42, %v5149_v33 }
0x106a   : > { %v5176_v50 = vmul.f32 %v5167_v21, %v5153_v8  ;;  %v5177_v37 = vmul.f32 %v5171_v49, %v5161_v24 }
0x106b   : > { %v5187_v14 = vpop.permute.xlu1 %5186  ;;  %7372 = vmatpush1.bf16.msra.mxu0 %v7371_v35  ;;  %v5236_v35 = vsel %vm714_vm7, %v9651_v19, %v9660_v61  ;;  %v5266_v19 = vsel %vm760_vm8, %v5259_v48, %v5261_v9  ;;  %v5274_v61 = vsel %vm760_vm8, %v5261_v9, %v5259_v48  ;;  %v9752_v48 = vld [vmem:[%s10346_s6] sm:$0xff]  ;;  %v9758_v9 = vld [vmem:[%s10346_s6 + $0x18] sm:$0xff] }
0x106c   : > { %v5189_v0 = vpop.permute.xlu0 %5188  ;;  %v7373_v2 = vpack.c.bf16 %v5177_v37, %v5175_v25  ;;  %v7375_v15 = vpack.c.bf16 %v5176_v50, %v5174_v44  ;;  %v5251_v21 = vmul.f32 %v5247_v63, %v5236_v35  ;;  %v5288_v8 = vmul.f32 %v5281_v46, %v5266_v19  ;;  %v9765_v37 = vld [vmem:[%s10346_s6 + $0x10] sm:$0xff]  ;;  %v6990_v19 = vld [vmem:[%s10341_s1 + $0x1] ss:$8 sm:$0x3] }
0x106d   : > { %v5191_v59 = vsel %vm668_vm6, %v5187_v14, %v5189_v0  ;;  %v5199_v5 = vsel %vm668_vm6, %v5189_v0, %v5187_v14  ;;  %v5289_v24 = vmul.f32 %v5285_v40, %v5274_v61 }
0x106e   : > { %v5214_v36 = vmul.f32 %v5205_v1, %v5191_v59  ;;  %v5215_v60 = vmul.f32 %v5209_v11, %v5199_v5  ;;  %7374 = vmatprep.subr.bf16.mxu0 %v7373_v2 }
0x106f   : > { %v5225_v52 = vpop.permute.xlu1 %5224  ;;  %7376 = vmatpush1.bf16.msra.mxu0 %v7375_v15 }
0x1070   : > { %v5227_v32 = vpop.permute.xlu0 %5226  ;;  %v7377_v45 = vpack.c.bf16 %v5215_v60, %v5213_v31  ;;  %v7379_v22 = vpack.c.bf16 %v5214_v36, %v5212_v51 }
0x1071   : > { %v5229_v17 = vsel %vm714_vm7, %v5225_v52, %v5227_v32  ;;  %v5237_v23 = vsel %vm714_vm7, %v5227_v32, %v5225_v52 }
0x1072   : > { %v5252_v49 = vmul.f32 %v5243_v58, %v5229_v17  ;;  %v5253_v55 = vmul.f32 %v5247_v63, %v5237_v23  ;;  %7378 = vmatprep.subr.bf16.mxu0 %v7377_v45  ;;  %v5441_v23 = vld [vmem:[%s10341_s1] ss:$8 sm:$0x3] }
0x1073   : > { %v5263_v39 = vpop.permute.xlu1 %5262  ;;  %7380 = vmatpush1.bf16.msra.mxu0 %v7379_v22 }
0x1074   : > { %v5265_v29 = vpop.permute.xlu0 %5264  ;;  %v7381_v33 = vpack.c.bf16 %v5253_v55, %v5251_v21  ;;  %v7383_v42 = vpack.c.bf16 %v5252_v49, %v5250_v53  ;;  %v5446_v49 = vrot.slane %v5441_v23, %v7681_v4  ;;  %v5450_v55 = vrot.slane %v5441_v23, %v7674_v3 }
0x1075   : > { %v5267_v1 = vsel %vm760_vm8, %v5263_v39, %v5265_v29  ;;  %v5275_v11 = vsel %vm760_vm8, %v5265_v29, %v5263_v39 }
0x1076   : > { %v5290_v44 = vmul.f32 %v5281_v46, %v5267_v1  ;;  %v5291_v25 = vmul.f32 %v5285_v40, %v5275_v11  ;;  %7382 = vmatprep.subr.bf16.mxu0 %v7381_v33  ;;  %v5488_v1 = vrot.slane %v6990_v19, %v7674_v3  ;;  %v6991_v11 = vld [vmem:[%s10341_s1 + $0x2] ss:$8 sm:$0x3] }
0x1077   : > { %7384 = vmatpush1.bf16.msra.mxu0 %v7383_v42  ;;  %v5484_v42 = vrot.slane %v6990_v19, %v7681_v4 }
0x1078   : > { %v7385_v12 = vpack.c.bf16 %v5291_v25, %v5289_v24  ;;  %v7387_v50 = vpack.c.bf16 %v5290_v44, %v5288_v8 }
0x107a   : > { %7386 = vmatprep.subr.bf16.mxu0 %v7385_v12 }
0x107b   : > { %7388 = vmatpush1.bf16.msra.mxu0 %v7387_v50 }
0x107e   : > { %5397 = vmatmul.mubr.f32.vlgmr.msra.gmra.mrb[20].mxu0 %v9752_v48 }
0x107f   : > { %6988 = vmatprep.mubr.msk.f32.mxu0 %vm479_vm1, %v9758_v9 }
0x1082   : > { %5403 = vmatmul.mubr.f32.gmra.mrb[22].mxu0 %v9765_v37 }
0x1083   : > { %7008 = vmatprep.mubr.msk.f32.mxu0 %vm479_vm1, %v9376_v41 }
0x1151   : > { %v5398_v16 = vpop.f32.mrb[20].mxu0 }
0x1152   : > { %v5399_v14 = vadd.f32 %v5398_v16, %v8246_v54  ;;  %v5400_v0 = vpop.f32.mrb[21].mxu0 }
0x1153   : > { %v5401_v2 = vadd.f32 %v5400_v0, %v8246_v54 }
0x1154   : > { %v5411_v15 = vmul.f32 %v5410_v28, %v5399_v14  ;;  %v5526_v14 = vrot.slane %v6991_v11, %v7674_v3 }
0x1155   : > { %v5412_v58 = vmul.f32 %v5410_v28, %v5401_v2  ;;  %v5404_v63 = vpop.f32.mrb[22].mxu0 }
0x1156   : > { %v9773_v59 = vadd.f32 %v5411_v15, %v9383_v62  ;;  %v5406_v5 = vpop.f32.mrb[23].mxu0  ;;  %v5405_v41 = vadd.f32 %v5404_v63, %v8260_v43 }
0x1157   : > { %v9776_v51 = vadd.f32 %v5412_v58, %v9386_v38  ;;  %v5407_v31 = vadd.f32 %v5406_v5, %v8260_v43  ;;  %v6992_v58 = vld [vmem:[%s10341_s1 + $0x3] ss:$8 sm:$0x3] }
0x1158   : > { %5429 = vrot.lane.b32.xlu1 %v9773_v59, %s7575_s12  ;;  %v5413_v62 = vmul.f32 %v5410_v28, %v5405_v41 }
0x1159   : > { %5597 = vrot.lane.b32.xlu0 %v9776_v51, %s7578_s15 }
0x115a   : > { %v9792_v38 = vadd.f32 %v5413_v62, %v9402_v30  ;;  %v5414_v30 = vmul.f32 %v5410_v28, %v5407_v31  ;;  %v5522_v28 = vrot.slane %v6991_v11, %v7681_v4 }
0x115c   : > { %5467 = vrot.lane.b32.xlu1 %v9773_v59, %s7574_s30  ;;  %v9812_v56 = vadd.f32 %v5414_v30, %v9422_v34 }
0x115d   : > { %5635 = vrot.lane.b32.xlu0 %v9776_v51, %s7579_s18 }
0x1160   : > { %5505 = vrot.lane.b32.xlu1 %v9773_v59, %s7576_s13 }
0x1161   : > { %5673 = vrot.lane.b32.xlu0 %v9776_v51, %s7580_s21 }
0x1164   : > { %5543 = vrot.lane.b32.xlu1 %v9773_v59, %s7577_s14 }
0x1165   : > { %5431 = vrot.lane.b32.xlu0 %v9792_v38, %s7575_s12 }
0x1168   : > { %5595 = vrot.lane.b32.xlu1 %v9773_v59, %s7578_s15 }
0x1169   : > { %5469 = vrot.lane.b32.xlu0 %v9792_v38, %s7574_s30 }
0x116c   : > { %5633 = vrot.lane.b32.xlu1 %v9773_v59, %s7579_s18 }
0x116d   : > { %5507 = vrot.lane.b32.xlu0 %v9792_v38, %s7576_s13 }
0x1170   : > { %5671 = vrot.lane.b32.xlu1 %v9773_v59, %s7580_s21 }
0x1171   : > { %5545 = vrot.lane.b32.xlu0 %v9792_v38, %s7577_s14 }
0x1174   : > { %5421 = vrot.lane.b32.xlu1 %v9776_v51, %s7575_s12 }
0x1175   : > { %5423 = vrot.lane.b32.xlu0 %v9812_v56, %s7575_s12 }
0x1178   : > { %5461 = vrot.lane.b32.xlu1 %v9776_v51, %s7574_s30 }
0x1179   : > { %5463 = vrot.lane.b32.xlu0 %v9812_v56, %s7574_s30 }
0x117c   : > { %5499 = vrot.lane.b32.xlu1 %v9776_v51, %s7576_s13 }
0x117d   : > { %5501 = vrot.lane.b32.xlu0 %v9812_v56, %s7576_s13 }
0x1180   : > { %5537 = vrot.lane.b32.xlu1 %v9776_v51, %s7577_s14 }
0x1181   : > { %5539 = vrot.lane.b32.xlu0 %v9812_v56, %s7577_s14 }
0x1184   : > { %5709 = vrot.lane.b32.xlu1 %v9773_v59, %s7581_s22 }
0x1185   : > { %5711 = vrot.lane.b32.xlu0 %v9776_v51, %s7581_s22 }
0x1188   : > { %5599 = vrot.lane.b32.xlu1 %v9792_v38, %s7578_s15 }
0x1189   : > { %5601 = vrot.lane.b32.xlu0 %v9812_v56, %s7578_s15 }
0x118c   : > { %5637 = vrot.lane.b32.xlu1 %v9792_v38, %s7579_s18 }
0x118d   : > { %5639 = vrot.lane.b32.xlu0 %v9812_v56, %s7579_s18 }
0x1190   : > { %5675 = vrot.lane.b32.xlu1 %v9792_v38, %s7580_s21 }
0x1191   : > { %5677 = vrot.lane.b32.xlu0 %v9812_v56, %s7580_s21 }
0x1194   : > { %5713 = vrot.lane.b32.xlu1 %v9792_v38, %s7581_s22 }
0x1195   : > { %5715 = vrot.lane.b32.xlu0 %v9812_v56, %s7581_s22 }
0x11ca   : > { %v5430_v34 = vpop.permute.xlu1 %5429 }
0x11cb   : > { %v9850_v36 = vpop.permute.xlu0 %5597 }
0x11ce   : > { %v5468_v60 = vpop.permute.xlu1 %5467 }
0x11cf   : > { %v9852_v47 = vpop.permute.xlu0 %5635 }
0x11d2   : > { %v5506_v35 = vpop.permute.xlu1 %5505 }
0x11d3   : > { %v9854_v52 = vpop.permute.xlu0 %5673 }
0x11d6   : > { %v9856_v32 = vpop.permute.xlu1 %5543 }
0x11d7   : > { %v5432_v45 = vpop.permute.xlu0 %5431 }
0x11da   : > { %v9858_v22 = vpop.permute.xlu1 %5595 }
0x11db   : > { %v5470_v46 = vpop.permute.xlu0 %5469 }
0x11de   : > { %v9860_v40 = vpop.permute.xlu1 %5633 }
0x11df   : > { %v5508_v17 = vpop.permute.xlu0 %5507 }
0x11e2   : > { %v9865_v53 = vpop.permute.xlu1 %5671 }
0x11e3   : > { %v5546_v21 = vpop.permute.xlu0 %5545 }
0x11e6   : > { %v5422_v61 = vpop.permute.xlu1 %5421 }
0x11e7   : > { %v5433_v39 = vsel %vm431_vm2, %v5430_v34, %v5422_v61  ;;  %v5439_v29 = vsel %vm431_vm2, %v5422_v61, %v5430_v34  ;;  %v5424_v33 = vpop.permute.xlu0 %5423 }
0x11e8   : > { %v5453_v8 = vmul.f32 %v5446_v49, %v5439_v29  ;;  %v5454_v24 = vmul.f32 %v5450_v55, %v5433_v39  ;;  %v5434_v44 = vsel %vm431_vm2, %v5432_v45, %v5424_v33  ;;  %v5440_v25 = vsel %vm431_vm2, %v5424_v33, %v5432_v45 }
0x11e9   : > { %v5455_v12 = vmul.f32 %v5446_v49, %v5440_v25  ;;  %v5456_v50 = vmul.f32 %v5450_v55, %v5434_v44  ;;  %v5560_v49 = vrot.slane %v6992_v58, %v7681_v4 }
0x11ea   : > { %v5462_v16 = vpop.permute.xlu1 %5461 }
0x11eb   : > { %v5471_v0 = vsel %vm479_vm1, %v5468_v60, %v5462_v16  ;;  %v5477_v2 = vsel %vm479_vm1, %v5462_v16, %v5468_v60  ;;  %v5464_v15 = vpop.permute.xlu0 %5463  ;;  %v7389_v63 = vpack.c.bf16 %v5456_v50, %v5454_v24  ;;  %v7391_v5 = vpack.c.bf16 %v5455_v12, %v5453_v8 }
0x11ec   : > { %v5491_v41 = vmul.f32 %v5484_v42, %v5477_v2  ;;  %v5492_v62 = vmul.f32 %v5488_v1, %v5471_v0  ;;  %v5472_v31 = vsel %vm479_vm1, %v5470_v46, %v5464_v15  ;;  %v5478_v30 = vsel %vm479_vm1, %v5464_v15, %v5470_v46  ;;  %v6993_v46 = vld [vmem:[%s10341_s1 + $0x4] ss:$8 sm:$0x3] }
0x11ed   : > { %v5493_v34 = vmul.f32 %v5484_v42, %v5478_v30  ;;  %v5494_v45 = vmul.f32 %v5488_v1, %v5472_v31  ;;  %7390 = vmatprep.subr.bf16.mxu1 %v7389_v63  ;;  %v5564_v60 = vrot.slane %v6992_v58, %v7674_v3 }
0x11ee   : > { %v5500_v23 = vpop.permute.xlu1 %5499  ;;  %7392 = vmatpush1.bf16.msra.mxu1 %v7391_v5  ;;  %v6994_v5 = vld [vmem:[%s10341_s1 + $0x5] ss:$8 sm:$0x3] }
0x11ef   : > { %v5509_v55 = vsel %vm525_vm3, %v5506_v35, %v5500_v23  ;;  %v5515_v19 = vsel %vm525_vm3, %v5500_v23, %v5506_v35  ;;  %v5502_v61 = vpop.permute.xlu0 %5501  ;;  %v7393_v39 = vpack.c.bf16 %v5494_v45, %v5492_v62  ;;  %v7395_v29 = vpack.c.bf16 %v5493_v34, %v5491_v41 }
0x11f0   : > { %v5529_v33 = vmul.f32 %v5522_v28, %v5515_v19  ;;  %v5530_v42 = vmul.f32 %v5526_v14, %v5509_v55  ;;  %v5510_v1 = vsel %vm525_vm3, %v5508_v17, %v5502_v61  ;;  %v5516_v11 = vsel %vm525_vm3, %v5502_v61, %v5508_v17 }
0x11f1   : > { %v5531_v8 = vmul.f32 %v5522_v28, %v5516_v11  ;;  %v5532_v24 = vmul.f32 %v5526_v14, %v5510_v1  ;;  %7394 = vmatprep.subr.bf16.mxu1 %v7393_v39  ;;  %v5584_v35 = vrot.slane %v6993_v46, %v7674_v3  ;;  %v5618_v23 = vrot.slane %v6994_v5, %v7681_v4 }
0x11f2   : > { %v5538_v44 = vpop.permute.xlu1 %5537  ;;  %7396 = vmatpush1.bf16.msra.mxu1 %v7395_v29  ;;  %v5603_v55 = vsel %vm622_vm5, %v9858_v22, %v9850_v36  ;;  %v5611_v19 = vsel %vm622_vm5, %v9850_v36, %v9858_v22  ;;  %v6996_v36 = vld [vmem:[%s10341_s1 + $0x7] ss:$8 sm:$0x3] }
0x11f3   : > { %v5547_v25 = vsel %vm571_vm4, %v9856_v32, %v5538_v44  ;;  %v5553_v12 = vsel %vm571_vm4, %v5538_v44, %v9856_v32  ;;  %v5540_v50 = vpop.permute.xlu0 %5539  ;;  %v7397_v16 = vpack.c.bf16 %v5532_v24, %v5530_v42  ;;  %v7399_v0 = vpack.c.bf16 %v5531_v8, %v5529_v33 }
0x11f4   : > { %v5567_v2 = vmul.f32 %v5560_v49, %v5553_v12  ;;  %v5568_v15 = vmul.f32 %v5564_v60, %v5547_v25  ;;  %v5548_v17 = vsel %vm571_vm4, %v5546_v21, %v5540_v50  ;;  %v5554_v28 = vsel %vm571_vm4, %v5540_v50, %v5546_v21  ;;  %v6995_v21 = vld [vmem:[%s10341_s1 + $0x6] ss:$8 sm:$0x3] }
0x11f5   : > { %v5569_v14 = vmul.f32 %v5560_v49, %v5554_v28  ;;  %v5570_v58 = vmul.f32 %v5564_v60, %v5548_v17  ;;  %7398 = vmatprep.subr.bf16.mxu1 %v7397_v16  ;;  %v5590_v63 = vmul.f32 %v5584_v35, %v9812_v56  ;;  %v5580_v32 = vrot.slane %v6993_v46, %v7681_v4 }
0x11f6   : > { %v9910_v41 = vpop.permute.xlu1 %5709  ;;  %7400 = vmatpush1.bf16.msra.mxu1 %v7399_v0  ;;  %v5588_v34 = vmul.f32 %v5584_v35, %v9776_v51  ;;  %v5622_v49 = vrot.slane %v6994_v5, %v7674_v3  ;;  %v5656_v29 = vrot.slane %v6995_v21, %v7681_v4  ;;  %v5660_v33 = vrot.slane %v6995_v21, %v7674_v3 }
0x11f7   : > { %v5712_v62 = vpop.permute.xlu0 %5711  ;;  %v7401_v31 = vpack.c.bf16 %v5570_v58, %v5568_v15  ;;  %v7403_v30 = vpack.c.bf16 %v5569_v14, %v5567_v2  ;;  %v5589_v45 = vmul.f32 %v5580_v32, %v9792_v38  ;;  %v5587_v39 = vmul.f32 %v5580_v32, %v9773_v59 }
0x11f8   : > { %v7405_v60 = vpack.c.bf16 %v5590_v63, %v5588_v34  ;;  %v5625_v8 = vmul.f32 %v5618_v23, %v5603_v55  ;;  %v5626_v24 = vmul.f32 %v5622_v49, %v5611_v19  ;;  %v5641_v35 = vsel %vm668_vm6, %v9860_v40, %v9852_v47  ;;  %v6997_v63 = vld [vmem:[%s10341_s1 + $0x10] ss:$8 sm:$0x3] }
0x11f9   : > { %7402 = vmatprep.subr.bf16.mxu1 %v7401_v31  ;;  %v7407_v11 = vpack.c.bf16 %v5589_v45, %v5587_v39  ;;  %v5649_v25 = vsel %vm668_vm6, %v9852_v47, %v9860_v40  ;;  %v5694_v2 = vrot.slane %v6996_v36, %v7681_v4  ;;  %v5698_v15 = vrot.slane %v6996_v36, %v7674_v3 }
0x11fa   : > { %v5600_v61 = vpop.permute.xlu1 %5599  ;;  %7404 = vmatpush1.bf16.msra.mxu1 %v7403_v30  ;;  %v5663_v14 = vmul.f32 %v5656_v29, %v5641_v35  ;;  %v5664_v58 = vmul.f32 %v5660_v33, %v5649_v25  ;;  %v5679_v5 = vsel %vm714_vm7, %v9865_v53, %v9854_v52  ;;  %v5687_v32 = vsel %vm714_vm7, %v9854_v52, %v9865_v53 }
0x11fb   : > { %v5602_v46 = vpop.permute.xlu0 %5601  ;;  %7406 = vmatprep.subr.bf16.mxu1 %v7405_v60  ;;  %v5732_v45 = vrot.slane %v6997_v63, %v7681_v4  ;;  %v5701_v55 = vmul.f32 %v5694_v2, %v5679_v5  ;;  %v5702_v19 = vmul.f32 %v5698_v15, %v5687_v32  ;;  %v5717_v52 = vsel %vm760_vm8, %v9910_v41, %v5712_v62 }
0x11fc   : > { %v5604_v42 = vsel %vm622_vm5, %v5600_v61, %v5602_v46  ;;  %v5612_v1 = vsel %vm622_vm5, %v5602_v46, %v5600_v61  ;;  %v5725_v53 = vsel %vm760_vm8, %v5712_v62, %v9910_v41 }
0x11fd   : > { %v5627_v22 = vmul.f32 %v5618_v23, %v5604_v42  ;;  %v5628_v44 = vmul.f32 %v5622_v49, %v5612_v1  ;;  %v5736_v23 = vrot.slane %v6997_v63, %v7674_v3 }
0x11fe   : > { %v5638_v12 = vpop.permute.xlu1 %5637  ;;  %7408 = vmatpush1.bf16.msra.mxu1 %v7407_v11 }
0x11ff   : > { %v5640_v50 = vpop.permute.xlu0 %5639  ;;  %v7409_v16 = vpack.c.bf16 %v5628_v44, %v5626_v24  ;;  %v7411_v0 = vpack.c.bf16 %v5627_v22, %v5625_v8  ;;  %v5739_v8 = vmul.f32 %v5732_v45, %v5717_v52  ;;  %v5740_v24 = vmul.f32 %v5736_v23, %v5725_v53 }
0x1200   : > { %v5642_v17 = vsel %vm668_vm6, %v5638_v12, %v5640_v50  ;;  %v5650_v28 = vsel %vm668_vm6, %v5640_v50, %v5638_v12  ;;  %v7003_v12 = vld [vmem:[%s10341_s1 + $0x4] ss:$8 sm:$0x3] }
0x1201   : > { %v5665_v47 = vmul.f32 %v5656_v29, %v5642_v17  ;;  %v5666_v40 = vmul.f32 %v5660_v33, %v5650_v28  ;;  %7410 = vmatprep.subr.bf16.mxu1 %v7409_v16  ;;  %v6029_v17 = vrot.slane %v7003_v12, %v7674_v3 }
0x1202   : > { %v5676_v31 = vpop.permute.xlu1 %5675  ;;  %7412 = vmatpush1.bf16.msra.mxu1 %v7411_v0 }
0x1203   : > { %v5678_v30 = vpop.permute.xlu0 %5677  ;;  %v7413_v34 = vpack.c.bf16 %v5666_v40, %v5664_v58  ;;  %v7415_v21 = vpack.c.bf16 %v5665_v47, %v5663_v14 }
0x1204   : > { %v5680_v49 = vsel %vm714_vm7, %v5676_v31, %v5678_v30  ;;  %v5688_v60 = vsel %vm714_vm7, %v5678_v30, %v5676_v31 }
0x1205   : > { %v5703_v61 = vmul.f32 %v5694_v2, %v5680_v49  ;;  %v5704_v39 = vmul.f32 %v5698_v15, %v5688_v60  ;;  %7414 = vmatprep.subr.bf16.mxu1 %v7413_v34 }
0x1206   : > { %v5714_v29 = vpop.permute.xlu1 %5713  ;;  %7416 = vmatpush1.bf16.msra.mxu1 %v7415_v21 }
0x1207   : > { %v5716_v46 = vpop.permute.xlu0 %5715  ;;  %v7417_v33 = vpack.c.bf16 %v5704_v39, %v5702_v19  ;;  %v7419_v42 = vpack.c.bf16 %v5703_v61, %v5701_v55  ;;  %v5886_v61 = vld [vmem:[%s10341_s1] ss:$8 sm:$0x3] }
0x1208   : > { %v5718_v1 = vsel %vm760_vm8, %v5714_v29, %v5716_v46  ;;  %v5726_v11 = vsel %vm760_vm8, %v5716_v46, %v5714_v29  ;;  %v5891_v53 = vrot.slane %v5886_v61, %v7681_v4  ;;  %v5895_v29 = vrot.slane %v5886_v61, %v7674_v3  ;;  %v7000_v46 = vld [vmem:[%s10341_s1 + $0x1] ss:$8 sm:$0x3] }
0x1209   : > { %v5741_v36 = vmul.f32 %v5732_v45, %v5718_v1  ;;  %v5742_v22 = vmul.f32 %v5736_v23, %v5726_v11  ;;  %7418 = vmatprep.subr.bf16.mxu1 %v7417_v33 }
0x120a   : > { %7420 = vmatpush1.bf16.msra.mxu1 %v7419_v42 }
0x120b   : > { %v7421_v44 = vpack.c.bf16 %v5742_v22, %v5740_v24  ;;  %v7423_v35 = vpack.c.bf16 %v5741_v36, %v5739_v8  ;;  %v5929_v8 = vrot.slane %v7000_v46, %v7681_v4  ;;  %v5933_v24 = vrot.slane %v7000_v46, %v7674_v3  ;;  %v7001_v36 = vld [vmem:[%s10341_s1 + $0x2] ss:$8 sm:$0x3] }
0x120d   : > { %7422 = vmatprep.subr.bf16.mxu1 %v7421_v44 }
0x120e   : > { %7424 = vmatpush1.bf16.msra.mxu1 %v7423_v35 }
0x1211   : > { %5848 = vmatmul.mubr.f32.vlgmr.msra.gmra.mrb[20].mxu1 %v9576_v18  ;;  %v6025_v18 = vrot.slane %v7003_v12, %v7681_v4 }
0x1212   : > { %6999 = vmatprep.mubr.msk.f32.mxu1 %vm479_vm1, %v9582_v26 }
0x1215   : > { %5854 = vmatmul.mubr.f32.gmra.mrb[22].mxu1 %v9589_v57 }
0x12e4   : > { %v5849_v41 = vpop.f32.mrb[20].mxu1 }
0x12e5   : > { %v5850_v62 = vadd.f32 %v5849_v41, %v8053_v13  ;;  %v5851_v25 = vpop.f32.mrb[21].mxu1 }
0x12e6   : > { %v5852_v50 = vadd.f32 %v5851_v25, %v8053_v13 }
0x12e7   : > { %v5860_v16 = vmax.f32 %v5850_v62, 0.0 }
0x12e8   : > { %v5861_v0 = vmax.f32 %v5852_v50, 0.0  ;;  %v5855_v2 = vpop.f32.mrb[22].mxu1  ;;  %v5967_v50 = vrot.slane %v7001_v36, %v7681_v4 }
0x12e9   : > { %v5856_v15 = vadd.f32 %v5855_v2, %v8060_v20  ;;  %v5857_v26 = vpop.f32.mrb[23].mxu1  ;;  %5874 = vrot.lane.b32.xlu1 %v5860_v16, %s7575_s12  ;;  %v9978_v58 = vmul.f32 %v6025_v18, %v5860_v16 }
0x12ea   : > { %v5858_v57 = vadd.f32 %v5857_v26, %v8060_v20  ;;  %6042 = vrot.lane.b32.xlu0 %v5861_v0, %s7578_s15  ;;  %v9984_v63 = vmul.f32 %v6029_v17, %v5861_v0 }
0x12eb   : > { %v5862_v28 = vmax.f32 %v5856_v15, 0.0  ;;  %v7002_v15 = vld [vmem:[%s10341_s1 + $0x3] ss:$8 sm:$0x3] }
0x12ec   : > { %v5863_v14 = vmax.f32 %v5858_v57, 0.0 }
0x12ed   : > { %v9980_v13 = vmul.f32 %v6025_v18, %v5862_v28  ;;  %5912 = vrot.lane.b32.xlu1 %v5860_v16, %s7574_s30 }
0x12ee   : > { %6080 = vrot.lane.b32.xlu0 %v5861_v0, %s7579_s18  ;;  %v9986_v47 = vmul.f32 %v6029_v17, %v5863_v14 }
0x12ef   : > { %v7443_v20 = vpack.c.bf16 %v9980_v13, %v9978_v58 }
0x12f0   : > { %v7441_v40 = vpack.c.bf16 %v9986_v47, %v9984_v63 }
0x12f1   : > { %5950 = vrot.lane.b32.xlu1 %v5860_v16, %s7576_s13 }
0x12f2   : > { %6118 = vrot.lane.b32.xlu0 %v5861_v0, %s7580_s21 }
0x12f5   : > { %5988 = vrot.lane.b32.xlu1 %v5860_v16, %s7577_s14 }
0x12f6   : > { %5876 = vrot.lane.b32.xlu0 %v5862_v28, %s7575_s12 }
0x12f9   : > { %6040 = vrot.lane.b32.xlu1 %v5860_v16, %s7578_s15 }
0x12fa   : > { %5914 = vrot.lane.b32.xlu0 %v5862_v28, %s7574_s30 }
0x12fd   : > { %6078 = vrot.lane.b32.xlu1 %v5860_v16, %s7579_s18 }
0x12fe   : > { %5952 = vrot.lane.b32.xlu0 %v5862_v28, %s7576_s13 }
0x1301   : > { %6116 = vrot.lane.b32.xlu1 %v5860_v16, %s7580_s21 }
0x1302   : > { %5990 = vrot.lane.b32.xlu0 %v5862_v28, %s7577_s14 }
0x1305   : > { %5866 = vrot.lane.b32.xlu1 %v5861_v0, %s7575_s12 }
0x1306   : > { %5868 = vrot.lane.b32.xlu0 %v5863_v14, %s7575_s12 }
0x1309   : > { %5906 = vrot.lane.b32.xlu1 %v5861_v0, %s7574_s30 }
0x130a   : > { %5908 = vrot.lane.b32.xlu0 %v5863_v14, %s7574_s30 }
0x130d   : > { %5944 = vrot.lane.b32.xlu1 %v5861_v0, %s7576_s13 }
0x130e   : > { %5946 = vrot.lane.b32.xlu0 %v5863_v14, %s7576_s13 }
0x1311   : > { %5982 = vrot.lane.b32.xlu1 %v5861_v0, %s7577_s14 }
0x1312   : > { %5984 = vrot.lane.b32.xlu0 %v5863_v14, %s7577_s14 }
0x1315   : > { %6154 = vrot.lane.b32.xlu1 %v5860_v16, %s7581_s22  ;;  %v5971_v16 = vrot.slane %v7001_v36, %v7674_v3 }
0x1316   : > { %6156 = vrot.lane.b32.xlu0 %v5861_v0, %s7581_s22 }
0x1319   : > { %6044 = vrot.lane.b32.xlu1 %v5862_v28, %s7578_s15 }
0x131a   : > { %6046 = vrot.lane.b32.xlu0 %v5863_v14, %s7578_s15 }
0x131d   : > { %6082 = vrot.lane.b32.xlu1 %v5862_v28, %s7579_s18 }
0x131e   : > { %6084 = vrot.lane.b32.xlu0 %v5863_v14, %s7579_s18 }
0x1321   : > { %6120 = vrot.lane.b32.xlu1 %v5862_v28, %s7580_s21 }
0x1322   : > { %6122 = vrot.lane.b32.xlu0 %v5863_v14, %s7580_s21 }
0x1325   : > { %6158 = vrot.lane.b32.xlu1 %v5862_v28, %s7581_s22 }
0x1326   : > { %6160 = vrot.lane.b32.xlu0 %v5863_v14, %s7581_s22 }
0x135b   : > { %v5875_v5 = vpop.permute.xlu1 %5874 }
0x135c   : > { %v10020_v32 = vpop.permute.xlu0 %6042 }
0x135f   : > { %v5913_v31 = vpop.permute.xlu1 %5912 }
0x1360   : > { %v10022_v30 = vpop.permute.xlu0 %6080 }
0x1363   : > { %v5951_v34 = vpop.permute.xlu1 %5950 }
0x1364   : > { %v10024_v21 = vpop.permute.xlu0 %6118 }
0x1367   : > { %v5989_v45 = vpop.permute.xlu1 %5988 }
0x1368   : > { %v5877_v23 = vpop.permute.xlu0 %5876 }
0x136b   : > { %v10026_v49 = vpop.permute.xlu1 %6040 }
0x136c   : > { %v5915_v60 = vpop.permute.xlu0 %5914 }
0x136f   : > { %v10028_v55 = vpop.permute.xlu1 %6078 }
0x1370   : > { %v5953_v19 = vpop.permute.xlu0 %5952  ;;  %v6086_v63 = vsel %vm668_vm6, %v10028_v55, %v10022_v30  ;;  %v6094_v47 = vsel %vm668_vm6, %v10022_v30, %v10028_v55  ;;  %v7007_v30 = vld [vmem:[%s10341_s1 + $0x10] ss:$8 sm:$0x3] }
0x1373   : > { %v10033_v39 = vpop.permute.xlu1 %6116 }
0x1374   : > { %v5991_v52 = vpop.permute.xlu0 %5990  ;;  %v6124_v13 = vsel %vm714_vm7, %v10033_v39, %v10024_v21 }
0x1377   : > { %v5867_v33 = vpop.permute.xlu1 %5866 }
0x1378   : > { %v5878_v42 = vsel %vm431_vm2, %v5875_v5, %v5867_v33  ;;  %v5884_v1 = vsel %vm431_vm2, %v5867_v33, %v5875_v5  ;;  %v5869_v11 = vpop.permute.xlu0 %5868 }
0x1379   : > { %v5898_v22 = vmul.f32 %v5891_v53, %v5884_v1  ;;  %v5899_v44 = vmul.f32 %v5895_v29, %v5878_v42  ;;  %v5879_v35 = vsel %vm431_vm2, %v5877_v23, %v5869_v11  ;;  %v5885_v41 = vsel %vm431_vm2, %v5869_v11, %v5877_v23 }
0x137a   : > { %v5900_v62 = vmul.f32 %v5891_v53, %v5885_v41  ;;  %v5901_v25 = vmul.f32 %v5895_v29, %v5879_v35  ;;  %v6005_v29 = vrot.slane %v7002_v15, %v7681_v4 }
0x137b   : > { %v5907_v12 = vpop.permute.xlu1 %5906 }
0x137c   : > { %v5916_v0 = vsel %vm479_vm1, %v5913_v31, %v5907_v12  ;;  %v5922_v2 = vsel %vm479_vm1, %v5907_v12, %v5913_v31  ;;  %v5909_v18 = vpop.permute.xlu0 %5908  ;;  %v7425_v26 = vpack.c.bf16 %v5901_v25, %v5899_v44  ;;  %v7427_v57 = vpack.c.bf16 %v5900_v62, %v5898_v22 }
0x137d   : > { %v5936_v17 = vmul.f32 %v5929_v8, %v5922_v2  ;;  %v5937_v28 = vmul.f32 %v5933_v24, %v5916_v0  ;;  %v5917_v14 = vsel %vm479_vm1, %v5915_v60, %v5909_v18  ;;  %v5923_v5 = vsel %vm479_vm1, %v5909_v18, %v5915_v60 }
0x137e   : > { %v5938_v23 = vmul.f32 %v5929_v8, %v5923_v5  ;;  %v5939_v61 = vmul.f32 %v5933_v24, %v5917_v14  ;;  %7426 = vmatprep.subr.bf16.mxu0 %v7425_v26  ;;  %v6009_v31 = vrot.slane %v7002_v15, %v7674_v3  ;;  %v6048_v5 = vsel %vm622_vm5, %v10026_v49, %v10020_v32 }
0x137f   : > { %v5945_v53 = vpop.permute.xlu1 %5944  ;;  %7428 = vmatpush1.bf16.msra.mxu0 %v7427_v57 }
0x1380   : > { %v5954_v46 = vsel %vm525_vm3, %v5951_v34, %v5945_v53  ;;  %v5960_v33 = vsel %vm525_vm3, %v5945_v53, %v5951_v34  ;;  %v5947_v42 = vpop.permute.xlu0 %5946  ;;  %v7429_v1 = vpack.c.bf16 %v5939_v61, %v5937_v28  ;;  %v7431_v11 = vpack.c.bf16 %v5938_v23, %v5936_v17 }
0x1381   : > { %v5974_v36 = vmul.f32 %v5967_v50, %v5960_v33  ;;  %v5975_v22 = vmul.f32 %v5971_v16, %v5954_v46  ;;  %v5955_v60 = vsel %vm525_vm3, %v5953_v19, %v5947_v42  ;;  %v5961_v8 = vsel %vm525_vm3, %v5947_v42, %v5953_v19 }
0x1382   : > { %v5976_v24 = vmul.f32 %v5967_v50, %v5961_v8  ;;  %v5977_v44 = vmul.f32 %v5971_v16, %v5955_v60  ;;  %7430 = vmatprep.subr.bf16.mxu0 %v7429_v1  ;;  %v7004_v50 = vld [vmem:[%s10341_s1 + $0x5] ss:$8 sm:$0x3]  ;;  %v6056_v23 = vsel %vm622_vm5, %v10020_v32, %v10026_v49  ;;  %v7006_v32 = vld [vmem:[%s10341_s1 + $0x7] ss:$8 sm:$0x3] }
0x1383   : > { %v5983_v35 = vpop.permute.xlu1 %5982  ;;  %7432 = vmatpush1.bf16.msra.mxu0 %v7431_v11  ;;  %v6063_v28 = vrot.slane %v7004_v50, %v7681_v4  ;;  %v6067_v14 = vrot.slane %v7004_v50, %v7674_v3  ;;  %v6139_v8 = vrot.slane %v7006_v32, %v7681_v4 }
0x1384   : > { %v5992_v41 = vsel %vm571_vm4, %v5989_v45, %v5983_v35  ;;  %v5998_v62 = vsel %vm571_vm4, %v5983_v35, %v5989_v45  ;;  %v5985_v25 = vpop.permute.xlu0 %5984  ;;  %v7433_v34 = vpack.c.bf16 %v5977_v44, %v5975_v22  ;;  %v7435_v12 = vpack.c.bf16 %v5976_v24, %v5974_v36 }
0x1385   : > { %v6012_v0 = vmul.f32 %v6005_v29, %v5998_v62  ;;  %v6013_v2 = vmul.f32 %v6009_v31, %v5992_v41  ;;  %v5993_v18 = vsel %vm571_vm4, %v5991_v52, %v5985_v25  ;;  %v5999_v15 = vsel %vm571_vm4, %v5985_v25, %v5991_v52  ;;  %v7005_v52 = vld [vmem:[%s10341_s1 + $0x6] ss:$8 sm:$0x3] }
0x1386   : > { %v6014_v26 = vmul.f32 %v6005_v29, %v5999_v15  ;;  %v6015_v19 = vmul.f32 %v6009_v31, %v5993_v18  ;;  %7434 = vmatprep.subr.bf16.mxu0 %v7433_v34  ;;  %v6101_v29 = vrot.slane %v7005_v52, %v7681_v4  ;;  %v6105_v31 = vrot.slane %v7005_v52, %v7674_v3 }
0x1387   : > { %v6155_v16 = vpop.permute.xlu1 %6154  ;;  %7436 = vmatpush1.bf16.msra.mxu0 %v7435_v12  ;;  %v6070_v42 = vmul.f32 %v6063_v28, %v6048_v5  ;;  %v6071_v1 = vmul.f32 %v6067_v14, %v6056_v23  ;;  %v6143_v24 = vrot.slane %v7006_v32, %v7674_v3  ;;  %v6181_v18 = vrot.slane %v7007_v30, %v7674_v3 }
0x1388   : > { %v6157_v57 = vpop.permute.xlu0 %6156  ;;  %v7437_v45 = vpack.c.bf16 %v6015_v19, %v6013_v2  ;;  %v7439_v17 = vpack.c.bf16 %v6014_v26, %v6012_v0  ;;  %v6108_v41 = vmul.f32 %v6101_v29, %v6086_v63  ;;  %v6109_v62 = vmul.f32 %v6105_v31, %v6094_v47 }
0x1389   : > { %v6177_v2 = vrot.slane %v7007_v30, %v7681_v4  ;;  %v6146_v19 = vmul.f32 %v6139_v8, %v6124_v13 }
0x138a   : > { %7438 = vmatprep.subr.bf16.mxu0 %v7437_v45 }
0x138b   : > { %v6045_v61 = vpop.permute.xlu1 %6044  ;;  %7440 = vmatpush1.bf16.msra.mxu0 %v7439_v17 }
0x138c   : > { %v6047_v53 = vpop.permute.xlu0 %6046  ;;  %7442 = vmatprep.subr.bf16.mxu0 %v7441_v40 }
0x138d   : > { %v6049_v46 = vsel %vm622_vm5, %v6045_v61, %v6047_v53  ;;  %v6057_v33 = vsel %vm622_vm5, %v6047_v53, %v6045_v61 }
0x138e   : > { %v6072_v49 = vmul.f32 %v6063_v28, %v6049_v46  ;;  %v6073_v11 = vmul.f32 %v6067_v14, %v6057_v33 }
0x138f   : > { %v6083_v40 = vpop.permute.xlu1 %6082  ;;  %7444 = vmatpush1.bf16.msra.mxu0 %v7443_v20  ;;  %v6132_v20 = vsel %vm714_vm7, %v10024_v21, %v10033_v39  ;;  %v6162_v21 = vsel %vm760_vm8, %v6155_v16, %v6157_v57  ;;  %v6170_v39 = vsel %vm760_vm8, %v6157_v57, %v6155_v16  ;;  %v6306_v57 = vstv %s7010_s27 }
0x1390   : > { %v6085_v36 = vpop.permute.xlu0 %6084  ;;  %v7445_v22 = vpack.c.bf16 %v6073_v11, %v6071_v1  ;;  %v7447_v60 = vpack.c.bf16 %v6072_v49, %v6070_v42  ;;  %v6147_v50 = vmul.f32 %v6143_v24, %v6132_v20  ;;  %v6184_v53 = vmul.f32 %v6177_v2, %v6162_v21  ;;  %v7015_v11 = vld [vmem:[%s10341_s1 + $0x4] ss:$8 sm:$0x3]  ;;  %v10182_v20 = vld [vmem:[%s10348_s8] sm:$0x3] }
0x1391   : > { %v6087_v44 = vsel %vm668_vm6, %v6083_v40, %v6085_v36  ;;  %v6095_v35 = vsel %vm668_vm6, %v6085_v36, %v6083_v40 }
0x1392   : > { %v6110_v55 = vmul.f32 %v6101_v29, %v6087_v44  ;;  %v6111_v58 = vmul.f32 %v6105_v31, %v6095_v35  ;;  %7446 = vmatprep.subr.bf16.mxu0 %v7445_v22  ;;  %v6185_v29 = vmul.f32 %v6181_v18, %v6170_v39  ;;  %v6482_v22 = vrot.slane %v7015_v11, %v7681_v4  ;;  %v7017_v39 = vld [vmem:[%s10341_s1 + $0x6] ss:$8 sm:$0x3] }
0x1393   : > { %v6121_v25 = vpop.permute.xlu1 %6120  ;;  %7448 = vmatpush1.bf16.msra.mxu0 %v7447_v60 }
0x1394   : > { %v6123_v34 = vpop.permute.xlu0 %6122  ;;  %v7449_v12 = vpack.c.bf16 %v6111_v58, %v6109_v62  ;;  %v7451_v0 = vpack.c.bf16 %v6110_v55, %v6108_v41 }
0x1395   : > { %v6125_v15 = vsel %vm714_vm7, %v6121_v25, %v6123_v34  ;;  %v6133_v26 = vsel %vm714_vm7, %v6123_v34, %v6121_v25  ;;  %v6702_v25 = vrot.slane %v10182_v20, %v7674_v3  ;;  %v416_v34 = vld [vmem:[#allocation3] sm:$0x1] }
0x1396   : > { %v6148_v45 = vmul.f32 %v6139_v8, %v6125_v15  ;;  %v6149_v17 = vmul.f32 %v6143_v24, %v6133_v26  ;;  %7450 = vmatprep.subr.bf16.mxu0 %v7449_v12 }
0x1397   : > { %v6159_v28 = vpop.permute.xlu1 %6158  ;;  %7452 = vmatpush1.bf16.msra.mxu0 %v7451_v0  ;;  %7020 = vmatprep.mubr.msk.f32.mxu1 %vm479_vm1, %v6702_v25 }
0x1398   : > { %v6161_v14 = vpop.permute.xlu0 %6160  ;;  %v7453_v52 = vpack.c.bf16 %v6149_v17, %v6147_v50  ;;  %v7455_v5 = vpack.c.bf16 %v6148_v45, %v6146_v19  ;;  %v7016_v19 = vld [vmem:[%s10341_s1 + $0x5] ss:$8 sm:$0x3] }
0x1399   : > { %v6163_v23 = vsel %vm760_vm8, %v6159_v28, %v6161_v14  ;;  %v6171_v61 = vsel %vm760_vm8, %v6161_v14, %v6159_v28  ;;  %v10199_v17 = vrot.slane %v7016_v19, %v7681_v4  ;;  %v10202_v21 = vrot.slane %v7016_v19, %v7674_v3 }
0x139a   : > { %v6186_v31 = vmul.f32 %v6177_v2, %v6163_v23  ;;  %v6187_v46 = vmul.f32 %v6181_v18, %v6171_v61  ;;  %7454 = vmatprep.subr.bf16.mxu0 %v7453_v52 }
0x139b   : > { %7456 = vmatpush1.bf16.msra.mxu0 %v7455_v5 }
0x139c   : > { %v7457_v33 = vpack.c.bf16 %v6187_v46, %v6185_v29  ;;  %v7459_v42 = vpack.c.bf16 %v6186_v31, %v6184_v53  ;;  %v10216_v53 = vrot.slane %v7017_v39, %v7681_v4  ;;  %v10219_v29 = vrot.slane %v7017_v39, %v7674_v3  ;;  %v7018_v31 = vld [vmem:[%s10341_s1 + $0x7] ss:$8 sm:$0x3] }
0x139e   : > { %7458 = vmatprep.subr.bf16.mxu0 %v7457_v33 }
0x139f   : > { %7460 = vmatpush1.bf16.msra.mxu0 %v7459_v42 }
0x13a2   : > { %6293 = vmatmul.mubr.f32.vlgmr.msra.gmra.mrb[24].mxu0 %v9752_v48  ;;  %v6316_v48 = vstv %s7011_s28 }
0x13a3   : > { %7009 = vmatprep.mubr.msk.f32.mxu0 %vm479_vm1, %v9758_v9 }
0x13a6   : > { %6299 = vmatmul.mubr.f32.gmra.mrb[26].mxu0 %v9765_v37 }
0x1475   : > { %v6294_v16 = vpop.f32.mrb[24].mxu0 }
0x1476   : > { %v6295_v1 = vadd.f32 %v6294_v16, %v8246_v54  ;;  %v6296_v32 = vpop.f32.mrb[25].mxu0 }
0x1477   : > { %v6297_v49 = vadd.f32 %v6296_v32, %v8246_v54  ;;  %v6486_v54 = vrot.slane %v7015_v11, %v7674_v3  ;;  %v10233_v32 = vrot.slane %v7018_v31, %v7681_v4  ;;  %v6343_v11 = vld [vmem:[%s10341_s1] ss:$8 sm:$0x3] }
0x1478   : > { %v6307_v63 = vmul.f32 %v6306_v57, %v6295_v1 }
0x1479   : > { %v6308_v47 = vmul.f32 %v6306_v57, %v6297_v49  ;;  %v6300_v40 = vpop.f32.mrb[26].mxu0  ;;  %v10236_v49 = vrot.slane %v7018_v31, %v7674_v3 }
0x147a   : > { %v6311_v9 = vadd.f32 %v6307_v63, %v9773_v59  ;;  %v6301_v37 = vadd.f32 %v6300_v40, %v8260_v43  ;;  %v6302_v36 = vpop.f32.mrb[27].mxu0 }
0x147b   : > { %v6312_v60 = vadd.f32 %v6308_v47, %v9776_v51  ;;  %v6303_v8 = vadd.f32 %v6302_v36, %v8260_v43  ;;  %v6348_v36 = vrot.slane %v6343_v11, %v7681_v4 }
0x147c   : > { %v6317_v24 = vmul.f32 %v6316_v48, %v6311_v9  ;;  %v6309_v44 = vmul.f32 %v6306_v57, %v6301_v37 }
0x147d   : > { %v6318_v35 = vmul.f32 %v6316_v48, %v6312_v60  ;;  %v6310_v41 = vmul.f32 %v6306_v57, %v6303_v8  ;;  %v7012_v60 = vld [vmem:[%s10341_s1 + $0x1] ss:$8 sm:$0x3] }
0x147e   : > { %v6313_v62 = vadd.f32 %v6309_v44, %v9792_v38  ;;  %6331 = vrot.lane.b32.xlu1 %v6317_v24, %s7575_s12  ;;  %v10139_v59 = vmul.f32 %v6482_v22, %v6317_v24 }
0x147f   : > { %v6314_v30 = vadd.f32 %v6310_v41, %v9812_v56  ;;  %6499 = vrot.lane.b32.xlu0 %v6318_v35, %s7578_s15  ;;  %v10143_v55 = vmul.f32 %v6486_v54, %v6318_v35  ;;  %v6390_v41 = vrot.slane %v7012_v60, %v7674_v3 }
0x1480   : > { %v6319_v51 = vmul.f32 %v6316_v48, %v6313_v62  ;;  %v7013_v62 = vld [vmem:[%s10341_s1 + $0x2] ss:$8 sm:$0x3] }
0x1481   : > { %v6320_v43 = vmul.f32 %v6316_v48, %v6314_v30 }
0x1482   : > { %6369 = vrot.lane.b32.xlu1 %v6317_v24, %s7574_s30  ;;  %v10146_v58 = vmul.f32 %v6482_v22, %v6319_v51  ;;  %v6352_v22 = vrot.slane %v6343_v11, %v7674_v3 }
0x1483   : > { %6537 = vrot.lane.b32.xlu0 %v6318_v35, %s7579_s18  ;;  %v10149_v13 = vmul.f32 %v6486_v54, %v6320_v43 }
0x1484   : > { %v7479_v38 = vpack.c.bf16 %v10146_v58, %v10139_v59 }
0x1485   : > { %v7477_v56 = vpack.c.bf16 %v10149_v13, %v10143_v55 }
0x1486   : > { %6407 = vrot.lane.b32.xlu1 %v6317_v24, %s7576_s13 }
0x1487   : > { %6575 = vrot.lane.b32.xlu0 %v6318_v35, %s7580_s21 }
0x148a   : > { %6445 = vrot.lane.b32.xlu1 %v6317_v24, %s7577_s14 }
0x148b   : > { %6333 = vrot.lane.b32.xlu0 %v6319_v51, %s7575_s12 }
0x148e   : > { %6497 = vrot.lane.b32.xlu1 %v6317_v24, %s7578_s15 }
0x148f   : > { %6371 = vrot.lane.b32.xlu0 %v6319_v51, %s7574_s30 }
0x1492   : > { %6535 = vrot.lane.b32.xlu1 %v6317_v24, %s7579_s18 }
0x1493   : > { %6409 = vrot.lane.b32.xlu0 %v6319_v51, %s7576_s13 }
0x1496   : > { %6573 = vrot.lane.b32.xlu1 %v6317_v24, %s7580_s21 }
0x1497   : > { %6447 = vrot.lane.b32.xlu0 %v6319_v51, %s7577_s14 }
0x149a   : > { %6323 = vrot.lane.b32.xlu1 %v6318_v35, %s7575_s12 }
0x149b   : > { %6325 = vrot.lane.b32.xlu0 %v6320_v43, %s7575_s12 }
0x149e   : > { %6363 = vrot.lane.b32.xlu1 %v6318_v35, %s7574_s30 }
0x149f   : > { %6365 = vrot.lane.b32.xlu0 %v6320_v43, %s7574_s30 }
0x14a2   : > { %6401 = vrot.lane.b32.xlu1 %v6318_v35, %s7576_s13 }
0x14a3   : > { %6403 = vrot.lane.b32.xlu0 %v6320_v43, %s7576_s13 }
0x14a6   : > { %6439 = vrot.lane.b32.xlu1 %v6318_v35, %s7577_s14 }
0x14a7   : > { %6441 = vrot.lane.b32.xlu0 %v6320_v43, %s7577_s14  ;;  %s397_s14 = scalar_lea.vmem %s10351_s11, %s6872_s26 }
0x14aa   : > { %6611 = vrot.lane.b32.xlu1 %v6317_v24, %s7581_s22 }
0x14ab   : > { %6613 = vrot.lane.b32.xlu0 %v6318_v35, %s7581_s22  ;;  %v6386_v35 = vrot.slane %v7012_v60, %v7681_v4 }
0x14ae   : > { %6501 = vrot.lane.b32.xlu1 %v6319_v51, %s7578_s15 }
0x14af   : > { %6503 = vrot.lane.b32.xlu0 %v6320_v43, %s7578_s15 }
0x14b2   : > { %6539 = vrot.lane.b32.xlu1 %v6319_v51, %s7579_s18 }
0x14b3   : > { %6541 = vrot.lane.b32.xlu0 %v6320_v43, %s7579_s18 }
0x14b6   : > { %6577 = vrot.lane.b32.xlu1 %v6319_v51, %s7580_s21 }
0x14b7   : > { %6579 = vrot.lane.b32.xlu0 %v6320_v43, %s7580_s21 }
0x14ba   : > { %6615 = vrot.lane.b32.xlu1 %v6319_v51, %s7581_s22 }
0x14bb   : > { %6617 = vrot.lane.b32.xlu0 %v6320_v43, %s7581_s22 }
0x14be   : > { %6687 = vperm.xlu1 %7529, %v416_v34  }
0x14f0   : > { %v6332_v12 = vpop.permute.xlu1 %6331 }
0x14f1   : > { %v6500_v0 = vpop.permute.xlu0 %6499 }
0x14f4   : > { %v6370_v2 = vpop.permute.xlu1 %6369 }
0x14f5   : > { %v6538_v18 = vpop.permute.xlu0 %6537 }
0x14f8   : > { %v10191_v15 = vpop.permute.xlu1 %6407 }
0x14f9   : > { %v6576_v26 = vpop.permute.xlu0 %6575 }
0x14fc   : > { %v10196_v50 = vpop.permute.xlu1 %6445 }
0x14fd   : > { %v6334_v45 = vpop.permute.xlu0 %6333 }
0x1500   : > { %v6498_v28 = vpop.permute.xlu1 %6497 }
0x1501   : > { %v6505_v14 = vsel %vm622_vm5, %v6498_v28, %v6500_v0  ;;  %v6513_v52 = vsel %vm622_vm5, %v6500_v0, %v6498_v28  ;;  %v6372_v5 = vpop.permute.xlu0 %6371 }
0x1502   : > { %v10210_v23 = vmul.f32 %v10199_v17, %v6505_v14  ;;  %v10213_v61 = vmul.f32 %v10202_v21, %v6513_v52 }
0x1504   : > { %v6536_v46 = vpop.permute.xlu1 %6535 }
0x1505   : > { %v6543_v33 = vsel %vm668_vm6, %v6536_v46, %v6538_v18  ;;  %v6551_v42 = vsel %vm668_vm6, %v6538_v18, %v6536_v46  ;;  %v6410_v16 = vpop.permute.xlu0 %6409  ;;  %v6424_v18 = vrot.slane %v7013_v62, %v7681_v4 }
0x1506   : > { %v10227_v57 = vmul.f32 %v10216_v53, %v6543_v33  ;;  %v10230_v1 = vmul.f32 %v10219_v29, %v6551_v42 }
0x1508   : > { %v6574_v63 = vpop.permute.xlu1 %6573 }
0x1509   : > { %v6581_v48 = vsel %vm714_vm7, %v6574_v63, %v6576_v26  ;;  %v6589_v47 = vsel %vm714_vm7, %v6576_v26, %v6574_v63  ;;  %v10243_v40 = vpop.permute.xlu0 %6447  ;;  %v6428_v26 = vrot.slane %v7013_v62, %v7674_v3 }
0x150a   : > { %v10246_v9 = vmul.f32 %v10233_v32, %v6581_v48  ;;  %v10249_v37 = vmul.f32 %v10236_v49, %v6589_v47 }
0x150c   : > { %v6324_v8 = vpop.permute.xlu1 %6323 }
0x150d   : > { %v6335_v54 = vsel %vm431_vm2, %v6332_v12, %v6324_v8  ;;  %v6341_v24 = vsel %vm431_vm2, %v6324_v8, %v6332_v12  ;;  %v6326_v44 = vpop.permute.xlu0 %6325 }
0x150e   : > { %v6355_v30 = vmul.f32 %v6348_v36, %v6341_v24  ;;  %v6356_v51 = vmul.f32 %v6352_v22, %v6335_v54  ;;  %v6336_v43 = vsel %vm431_vm2, %v6334_v45, %v6326_v44  ;;  %v6342_v25 = vsel %vm431_vm2, %v6326_v44, %v6334_v45  ;;  %v7014_v45 = vld [vmem:[%s10341_s1 + $0x3] ss:$8 sm:$0x3] }
0x150f   : > { %v6357_v34 = vmul.f32 %v6348_v36, %v6342_v25  ;;  %v6358_v0 = vmul.f32 %v6352_v22, %v6336_v43  ;;  %v6462_v47 = vrot.slane %v7014_v45, %v7681_v4 }
0x1510   : > { %6359 = vst [vmem:[#allocation2] sm:$0xff] %v6355_v30  ;;  %6360 = vst [vmem:[#allocation2 + $0x8] sm:$0xff] %v6356_v51  ;;  %v6364_v12 = vpop.permute.xlu1 %6363 }
0x1511   : > { %6361 = vst [vmem:[#allocation2 + $0x10] sm:$0xff] %v6357_v34  ;;  %6362 = vst [vmem:[#allocation2 + $0x18] sm:$0xff] %v6358_v0  ;;  %v6373_v19 = vsel %vm479_vm1, %v6370_v2, %v6364_v12  ;;  %v6379_v39 = vsel %vm479_vm1, %v6364_v12, %v6370_v2  ;;  %v6366_v28 = vpop.permute.xlu0 %6365  ;;  %v7461_v14 = vpack.c.bf16 %v6358_v0, %v6356_v51  ;;  %v7019_v51 = vld [vmem:[%s10341_s1 + $0x10] ss:$8 sm:$0x3] }
0x1512   : > { %v7463_v52 = vpack.c.bf16 %v6357_v34, %v6355_v30  ;;  %v6393_v31 = vmul.f32 %v6386_v35, %v6379_v39  ;;  %v6394_v46 = vmul.f32 %v6390_v41, %v6373_v19  ;;  %v6374_v33 = vsel %vm479_vm1, %v6372_v5, %v6366_v28 }
0x1513   : > { %v6380_v42 = vsel %vm479_vm1, %v6366_v28, %v6372_v5  ;;  %v6396_v63 = vmul.f32 %v6390_v41, %v6374_v33  ;;  %7462 = vmatprep.subr.bf16.mxu1 %v7461_v14  ;;  %v6466_v2 = vrot.slane %v7014_v45, %v7674_v3  ;;  %v6634_v28 = vrot.slane %v7019_v51, %v7681_v4 }
0x1514   : > { %v6395_v11 = vmul.f32 %v6386_v35, %v6380_v42  ;;  %v6402_v48 = vpop.permute.xlu1 %6401  ;;  %7464 = vmatpush1.bf16.msra.mxu1 %v7463_v52  ;;  %v6638_v45 = vrot.slane %v7019_v51, %v7674_v3 }
0x1515   : > { %v6411_v36 = vsel %vm525_vm3, %v10191_v15, %v6402_v48  ;;  %v6417_v22 = vsel %vm525_vm3, %v6402_v48, %v10191_v15  ;;  %v6404_v60 = vpop.permute.xlu0 %6403  ;;  %v7465_v8 = vpack.c.bf16 %v6396_v63, %v6394_v46 }
0x1516   : > { %v7467_v54 = vpack.c.bf16 %v6395_v11, %v6393_v31  ;;  %v6431_v24 = vmul.f32 %v6424_v18, %v6417_v22  ;;  %v6432_v5 = vmul.f32 %v6428_v26, %v6411_v36  ;;  %v6412_v44 = vsel %vm525_vm3, %v6410_v16, %v6404_v60 }
0x1517   : > { %v6418_v35 = vsel %vm525_vm3, %v6404_v60, %v6410_v16  ;;  %v6434_v62 = vmul.f32 %v6428_v26, %v6412_v44  ;;  %7466 = vmatprep.subr.bf16.mxu1 %v7465_v8 }
0x1518   : > { %v6433_v41 = vmul.f32 %v6424_v18, %v6418_v35  ;;  %v6440_v30 = vpop.permute.xlu1 %6439  ;;  %7468 = vmatpush1.bf16.msra.mxu1 %v7467_v54 }
0x1519   : > { %v6449_v15 = vsel %vm571_vm4, %v10196_v50, %v6440_v30  ;;  %v6455_v43 = vsel %vm571_vm4, %v6440_v30, %v10196_v50  ;;  %v6442_v25 = vpop.permute.xlu0 %6441  ;;  %v7469_v34 = vpack.c.bf16 %v6434_v62, %v6432_v5 }
0x151a   : > { %v7471_v0 = vpack.c.bf16 %v6433_v41, %v6431_v24  ;;  %v6469_v12 = vmul.f32 %v6462_v47, %v6455_v43  ;;  %v6470_v16 = vmul.f32 %v6466_v2, %v6449_v15  ;;  %v6450_v18 = vsel %vm571_vm4, %v10243_v40, %v6442_v25 }
0x151b   : > { %v6456_v26 = vsel %vm571_vm4, %v6442_v25, %v10243_v40  ;;  %v6472_v39 = vmul.f32 %v6466_v2, %v6450_v18  ;;  %7470 = vmatprep.subr.bf16.mxu1 %v7469_v34 }
0x151c   : > { %v6471_v19 = vmul.f32 %v6462_v47, %v6456_v26  ;;  %v6612_v14 = vpop.permute.xlu1 %6611  ;;  %7472 = vmatpush1.bf16.msra.mxu1 %v7471_v0 }
0x151d   : > { %v6614_v50 = vpop.permute.xlu0 %6613  ;;  %v7473_v52 = vpack.c.bf16 %v6472_v39, %v6470_v16 }
0x151e   : > { %v7475_v31 = vpack.c.bf16 %v6471_v19, %v6469_v12  ;;  %v6619_v46 = vsel %vm760_vm8, %v6612_v14, %v6614_v50  ;;  %v6627_v33 = vsel %vm760_vm8, %v6614_v50, %v6612_v14 }
0x151f   : > { %v6641_v42 = vmul.f32 %v6634_v28, %v6619_v46  ;;  %v6642_v11 = vmul.f32 %v6638_v45, %v6627_v33  ;;  %7474 = vmatprep.subr.bf16.mxu1 %v7473_v52 }
0x1520   : > { %v6502_v40 = vpop.permute.xlu1 %6501  ;;  %7476 = vmatpush1.bf16.msra.mxu1 %v7475_v31 }
0x1521   : > { %v6504_v63 = vpop.permute.xlu0 %6503  ;;  %7478 = vmatprep.subr.bf16.mxu1 %v7477_v56 }
0x1522   : > { %v6506_v3 = vsel %vm622_vm5, %v6502_v40, %v6504_v63  ;;  %v6514_v48 = vsel %vm622_vm5, %v6504_v63, %v6502_v40 }
0x1523   : > { %v6529_v47 = vmul.f32 %v10199_v17, %v6506_v3  ;;  %v6530_v2 = vmul.f32 %v10202_v21, %v6514_v48 }
0x1524   : > { %v6540_v36 = vpop.permute.xlu1 %6539  ;;  %7480 = vmatpush1.bf16.msra.mxu1 %v7479_v38 }
0x1525   : > { %v6542_v22 = vpop.permute.xlu0 %6541  ;;  %v7481_v60 = vpack.c.bf16 %v6530_v2, %v10213_v61  ;;  %v7483_v8 = vpack.c.bf16 %v6529_v47, %v10210_v23 }
0x1526   : > { %v6544_v55 = vsel %vm668_vm6, %v6540_v36, %v6542_v22  ;;  %v6552_v13 = vsel %vm668_vm6, %v6542_v22, %v6540_v36 }
0x1527   : > { %v6567_v56 = vmul.f32 %v10216_v53, %v6544_v55  ;;  %v6568_v17 = vmul.f32 %v10219_v29, %v6552_v13  ;;  %7482 = vmatprep.subr.bf16.mxu1 %v7481_v60 }
0x1528   : > { %v6578_v21 = vpop.permute.xlu1 %6577  ;;  %7484 = vmatpush1.bf16.msra.mxu1 %v7483_v8 }
0x1529   : > { %v6580_v54 = vpop.permute.xlu0 %6579  ;;  %v7485_v59 = vpack.c.bf16 %v6568_v17, %v10230_v1  ;;  %v7487_v58 = vpack.c.bf16 %v6567_v56, %v10227_v57 }
0x152a   : > { %v6582_v38 = vsel %vm714_vm7, %v6578_v21, %v6580_v54  ;;  %v6590_v23 = vsel %vm714_vm7, %v6580_v54, %v6578_v21 }
0x152b   : > { %v6605_v61 = vmul.f32 %v10233_v32, %v6582_v38  ;;  %v6606_v24 = vmul.f32 %v10236_v49, %v6590_v23  ;;  %7486 = vmatprep.subr.bf16.mxu1 %v7485_v59  ;;  %v6698_v49 = vrot.slane %v10182_v20, %v7681_v4 }
0x152c   : > { %v6616_v53 = vpop.permute.xlu1 %6615  ;;  %7488 = vmatpush1.bf16.msra.mxu1 %v7487_v58 }
0x152d   : > { %v6618_v29 = vpop.permute.xlu0 %6617  ;;  %v7489_v5 = vpack.c.bf16 %v6606_v24, %v10249_v37  ;;  %v7491_v44 = vpack.c.bf16 %v6605_v61, %v10246_v9 }
0x152e   : > { %v6620_v1 = vsel %vm760_vm8, %v6616_v53, %v6618_v29  ;;  %v6628_v57 = vsel %vm760_vm8, %v6618_v29, %v6616_v53 }
0x152f   : > { %v6643_v35 = vmul.f32 %v6634_v28, %v6620_v1  ;;  %v6644_v41 = vmul.f32 %v6638_v45, %v6628_v57  ;;  %7490 = vmatprep.subr.bf16.mxu1 %v7489_v5 }
0x1530   : > { %7492 = vmatpush1.bf16.msra.mxu1 %v7491_v44 }
0x1531   : > { %v7493_v62 = vpack.c.bf16 %v6644_v41, %v6642_v11  ;;  %v7495_v32 = vpack.c.bf16 %v6643_v35, %v6641_v42 }
0x1533   : > { %7494 = vmatprep.subr.bf16.mxu1 %v7493_v62 }
0x1534   : > { %7496 = vmatpush1.bf16.msra.mxu1 %v7495_v32 }
0x1537   : > { %6771 = vmatmul.mubr.f32.vlgmr.msra.gmra.mrb[24].mxu1 %v6698_v49 }
0x153d   : > { %v6688_v37 = vpop.permute.xlu1 %6687 }
0x153e   : > { %v6693_v9 = vrot.slane %v6688_v37, %v7681_v4 }
0x160a   : > { %v6772_v30 = vpop.f32.mrb[24].mxu1 }
0x160b   : > { %v6773_v51 = vadd.f32 %v6772_v30, %v6693_v9  ;;  %v6774_v15 = vpop.f32.mrb[25].mxu1 }
0x160c   : > { %v6775_v43 = vadd.f32 %v6774_v15, %v6693_v9 }
0x160d   : > { %v6779_v25 = vadd.f32 %v6773_v51, %v7691_v7 }
0x160e   : > { %v6780_v34 = vadd.f32 %v6775_v43, %v7684_v6 }
0x1610   : > { %v6783_v0 = vcombine.low %v6779_v25, %v6780_v34 }
0x1612   : > { %v6790_v12 = vrot.slane %v6783_v0, %v7750_v27 }
0x1614   : > { %v6797_v20 = vrot.slane %v6790_v12, %v7750_v27 }
0x1616   : > { %6799 = vst.msk [vmem:[%s397_s14] sm:$0x3] %vm7712_vm0, %v6797_v20 }
0x1617 PF: > { %s24_s19 = sadd.s32 1, %s7571_s19  }
0x1618   : > { %p21_p1 = scmp.ge.s32.totalorder %s24_s19, 4  }
0x161a   :  { %23 = sbr.rel (!%p21_p1) target bundleno = 4 (0x4), region = 115 }
0x1621   :  { %6819 = vsyncpa [#allocation5], 1 }
0x1622   :  { %6821 = vsyncpa [#allocation5 + $0x1], 1 }

</bundles_post_ra>
